<compile_context>
chip_gen: v7x
topology: tpu7x:2x2x1
jax: 0.10.0
libtpu: 0.0.40
codegen_flags: <defaults>
</compile_context>

<pallas_src>
import functools

import jax
import jax.numpy as jnp
from jax import lax
from jax.experimental import pallas as pl
from jax.experimental.pallas import tpu as pltpu


# ----------------------------------------------------------------------------
# Small helpers usable inside kernels
# ----------------------------------------------------------------------------
def _erf_approx(x):
    # TODO(synk): exact erf (nn.GELU default) replaced by the Abramowitz&Stegun
    # 7.1.26 rational approximation (|err| < 1.5e-7) so only exp/mul/add lower.
    a1, a2, a3, a4, a5 = 0.254829592, -0.284496736, 1.421413741, -1.453152027, 1.061405429
    p = 0.3275911
    ax = jnp.abs(x)
    t = 1.0 / (1.0 + p * ax)
    poly = ((((a5 * t + a4) * t + a3) * t + a2) * t + a1) * t
    y = 1.0 - poly * jnp.exp(-ax * ax)
    return jnp.where(x >= 0, y, -y)


def _gelu_exact(x):
    return 0.5 * x * (1.0 + _erf_approx(x * 0.7071067811865476))


def _layernorm(z, w, b, eps=1e-5):
    mu = jnp.mean(z, axis=-1, keepdims=True)
    var = jnp.mean((z - mu) ** 2, axis=-1, keepdims=True)
    return (z - mu) * lax.rsqrt(var + eps) * w + b


_NUM_TC_CACHE = None


def _num_tensorcores():
    """Best-effort TensorCore count (defaults to 1 if unknown)."""
    global _NUM_TC_CACHE
    if _NUM_TC_CACHE is None:
        n = 1
        try:
            info = pltpu.get_tpu_info()
            for attr in ("num_cores", "core_count", "num_tensorcores",
                         "tensorcore_count", "cores_per_chip"):
                v = getattr(info, attr, None)
                if isinstance(v, int) and v >= 1:
                    n = v
                    break
        except Exception:
            n = 1
        _NUM_TC_CACHE = n
    return _NUM_TC_CACHE


# ----------------------------------------------------------------------------
# Kernel 1: the FULL reasoning chain in one launch.
#   For each of num_steps: 2-layer LSTM over the (seq=T, feat=H) input,
#   verifier MLP (Linear->GELU->Linear(->1)).  Gate lanes use 4H = 128.
#   Weight packing guarantees exact H-wide reference math (zero padded rows).
# ----------------------------------------------------------------------------
def cot_chain_kernel(x_ref,
                     whh0_ref, w1cat_ref, b0_ref, b1_ref,
                     wfused_ref, vb1_ref, v2w_ref, v2b_ref,
                     y_ref, s_ref, *, num_steps):
    T, G = x_ref.shape                     # G = 4*H = 128 (full lane width)
    H = G // 4

    whh0 = whh0_ref[...]                   # (G, G)   rows >= H are zero
    w1cat = w1cat_ref[...]                 # (2G, G)  fused [wih1; whh1]
    b0 = b0_ref[...]                       # (1, G)
    b1 = b1_ref[...]                       # (1, G)
    wfused = wfused_ref[...]               # (G, 2G)  fused [wih0 | v1w]
    vb1 = vb1_ref[...]                     # (1, G)   verifier bias-1 (zero pad)
    v2w = v2w_ref[...]                     # (1, G)   verifier out weight row
    v2b = v2b_ref[...]                     # (1, 1)

    def lstm_cell(pre, c_prev):
        # pre: (1, 4H) fused gate pre-activations, PyTorch gate order [i|f|g|o].
        # No per-gate lane masks: lanes >= H carry bounded junk that only ever
        # multiplies zero-padded weight rows downstream.
        sig = jax.nn.sigmoid(pre)
        th = jnp.tanh(pre)
        f_g = pltpu.roll(sig, 3 * H, axis=1)      # f -> lanes [0, H)
        g_g = pltpu.roll(th, 2 * H, axis=1)       # g -> lanes [0, H)
        o_g = pltpu.roll(sig, H, axis=1)          # o -> lanes [0, H) (off crit path)
        c_new = f_g * c_prev + sig * g_g          # i (lanes [0,H) of sig) * g
        h_new = o_g * jnp.tanh(c_new)
        return h_new, c_new

    zeros = jnp.zeros((1, G), jnp.float32)

    # Step-0 input gates from the raw input (verifier half of this fused
    # output is unused).
    fused = jnp.dot(x_ref[...], wfused, preferred_element_type=jnp.float32)
    xg = fused[:, :G] + b0                 # (T, G) gate pre-acts, input->hidden

    for s in range(num_steps):             # fused chain: one launch
        h1 = c1 = h2 = c2 = zeros
        rows = []
        for t in range(T):                 # fully unrolled (T static)
            pre0 = xg[t:t + 1, :] + jnp.dot(
                h1, whh0, preferred_element_type=jnp.float32)
            h1, c1 = lstm_cell(pre0, c1)
            # Fused layer-1 recurrence: one (1,2G)@(2G,G) dot.
            pre1 = jnp.dot(jnp.concatenate([h1, h2], axis=1), w1cat,
                           preferred_element_type=jnp.float32) + b1
            h2, c2 = lstm_cell(pre1, c2)
            rows.append(h2)

        y = jnp.concatenate(rows, axis=0)  # (T, G): one tile, single store
        y_ref[s] = y

        # Fused: next-step input gates AND verifier hidden in one
        # (T,G)@(G,2G) dot.
        fused = jnp.dot(y, wfused, preferred_element_type=jnp.float32)
        if s + 1 < num_steps:
            xg = fused[:, :G] + b0
        hid = _gelu_exact(fused[:, G:] + vb1)                    # (T, G)
        # Verifier output layer: elementwise mul + lane reduce (no 1-col MXU op).
        sc = jnp.sum(hid * v2w, axis=-1, keepdims=True) + v2b    # (T, 1)
        s_ref[s] = jnp.broadcast_to(sc, (T, G))                  # lane-dense store


@functools.partial(jax.jit, static_argnames=("num_steps",))
def cot_chain(hidden_states, chain_w, *, num_steps):
    T, H = hidden_states.shape
    G = 4 * H                              # assumes 4*H is a multiple of 128
    x_pad = jnp.pad(hidden_states.astype(jnp.float32), ((0, 0), (0, G - H)))
    y_pad, s_pad = pl.pallas_call(
        functools.partial(cot_chain_kernel, num_steps=num_steps),
        out_shape=(jax.ShapeDtypeStruct((num_steps, T, G), jnp.float32),
                   jax.ShapeDtypeStruct((num_steps, T, G), jnp.float32)),
    )(x_pad,
      chain_w["whh0"], chain_w["w1cat"], chain_w["b0"], chain_w["b1"],
      chain_w["wfused"], chain_w["vb1"], chain_w["v2w"], chain_w["v2b"])
    return y_pad[:, :, :H], s_pad[:, :, :1]


# ----------------------------------------------------------------------------
# Kernel 2: BOTH post-norm TransformerEncoderLayers (nhead=8, relu FFN) fused.
#   Dense math runs on the flattened (rows, H) slab.  The 8 heads are batched:
#   head-masked q copies are stacked along sublanes -> one QK^T, one softmax,
#   one PV matmul per layer.  Block-diagonal batch masking keeps per-example
#   attention exact.  Head/batch masks are hoisted out of the layer loop.
# ----------------------------------------------------------------------------
def encoder_kernel(x_ref,
                   wqt_ref, wkt_ref, wvt_ref, bq_ref, bk_ref, bv_ref,
                   wot_ref, bo_ref, ln1w_ref, ln1b_ref,
                   w1t_ref, b1_ref, w2t_ref, b2_ref, ln2w_ref, ln2b_ref,
                   out_ref, *, num_heads, seq):
    x = x_ref[0]                                   # (M, H), M = (B/blocks)*seq
    M, H = x.shape
    hd = H // num_heads
    scale = 1.0 / float(hd) ** 0.5
    num_layers = wqt_ref.shape[0]
    MS = num_heads * M
    neg = jnp.float32(-1e30)

    # ---- hoisted masks (computed once, reused by both layers) ----
    # Head-of-row / head-of-column mask for the sublane-stacked q / output.
    col_head = lax.broadcasted_iota(jnp.int32, (MS, H), 1) // hd
    row_head = lax.broadcasted_iota(jnp.int32, (MS, H), 0) // M
    head_mask_rows = (col_head == row_head).astype(jnp.float32)        # (MS, H)
    # Block-diagonal same-example mask, repeated over the head blocks.
    rbs = (lax.broadcasted_iota(jnp.int32, (MS, M), 0) % M) // seq
    cbs = lax.broadcasted_iota(jnp.int32, (MS, M), 1) // seq
    same_batch_stack = rbs == cbs                                      # (MS, M)

    for l in range(num_layers):
        q = jnp.dot(x, wqt_ref[l], preferred_element_type=jnp.float32) + bq_ref[l]
        k = jnp.dot(x, wkt_ref[l], preferred_element_type=jnp.float32) + bk_ref[l]
        v = jnp.dot(x, wvt_ref[l], preferred_element_type=jnp.float32) + bv_ref[l]

        # Head-batched attention: one QK^T, one softmax, one PV for all heads.
        q_stack = jnp.concatenate([q] * num_heads, axis=0) * head_mask_rows  # (MS, H)
        s = lax.dot_general(q_stack, k, (((1,), (1,)), ((), ())),
                            preferred_element_type=jnp.float32) * scale      # (MS, M)
        s = jnp.where(same_batch_stack, s, neg)
        s = s - jnp.max(s, axis=-1, keepdims=True)
        p = jnp.exp(s)
        p = p * pl.reciprocal(jnp.sum(p, axis=-1, keepdims=True), approx=True)
        o_stack = jnp.dot(p, v, preferred_element_type=jnp.float32)          # (MS, H)

        # Per-head lane-mask then sum the head row-blocks back to (M, H).
        z = o_stack * head_mask_rows
        attn = z[0:M]
        for h in range(1, num_heads):
            attn = attn + z[h * M:(h + 1) * M]

        attn = jnp.dot(attn, wot_ref[l], preferred_element_type=jnp.float32) + bo_ref[l]
        # post-norm (norm_first=False): x = LN1(x + attn); x = LN2(x + FFN(x))
        x = _layernorm(x + attn, ln1w_ref[l], ln1b_ref[l])
        ff = jnp.dot(x, w1t_ref[l], preferred_element_type=jnp.float32) + b1_ref[l]
        ff = jnp.maximum(ff, 0.0)                            # default activation: relu
        ff = jnp.dot(ff, w2t_ref[l], preferred_element_type=jnp.float32) + b2_ref[l]
        x = _layernorm(x + ff, ln2w_ref[l], ln2b_ref[l])

    out_ref[0] = x


def transformer_encoder(xb, enc_w, *, num_heads, seq):
    # xb: (num_blocks, rows, H); weights are stacked over layers on a leading axis.
    nblk, M, H = xb.shape
    names = ["wqt", "wkt", "wvt", "bq", "bk", "bv", "wot", "bo", "ln1w", "ln1b",
             "w1t", "b1", "w2t", "b2", "ln2w", "ln2b"]
    weights = [enc_w[n] for n in names]
    in_specs = [pl.BlockSpec((1, M, H), lambda i: (i, 0, 0))]
    in_specs += [pl.BlockSpec(w.shape, lambda i, nd=w.ndim: (0,) * nd) for w in weights]
    return pl.pallas_call(
        functools.partial(encoder_kernel, num_heads=num_heads, seq=seq),
        grid=(nblk,),
        in_specs=in_specs,
        out_specs=pl.BlockSpec((1, M, H), lambda i: (i, 0, 0)),
        out_shape=jax.ShapeDtypeStruct((nblk, M, H), jnp.float32),
        compiler_params=pltpu.CompilerParams(dimension_semantics=("parallel",)),
    )(xb, *weights)


@functools.partial(jax.jit, static_argnames=("num_heads", "nblk"))
def compose_kept_steps(y_all, scores_all, idx, enc_w, *, num_heads, nblk):
    y_kept = y_all[idx]                       # (n_kept, B, H)
    step_scores = scores_all[idx]             # (n_kept, B, 1) == torch.stack(step_scores)
    x = jnp.transpose(y_kept, (1, 0, 2))      # (B, n_kept, H) == torch.stack(steps, dim=1)
    B, n, H = x.shape
    xb = x.reshape(nblk, (B // nblk) * n, H)
    out = transformer_encoder(xb, enc_w, num_heads=num_heads, seq=n)
    return out.reshape(B, n, H), step_scores


# ----------------------------------------------------------------------------
# Module-level forward (host glue; hot paths live in the two fused kernels)
# ----------------------------------------------------------------------------
def chain_of_thought_forward(hidden_states, params, *, num_steps=5, num_heads=8,
                             attention_mask=None, tokenizer=None):
    del attention_mask  # unused by the reference forward as well
    y_all, scores_all = cot_chain(hidden_states, params["chain"],
                                  num_steps=num_steps)

    # Single device->host sync for the whole chain.  The data-dependent
    # `if step_score.mean() > 0.5:` keeps eager PyTorch semantics.
    scores_host = jax.device_get(scores_all)          # (num_steps, T, 1) numpy
    kept = [i for i in range(num_steps) if float(scores_host[i].mean()) > 0.5]

    if kept:
        n = len(kept)
        B = hidden_states.shape[0]
        # Split across grid blocks only when the chip actually has >=2
        # TensorCores and per-block rows stay sublane (8) aligned.
        nblk = 2 if (_num_tensorcores() >= 2 and B % 2 == 0
                     and ((B // 2) * n) % 8 == 0) else 1
        idx = jnp.asarray(kept, dtype=jnp.int32)
        composed, step_scores_tensor = compose_kept_steps(
            y_all, scores_all, idx, params["encoder"],
            num_heads=num_heads, nblk=nblk)
    else:
        composed = hidden_states
        step_scores_tensor = jnp.zeros((1,), jnp.float32)

    # TODO(synk): tokenizer decode path skipped (no tokenizer passed), matching
    # the reference eval path; reasoning_paths stays empty.
    return {
        "reasoning_states": composed,
        "step_scores": step_scores_tensor,
        "reasoning_paths": [],
        "path_scores": jnp.zeros((1,), jnp.float32),
    }


# ----------------------------------------------------------------------------
# Deterministic synthetic parameters (shapes from the module's __init__),
# pre-packed into the kernel-friendly layouts described above.
# ----------------------------------------------------------------------------
def _uniform(key, shape, scale=0.1):
    return jax.random.uniform(key, shape, jnp.float32, -scale, scale)


def init_chain(key, H):
    """LSTM (2 layers) + verifier weights, packed for cot_chain_kernel."""
    G = 4 * H
    ks = jax.random.split(key, 11)
    wih0, whh0 = _uniform(ks[0], (G, H)), _uniform(ks[1], (G, H))
    bih0, bhh0 = _uniform(ks[2], (G,)), _uniform(ks[3], (G,))
    wih1, whh1 = _uniform(ks[4], (G, H)), _uniform(ks[5], (G, H))
    bih1, bhh1 = _uniform(ks[6], (G,)), _uniform(ks[7], (G,))
    v1w, v1b = _uniform(ks[8], (H, H)), _uniform(ks[9], (H,))
    v2w = _uniform(ks[10], (1, H))
    v2b = jnp.array([[1.0]], jnp.float32)   # bias so mean(step_score) > 0.5 (keep steps)

    def pad_rows(wt, rows):                  # zero rows for padded/junk input lanes
        return jnp.pad(wt, ((0, rows - wt.shape[0]), (0, 0)))

    # Transpose to (in, 4H) so the kernel computes x @ W; gate order i|f|g|o is
    # preserved along the lane axis.
    whh0_p = pad_rows(whh0.T, G)                                        # (G, G)
    w1cat = jnp.concatenate([pad_rows(wih1.T, G), pad_rows(whh1.T, G)], axis=0)  # (2G, G)
    wfused = jnp.concatenate(
        [pad_rows(wih0.T, G),                                           # (G, G)
         jnp.pad(pad_rows(v1w.T, G), ((0, 0), (0, G - H)))],            # (G, G)
        axis=1)                                                         # (G, 2G)
    return {"whh0": whh0_p,
            "b0": (bih0 + bhh0).reshape(1, G),
            "w1cat": w1cat,
            "b1": (bih1 + bhh1).reshape(1, G),
            "wfused": wfused,
            "vb1": jnp.pad(v1b, (0, G - H)).reshape(1, G),
            "v2w": jnp.pad(v2w, ((0, 0), (0, G - H))),                  # (1, G)
            "v2b": v2b}


def init_encoder(key, H, ff, num_layers=2):
    ks = jax.random.split(key, 8)
    in_w, in_b = _uniform(ks[0], (3 * H, H)), _uniform(ks[1], (3 * H,))
    out_w, out_b = _uniform(ks[2], (H, H)), _uniform(ks[3], (H,))
    w1, b1 = _uniform(ks[4], (ff, H)), _uniform(ks[5], (ff,))
    w2, b2 = _uniform(ks[6], (H, ff)), _uniform(ks[7], (H,))
    wq, wk, wv = in_w[:H], in_w[H:2 * H], in_w[2 * H:]
    bq, bk, bv = in_b[:H], in_b[H:2 * H], in_b[2 * H:]
    layer = {"wqt": wq.T, "wkt": wk.T, "wvt": wv.T,
             "bq": bq.reshape(1, H), "bk": bk.reshape(1, H), "bv": bv.reshape(1, H),
             "wot": out_w.T, "bo": out_b.reshape(1, H),
             "ln1w": jnp.ones((1, H), jnp.float32), "ln1b": jnp.zeros((1, H), jnp.float32),
             "w1t": w1.T, "b1": b1.reshape(1, ff),
             "w2t": w2.T, "b2": b2.reshape(1, H),
             "ln2w": jnp.ones((1, H), jnp.float32), "ln2b": jnp.zeros((1, H), jnp.float32)}
    # nn.TransformerEncoder deep-copies the given layer, so both layers start
    # from identical weights; stack them on a leading "layer" axis.
    return {k: jnp.stack([v] * num_layers, axis=0) for k, v in layer.items()}


def init_params(key, H):
    k_chain, k_enc = jax.random.split(key, 2)
    return {"chain": init_chain(k_chain, H),
            "encoder": init_encoder(k_enc, H, 4 * H, num_layers=2)}


# ----------------------------------------------------------------------------
if __name__ == "__main__":
    B, H, NUM_STEPS = 8, 32, 5
    key = jax.random.PRNGKey(0)
    k_params, k_x = jax.random.split(key)

    params = init_params(k_params, H)
    hidden_states = jax.random.normal(k_x, (B, H), jnp.float32)

    out = chain_of_thought_forward(hidden_states, params,
                                   num_steps=NUM_STEPS, num_heads=8)

    jax.block_until_ready(out["reasoning_states"])
    jax.block_until_ready(out["step_scores"])
    jax.block_until_ready(out["path_scores"])
    print("KERNEL_OK")
</pallas_src>

<mosaic_0001>
module attributes {stable_mosaic.version = 11 : i64} {
  func.func @cot_chain_kernel(%arg0: memref<8x128xf32, #tpu.memory_space<vmem>>, %arg1: memref<128x128xf32, #tpu.memory_space<vmem>>, %arg2: memref<256x128xf32, #tpu.memory_space<vmem>>, %arg3: memref<1x128xf32, #tpu.memory_space<vmem>>, %arg4: memref<1x128xf32, #tpu.memory_space<vmem>>, %arg5: memref<128x256xf32, #tpu.memory_space<vmem>>, %arg6: memref<1x128xf32, #tpu.memory_space<vmem>>, %arg7: memref<1x128xf32, #tpu.memory_space<vmem>>, %arg8: memref<1x1xf32, #tpu.memory_space<vmem>>, %arg9: memref<5x8x128xf32, #tpu.memory_space<vmem>>, %arg10: memref<5x8x128xf32, #tpu.memory_space<vmem>>) attributes {dimension_semantics = [], scalar_prefetch = 0 : i64, scratch_operands = 0 : i64, tpu.core_type = #tpu.core_type<tc>} {
    %c0 = arith.constant 0 : index
    %c0_0 = arith.constant 0 : index
    %0 = vector.load %arg1[%c0, %c0_0] : memref<128x128xf32, #tpu.memory_space<vmem>>, vector<128x128xf32>
    %c0_1 = arith.constant 0 : index
    %c0_2 = arith.constant 0 : index
    %1 = vector.load %arg2[%c0_1, %c0_2] : memref<256x128xf32, #tpu.memory_space<vmem>>, vector<256x128xf32>
    %c0_3 = arith.constant 0 : index
    %c0_4 = arith.constant 0 : index
    %2 = vector.load %arg3[%c0_3, %c0_4] : memref<1x128xf32, #tpu.memory_space<vmem>>, vector<1x128xf32>
    %c0_5 = arith.constant 0 : index
    %c0_6 = arith.constant 0 : index
    %3 = vector.load %arg4[%c0_5, %c0_6] : memref<1x128xf32, #tpu.memory_space<vmem>>, vector<1x128xf32>
    %c0_7 = arith.constant 0 : index
    %c0_8 = arith.constant 0 : index
    %4 = vector.load %arg5[%c0_7, %c0_8] : memref<128x256xf32, #tpu.memory_space<vmem>>, vector<128x256xf32>
    %c0_9 = arith.constant 0 : index
    %c0_10 = arith.constant 0 : index
    %5 = vector.load %arg6[%c0_9, %c0_10] : memref<1x128xf32, #tpu.memory_space<vmem>>, vector<1x128xf32>
    %c0_11 = arith.constant 0 : index
    %c0_12 = arith.constant 0 : index
    %6 = vector.load %arg7[%c0_11, %c0_12] : memref<1x128xf32, #tpu.memory_space<vmem>>, vector<1x128xf32>
    %c0_13 = arith.constant 0 : index
    %c0_14 = arith.constant 0 : index
    %7 = vector.load %arg8[%c0_13, %c0_14] : memref<1x1xf32, #tpu.memory_space<vmem>>, vector<1x1xf32>
    %cst = arith.constant 0.000000e+00 : f32
    %8 = vector.broadcast %cst : f32 to vector<1x128xf32>
    %c0_15 = arith.constant 0 : index
    %c0_16 = arith.constant 0 : index
    %9 = vector.load %arg0[%c0_15, %c0_16] : memref<8x128xf32, #tpu.memory_space<vmem>>, vector<8x128xf32>
    %cst_17 = arith.constant dense<0.000000e+00> : vector<8x256xf32>
    %10 = tpu.matmul %9, %4, %cst_17 {dimension_numbers = #tpu.dot_dimension_numbers<[1], [0], [0], [1], [0, 0, 1, 1], [], []>} : vector<8x128xf32>, vector<128x256xf32>, vector<8x256xf32> -> vector<8x256xf32>
    %11 = vector.extract_strided_slice %10 {offsets = [0, 0], sizes = [8, 128], strides = [1, 1]} : vector<8x256xf32> to vector<8x128xf32>
    %12 = vector.broadcast %2 : vector<1x128xf32> to vector<8x128xf32>
    %13 = arith.addf %11, %12 : vector<8x128xf32>
    %14 = vector.extract_strided_slice %13 {offsets = [0, 0], sizes = [1, 128], strides = [1, 1]} : vector<8x128xf32> to vector<1x128xf32>
    %cst_18 = arith.constant dense<0.000000e+00> : vector<1x128xf32>
    %15 = tpu.matmul %8, %0, %cst_18 {dimension_numbers = #tpu.dot_dimension_numbers<[1], [0], [0], [1], [0, 0, 1, 1], [], []>} : vector<1x128xf32>, vector<128x128xf32>, vector<1x128xf32> -> vector<1x128xf32>
    %16 = arith.addf %14, %15 : vector<1x128xf32>
    %17 = arith.negf %16 : vector<1x128xf32>
    %18 = math.exp %17 : vector<1x128xf32>
    %cst_19 = arith.constant 1.000000e+00 : f32
    %19 = vector.broadcast %cst_19 : f32 to vector<1x128xf32>
    %20 = arith.addf %19, %18 : vector<1x128xf32>
    %21 = arith.divf %19, %20 : vector<1x128xf32>
    %22 = math.tanh %16 : vector<1x128xf32>
    %c96_i32 = arith.constant 96 : i32
    %23 = tpu.dynamic_rotate %21 by %c96_i32 dim 1 : vector<1x128xf32>, i32 -> vector<1x128xf32>
    %c64_i32 = arith.constant 64 : i32
    %24 = tpu.dynamic_rotate %22 by %c64_i32 dim 1 : vector<1x128xf32>, i32 -> vector<1x128xf32>
    %c32_i32 = arith.constant 32 : i32
    %25 = tpu.dynamic_rotate %21 by %c32_i32 dim 1 : vector<1x128xf32>, i32 -> vector<1x128xf32>
    %26 = arith.mulf %23, %8 : vector<1x128xf32>
    %27 = arith.mulf %21, %24 : vector<1x128xf32>
    %28 = arith.addf %26, %27 : vector<1x128xf32>
    %29 = math.tanh %28 : vector<1x128xf32>
    %30 = arith.mulf %25, %29 : vector<1x128xf32>
    %31 = tpu.concatenate %30, %8 in 1 : vector<1x128xf32>, vector<1x128xf32> -> vector<1x256xf32>
    %cst_20 = arith.constant dense<0.000000e+00> : vector<1x128xf32>
    %32 = tpu.matmul %31, %1, %cst_20 {dimension_numbers = #tpu.dot_dimension_numbers<[1], [0], [0], [1], [0, 0, 1, 1], [], []>} : vector<1x256xf32>, vector<256x128xf32>, vector<1x128xf32> -> vector<1x128xf32>
    %33 = arith.addf %32, %3 : vector<1x128xf32>
    %34 = arith.negf %33 : vector<1x128xf32>
    %35 = math.exp %34 : vector<1x128xf32>
    %cst_21 = arith.constant 1.000000e+00 : f32
    %36 = vector.broadcast %cst_21 : f32 to vector<1x128xf32>
    %37 = arith.addf %36, %35 : vector<1x128xf32>
    %38 = arith.divf %36, %37 : vector<1x128xf32>
    %39 = math.tanh %33 : vector<1x128xf32>
    %c96_i32_22 = arith.constant 96 : i32
    %40 = tpu.dynamic_rotate %38 by %c96_i32_22 dim 1 : vector<1x128xf32>, i32 -> vector<1x128xf32>
    %c64_i32_23 = arith.constant 64 : i32
    %41 = tpu.dynamic_rotate %39 by %c64_i32_23 dim 1 : vector<1x128xf32>, i32 -> vector<1x128xf32>
    %c32_i32_24 = arith.constant 32 : i32
    %42 = tpu.dynamic_rotate %38 by %c32_i32_24 dim 1 : vector<1x128xf32>, i32 -> vector<1x128xf32>
    %43 = arith.mulf %40, %8 : vector<1x128xf32>
    %44 = arith.mulf %38, %41 : vector<1x128xf32>
    %45 = arith.addf %43, %44 : vector<1x128xf32>
    %46 = math.tanh %45 : vector<1x128xf32>
    %47 = arith.mulf %42, %46 : vector<1x128xf32>
    %48 = vector.extract_strided_slice %13 {offsets = [1, 0], sizes = [1, 128], strides = [1, 1]} : vector<8x128xf32> to vector<1x128xf32>
    %cst_25 = arith.constant dense<0.000000e+00> : vector<1x128xf32>
    %49 = tpu.matmul %30, %0, %cst_25 {dimension_numbers = #tpu.dot_dimension_numbers<[1], [0], [0], [1], [0, 0, 1, 1], [], []>} : vector<1x128xf32>, vector<128x128xf32>, vector<1x128xf32> -> vector<1x128xf32>
    %50 = arith.addf %48, %49 : vector<1x128xf32>
    %51 = arith.negf %50 : vector<1x128xf32>
    %52 = math.exp %51 : vector<1x128xf32>
    %cst_26 = arith.constant 1.000000e+00 : f32
    %53 = vector.broadcast %cst_26 : f32 to vector<1x128xf32>
    %54 = arith.addf %53, %52 : vector<1x128xf32>
    %55 = arith.divf %53, %54 : vector<1x128xf32>
    %56 = math.tanh %50 : vector<1x128xf32>
    %c96_i32_27 = arith.constant 96 : i32
    %57 = tpu.dynamic_rotate %55 by %c96_i32_27 dim 1 : vector<1x128xf32>, i32 -> vector<1x128xf32>
    %c64_i32_28 = arith.constant 64 : i32
    %58 = tpu.dynamic_rotate %56 by %c64_i32_28 dim 1 : vector<1x128xf32>, i32 -> vector<1x128xf32>
    %c32_i32_29 = arith.constant 32 : i32
    %59 = tpu.dynamic_rotate %55 by %c32_i32_29 dim 1 : vector<1x128xf32>, i32 -> vector<1x128xf32>
    %60 = arith.mulf %57, %28 : vector<1x128xf32>
    %61 = arith.mulf %55, %58 : vector<1x128xf32>
    %62 = arith.addf %60, %61 : vector<1x128xf32>
    %63 = math.tanh %62 : vector<1x128xf32>
    %64 = arith.mulf %59, %63 : vector<1x128xf32>
    %65 = tpu.concatenate %64, %47 in 1 : vector<1x128xf32>, vector<1x128xf32> -> vector<1x256xf32>
    %cst_30 = arith.constant dense<0.000000e+00> : vector<1x128xf32>
    %66 = tpu.matmul %65, %1, %cst_30 {dimension_numbers = #tpu.dot_dimension_numbers<[1], [0], [0], [1], [0, 0, 1, 1], [], []>} : vector<1x256xf32>, vector<256x128xf32>, vector<1x128xf32> -> vector<1x128xf32>
    %67 = arith.addf %66, %3 : vector<1x128xf32>
    %68 = arith.negf %67 : vector<1x128xf32>
    %69 = math.exp %68 : vector<1x128xf32>
    %cst_31 = arith.constant 1.000000e+00 : f32
    %70 = vector.broadcast %cst_31 : f32 to vector<1x128xf32>
    %71 = arith.addf %70, %69 : vector<1x128xf32>
    %72 = arith.divf %70, %71 : vector<1x128xf32>
    %73 = math.tanh %67 : vector<1x128xf32>
    %c96_i32_32 = arith.constant 96 : i32
    %74 = tpu.dynamic_rotate %72 by %c96_i32_32 dim 1 : vector<1x128xf32>, i32 -> vector<1x128xf32>
    %c64_i32_33 = arith.constant 64 : i32
    %75 = tpu.dynamic_rotate %73 by %c64_i32_33 dim 1 : vector<1x128xf32>, i32 -> vector<1x128xf32>
    %c32_i32_34 = arith.constant 32 : i32
    %76 = tpu.dynamic_rotate %72 by %c32_i32_34 dim 1 : vector<1x128xf32>, i32 -> vector<1x128xf32>
    %77 = arith.mulf %74, %45 : vector<1x128xf32>
    %78 = arith.mulf %72, %75 : vector<1x128xf32>
    %79 = arith.addf %77, %78 : vector<1x128xf32>
    %80 = math.tanh %79 : vector<1x128xf32>
    %81 = arith.mulf %76, %80 : vector<1x128xf32>
    %82 = vector.extract_strided_slice %13 {offsets = [2, 0], sizes = [1, 128], strides = [1, 1]} : vector<8x128xf32> to vector<1x128xf32>
    %cst_35 = arith.constant dense<0.000000e+00> : vector<1x128xf32>
    %83 = tpu.matmul %64, %0, %cst_35 {dimension_numbers = #tpu.dot_dimension_numbers<[1], [0], [0], [1], [0, 0, 1, 1], [], []>} : vector<1x128xf32>, vector<128x128xf32>, vector<1x128xf32> -> vector<1x128xf32>
    %84 = arith.addf %82, %83 : vector<1x128xf32>
    %85 = arith.negf %84 : vector<1x128xf32>
    %86 = math.exp %85 : vector<1x128xf32>
    %cst_36 = arith.constant 1.000000e+00 : f32
    %87 = vector.broadcast %cst_36 : f32 to vector<1x128xf32>
    %88 = arith.addf %87, %86 : vector<1x128xf32>
    %89 = arith.divf %87, %88 : vector<1x128xf32>
    %90 = math.tanh %84 : vector<1x128xf32>
    %c96_i32_37 = arith.constant 96 : i32
    %91 = tpu.dynamic_rotate %89 by %c96_i32_37 dim 1 : vector<1x128xf32>, i32 -> vector<1x128xf32>
    %c64_i32_38 = arith.constant 64 : i32
    %92 = tpu.dynamic_rotate %90 by %c64_i32_38 dim 1 : vector<1x128xf32>, i32 -> vector<1x128xf32>
    %c32_i32_39 = arith.constant 32 : i32
    %93 = tpu.dynamic_rotate %89 by %c32_i32_39 dim 1 : vector<1x128xf32>, i32 -> vector<1x128xf32>
    %94 = arith.mulf %91, %62 : vector<1x128xf32>
    %95 = arith.mulf %89, %92 : vector<1x128xf32>
    %96 = arith.addf %94, %95 : vector<1x128xf32>
    %97 = math.tanh %96 : vector<1x128xf32>
    %98 = arith.mulf %93, %97 : vector<1x128xf32>
    %99 = tpu.concatenate %98, %81 in 1 : vector<1x128xf32>, vector<1x128xf32> -> vector<1x256xf32>
    %cst_40 = arith.constant dense<0.000000e+00> : vector<1x128xf32>
    %100 = tpu.matmul %99, %1, %cst_40 {dimension_numbers = #tpu.dot_dimension_numbers<[1], [0], [0], [1], [0, 0, 1, 1], [], []>} : vector<1x256xf32>, vector<256x128xf32>, vector<1x128xf32> -> vector<1x128xf32>
    %101 = arith.addf %100, %3 : vector<1x128xf32>
    %102 = arith.negf %101 : vector<1x128xf32>
    %103 = math.exp %102 : vector<1x128xf32>
    %cst_41 = arith.constant 1.000000e+00 : f32
    %104 = vector.broadcast %cst_41 : f32 to vector<1x128xf32>
    %105 = arith.addf %104, %103 : vector<1x128xf32>
    %106 = arith.divf %104, %105 : vector<1x128xf32>
    %107 = math.tanh %101 : vector<1x128xf32>
    %c96_i32_42 = arith.constant 96 : i32
    %108 = tpu.dynamic_rotate %106 by %c96_i32_42 dim 1 : vector<1x128xf32>, i32 -> vector<1x128xf32>
    %c64_i32_43 = arith.constant 64 : i32
    %109 = tpu.dynamic_rotate %107 by %c64_i32_43 dim 1 : vector<1x128xf32>, i32 -> vector<1x128xf32>
    %c32_i32_44 = arith.constant 32 : i32
    %110 = tpu.dynamic_rotate %106 by %c32_i32_44 dim 1 : vector<1x128xf32>, i32 -> vector<1x128xf32>
    %111 = arith.mulf %108, %79 : vector<1x128xf32>
    %112 = arith.mulf %106, %109 : vector<1x128xf32>
    %113 = arith.addf %111, %112 : vector<1x128xf32>
    %114 = math.tanh %113 : vector<1x128xf32>
    %115 = arith.mulf %110, %114 : vector<1x128xf32>
    %116 = vector.extract_strided_slice %13 {offsets = [3, 0], sizes = [1, 128], strides = [1, 1]} : vector<8x128xf32> to vector<1x128xf32>
    %cst_45 = arith.constant dense<0.000000e+00> : vector<1x128xf32>
    %117 = tpu.matmul %98, %0, %cst_45 {dimension_numbers = #tpu.dot_dimension_numbers<[1], [0], [0], [1], [0, 0, 1, 1], [], []>} : vector<1x128xf32>, vector<128x128xf32>, vector<1x128xf32> -> vector<1x128xf32>
    %118 = arith.addf %116, %117 : vector<1x128xf32>
    %119 = arith.negf %118 : vector<1x128xf32>
    %120 = math.exp %119 : vector<1x128xf32>
    %cst_46 = arith.constant 1.000000e+00 : f32
    %121 = vector.broadcast %cst_46 : f32 to vector<1x128xf32>
    %122 = arith.addf %121, %120 : vector<1x128xf32>
    %123 = arith.divf %121, %122 : vector<1x128xf32>
    %124 = math.tanh %118 : vector<1x128xf32>
    %c96_i32_47 = arith.constant 96 : i32
    %125 = tpu.dynamic_rotate %123 by %c96_i32_47 dim 1 : vector<1x128xf32>, i32 -> vector<1x128xf32>
    %c64_i32_48 = arith.constant 64 : i32
    %126 = tpu.dynamic_rotate %124 by %c64_i32_48 dim 1 : vector<1x128xf32>, i32 -> vector<1x128xf32>
    %c32_i32_49 = arith.constant 32 : i32
    %127 = tpu.dynamic_rotate %123 by %c32_i32_49 dim 1 : vector<1x128xf32>, i32 -> vector<1x128xf32>
    %128 = arith.mulf %125, %96 : vector<1x128xf32>
    %129 = arith.mulf %123, %126 : vector<1x128xf32>
    %130 = arith.addf %128, %129 : vector<1x128xf32>
    %131 = math.tanh %130 : vector<1x128xf32>
    %132 = arith.mulf %127, %131 : vector<1x128xf32>
    %133 = tpu.concatenate %132, %115 in 1 : vector<1x128xf32>, vector<1x128xf32> -> vector<1x256xf32>
    %cst_50 = arith.constant dense<0.000000e+00> : vector<1x128xf32>
    %134 = tpu.matmul %133, %1, %cst_50 {dimension_numbers = #tpu.dot_dimension_numbers<[1], [0], [0], [1], [0, 0, 1, 1], [], []>} : vector<1x256xf32>, vector<256x128xf32>, vector<1x128xf32> -> vector<1x128xf32>
    %135 = arith.addf %134, %3 : vector<1x128xf32>
    %136 = arith.negf %135 : vector<1x128xf32>
    %137 = math.exp %136 : vector<1x128xf32>
    %cst_51 = arith.constant 1.000000e+00 : f32
    %138 = vector.broadcast %cst_51 : f32 to vector<1x128xf32>
    %139 = arith.addf %138, %137 : vector<1x128xf32>
    %140 = arith.divf %138, %139 : vector<1x128xf32>
    %141 = math.tanh %135 : vector<1x128xf32>
    %c96_i32_52 = arith.constant 96 : i32
    %142 = tpu.dynamic_rotate %140 by %c96_i32_52 dim 1 : vector<1x128xf32>, i32 -> vector<1x128xf32>
    %c64_i32_53 = arith.constant 64 : i32
    %143 = tpu.dynamic_rotate %141 by %c64_i32_53 dim 1 : vector<1x128xf32>, i32 -> vector<1x128xf32>
    %c32_i32_54 = arith.constant 32 : i32
    %144 = tpu.dynamic_rotate %140 by %c32_i32_54 dim 1 : vector<1x128xf32>, i32 -> vector<1x128xf32>
    %145 = arith.mulf %142, %113 : vector<1x128xf32>
    %146 = arith.mulf %140, %143 : vector<1x128xf32>
    %147 = arith.addf %145, %146 : vector<1x128xf32>
    %148 = math.tanh %147 : vector<1x128xf32>
    %149 = arith.mulf %144, %148 : vector<1x128xf32>
    %150 = vector.extract_strided_slice %13 {offsets = [4, 0], sizes = [1, 128], strides = [1, 1]} : vector<8x128xf32> to vector<1x128xf32>
    %cst_55 = arith.constant dense<0.000000e+00> : vector<1x128xf32>
    %151 = tpu.matmul %132, %0, %cst_55 {dimension_numbers = #tpu.dot_dimension_numbers<[1], [0], [0], [1], [0, 0, 1, 1], [], []>} : vector<1x128xf32>, vector<128x128xf32>, vector<1x128xf32> -> vector<1x128xf32>
    %152 = arith.addf %150, %151 : vector<1x128xf32>
    %153 = arith.negf %152 : vector<1x128xf32>
    %154 = math.exp %153 : vector<1x128xf32>
    %cst_56 = arith.constant 1.000000e+00 : f32
    %155 = vector.broadcast %cst_56 : f32 to vector<1x128xf32>
    %156 = arith.addf %155, %154 : vector<1x128xf32>
    %157 = arith.divf %155, %156 : vector<1x128xf32>
    %158 = math.tanh %152 : vector<1x128xf32>
    %c96_i32_57 = arith.constant 96 : i32
    %159 = tpu.dynamic_rotate %157 by %c96_i32_57 dim 1 : vector<1x128xf32>, i32 -> vector<1x128xf32>
    %c64_i32_58 = arith.constant 64 : i32
    %160 = tpu.dynamic_rotate %158 by %c64_i32_58 dim 1 : vector<1x128xf32>, i32 -> vector<1x128xf32>
    %c32_i32_59 = arith.constant 32 : i32
    %161 = tpu.dynamic_rotate %157 by %c32_i32_59 dim 1 : vector<1x128xf32>, i32 -> vector<1x128xf32>
    %162 = arith.mulf %159, %130 : vector<1x128xf32>
    %163 = arith.mulf %157, %160 : vector<1x128xf32>
    %164 = arith.addf %162, %163 : vector<1x128xf32>
    %165 = math.tanh %164 : vector<1x128xf32>
    %166 = arith.mulf %161, %165 : vector<1x128xf32>
    %167 = tpu.concatenate %166, %149 in 1 : vector<1x128xf32>, vector<1x128xf32> -> vector<1x256xf32>
    %cst_60 = arith.constant dense<0.000000e+00> : vector<1x128xf32>
    %168 = tpu.matmul %167, %1, %cst_60 {dimension_numbers = #tpu.dot_dimension_numbers<[1], [0], [0], [1], [0, 0, 1, 1], [], []>} : vector<1x256xf32>, vector<256x128xf32>, vector<1x128xf32> -> vector<1x128xf32>
    %169 = arith.addf %168, %3 : vector<1x128xf32>
    %170 = arith.negf %169 : vector<1x128xf32>
    %171 = math.exp %170 : vector<1x128xf32>
    %cst_61 = arith.constant 1.000000e+00 : f32
    %172 = vector.broadcast %cst_61 : f32 to vector<1x128xf32>
    %173 = arith.addf %172, %171 : vector<1x128xf32>
    %174 = arith.divf %172, %173 : vector<1x128xf32>
    %175 = math.tanh %169 : vector<1x128xf32>
    %c96_i32_62 = arith.constant 96 : i32
    %176 = tpu.dynamic_rotate %174 by %c96_i32_62 dim 1 : vector<1x128xf32>, i32 -> vector<1x128xf32>
    %c64_i32_63 = arith.constant 64 : i32
    %177 = tpu.dynamic_rotate %175 by %c64_i32_63 dim 1 : vector<1x128xf32>, i32 -> vector<1x128xf32>
    %c32_i32_64 = arith.constant 32 : i32
    %178 = tpu.dynamic_rotate %174 by %c32_i32_64 dim 1 : vector<1x128xf32>, i32 -> vector<1x128xf32>
    %179 = arith.mulf %176, %147 : vector<1x128xf32>
    %180 = arith.mulf %174, %177 : vector<1x128xf32>
    %181 = arith.addf %179, %180 : vector<1x128xf32>
    %182 = math.tanh %181 : vector<1x128xf32>
    %183 = arith.mulf %178, %182 : vector<1x128xf32>
    %184 = vector.extract_strided_slice %13 {offsets = [5, 0], sizes = [1, 128], strides = [1, 1]} : vector<8x128xf32> to vector<1x128xf32>
    %cst_65 = arith.constant dense<0.000000e+00> : vector<1x128xf32>
    %185 = tpu.matmul %166, %0, %cst_65 {dimension_numbers = #tpu.dot_dimension_numbers<[1], [0], [0], [1], [0, 0, 1, 1], [], []>} : vector<1x128xf32>, vector<128x128xf32>, vector<1x128xf32> -> vector<1x128xf32>
    %186 = arith.addf %184, %185 : vector<1x128xf32>
    %187 = arith.negf %186 : vector<1x128xf32>
    %188 = math.exp %187 : vector<1x128xf32>
    %cst_66 = arith.constant 1.000000e+00 : f32
    %189 = vector.broadcast %cst_66 : f32 to vector<1x128xf32>
    %190 = arith.addf %189, %188 : vector<1x128xf32>
    %191 = arith.divf %189, %190 : vector<1x128xf32>
    %192 = math.tanh %186 : vector<1x128xf32>
    %c96_i32_67 = arith.constant 96 : i32
    %193 = tpu.dynamic_rotate %191 by %c96_i32_67 dim 1 : vector<1x128xf32>, i32 -> vector<1x128xf32>
    %c64_i32_68 = arith.constant 64 : i32
    %194 = tpu.dynamic_rotate %192 by %c64_i32_68 dim 1 : vector<1x128xf32>, i32 -> vector<1x128xf32>
    %c32_i32_69 = arith.constant 32 : i32
    %195 = tpu.dynamic_rotate %191 by %c32_i32_69 dim 1 : vector<1x128xf32>, i32 -> vector<1x128xf32>
    %196 = arith.mulf %193, %164 : vector<1x128xf32>
    %197 = arith.mulf %191, %194 : vector<1x128xf32>
    %198 = arith.addf %196, %197 : vector<1x128xf32>
    %199 = math.tanh %198 : vector<1x128xf32>
    %200 = arith.mulf %195, %199 : vector<1x128xf32>
    %201 = tpu.concatenate %200, %183 in 1 : vector<1x128xf32>, vector<1x128xf32> -> vector<1x256xf32>
    %cst_70 = arith.constant dense<0.000000e+00> : vector<1x128xf32>
    %202 = tpu.matmul %201, %1, %cst_70 {dimension_numbers = #tpu.dot_dimension_numbers<[1], [0], [0], [1], [0, 0, 1, 1], [], []>} : vector<1x256xf32>, vector<256x128xf32>, vector<1x128xf32> -> vector<1x128xf32>
    %203 = arith.addf %202, %3 : vector<1x128xf32>
    %204 = arith.negf %203 : vector<1x128xf32>
    %205 = math.exp %204 : vector<1x128xf32>
    %cst_71 = arith.constant 1.000000e+00 : f32
    %206 = vector.broadcast %cst_71 : f32 to vector<1x128xf32>
    %207 = arith.addf %206, %205 : vector<1x128xf32>
    %208 = arith.divf %206, %207 : vector<1x128xf32>
    %209 = math.tanh %203 : vector<1x128xf32>
    %c96_i32_72 = arith.constant 96 : i32
    %210 = tpu.dynamic_rotate %208 by %c96_i32_72 dim 1 : vector<1x128xf32>, i32 -> vector<1x128xf32>
    %c64_i32_73 = arith.constant 64 : i32
    %211 = tpu.dynamic_rotate %209 by %c64_i32_73 dim 1 : vector<1x128xf32>, i32 -> vector<1x128xf32>
    %c32_i32_74 = arith.constant 32 : i32
    %212 = tpu.dynamic_rotate %208 by %c32_i32_74 dim 1 : vector<1x128xf32>, i32 -> vector<1x128xf32>
    %213 = arith.mulf %210, %181 : vector<1x128xf32>
    %214 = arith.mulf %208, %211 : vector<1x128xf32>
    %215 = arith.addf %213, %214 : vector<1x128xf32>
    %216 = math.tanh %215 : vector<1x128xf32>
    %217 = arith.mulf %212, %216 : vector<1x128xf32>
    %218 = vector.extract_strided_slice %13 {offsets = [6, 0], sizes = [1, 128], strides = [1, 1]} : vector<8x128xf32> to vector<1x128xf32>
    %cst_75 = arith.constant dense<0.000000e+00> : vector<1x128xf32>
    %219 = tpu.matmul %200, %0, %cst_75 {dimension_numbers = #tpu.dot_dimension_numbers<[1], [0], [0], [1], [0, 0, 1, 1], [], []>} : vector<1x128xf32>, vector<128x128xf32>, vector<1x128xf32> -> vector<1x128xf32>
    %220 = arith.addf %218, %219 : vector<1x128xf32>
    %221 = arith.negf %220 : vector<1x128xf32>
    %222 = math.exp %221 : vector<1x128xf32>
    %cst_76 = arith.constant 1.000000e+00 : f32
    %223 = vector.broadcast %cst_76 : f32 to vector<1x128xf32>
    %224 = arith.addf %223, %222 : vector<1x128xf32>
    %225 = arith.divf %223, %224 : vector<1x128xf32>
    %226 = math.tanh %220 : vector<1x128xf32>
    %c96_i32_77 = arith.constant 96 : i32
    %227 = tpu.dynamic_rotate %225 by %c96_i32_77 dim 1 : vector<1x128xf32>, i32 -> vector<1x128xf32>
    %c64_i32_78 = arith.constant 64 : i32
    %228 = tpu.dynamic_rotate %226 by %c64_i32_78 dim 1 : vector<1x128xf32>, i32 -> vector<1x128xf32>
    %c32_i32_79 = arith.constant 32 : i32
    %229 = tpu.dynamic_rotate %225 by %c32_i32_79 dim 1 : vector<1x128xf32>, i32 -> vector<1x128xf32>
    %230 = arith.mulf %227, %198 : vector<1x128xf32>
    %231 = arith.mulf %225, %228 : vector<1x128xf32>
    %232 = arith.addf %230, %231 : vector<1x128xf32>
    %233 = math.tanh %232 : vector<1x128xf32>
    %234 = arith.mulf %229, %233 : vector<1x128xf32>
    %235 = tpu.concatenate %234, %217 in 1 : vector<1x128xf32>, vector<1x128xf32> -> vector<1x256xf32>
    %cst_80 = arith.constant dense<0.000000e+00> : vector<1x128xf32>
    %236 = tpu.matmul %235, %1, %cst_80 {dimension_numbers = #tpu.dot_dimension_numbers<[1], [0], [0], [1], [0, 0, 1, 1], [], []>} : vector<1x256xf32>, vector<256x128xf32>, vector<1x128xf32> -> vector<1x128xf32>
    %237 = arith.addf %236, %3 : vector<1x128xf32>
    %238 = arith.negf %237 : vector<1x128xf32>
    %239 = math.exp %238 : vector<1x128xf32>
    %cst_81 = arith.constant 1.000000e+00 : f32
    %240 = vector.broadcast %cst_81 : f32 to vector<1x128xf32>
    %241 = arith.addf %240, %239 : vector<1x128xf32>
    %242 = arith.divf %240, %241 : vector<1x128xf32>
    %243 = math.tanh %237 : vector<1x128xf32>
    %c96_i32_82 = arith.constant 96 : i32
    %244 = tpu.dynamic_rotate %242 by %c96_i32_82 dim 1 : vector<1x128xf32>, i32 -> vector<1x128xf32>
    %c64_i32_83 = arith.constant 64 : i32
    %245 = tpu.dynamic_rotate %243 by %c64_i32_83 dim 1 : vector<1x128xf32>, i32 -> vector<1x128xf32>
    %c32_i32_84 = arith.constant 32 : i32
    %246 = tpu.dynamic_rotate %242 by %c32_i32_84 dim 1 : vector<1x128xf32>, i32 -> vector<1x128xf32>
    %247 = arith.mulf %244, %215 : vector<1x128xf32>
    %248 = arith.mulf %242, %245 : vector<1x128xf32>
    %249 = arith.addf %247, %248 : vector<1x128xf32>
    %250 = math.tanh %249 : vector<1x128xf32>
    %251 = arith.mulf %246, %250 : vector<1x128xf32>
    %252 = vector.extract_strided_slice %13 {offsets = [7, 0], sizes = [1, 128], strides = [1, 1]} : vector<8x128xf32> to vector<1x128xf32>
    %cst_85 = arith.constant dense<0.000000e+00> : vector<1x128xf32>
    %253 = tpu.matmul %234, %0, %cst_85 {dimension_numbers = #tpu.dot_dimension_numbers<[1], [0], [0], [1], [0, 0, 1, 1], [], []>} : vector<1x128xf32>, vector<128x128xf32>, vector<1x128xf32> -> vector<1x128xf32>
    %254 = arith.addf %252, %253 : vector<1x128xf32>
    %255 = arith.negf %254 : vector<1x128xf32>
    %256 = math.exp %255 : vector<1x128xf32>
    %cst_86 = arith.constant 1.000000e+00 : f32
    %257 = vector.broadcast %cst_86 : f32 to vector<1x128xf32>
    %258 = arith.addf %257, %256 : vector<1x128xf32>
    %259 = arith.divf %257, %258 : vector<1x128xf32>
    %260 = math.tanh %254 : vector<1x128xf32>
    %c96_i32_87 = arith.constant 96 : i32
    %261 = tpu.dynamic_rotate %259 by %c96_i32_87 dim 1 : vector<1x128xf32>, i32 -> vector<1x128xf32>
    %c64_i32_88 = arith.constant 64 : i32
    %262 = tpu.dynamic_rotate %260 by %c64_i32_88 dim 1 : vector<1x128xf32>, i32 -> vector<1x128xf32>
    %c32_i32_89 = arith.constant 32 : i32
    %263 = tpu.dynamic_rotate %259 by %c32_i32_89 dim 1 : vector<1x128xf32>, i32 -> vector<1x128xf32>
    %264 = arith.mulf %261, %232 : vector<1x128xf32>
    %265 = arith.mulf %259, %262 : vector<1x128xf32>
    %266 = arith.addf %264, %265 : vector<1x128xf32>
    %267 = math.tanh %266 : vector<1x128xf32>
    %268 = arith.mulf %263, %267 : vector<1x128xf32>
    %269 = tpu.concatenate %268, %251 in 1 : vector<1x128xf32>, vector<1x128xf32> -> vector<1x256xf32>
    %cst_90 = arith.constant dense<0.000000e+00> : vector<1x128xf32>
    %270 = tpu.matmul %269, %1, %cst_90 {dimension_numbers = #tpu.dot_dimension_numbers<[1], [0], [0], [1], [0, 0, 1, 1], [], []>} : vector<1x256xf32>, vector<256x128xf32>, vector<1x128xf32> -> vector<1x128xf32>
    %271 = arith.addf %270, %3 : vector<1x128xf32>
    %272 = arith.negf %271 : vector<1x128xf32>
    %273 = math.exp %272 : vector<1x128xf32>
    %cst_91 = arith.constant 1.000000e+00 : f32
    %274 = vector.broadcast %cst_91 : f32 to vector<1x128xf32>
    %275 = arith.addf %274, %273 : vector<1x128xf32>
    %276 = arith.divf %274, %275 : vector<1x128xf32>
    %277 = math.tanh %271 : vector<1x128xf32>
    %c96_i32_92 = arith.constant 96 : i32
    %278 = tpu.dynamic_rotate %276 by %c96_i32_92 dim 1 : vector<1x128xf32>, i32 -> vector<1x128xf32>
    %c64_i32_93 = arith.constant 64 : i32
    %279 = tpu.dynamic_rotate %277 by %c64_i32_93 dim 1 : vector<1x128xf32>, i32 -> vector<1x128xf32>
    %c32_i32_94 = arith.constant 32 : i32
    %280 = tpu.dynamic_rotate %276 by %c32_i32_94 dim 1 : vector<1x128xf32>, i32 -> vector<1x128xf32>
    %281 = arith.mulf %278, %249 : vector<1x128xf32>
    %282 = arith.mulf %276, %279 : vector<1x128xf32>
    %283 = arith.addf %281, %282 : vector<1x128xf32>
    %284 = math.tanh %283 : vector<1x128xf32>
    %285 = arith.mulf %280, %284 : vector<1x128xf32>
    %286 = tpu.concatenate %47, %81, %115, %149, %183, %217, %251, %285 in 0 : vector<1x128xf32>, vector<1x128xf32>, vector<1x128xf32>, vector<1x128xf32>, vector<1x128xf32>, vector<1x128xf32>, vector<1x128xf32>, vector<1x128xf32> -> vector<8x128xf32>
    %c0_95 = arith.constant 0 : index
    %c0_96 = arith.constant 0 : index
    %c0_97 = arith.constant 0 : index
    %287 = vector.load %arg9[%c0_95, %c0_96, %c0_97] : memref<5x8x128xf32, #tpu.memory_space<vmem>>, vector<1x8x128xf32>
    %288 = vector.shape_cast %287 : vector<1x8x128xf32> to vector<8x128xf32>
    %289 = vector.shape_cast %286 : vector<8x128xf32> to vector<1x8x128xf32>
    tpu.vector_store %arg9[%c0_95, %c0_96, %c0_97], %289 {strides = array<i32>} : memref<5x8x128xf32, #tpu.memory_space<vmem>>, vector<1x8x128xf32>,
    %cst_98 = arith.constant dense<0.000000e+00> : vector<8x256xf32>
    %290 = tpu.matmul %286, %4, %cst_98 {dimension_numbers = #tpu.dot_dimension_numbers<[1], [0], [0], [1], [0, 0, 1, 1], [], []>} : vector<8x128xf32>, vector<128x256xf32>, vector<8x256xf32> -> vector<8x256xf32>
    %291 = vector.extract_strided_slice %290 {offsets = [0, 0], sizes = [8, 128], strides = [1, 1]} : vector<8x256xf32> to vector<8x128xf32>
    %292 = vector.broadcast %2 : vector<1x128xf32> to vector<8x128xf32>
    %293 = arith.addf %291, %292 : vector<8x128xf32>
    %294 = vector.extract_strided_slice %290 {offsets = [0, 128], sizes = [8, 128], strides = [1, 1]} : vector<8x256xf32> to vector<8x128xf32>
    %295 = vector.broadcast %5 : vector<1x128xf32> to vector<8x128xf32>
    %296 = arith.addf %294, %295 : vector<8x128xf32>
    %cst_99 = arith.constant 5.000000e-01 : f32
    %297 = vector.broadcast %cst_99 : f32 to vector<8x128xf32>
    %298 = arith.mulf %297, %296 : vector<8x128xf32>
    %cst_100 = arith.constant 0.707106769 : f32
    %299 = vector.broadcast %cst_100 : f32 to vector<8x128xf32>
    %300 = arith.mulf %296, %299 : vector<8x128xf32>
    %301 = math.absf %300 : vector<8x128xf32>
    %cst_101 = arith.constant 0.327591091 : f32
    %302 = vector.broadcast %cst_101 : f32 to vector<8x128xf32>
    %303 = arith.mulf %302, %301 : vector<8x128xf32>
    %cst_102 = arith.constant 1.000000e+00 : f32
    %304 = vector.broadcast %cst_102 : f32 to vector<8x128xf32>
    %305 = arith.addf %304, %303 : vector<8x128xf32>
    %cst_103 = arith.constant 1.000000e+00 : f32
    %306 = vector.broadcast %cst_103 : f32 to vector<8x128xf32>
    %307 = arith.divf %306, %305 : vector<8x128xf32>
    %cst_104 = arith.constant 1.06140542 : f32
    %308 = vector.broadcast %cst_104 : f32 to vector<8x128xf32>
    %309 = arith.mulf %308, %307 : vector<8x128xf32>
    %cst_105 = arith.constant -1.45315206 : f32
    %310 = vector.broadcast %cst_105 : f32 to vector<8x128xf32>
    %311 = arith.addf %309, %310 : vector<8x128xf32>
    %312 = arith.mulf %311, %307 : vector<8x128xf32>
    %cst_106 = arith.constant 1.42141378 : f32
    %313 = vector.broadcast %cst_106 : f32 to vector<8x128xf32>
    %314 = arith.addf %312, %313 : vector<8x128xf32>
    %315 = arith.mulf %314, %307 : vector<8x128xf32>
    %cst_107 = arith.constant -0.284496725 : f32
    %316 = vector.broadcast %cst_107 : f32 to vector<8x128xf32>
    %317 = arith.addf %315, %316 : vector<8x128xf32>
    %318 = arith.mulf %317, %307 : vector<8x128xf32>
    %cst_108 = arith.constant 0.254829586 : f32
    %319 = vector.broadcast %cst_108 : f32 to vector<8x128xf32>
    %320 = arith.addf %318, %319 : vector<8x128xf32>
    %321 = arith.mulf %320, %307 : vector<8x128xf32>
    %cst_109 = arith.constant 0.000000e+00 : f32
    %322 = vector.broadcast %cst_109 : f32 to vector<8x128xf32>
    %323 = arith.subf %322, %301 : vector<8x128xf32>
    %324 = arith.mulf %323, %301 : vector<8x128xf32>
    %325 = math.exp %324 : vector<8x128xf32>
    %326 = arith.mulf %321, %325 : vector<8x128xf32>
    %cst_110 = arith.constant 1.000000e+00 : f32
    %327 = vector.broadcast %cst_110 : f32 to vector<8x128xf32>
    %328 = arith.subf %327, %326 : vector<8x128xf32>
    %cst_111 = arith.constant 0.000000e+00 : f32
    %329 = vector.broadcast %cst_111 : f32 to vector<8x128xf32>
    %330 = arith.cmpf oge, %300, %329 : vector<8x128xf32>
    %cst_112 = arith.constant 0.000000e+00 : f32
    %331 = vector.broadcast %cst_112 : f32 to vector<8x128xf32>
    %332 = arith.subf %331, %328 : vector<8x128xf32>
    %333 = arith.select %330, %328, %332 : vector<8x128xi1>, vector<8x128xf32>
    %cst_113 = arith.constant 1.000000e+00 : f32
    %334 = vector.broadcast %cst_113 : f32 to vector<8x128xf32>
    %335 = arith.addf %334, %333 : vector<8x128xf32>
    %336 = arith.mulf %298, %335 : vector<8x128xf32>
    %337 = vector.broadcast %6 : vector<1x128xf32> to vector<8x128xf32>
    %338 = arith.mulf %336, %337 : vector<8x128xf32>
    %cst_114 = arith.constant dense<0.000000e+00> : vector<8xf32>
    %339 = vector.multi_reduction <add>, %338, %cst_114 [1] : vector<8x128xf32> to vector<8xf32>
    %340 = vector.shape_cast %339 : vector<8xf32> to vector<8x1xf32>
    %341 = vector.broadcast %7 : vector<1x1xf32> to vector<8x1xf32>
    %342 = arith.addf %340, %341 : vector<8x1xf32>
    %343 = vector.shape_cast %342 : vector<8x1xf32> to vector<8x1xf32>
    %344 = vector.broadcast %343 : vector<8x1xf32> to vector<8x128xf32>
    %c0_115 = arith.constant 0 : index
    %c0_116 = arith.constant 0 : index
    %c0_117 = arith.constant 0 : index
    %345 = vector.load %arg10[%c0_115, %c0_116, %c0_117] : memref<5x8x128xf32, #tpu.memory_space<vmem>>, vector<1x8x128xf32>
    %346 = vector.shape_cast %345 : vector<1x8x128xf32> to vector<8x128xf32>
    %347 = vector.shape_cast %344 : vector<8x128xf32> to vector<1x8x128xf32>
    tpu.vector_store %arg10[%c0_115, %c0_116, %c0_117], %347 {strides = array<i32>} : memref<5x8x128xf32, #tpu.memory_space<vmem>>, vector<1x8x128xf32>,
    %348 = vector.extract_strided_slice %293 {offsets = [0, 0], sizes = [1, 128], strides = [1, 1]} : vector<8x128xf32> to vector<1x128xf32>
    %cst_118 = arith.constant dense<0.000000e+00> : vector<1x128xf32>
    %349 = tpu.matmul %8, %0, %cst_118 {dimension_numbers = #tpu.dot_dimension_numbers<[1], [0], [0], [1], [0, 0, 1, 1], [], []>} : vector<1x128xf32>, vector<128x128xf32>, vector<1x128xf32> -> vector<1x128xf32>
    %350 = arith.addf %348, %349 : vector<1x128xf32>
    %351 = arith.negf %350 : vector<1x128xf32>
    %352 = math.exp %351 : vector<1x128xf32>
    %cst_119 = arith.constant 1.000000e+00 : f32
    %353 = vector.broadcast %cst_119 : f32 to vector<1x128xf32>
    %354 = arith.addf %353, %352 : vector<1x128xf32>
    %355 = arith.divf %353, %354 : vector<1x128xf32>
    %356 = math.tanh %350 : vector<1x128xf32>
    %c96_i32_120 = arith.constant 96 : i32
    %357 = tpu.dynamic_rotate %355 by %c96_i32_120 dim 1 : vector<1x128xf32>, i32 -> vector<1x128xf32>
    %c64_i32_121 = arith.constant 64 : i32
    %358 = tpu.dynamic_rotate %356 by %c64_i32_121 dim 1 : vector<1x128xf32>, i32 -> vector<1x128xf32>
    %c32_i32_122 = arith.constant 32 : i32
    %359 = tpu.dynamic_rotate %355 by %c32_i32_122 dim 1 : vector<1x128xf32>, i32 -> vector<1x128xf32>
    %360 = arith.mulf %357, %8 : vector<1x128xf32>
    %361 = arith.mulf %355, %358 : vector<1x128xf32>
    %362 = arith.addf %360, %361 : vector<1x128xf32>
    %363 = math.tanh %362 : vector<1x128xf32>
    %364 = arith.mulf %359, %363 : vector<1x128xf32>
    %365 = tpu.concatenate %364, %8 in 1 : vector<1x128xf32>, vector<1x128xf32> -> vector<1x256xf32>
    %cst_123 = arith.constant dense<0.000000e+00> : vector<1x128xf32>
    %366 = tpu.matmul %365, %1, %cst_123 {dimension_numbers = #tpu.dot_dimension_numbers<[1], [0], [0], [1], [0, 0, 1, 1], [], []>} : vector<1x256xf32>, vector<256x128xf32>, vector<1x128xf32> -> vector<1x128xf32>
    %367 = arith.addf %366, %3 : vector<1x128xf32>
    %368 = arith.negf %367 : vector<1x128xf32>
    %369 = math.exp %368 : vector<1x128xf32>
    %cst_124 = arith.constant 1.000000e+00 : f32
    %370 = vector.broadcast %cst_124 : f32 to vector<1x128xf32>
    %371 = arith.addf %370, %369 : vector<1x128xf32>
    %372 = arith.divf %370, %371 : vector<1x128xf32>
    %373 = math.tanh %367 : vector<1x128xf32>
    %c96_i32_125 = arith.constant 96 : i32
    %374 = tpu.dynamic_rotate %372 by %c96_i32_125 dim 1 : vector<1x128xf32>, i32 -> vector<1x128xf32>
    %c64_i32_126 = arith.constant 64 : i32
    %375 = tpu.dynamic_rotate %373 by %c64_i32_126 dim 1 : vector<1x128xf32>, i32 -> vector<1x128xf32>
    %c32_i32_127 = arith.constant 32 : i32
    %376 = tpu.dynamic_rotate %372 by %c32_i32_127 dim 1 : vector<1x128xf32>, i32 -> vector<1x128xf32>
    %377 = arith.mulf %374, %8 : vector<1x128xf32>
    %378 = arith.mulf %372, %375 : vector<1x128xf32>
    %379 = arith.addf %377, %378 : vector<1x128xf32>
    %380 = math.tanh %379 : vector<1x128xf32>
    %381 = arith.mulf %376, %380 : vector<1x128xf32>
    %382 = vector.extract_strided_slice %293 {offsets = [1, 0], sizes = [1, 128], strides = [1, 1]} : vector<8x128xf32> to vector<1x128xf32>
    %cst_128 = arith.constant dense<0.000000e+00> : vector<1x128xf32>
    %383 = tpu.matmul %364, %0, %cst_128 {dimension_numbers = #tpu.dot_dimension_numbers<[1], [0], [0], [1], [0, 0, 1, 1], [], []>} : vector<1x128xf32>, vector<128x128xf32>, vector<1x128xf32> -> vector<1x128xf32>
    %384 = arith.addf %382, %383 : vector<1x128xf32>
    %385 = arith.negf %384 : vector<1x128xf32>
    %386 = math.exp %385 : vector<1x128xf32>
    %cst_129 = arith.constant 1.000000e+00 : f32
    %387 = vector.broadcast %cst_129 : f32 to vector<1x128xf32>
    %388 = arith.addf %387, %386 : vector<1x128xf32>
    %389 = arith.divf %387, %388 : vector<1x128xf32>
    %390 = math.tanh %384 : vector<1x128xf32>
    %c96_i32_130 = arith.constant 96 : i32
    %391 = tpu.dynamic_rotate %389 by %c96_i32_130 dim 1 : vector<1x128xf32>, i32 -> vector<1x128xf32>
    %c64_i32_131 = arith.constant 64 : i32
    %392 = tpu.dynamic_rotate %390 by %c64_i32_131 dim 1 : vector<1x128xf32>, i32 -> vector<1x128xf32>
    %c32_i32_132 = arith.constant 32 : i32
    %393 = tpu.dynamic_rotate %389 by %c32_i32_132 dim 1 : vector<1x128xf32>, i32 -> vector<1x128xf32>
    %394 = arith.mulf %391, %362 : vector<1x128xf32>
    %395 = arith.mulf %389, %392 : vector<1x128xf32>
    %396 = arith.addf %394, %395 : vector<1x128xf32>
    %397 = math.tanh %396 : vector<1x128xf32>
    %398 = arith.mulf %393, %397 : vector<1x128xf32>
    %399 = tpu.concatenate %398, %381 in 1 : vector<1x128xf32>, vector<1x128xf32> -> vector<1x256xf32>
    %cst_133 = arith.constant dense<0.000000e+00> : vector<1x128xf32>
    %400 = tpu.matmul %399, %1, %cst_133 {dimension_numbers = #tpu.dot_dimension_numbers<[1], [0], [0], [1], [0, 0, 1, 1], [], []>} : vector<1x256xf32>, vector<256x128xf32>, vector<1x128xf32> -> vector<1x128xf32>
    %401 = arith.addf %400, %3 : vector<1x128xf32>
    %402 = arith.negf %401 : vector<1x128xf32>
    %403 = math.exp %402 : vector<1x128xf32>
    %cst_134 = arith.constant 1.000000e+00 : f32
    %404 = vector.broadcast %cst_134 : f32 to vector<1x128xf32>
    %405 = arith.addf %404, %403 : vector<1x128xf32>
    %406 = arith.divf %404, %405 : vector<1x128xf32>
    %407 = math.tanh %401 : vector<1x128xf32>
    %c96_i32_135 = arith.constant 96 : i32
    %408 = tpu.dynamic_rotate %406 by %c96_i32_135 dim 1 : vector<1x128xf32>, i32 -> vector<1x128xf32>
    %c64_i32_136 = arith.constant 64 : i32
    %409 = tpu.dynamic_rotate %407 by %c64_i32_136 dim 1 : vector<1x128xf32>, i32 -> vector<1x128xf32>
    %c32_i32_137 = arith.constant 32 : i32
    %410 = tpu.dynamic_rotate %406 by %c32_i32_137 dim 1 : vector<1x128xf32>, i32 -> vector<1x128xf32>
    %411 = arith.mulf %408, %379 : vector<1x128xf32>
    %412 = arith.mulf %406, %409 : vector<1x128xf32>
    %413 = arith.addf %411, %412 : vector<1x128xf32>
    %414 = math.tanh %413 : vector<1x128xf32>
    %415 = arith.mulf %410, %414 : vector<1x128xf32>
    %416 = vector.extract_strided_slice %293 {offsets = [2, 0], sizes = [1, 128], strides = [1, 1]} : vector<8x128xf32> to vector<1x128xf32>
    %cst_138 = arith.constant dense<0.000000e+00> : vector<1x128xf32>
    %417 = tpu.matmul %398, %0, %cst_138 {dimension_numbers = #tpu.dot_dimension_numbers<[1], [0], [0], [1], [0, 0, 1, 1], [], []>} : vector<1x128xf32>, vector<128x128xf32>, vector<1x128xf32> -> vector<1x128xf32>
    %418 = arith.addf %416, %417 : vector<1x128xf32>
    %419 = arith.negf %418 : vector<1x128xf32>
    %420 = math.exp %419 : vector<1x128xf32>
    %cst_139 = arith.constant 1.000000e+00 : f32
    %421 = vector.broadcast %cst_139 : f32 to vector<1x128xf32>
    %422 = arith.addf %421, %420 : vector<1x128xf32>
    %423 = arith.divf %421, %422 : vector<1x128xf32>
    %424 = math.tanh %418 : vector<1x128xf32>
    %c96_i32_140 = arith.constant 96 : i32
    %425 = tpu.dynamic_rotate %423 by %c96_i32_140 dim 1 : vector<1x128xf32>, i32 -> vector<1x128xf32>
    %c64_i32_141 = arith.constant 64 : i32
    %426 = tpu.dynamic_rotate %424 by %c64_i32_141 dim 1 : vector<1x128xf32>, i32 -> vector<1x128xf32>
    %c32_i32_142 = arith.constant 32 : i32
    %427 = tpu.dynamic_rotate %423 by %c32_i32_142 dim 1 : vector<1x128xf32>, i32 -> vector<1x128xf32>
    %428 = arith.mulf %425, %396 : vector<1x128xf32>
    %429 = arith.mulf %423, %426 : vector<1x128xf32>
    %430 = arith.addf %428, %429 : vector<1x128xf32>
    %431 = math.tanh %430 : vector<1x128xf32>
    %432 = arith.mulf %427, %431 : vector<1x128xf32>
    %433 = tpu.concatenate %432, %415 in 1 : vector<1x128xf32>, vector<1x128xf32> -> vector<1x256xf32>
    %cst_143 = arith.constant dense<0.000000e+00> : vector<1x128xf32>
    %434 = tpu.matmul %433, %1, %cst_143 {dimension_numbers = #tpu.dot_dimension_numbers<[1], [0], [0], [1], [0, 0, 1, 1], [], []>} : vector<1x256xf32>, vector<256x128xf32>, vector<1x128xf32> -> vector<1x128xf32>
    %435 = arith.addf %434, %3 : vector<1x128xf32>
    %436 = arith.negf %435 : vector<1x128xf32>
    %437 = math.exp %436 : vector<1x128xf32>
    %cst_144 = arith.constant 1.000000e+00 : f32
    %438 = vector.broadcast %cst_144 : f32 to vector<1x128xf32>
    %439 = arith.addf %438, %437 : vector<1x128xf32>
    %440 = arith.divf %438, %439 : vector<1x128xf32>
    %441 = math.tanh %435 : vector<1x128xf32>
    %c96_i32_145 = arith.constant 96 : i32
    %442 = tpu.dynamic_rotate %440 by %c96_i32_145 dim 1 : vector<1x128xf32>, i32 -> vector<1x128xf32>
    %c64_i32_146 = arith.constant 64 : i32
    %443 = tpu.dynamic_rotate %441 by %c64_i32_146 dim 1 : vector<1x128xf32>, i32 -> vector<1x128xf32>
    %c32_i32_147 = arith.constant 32 : i32
    %444 = tpu.dynamic_rotate %440 by %c32_i32_147 dim 1 : vector<1x128xf32>, i32 -> vector<1x128xf32>
    %445 = arith.mulf %442, %413 : vector<1x128xf32>
    %446 = arith.mulf %440, %443 : vector<1x128xf32>
    %447 = arith.addf %445, %446 : vector<1x128xf32>
    %448 = math.tanh %447 : vector<1x128xf32>
    %449 = arith.mulf %444, %448 : vector<1x128xf32>
    %450 = vector.extract_strided_slice %293 {offsets = [3, 0], sizes = [1, 128], strides = [1, 1]} : vector<8x128xf32> to vector<1x128xf32>
    %cst_148 = arith.constant dense<0.000000e+00> : vector<1x128xf32>
    %451 = tpu.matmul %432, %0, %cst_148 {dimension_numbers = #tpu.dot_dimension_numbers<[1], [0], [0], [1], [0, 0, 1, 1], [], []>} : vector<1x128xf32>, vector<128x128xf32>, vector<1x128xf32> -> vector<1x128xf32>
    %452 = arith.addf %450, %451 : vector<1x128xf32>
    %453 = arith.negf %452 : vector<1x128xf32>
    %454 = math.exp %453 : vector<1x128xf32>
    %cst_149 = arith.constant 1.000000e+00 : f32
    %455 = vector.broadcast %cst_149 : f32 to vector<1x128xf32>
    %456 = arith.addf %455, %454 : vector<1x128xf32>
    %457 = arith.divf %455, %456 : vector<1x128xf32>
    %458 = math.tanh %452 : vector<1x128xf32>
    %c96_i32_150 = arith.constant 96 : i32
    %459 = tpu.dynamic_rotate %457 by %c96_i32_150 dim 1 : vector<1x128xf32>, i32 -> vector<1x128xf32>
    %c64_i32_151 = arith.constant 64 : i32
    %460 = tpu.dynamic_rotate %458 by %c64_i32_151 dim 1 : vector<1x128xf32>, i32 -> vector<1x128xf32>
    %c32_i32_152 = arith.constant 32 : i32
    %461 = tpu.dynamic_rotate %457 by %c32_i32_152 dim 1 : vector<1x128xf32>, i32 -> vector<1x128xf32>
    %462 = arith.mulf %459, %430 : vector<1x128xf32>
    %463 = arith.mulf %457, %460 : vector<1x128xf32>
    %464 = arith.addf %462, %463 : vector<1x128xf32>
    %465 = math.tanh %464 : vector<1x128xf32>
    %466 = arith.mulf %461, %465 : vector<1x128xf32>
    %467 = tpu.concatenate %466, %449 in 1 : vector<1x128xf32>, vector<1x128xf32> -> vector<1x256xf32>
    %cst_153 = arith.constant dense<0.000000e+00> : vector<1x128xf32>
    %468 = tpu.matmul %467, %1, %cst_153 {dimension_numbers = #tpu.dot_dimension_numbers<[1], [0], [0], [1], [0, 0, 1, 1], [], []>} : vector<1x256xf32>, vector<256x128xf32>, vector<1x128xf32> -> vector<1x128xf32>
    %469 = arith.addf %468, %3 : vector<1x128xf32>
    %470 = arith.negf %469 : vector<1x128xf32>
    %471 = math.exp %470 : vector<1x128xf32>
    %cst_154 = arith.constant 1.000000e+00 : f32
    %472 = vector.broadcast %cst_154 : f32 to vector<1x128xf32>
    %473 = arith.addf %472, %471 : vector<1x128xf32>
    %474 = arith.divf %472, %473 : vector<1x128xf32>
    %475 = math.tanh %469 : vector<1x128xf32>
    %c96_i32_155 = arith.constant 96 : i32
    %476 = tpu.dynamic_rotate %474 by %c96_i32_155 dim 1 : vector<1x128xf32>, i32 -> vector<1x128xf32>
    %c64_i32_156 = arith.constant 64 : i32
    %477 = tpu.dynamic_rotate %475 by %c64_i32_156 dim 1 : vector<1x128xf32>, i32 -> vector<1x128xf32>
    %c32_i32_157 = arith.constant 32 : i32
    %478 = tpu.dynamic_rotate %474 by %c32_i32_157 dim 1 : vector<1x128xf32>, i32 -> vector<1x128xf32>
    %479 = arith.mulf %476, %447 : vector<1x128xf32>
    %480 = arith.mulf %474, %477 : vector<1x128xf32>
    %481 = arith.addf %479, %480 : vector<1x128xf32>
    %482 = math.tanh %481 : vector<1x128xf32>
    %483 = arith.mulf %478, %482 : vector<1x128xf32>
    %484 = vector.extract_strided_slice %293 {offsets = [4, 0], sizes = [1, 128], strides = [1, 1]} : vector<8x128xf32> to vector<1x128xf32>
    %cst_158 = arith.constant dense<0.000000e+00> : vector<1x128xf32>
    %485 = tpu.matmul %466, %0, %cst_158 {dimension_numbers = #tpu.dot_dimension_numbers<[1], [0], [0], [1], [0, 0, 1, 1], [], []>} : vector<1x128xf32>, vector<128x128xf32>, vector<1x128xf32> -> vector<1x128xf32>
    %486 = arith.addf %484, %485 : vector<1x128xf32>
    %487 = arith.negf %486 : vector<1x128xf32>
    %488 = math.exp %487 : vector<1x128xf32>
    %cst_159 = arith.constant 1.000000e+00 : f32
    %489 = vector.broadcast %cst_159 : f32 to vector<1x128xf32>
    %490 = arith.addf %489, %488 : vector<1x128xf32>
    %491 = arith.divf %489, %490 : vector<1x128xf32>
    %492 = math.tanh %486 : vector<1x128xf32>
    %c96_i32_160 = arith.constant 96 : i32
    %493 = tpu.dynamic_rotate %491 by %c96_i32_160 dim 1 : vector<1x128xf32>, i32 -> vector<1x128xf32>
    %c64_i32_161 = arith.constant 64 : i32
    %494 = tpu.dynamic_rotate %492 by %c64_i32_161 dim 1 : vector<1x128xf32>, i32 -> vector<1x128xf32>
    %c32_i32_162 = arith.constant 32 : i32
    %495 = tpu.dynamic_rotate %491 by %c32_i32_162 dim 1 : vector<1x128xf32>, i32 -> vector<1x128xf32>
    %496 = arith.mulf %493, %464 : vector<1x128xf32>
    %497 = arith.mulf %491, %494 : vector<1x128xf32>
    %498 = arith.addf %496, %497 : vector<1x128xf32>
    %499 = math.tanh %498 : vector<1x128xf32>
    %500 = arith.mulf %495, %499 : vector<1x128xf32>
    %501 = tpu.concatenate %500, %483 in 1 : vector<1x128xf32>, vector<1x128xf32> -> vector<1x256xf32>
    %cst_163 = arith.constant dense<0.000000e+00> : vector<1x128xf32>
    %502 = tpu.matmul %501, %1, %cst_163 {dimension_numbers = #tpu.dot_dimension_numbers<[1], [0], [0], [1], [0, 0, 1, 1], [], []>} : vector<1x256xf32>, vector<256x128xf32>, vector<1x128xf32> -> vector<1x128xf32>
    %503 = arith.addf %502, %3 : vector<1x128xf32>
    %504 = arith.negf %503 : vector<1x128xf32>
    %505 = math.exp %504 : vector<1x128xf32>
    %cst_164 = arith.constant 1.000000e+00 : f32
    %506 = vector.broadcast %cst_164 : f32 to vector<1x128xf32>
    %507 = arith.addf %506, %505 : vector<1x128xf32>
    %508 = arith.divf %506, %507 : vector<1x128xf32>
    %509 = math.tanh %503 : vector<1x128xf32>
    %c96_i32_165 = arith.constant 96 : i32
    %510 = tpu.dynamic_rotate %508 by %c96_i32_165 dim 1 : vector<1x128xf32>, i32 -> vector<1x128xf32>
    %c64_i32_166 = arith.constant 64 : i32
    %511 = tpu.dynamic_rotate %509 by %c64_i32_166 dim 1 : vector<1x128xf32>, i32 -> vector<1x128xf32>
    %c32_i32_167 = arith.constant 32 : i32
    %512 = tpu.dynamic_rotate %508 by %c32_i32_167 dim 1 : vector<1x128xf32>, i32 -> vector<1x128xf32>
    %513 = arith.mulf %510, %481 : vector<1x128xf32>
    %514 = arith.mulf %508, %511 : vector<1x128xf32>
    %515 = arith.addf %513, %514 : vector<1x128xf32>
    %516 = math.tanh %515 : vector<1x128xf32>
    %517 = arith.mulf %512, %516 : vector<1x128xf32>
    %518 = vector.extract_strided_slice %293 {offsets = [5, 0], sizes = [1, 128], strides = [1, 1]} : vector<8x128xf32> to vector<1x128xf32>
    %cst_168 = arith.constant dense<0.000000e+00> : vector<1x128xf32>
    %519 = tpu.matmul %500, %0, %cst_168 {dimension_numbers = #tpu.dot_dimension_numbers<[1], [0], [0], [1], [0, 0, 1, 1], [], []>} : vector<1x128xf32>, vector<128x128xf32>, vector<1x128xf32> -> vector<1x128xf32>
    %520 = arith.addf %518, %519 : vector<1x128xf32>
    %521 = arith.negf %520 : vector<1x128xf32>
    %522 = math.exp %521 : vector<1x128xf32>
    %cst_169 = arith.constant 1.000000e+00 : f32
    %523 = vector.broadcast %cst_169 : f32 to vector<1x128xf32>
    %524 = arith.addf %523, %522 : vector<1x128xf32>
    %525 = arith.divf %523, %524 : vector<1x128xf32>
    %526 = math.tanh %520 : vector<1x128xf32>
    %c96_i32_170 = arith.constant 96 : i32
    %527 = tpu.dynamic_rotate %525 by %c96_i32_170 dim 1 : vector<1x128xf32>, i32 -> vector<1x128xf32>
    %c64_i32_171 = arith.constant 64 : i32
    %528 = tpu.dynamic_rotate %526 by %c64_i32_171 dim 1 : vector<1x128xf32>, i32 -> vector<1x128xf32>
    %c32_i32_172 = arith.constant 32 : i32
    %529 = tpu.dynamic_rotate %525 by %c32_i32_172 dim 1 : vector<1x128xf32>, i32 -> vector<1x128xf32>
    %530 = arith.mulf %527, %498 : vector<1x128xf32>
    %531 = arith.mulf %525, %528 : vector<1x128xf32>
    %532 = arith.addf %530, %531 : vector<1x128xf32>
    %533 = math.tanh %532 : vector<1x128xf32>
    %534 = arith.mulf %529, %533 : vector<1x128xf32>
    %535 = tpu.concatenate %534, %517 in 1 : vector<1x128xf32>, vector<1x128xf32> -> vector<1x256xf32>
    %cst_173 = arith.constant dense<0.000000e+00> : vector<1x128xf32>
    %536 = tpu.matmul %535, %1, %cst_173 {dimension_numbers = #tpu.dot_dimension_numbers<[1], [0], [0], [1], [0, 0, 1, 1], [], []>} : vector<1x256xf32>, vector<256x128xf32>, vector<1x128xf32> -> vector<1x128xf32>
    %537 = arith.addf %536, %3 : vector<1x128xf32>
    %538 = arith.negf %537 : vector<1x128xf32>
    %539 = math.exp %538 : vector<1x128xf32>
    %cst_174 = arith.constant 1.000000e+00 : f32
    %540 = vector.broadcast %cst_174 : f32 to vector<1x128xf32>
    %541 = arith.addf %540, %539 : vector<1x128xf32>
    %542 = arith.divf %540, %541 : vector<1x128xf32>
    %543 = math.tanh %537 : vector<1x128xf32>
    %c96_i32_175 = arith.constant 96 : i32
    %544 = tpu.dynamic_rotate %542 by %c96_i32_175 dim 1 : vector<1x128xf32>, i32 -> vector<1x128xf32>
    %c64_i32_176 = arith.constant 64 : i32
    %545 = tpu.dynamic_rotate %543 by %c64_i32_176 dim 1 : vector<1x128xf32>, i32 -> vector<1x128xf32>
    %c32_i32_177 = arith.constant 32 : i32
    %546 = tpu.dynamic_rotate %542 by %c32_i32_177 dim 1 : vector<1x128xf32>, i32 -> vector<1x128xf32>
    %547 = arith.mulf %544, %515 : vector<1x128xf32>
    %548 = arith.mulf %542, %545 : vector<1x128xf32>
    %549 = arith.addf %547, %548 : vector<1x128xf32>
    %550 = math.tanh %549 : vector<1x128xf32>
    %551 = arith.mulf %546, %550 : vector<1x128xf32>
    %552 = vector.extract_strided_slice %293 {offsets = [6, 0], sizes = [1, 128], strides = [1, 1]} : vector<8x128xf32> to vector<1x128xf32>
    %cst_178 = arith.constant dense<0.000000e+00> : vector<1x128xf32>
    %553 = tpu.matmul %534, %0, %cst_178 {dimension_numbers = #tpu.dot_dimension_numbers<[1], [0], [0], [1], [0, 0, 1, 1], [], []>} : vector<1x128xf32>, vector<128x128xf32>, vector<1x128xf32> -> vector<1x128xf32>
    %554 = arith.addf %552, %553 : vector<1x128xf32>
    %555 = arith.negf %554 : vector<1x128xf32>
    %556 = math.exp %555 : vector<1x128xf32>
    %cst_179 = arith.constant 1.000000e+00 : f32
    %557 = vector.broadcast %cst_179 : f32 to vector<1x128xf32>
    %558 = arith.addf %557, %556 : vector<1x128xf32>
    %559 = arith.divf %557, %558 : vector<1x128xf32>
    %560 = math.tanh %554 : vector<1x128xf32>
    %c96_i32_180 = arith.constant 96 : i32
    %561 = tpu.dynamic_rotate %559 by %c96_i32_180 dim 1 : vector<1x128xf32>, i32 -> vector<1x128xf32>
    %c64_i32_181 = arith.constant 64 : i32
    %562 = tpu.dynamic_rotate %560 by %c64_i32_181 dim 1 : vector<1x128xf32>, i32 -> vector<1x128xf32>
    %c32_i32_182 = arith.constant 32 : i32
    %563 = tpu.dynamic_rotate %559 by %c32_i32_182 dim 1 : vector<1x128xf32>, i32 -> vector<1x128xf32>
    %564 = arith.mulf %561, %532 : vector<1x128xf32>
    %565 = arith.mulf %559, %562 : vector<1x128xf32>
    %566 = arith.addf %564, %565 : vector<1x128xf32>
    %567 = math.tanh %566 : vector<1x128xf32>
    %568 = arith.mulf %563, %567 : vector<1x128xf32>
    %569 = tpu.concatenate %568, %551 in 1 : vector<1x128xf32>, vector<1x128xf32> -> vector<1x256xf32>
    %cst_183 = arith.constant dense<0.000000e+00> : vector<1x128xf32>
    %570 = tpu.matmul %569, %1, %cst_183 {dimension_numbers = #tpu.dot_dimension_numbers<[1], [0], [0], [1], [0, 0, 1, 1], [], []>} : vector<1x256xf32>, vector<256x128xf32>, vector<1x128xf32> -> vector<1x128xf32>
    %571 = arith.addf %570, %3 : vector<1x128xf32>
    %572 = arith.negf %571 : vector<1x128xf32>
    %573 = math.exp %572 : vector<1x128xf32>
    %cst_184 = arith.constant 1.000000e+00 : f32
    %574 = vector.broadcast %cst_184 : f32 to vector<1x128xf32>
    %575 = arith.addf %574, %573 : vector<1x128xf32>
    %576 = arith.divf %574, %575 : vector<1x128xf32>
    %577 = math.tanh %571 : vector<1x128xf32>
    %c96_i32_185 = arith.constant 96 : i32
    %578 = tpu.dynamic_rotate %576 by %c96_i32_185 dim 1 : vector<1x128xf32>, i32 -> vector<1x128xf32>
    %c64_i32_186 = arith.constant 64 : i32
    %579 = tpu.dynamic_rotate %577 by %c64_i32_186 dim 1 : vector<1x128xf32>, i32 -> vector<1x128xf32>
    %c32_i32_187 = arith.constant 32 : i32
    %580 = tpu.dynamic_rotate %576 by %c32_i32_187 dim 1 : vector<1x128xf32>, i32 -> vector<1x128xf32>
    %581 = arith.mulf %578, %549 : vector<1x128xf32>
    %582 = arith.mulf %576, %579 : vector<1x128xf32>
    %583 = arith.addf %581, %582 : vector<1x128xf32>
    %584 = math.tanh %583 : vector<1x128xf32>
    %585 = arith.mulf %580, %584 : vector<1x128xf32>
    %586 = vector.extract_strided_slice %293 {offsets = [7, 0], sizes = [1, 128], strides = [1, 1]} : vector<8x128xf32> to vector<1x128xf32>
    %cst_188 = arith.constant dense<0.000000e+00> : vector<1x128xf32>
    %587 = tpu.matmul %568, %0, %cst_188 {dimension_numbers = #tpu.dot_dimension_numbers<[1], [0], [0], [1], [0, 0, 1, 1], [], []>} : vector<1x128xf32>, vector<128x128xf32>, vector<1x128xf32> -> vector<1x128xf32>
    %588 = arith.addf %586, %587 : vector<1x128xf32>
    %589 = arith.negf %588 : vector<1x128xf32>
    %590 = math.exp %589 : vector<1x128xf32>
    %cst_189 = arith.constant 1.000000e+00 : f32
    %591 = vector.broadcast %cst_189 : f32 to vector<1x128xf32>
    %592 = arith.addf %591, %590 : vector<1x128xf32>
    %593 = arith.divf %591, %592 : vector<1x128xf32>
    %594 = math.tanh %588 : vector<1x128xf32>
    %c96_i32_190 = arith.constant 96 : i32
    %595 = tpu.dynamic_rotate %593 by %c96_i32_190 dim 1 : vector<1x128xf32>, i32 -> vector<1x128xf32>
    %c64_i32_191 = arith.constant 64 : i32
    %596 = tpu.dynamic_rotate %594 by %c64_i32_191 dim 1 : vector<1x128xf32>, i32 -> vector<1x128xf32>
    %c32_i32_192 = arith.constant 32 : i32
    %597 = tpu.dynamic_rotate %593 by %c32_i32_192 dim 1 : vector<1x128xf32>, i32 -> vector<1x128xf32>
    %598 = arith.mulf %595, %566 : vector<1x128xf32>
    %599 = arith.mulf %593, %596 : vector<1x128xf32>
    %600 = arith.addf %598, %599 : vector<1x128xf32>
    %601 = math.tanh %600 : vector<1x128xf32>
    %602 = arith.mulf %597, %601 : vector<1x128xf32>
    %603 = tpu.concatenate %602, %585 in 1 : vector<1x128xf32>, vector<1x128xf32> -> vector<1x256xf32>
    %cst_193 = arith.constant dense<0.000000e+00> : vector<1x128xf32>
    %604 = tpu.matmul %603, %1, %cst_193 {dimension_numbers = #tpu.dot_dimension_numbers<[1], [0], [0], [1], [0, 0, 1, 1], [], []>} : vector<1x256xf32>, vector<256x128xf32>, vector<1x128xf32> -> vector<1x128xf32>
    %605 = arith.addf %604, %3 : vector<1x128xf32>
    %606 = arith.negf %605 : vector<1x128xf32>
    %607 = math.exp %606 : vector<1x128xf32>
    %cst_194 = arith.constant 1.000000e+00 : f32
    %608 = vector.broadcast %cst_194 : f32 to vector<1x128xf32>
    %609 = arith.addf %608, %607 : vector<1x128xf32>
    %610 = arith.divf %608, %609 : vector<1x128xf32>
    %611 = math.tanh %605 : vector<1x128xf32>
    %c96_i32_195 = arith.constant 96 : i32
    %612 = tpu.dynamic_rotate %610 by %c96_i32_195 dim 1 : vector<1x128xf32>, i32 -> vector<1x128xf32>
    %c64_i32_196 = arith.constant 64 : i32
    %613 = tpu.dynamic_rotate %611 by %c64_i32_196 dim 1 : vector<1x128xf32>, i32 -> vector<1x128xf32>
    %c32_i32_197 = arith.constant 32 : i32
    %614 = tpu.dynamic_rotate %610 by %c32_i32_197 dim 1 : vector<1x128xf32>, i32 -> vector<1x128xf32>
    %615 = arith.mulf %612, %583 : vector<1x128xf32>
    %616 = arith.mulf %610, %613 : vector<1x128xf32>
    %617 = arith.addf %615, %616 : vector<1x128xf32>
    %618 = math.tanh %617 : vector<1x128xf32>
    %619 = arith.mulf %614, %618 : vector<1x128xf32>
    %620 = tpu.concatenate %381, %415, %449, %483, %517, %551, %585, %619 in 0 : vector<1x128xf32>, vector<1x128xf32>, vector<1x128xf32>, vector<1x128xf32>, vector<1x128xf32>, vector<1x128xf32>, vector<1x128xf32>, vector<1x128xf32> -> vector<8x128xf32>
    %c1 = arith.constant 1 : index
    %c0_198 = arith.constant 0 : index
    %c0_199 = arith.constant 0 : index
    %621 = vector.load %arg9[%c1, %c0_198, %c0_199] : memref<5x8x128xf32, #tpu.memory_space<vmem>>, vector<1x8x128xf32>
    %622 = vector.shape_cast %621 : vector<1x8x128xf32> to vector<8x128xf32>
    %623 = vector.shape_cast %620 : vector<8x128xf32> to vector<1x8x128xf32>
    tpu.vector_store %arg9[%c1, %c0_198, %c0_199], %623 {strides = array<i32>} : memref<5x8x128xf32, #tpu.memory_space<vmem>>, vector<1x8x128xf32>,
    %cst_200 = arith.constant dense<0.000000e+00> : vector<8x256xf32>
    %624 = tpu.matmul %620, %4, %cst_200 {dimension_numbers = #tpu.dot_dimension_numbers<[1], [0], [0], [1], [0, 0, 1, 1], [], []>} : vector<8x128xf32>, vector<128x256xf32>, vector<8x256xf32> -> vector<8x256xf32>
    %625 = vector.extract_strided_slice %624 {offsets = [0, 0], sizes = [8, 128], strides = [1, 1]} : vector<8x256xf32> to vector<8x128xf32>
    %626 = vector.broadcast %2 : vector<1x128xf32> to vector<8x128xf32>
    %627 = arith.addf %625, %626 : vector<8x128xf32>
    %628 = vector.extract_strided_slice %624 {offsets = [0, 128], sizes = [8, 128], strides = [1, 1]} : vector<8x256xf32> to vector<8x128xf32>
    %629 = vector.broadcast %5 : vector<1x128xf32> to vector<8x128xf32>
    %630 = arith.addf %628, %629 : vector<8x128xf32>
    %cst_201 = arith.constant 5.000000e-01 : f32
    %631 = vector.broadcast %cst_201 : f32 to vector<8x128xf32>
    %632 = arith.mulf %631, %630 : vector<8x128xf32>
    %cst_202 = arith.constant 0.707106769 : f32
    %633 = vector.broadcast %cst_202 : f32 to vector<8x128xf32>
    %634 = arith.mulf %630, %633 : vector<8x128xf32>
    %635 = math.absf %634 : vector<8x128xf32>
    %cst_203 = arith.constant 0.327591091 : f32
    %636 = vector.broadcast %cst_203 : f32 to vector<8x128xf32>
    %637 = arith.mulf %636, %635 : vector<8x128xf32>
    %cst_204 = arith.constant 1.000000e+00 : f32
    %638 = vector.broadcast %cst_204 : f32 to vector<8x128xf32>
    %639 = arith.addf %638, %637 : vector<8x128xf32>
    %cst_205 = arith.constant 1.000000e+00 : f32
    %640 = vector.broadcast %cst_205 : f32 to vector<8x128xf32>
    %641 = arith.divf %640, %639 : vector<8x128xf32>
    %cst_206 = arith.constant 1.06140542 : f32
    %642 = vector.broadcast %cst_206 : f32 to vector<8x128xf32>
    %643 = arith.mulf %642, %641 : vector<8x128xf32>
    %cst_207 = arith.constant -1.45315206 : f32
    %644 = vector.broadcast %cst_207 : f32 to vector<8x128xf32>
    %645 = arith.addf %643, %644 : vector<8x128xf32>
    %646 = arith.mulf %645, %641 : vector<8x128xf32>
    %cst_208 = arith.constant 1.42141378 : f32
    %647 = vector.broadcast %cst_208 : f32 to vector<8x128xf32>
    %648 = arith.addf %646, %647 : vector<8x128xf32>
    %649 = arith.mulf %648, %641 : vector<8x128xf32>
    %cst_209 = arith.constant -0.284496725 : f32
    %650 = vector.broadcast %cst_209 : f32 to vector<8x128xf32>
    %651 = arith.addf %649, %650 : vector<8x128xf32>
    %652 = arith.mulf %651, %641 : vector<8x128xf32>
    %cst_210 = arith.constant 0.254829586 : f32
    %653 = vector.broadcast %cst_210 : f32 to vector<8x128xf32>
    %654 = arith.addf %652, %653 : vector<8x128xf32>
    %655 = arith.mulf %654, %641 : vector<8x128xf32>
    %cst_211 = arith.constant 0.000000e+00 : f32
    %656 = vector.broadcast %cst_211 : f32 to vector<8x128xf32>
    %657 = arith.subf %656, %635 : vector<8x128xf32>
    %658 = arith.mulf %657, %635 : vector<8x128xf32>
    %659 = math.exp %658 : vector<8x128xf32>
    %660 = arith.mulf %655, %659 : vector<8x128xf32>
    %cst_212 = arith.constant 1.000000e+00 : f32
    %661 = vector.broadcast %cst_212 : f32 to vector<8x128xf32>
    %662 = arith.subf %661, %660 : vector<8x128xf32>
    %cst_213 = arith.constant 0.000000e+00 : f32
    %663 = vector.broadcast %cst_213 : f32 to vector<8x128xf32>
    %664 = arith.cmpf oge, %634, %663 : vector<8x128xf32>
    %cst_214 = arith.constant 0.000000e+00 : f32
    %665 = vector.broadcast %cst_214 : f32 to vector<8x128xf32>
    %666 = arith.subf %665, %662 : vector<8x128xf32>
    %667 = arith.select %664, %662, %666 : vector<8x128xi1>, vector<8x128xf32>
    %cst_215 = arith.constant 1.000000e+00 : f32
    %668 = vector.broadcast %cst_215 : f32 to vector<8x128xf32>
    %669 = arith.addf %668, %667 : vector<8x128xf32>
    %670 = arith.mulf %632, %669 : vector<8x128xf32>
    %671 = vector.broadcast %6 : vector<1x128xf32> to vector<8x128xf32>
    %672 = arith.mulf %670, %671 : vector<8x128xf32>
    %cst_216 = arith.constant dense<0.000000e+00> : vector<8xf32>
    %673 = vector.multi_reduction <add>, %672, %cst_216 [1] : vector<8x128xf32> to vector<8xf32>
    %674 = vector.shape_cast %673 : vector<8xf32> to vector<8x1xf32>
    %675 = vector.broadcast %7 : vector<1x1xf32> to vector<8x1xf32>
    %676 = arith.addf %674, %675 : vector<8x1xf32>
    %677 = vector.shape_cast %676 : vector<8x1xf32> to vector<8x1xf32>
    %678 = vector.broadcast %677 : vector<8x1xf32> to vector<8x128xf32>
    %c1_217 = arith.constant 1 : index
    %c0_218 = arith.constant 0 : index
    %c0_219 = arith.constant 0 : index
    %679 = vector.load %arg10[%c1_217, %c0_218, %c0_219] : memref<5x8x128xf32, #tpu.memory_space<vmem>>, vector<1x8x128xf32>
    %680 = vector.shape_cast %679 : vector<1x8x128xf32> to vector<8x128xf32>
    %681 = vector.shape_cast %678 : vector<8x128xf32> to vector<1x8x128xf32>
    tpu.vector_store %arg10[%c1_217, %c0_218, %c0_219], %681 {strides = array<i32>} : memref<5x8x128xf32, #tpu.memory_space<vmem>>, vector<1x8x128xf32>,
    %682 = vector.extract_strided_slice %627 {offsets = [0, 0], sizes = [1, 128], strides = [1, 1]} : vector<8x128xf32> to vector<1x128xf32>
    %cst_220 = arith.constant dense<0.000000e+00> : vector<1x128xf32>
    %683 = tpu.matmul %8, %0, %cst_220 {dimension_numbers = #tpu.dot_dimension_numbers<[1], [0], [0], [1], [0, 0, 1, 1], [], []>} : vector<1x128xf32>, vector<128x128xf32>, vector<1x128xf32> -> vector<1x128xf32>
    %684 = arith.addf %682, %683 : vector<1x128xf32>
    %685 = arith.negf %684 : vector<1x128xf32>
    %686 = math.exp %685 : vector<1x128xf32>
    %cst_221 = arith.constant 1.000000e+00 : f32
    %687 = vector.broadcast %cst_221 : f32 to vector<1x128xf32>
    %688 = arith.addf %687, %686 : vector<1x128xf32>
    %689 = arith.divf %687, %688 : vector<1x128xf32>
    %690 = math.tanh %684 : vector<1x128xf32>
    %c96_i32_222 = arith.constant 96 : i32
    %691 = tpu.dynamic_rotate %689 by %c96_i32_222 dim 1 : vector<1x128xf32>, i32 -> vector<1x128xf32>
    %c64_i32_223 = arith.constant 64 : i32
    %692 = tpu.dynamic_rotate %690 by %c64_i32_223 dim 1 : vector<1x128xf32>, i32 -> vector<1x128xf32>
    %c32_i32_224 = arith.constant 32 : i32
    %693 = tpu.dynamic_rotate %689 by %c32_i32_224 dim 1 : vector<1x128xf32>, i32 -> vector<1x128xf32>
    %694 = arith.mulf %691, %8 : vector<1x128xf32>
    %695 = arith.mulf %689, %692 : vector<1x128xf32>
    %696 = arith.addf %694, %695 : vector<1x128xf32>
    %697 = math.tanh %696 : vector<1x128xf32>
    %698 = arith.mulf %693, %697 : vector<1x128xf32>
    %699 = tpu.concatenate %698, %8 in 1 : vector<1x128xf32>, vector<1x128xf32> -> vector<1x256xf32>
    %cst_225 = arith.constant dense<0.000000e+00> : vector<1x128xf32>
    %700 = tpu.matmul %699, %1, %cst_225 {dimension_numbers = #tpu.dot_dimension_numbers<[1], [0], [0], [1], [0, 0, 1, 1], [], []>} : vector<1x256xf32>, vector<256x128xf32>, vector<1x128xf32> -> vector<1x128xf32>
    %701 = arith.addf %700, %3 : vector<1x128xf32>
    %702 = arith.negf %701 : vector<1x128xf32>
    %703 = math.exp %702 : vector<1x128xf32>
    %cst_226 = arith.constant 1.000000e+00 : f32
    %704 = vector.broadcast %cst_226 : f32 to vector<1x128xf32>
    %705 = arith.addf %704, %703 : vector<1x128xf32>
    %706 = arith.divf %704, %705 : vector<1x128xf32>
    %707 = math.tanh %701 : vector<1x128xf32>
    %c96_i32_227 = arith.constant 96 : i32
    %708 = tpu.dynamic_rotate %706 by %c96_i32_227 dim 1 : vector<1x128xf32>, i32 -> vector<1x128xf32>
    %c64_i32_228 = arith.constant 64 : i32
    %709 = tpu.dynamic_rotate %707 by %c64_i32_228 dim 1 : vector<1x128xf32>, i32 -> vector<1x128xf32>
    %c32_i32_229 = arith.constant 32 : i32
    %710 = tpu.dynamic_rotate %706 by %c32_i32_229 dim 1 : vector<1x128xf32>, i32 -> vector<1x128xf32>
    %711 = arith.mulf %708, %8 : vector<1x128xf32>
    %712 = arith.mulf %706, %709 : vector<1x128xf32>
    %713 = arith.addf %711, %712 : vector<1x128xf32>
    %714 = math.tanh %713 : vector<1x128xf32>
    %715 = arith.mulf %710, %714 : vector<1x128xf32>
    %716 = vector.extract_strided_slice %627 {offsets = [1, 0], sizes = [1, 128], strides = [1, 1]} : vector<8x128xf32> to vector<1x128xf32>
    %cst_230 = arith.constant dense<0.000000e+00> : vector<1x128xf32>
    %717 = tpu.matmul %698, %0, %cst_230 {dimension_numbers = #tpu.dot_dimension_numbers<[1], [0], [0], [1], [0, 0, 1, 1], [], []>} : vector<1x128xf32>, vector<128x128xf32>, vector<1x128xf32> -> vector<1x128xf32>
    %718 = arith.addf %716, %717 : vector<1x128xf32>
    %719 = arith.negf %718 : vector<1x128xf32>
    %720 = math.exp %719 : vector<1x128xf32>
    %cst_231 = arith.constant 1.000000e+00 : f32
    %721 = vector.broadcast %cst_231 : f32 to vector<1x128xf32>
    %722 = arith.addf %721, %720 : vector<1x128xf32>
    %723 = arith.divf %721, %722 : vector<1x128xf32>
    %724 = math.tanh %718 : vector<1x128xf32>
    %c96_i32_232 = arith.constant 96 : i32
    %725 = tpu.dynamic_rotate %723 by %c96_i32_232 dim 1 : vector<1x128xf32>, i32 -> vector<1x128xf32>
    %c64_i32_233 = arith.constant 64 : i32
    %726 = tpu.dynamic_rotate %724 by %c64_i32_233 dim 1 : vector<1x128xf32>, i32 -> vector<1x128xf32>
    %c32_i32_234 = arith.constant 32 : i32
    %727 = tpu.dynamic_rotate %723 by %c32_i32_234 dim 1 : vector<1x128xf32>, i32 -> vector<1x128xf32>
    %728 = arith.mulf %725, %696 : vector<1x128xf32>
    %729 = arith.mulf %723, %726 : vector<1x128xf32>
    %730 = arith.addf %728, %729 : vector<1x128xf32>
    %731 = math.tanh %730 : vector<1x128xf32>
    %732 = arith.mulf %727, %731 : vector<1x128xf32>
    %733 = tpu.concatenate %732, %715 in 1 : vector<1x128xf32>, vector<1x128xf32> -> vector<1x256xf32>
    %cst_235 = arith.constant dense<0.000000e+00> : vector<1x128xf32>
    %734 = tpu.matmul %733, %1, %cst_235 {dimension_numbers = #tpu.dot_dimension_numbers<[1], [0], [0], [1], [0, 0, 1, 1], [], []>} : vector<1x256xf32>, vector<256x128xf32>, vector<1x128xf32> -> vector<1x128xf32>
    %735 = arith.addf %734, %3 : vector<1x128xf32>
    %736 = arith.negf %735 : vector<1x128xf32>
    %737 = math.exp %736 : vector<1x128xf32>
    %cst_236 = arith.constant 1.000000e+00 : f32
    %738 = vector.broadcast %cst_236 : f32 to vector<1x128xf32>
    %739 = arith.addf %738, %737 : vector<1x128xf32>
    %740 = arith.divf %738, %739 : vector<1x128xf32>
    %741 = math.tanh %735 : vector<1x128xf32>
    %c96_i32_237 = arith.constant 96 : i32
    %742 = tpu.dynamic_rotate %740 by %c96_i32_237 dim 1 : vector<1x128xf32>, i32 -> vector<1x128xf32>
    %c64_i32_238 = arith.constant 64 : i32
    %743 = tpu.dynamic_rotate %741 by %c64_i32_238 dim 1 : vector<1x128xf32>, i32 -> vector<1x128xf32>
    %c32_i32_239 = arith.constant 32 : i32
    %744 = tpu.dynamic_rotate %740 by %c32_i32_239 dim 1 : vector<1x128xf32>, i32 -> vector<1x128xf32>
    %745 = arith.mulf %742, %713 : vector<1x128xf32>
    %746 = arith.mulf %740, %743 : vector<1x128xf32>
    %747 = arith.addf %745, %746 : vector<1x128xf32>
    %748 = math.tanh %747 : vector<1x128xf32>
    %749 = arith.mulf %744, %748 : vector<1x128xf32>
    %750 = vector.extract_strided_slice %627 {offsets = [2, 0], sizes = [1, 128], strides = [1, 1]} : vector<8x128xf32> to vector<1x128xf32>
    %cst_240 = arith.constant dense<0.000000e+00> : vector<1x128xf32>
    %751 = tpu.matmul %732, %0, %cst_240 {dimension_numbers = #tpu.dot_dimension_numbers<[1], [0], [0], [1], [0, 0, 1, 1], [], []>} : vector<1x128xf32>, vector<128x128xf32>, vector<1x128xf32> -> vector<1x128xf32>
    %752 = arith.addf %750, %751 : vector<1x128xf32>
    %753 = arith.negf %752 : vector<1x128xf32>
    %754 = math.exp %753 : vector<1x128xf32>
    %cst_241 = arith.constant 1.000000e+00 : f32
    %755 = vector.broadcast %cst_241 : f32 to vector<1x128xf32>
    %756 = arith.addf %755, %754 : vector<1x128xf32>
    %757 = arith.divf %755, %756 : vector<1x128xf32>
    %758 = math.tanh %752 : vector<1x128xf32>
    %c96_i32_242 = arith.constant 96 : i32
    %759 = tpu.dynamic_rotate %757 by %c96_i32_242 dim 1 : vector<1x128xf32>, i32 -> vector<1x128xf32>
    %c64_i32_243 = arith.constant 64 : i32
    %760 = tpu.dynamic_rotate %758 by %c64_i32_243 dim 1 : vector<1x128xf32>, i32 -> vector<1x128xf32>
    %c32_i32_244 = arith.constant 32 : i32
    %761 = tpu.dynamic_rotate %757 by %c32_i32_244 dim 1 : vector<1x128xf32>, i32 -> vector<1x128xf32>
    %762 = arith.mulf %759, %730 : vector<1x128xf32>
    %763 = arith.mulf %757, %760 : vector<1x128xf32>
    %764 = arith.addf %762, %763 : vector<1x128xf32>
    %765 = math.tanh %764 : vector<1x128xf32>
    %766 = arith.mulf %761, %765 : vector<1x128xf32>
    %767 = tpu.concatenate %766, %749 in 1 : vector<1x128xf32>, vector<1x128xf32> -> vector<1x256xf32>
    %cst_245 = arith.constant dense<0.000000e+00> : vector<1x128xf32>
    %768 = tpu.matmul %767, %1, %cst_245 {dimension_numbers = #tpu.dot_dimension_numbers<[1], [0], [0], [1], [0, 0, 1, 1], [], []>} : vector<1x256xf32>, vector<256x128xf32>, vector<1x128xf32> -> vector<1x128xf32>
    %769 = arith.addf %768, %3 : vector<1x128xf32>
    %770 = arith.negf %769 : vector<1x128xf32>
    %771 = math.exp %770 : vector<1x128xf32>
    %cst_246 = arith.constant 1.000000e+00 : f32
    %772 = vector.broadcast %cst_246 : f32 to vector<1x128xf32>
    %773 = arith.addf %772, %771 : vector<1x128xf32>
    %774 = arith.divf %772, %773 : vector<1x128xf32>
    %775 = math.tanh %769 : vector<1x128xf32>
    %c96_i32_247 = arith.constant 96 : i32
    %776 = tpu.dynamic_rotate %774 by %c96_i32_247 dim 1 : vector<1x128xf32>, i32 -> vector<1x128xf32>
    %c64_i32_248 = arith.constant 64 : i32
    %777 = tpu.dynamic_rotate %775 by %c64_i32_248 dim 1 : vector<1x128xf32>, i32 -> vector<1x128xf32>
    %c32_i32_249 = arith.constant 32 : i32
    %778 = tpu.dynamic_rotate %774 by %c32_i32_249 dim 1 : vector<1x128xf32>, i32 -> vector<1x128xf32>
    %779 = arith.mulf %776, %747 : vector<1x128xf32>
    %780 = arith.mulf %774, %777 : vector<1x128xf32>
    %781 = arith.addf %779, %780 : vector<1x128xf32>
    %782 = math.tanh %781 : vector<1x128xf32>
    %783 = arith.mulf %778, %782 : vector<1x128xf32>
    %784 = vector.extract_strided_slice %627 {offsets = [3, 0], sizes = [1, 128], strides = [1, 1]} : vector<8x128xf32> to vector<1x128xf32>
    %cst_250 = arith.constant dense<0.000000e+00> : vector<1x128xf32>
    %785 = tpu.matmul %766, %0, %cst_250 {dimension_numbers = #tpu.dot_dimension_numbers<[1], [0], [0], [1], [0, 0, 1, 1], [], []>} : vector<1x128xf32>, vector<128x128xf32>, vector<1x128xf32> -> vector<1x128xf32>
    %786 = arith.addf %784, %785 : vector<1x128xf32>
    %787 = arith.negf %786 : vector<1x128xf32>
    %788 = math.exp %787 : vector<1x128xf32>
    %cst_251 = arith.constant 1.000000e+00 : f32
    %789 = vector.broadcast %cst_251 : f32 to vector<1x128xf32>
    %790 = arith.addf %789, %788 : vector<1x128xf32>
    %791 = arith.divf %789, %790 : vector<1x128xf32>
    %792 = math.tanh %786 : vector<1x128xf32>
    %c96_i32_252 = arith.constant 96 : i32
    %793 = tpu.dynamic_rotate %791 by %c96_i32_252 dim 1 : vector<1x128xf32>, i32 -> vector<1x128xf32>
    %c64_i32_253 = arith.constant 64 : i32
    %794 = tpu.dynamic_rotate %792 by %c64_i32_253 dim 1 : vector<1x128xf32>, i32 -> vector<1x128xf32>
    %c32_i32_254 = arith.constant 32 : i32
    %795 = tpu.dynamic_rotate %791 by %c32_i32_254 dim 1 : vector<1x128xf32>, i32 -> vector<1x128xf32>
    %796 = arith.mulf %793, %764 : vector<1x128xf32>
    %797 = arith.mulf %791, %794 : vector<1x128xf32>
    %798 = arith.addf %796, %797 : vector<1x128xf32>
    %799 = math.tanh %798 : vector<1x128xf32>
    %800 = arith.mulf %795, %799 : vector<1x128xf32>
    %801 = tpu.concatenate %800, %783 in 1 : vector<1x128xf32>, vector<1x128xf32> -> vector<1x256xf32>
    %cst_255 = arith.constant dense<0.000000e+00> : vector<1x128xf32>
    %802 = tpu.matmul %801, %1, %cst_255 {dimension_numbers = #tpu.dot_dimension_numbers<[1], [0], [0], [1], [0, 0, 1, 1], [], []>} : vector<1x256xf32>, vector<256x128xf32>, vector<1x128xf32> -> vector<1x128xf32>
    %803 = arith.addf %802, %3 : vector<1x128xf32>
    %804 = arith.negf %803 : vector<1x128xf32>
    %805 = math.exp %804 : vector<1x128xf32>
    %cst_256 = arith.constant 1.000000e+00 : f32
    %806 = vector.broadcast %cst_256 : f32 to vector<1x128xf32>
    %807 = arith.addf %806, %805 : vector<1x128xf32>
    %808 = arith.divf %806, %807 : vector<1x128xf32>
    %809 = math.tanh %803 : vector<1x128xf32>
    %c96_i32_257 = arith.constant 96 : i32
    %810 = tpu.dynamic_rotate %808 by %c96_i32_257 dim 1 : vector<1x128xf32>, i32 -> vector<1x128xf32>
    %c64_i32_258 = arith.constant 64 : i32
    %811 = tpu.dynamic_rotate %809 by %c64_i32_258 dim 1 : vector<1x128xf32>, i32 -> vector<1x128xf32>
    %c32_i32_259 = arith.constant 32 : i32
    %812 = tpu.dynamic_rotate %808 by %c32_i32_259 dim 1 : vector<1x128xf32>, i32 -> vector<1x128xf32>
    %813 = arith.mulf %810, %781 : vector<1x128xf32>
    %814 = arith.mulf %808, %811 : vector<1x128xf32>
    %815 = arith.addf %813, %814 : vector<1x128xf32>
    %816 = math.tanh %815 : vector<1x128xf32>
    %817 = arith.mulf %812, %816 : vector<1x128xf32>
    %818 = vector.extract_strided_slice %627 {offsets = [4, 0], sizes = [1, 128], strides = [1, 1]} : vector<8x128xf32> to vector<1x128xf32>
    %cst_260 = arith.constant dense<0.000000e+00> : vector<1x128xf32>
    %819 = tpu.matmul %800, %0, %cst_260 {dimension_numbers = #tpu.dot_dimension_numbers<[1], [0], [0], [1], [0, 0, 1, 1], [], []>} : vector<1x128xf32>, vector<128x128xf32>, vector<1x128xf32> -> vector<1x128xf32>
    %820 = arith.addf %818, %819 : vector<1x128xf32>
    %821 = arith.negf %820 : vector<1x128xf32>
    %822 = math.exp %821 : vector<1x128xf32>
    %cst_261 = arith.constant 1.000000e+00 : f32
    %823 = vector.broadcast %cst_261 : f32 to vector<1x128xf32>
    %824 = arith.addf %823, %822 : vector<1x128xf32>
    %825 = arith.divf %823, %824 : vector<1x128xf32>
    %826 = math.tanh %820 : vector<1x128xf32>
    %c96_i32_262 = arith.constant 96 : i32
    %827 = tpu.dynamic_rotate %825 by %c96_i32_262 dim 1 : vector<1x128xf32>, i32 -> vector<1x128xf32>
    %c64_i32_263 = arith.constant 64 : i32
    %828 = tpu.dynamic_rotate %826 by %c64_i32_263 dim 1 : vector<1x128xf32>, i32 -> vector<1x128xf32>
    %c32_i32_264 = arith.constant 32 : i32
    %829 = tpu.dynamic_rotate %825 by %c32_i32_264 dim 1 : vector<1x128xf32>, i32 -> vector<1x128xf32>
    %830 = arith.mulf %827, %798 : vector<1x128xf32>
    %831 = arith.mulf %825, %828 : vector<1x128xf32>
    %832 = arith.addf %830, %831 : vector<1x128xf32>
    %833 = math.tanh %832 : vector<1x128xf32>
    %834 = arith.mulf %829, %833 : vector<1x128xf32>
    %835 = tpu.concatenate %834, %817 in 1 : vector<1x128xf32>, vector<1x128xf32> -> vector<1x256xf32>
    %cst_265 = arith.constant dense<0.000000e+00> : vector<1x128xf32>
    %836 = tpu.matmul %835, %1, %cst_265 {dimension_numbers = #tpu.dot_dimension_numbers<[1], [0], [0], [1], [0, 0, 1, 1], [], []>} : vector<1x256xf32>, vector<256x128xf32>, vector<1x128xf32> -> vector<1x128xf32>
    %837 = arith.addf %836, %3 : vector<1x128xf32>
    %838 = arith.negf %837 : vector<1x128xf32>
    %839 = math.exp %838 : vector<1x128xf32>
    %cst_266 = arith.constant 1.000000e+00 : f32
    %840 = vector.broadcast %cst_266 : f32 to vector<1x128xf32>
    %841 = arith.addf %840, %839 : vector<1x128xf32>
    %842 = arith.divf %840, %841 : vector<1x128xf32>
    %843 = math.tanh %837 : vector<1x128xf32>
    %c96_i32_267 = arith.constant 96 : i32
    %844 = tpu.dynamic_rotate %842 by %c96_i32_267 dim 1 : vector<1x128xf32>, i32 -> vector<1x128xf32>
    %c64_i32_268 = arith.constant 64 : i32
    %845 = tpu.dynamic_rotate %843 by %c64_i32_268 dim 1 : vector<1x128xf32>, i32 -> vector<1x128xf32>
    %c32_i32_269 = arith.constant 32 : i32
    %846 = tpu.dynamic_rotate %842 by %c32_i32_269 dim 1 : vector<1x128xf32>, i32 -> vector<1x128xf32>
    %847 = arith.mulf %844, %815 : vector<1x128xf32>
    %848 = arith.mulf %842, %845 : vector<1x128xf32>
    %849 = arith.addf %847, %848 : vector<1x128xf32>
    %850 = math.tanh %849 : vector<1x128xf32>
    %851 = arith.mulf %846, %850 : vector<1x128xf32>
    %852 = vector.extract_strided_slice %627 {offsets = [5, 0], sizes = [1, 128], strides = [1, 1]} : vector<8x128xf32> to vector<1x128xf32>
    %cst_270 = arith.constant dense<0.000000e+00> : vector<1x128xf32>
    %853 = tpu.matmul %834, %0, %cst_270 {dimension_numbers = #tpu.dot_dimension_numbers<[1], [0], [0], [1], [0, 0, 1, 1], [], []>} : vector<1x128xf32>, vector<128x128xf32>, vector<1x128xf32> -> vector<1x128xf32>
    %854 = arith.addf %852, %853 : vector<1x128xf32>
    %855 = arith.negf %854 : vector<1x128xf32>
    %856 = math.exp %855 : vector<1x128xf32>
    %cst_271 = arith.constant 1.000000e+00 : f32
    %857 = vector.broadcast %cst_271 : f32 to vector<1x128xf32>
    %858 = arith.addf %857, %856 : vector<1x128xf32>
    %859 = arith.divf %857, %858 : vector<1x128xf32>
    %860 = math.tanh %854 : vector<1x128xf32>
    %c96_i32_272 = arith.constant 96 : i32
    %861 = tpu.dynamic_rotate %859 by %c96_i32_272 dim 1 : vector<1x128xf32>, i32 -> vector<1x128xf32>
    %c64_i32_273 = arith.constant 64 : i32
    %862 = tpu.dynamic_rotate %860 by %c64_i32_273 dim 1 : vector<1x128xf32>, i32 -> vector<1x128xf32>
    %c32_i32_274 = arith.constant 32 : i32
    %863 = tpu.dynamic_rotate %859 by %c32_i32_274 dim 1 : vector<1x128xf32>, i32 -> vector<1x128xf32>
    %864 = arith.mulf %861, %832 : vector<1x128xf32>
    %865 = arith.mulf %859, %862 : vector<1x128xf32>
    %866 = arith.addf %864, %865 : vector<1x128xf32>
    %867 = math.tanh %866 : vector<1x128xf32>
    %868 = arith.mulf %863, %867 : vector<1x128xf32>
    %869 = tpu.concatenate %868, %851 in 1 : vector<1x128xf32>, vector<1x128xf32> -> vector<1x256xf32>
    %cst_275 = arith.constant dense<0.000000e+00> : vector<1x128xf32>
    %870 = tpu.matmul %869, %1, %cst_275 {dimension_numbers = #tpu.dot_dimension_numbers<[1], [0], [0], [1], [0, 0, 1, 1], [], []>} : vector<1x256xf32>, vector<256x128xf32>, vector<1x128xf32> -> vector<1x128xf32>
    %871 = arith.addf %870, %3 : vector<1x128xf32>
    %872 = arith.negf %871 : vector<1x128xf32>
    %873 = math.exp %872 : vector<1x128xf32>
    %cst_276 = arith.constant 1.000000e+00 : f32
    %874 = vector.broadcast %cst_276 : f32 to vector<1x128xf32>
    %875 = arith.addf %874, %873 : vector<1x128xf32>
    %876 = arith.divf %874, %875 : vector<1x128xf32>
    %877 = math.tanh %871 : vector<1x128xf32>
    %c96_i32_277 = arith.constant 96 : i32
    %878 = tpu.dynamic_rotate %876 by %c96_i32_277 dim 1 : vector<1x128xf32>, i32 -> vector<1x128xf32>
    %c64_i32_278 = arith.constant 64 : i32
    %879 = tpu.dynamic_rotate %877 by %c64_i32_278 dim 1 : vector<1x128xf32>, i32 -> vector<1x128xf32>
    %c32_i32_279 = arith.constant 32 : i32
    %880 = tpu.dynamic_rotate %876 by %c32_i32_279 dim 1 : vector<1x128xf32>, i32 -> vector<1x128xf32>
    %881 = arith.mulf %878, %849 : vector<1x128xf32>
    %882 = arith.mulf %876, %879 : vector<1x128xf32>
    %883 = arith.addf %881, %882 : vector<1x128xf32>
    %884 = math.tanh %883 : vector<1x128xf32>
    %885 = arith.mulf %880, %884 : vector<1x128xf32>
    %886 = vector.extract_strided_slice %627 {offsets = [6, 0], sizes = [1, 128], strides = [1, 1]} : vector<8x128xf32> to vector<1x128xf32>
    %cst_280 = arith.constant dense<0.000000e+00> : vector<1x128xf32>
    %887 = tpu.matmul %868, %0, %cst_280 {dimension_numbers = #tpu.dot_dimension_numbers<[1], [0], [0], [1], [0, 0, 1, 1], [], []>} : vector<1x128xf32>, vector<128x128xf32>, vector<1x128xf32> -> vector<1x128xf32>
    %888 = arith.addf %886, %887 : vector<1x128xf32>
    %889 = arith.negf %888 : vector<1x128xf32>
    %890 = math.exp %889 : vector<1x128xf32>
    %cst_281 = arith.constant 1.000000e+00 : f32
    %891 = vector.broadcast %cst_281 : f32 to vector<1x128xf32>
    %892 = arith.addf %891, %890 : vector<1x128xf32>
    %893 = arith.divf %891, %892 : vector<1x128xf32>
    %894 = math.tanh %888 : vector<1x128xf32>
    %c96_i32_282 = arith.constant 96 : i32
    %895 = tpu.dynamic_rotate %893 by %c96_i32_282 dim 1 : vector<1x128xf32>, i32 -> vector<1x128xf32>
    %c64_i32_283 = arith.constant 64 : i32
    %896 = tpu.dynamic_rotate %894 by %c64_i32_283 dim 1 : vector<1x128xf32>, i32 -> vector<1x128xf32>
    %c32_i32_284 = arith.constant 32 : i32
    %897 = tpu.dynamic_rotate %893 by %c32_i32_284 dim 1 : vector<1x128xf32>, i32 -> vector<1x128xf32>
    %898 = arith.mulf %895, %866 : vector<1x128xf32>
    %899 = arith.mulf %893, %896 : vector<1x128xf32>
    %900 = arith.addf %898, %899 : vector<1x128xf32>
    %901 = math.tanh %900 : vector<1x128xf32>
    %902 = arith.mulf %897, %901 : vector<1x128xf32>
    %903 = tpu.concatenate %902, %885 in 1 : vector<1x128xf32>, vector<1x128xf32> -> vector<1x256xf32>
    %cst_285 = arith.constant dense<0.000000e+00> : vector<1x128xf32>
    %904 = tpu.matmul %903, %1, %cst_285 {dimension_numbers = #tpu.dot_dimension_numbers<[1], [0], [0], [1], [0, 0, 1, 1], [], []>} : vector<1x256xf32>, vector<256x128xf32>, vector<1x128xf32> -> vector<1x128xf32>
    %905 = arith.addf %904, %3 : vector<1x128xf32>
    %906 = arith.negf %905 : vector<1x128xf32>
    %907 = math.exp %906 : vector<1x128xf32>
    %cst_286 = arith.constant 1.000000e+00 : f32
    %908 = vector.broadcast %cst_286 : f32 to vector<1x128xf32>
    %909 = arith.addf %908, %907 : vector<1x128xf32>
    %910 = arith.divf %908, %909 : vector<1x128xf32>
    %911 = math.tanh %905 : vector<1x128xf32>
    %c96_i32_287 = arith.constant 96 : i32
    %912 = tpu.dynamic_rotate %910 by %c96_i32_287 dim 1 : vector<1x128xf32>, i32 -> vector<1x128xf32>
    %c64_i32_288 = arith.constant 64 : i32
    %913 = tpu.dynamic_rotate %911 by %c64_i32_288 dim 1 : vector<1x128xf32>, i32 -> vector<1x128xf32>
    %c32_i32_289 = arith.constant 32 : i32
    %914 = tpu.dynamic_rotate %910 by %c32_i32_289 dim 1 : vector<1x128xf32>, i32 -> vector<1x128xf32>
    %915 = arith.mulf %912, %883 : vector<1x128xf32>
    %916 = arith.mulf %910, %913 : vector<1x128xf32>
    %917 = arith.addf %915, %916 : vector<1x128xf32>
    %918 = math.tanh %917 : vector<1x128xf32>
    %919 = arith.mulf %914, %918 : vector<1x128xf32>
    %920 = vector.extract_strided_slice %627 {offsets = [7, 0], sizes = [1, 128], strides = [1, 1]} : vector<8x128xf32> to vector<1x128xf32>
    %cst_290 = arith.constant dense<0.000000e+00> : vector<1x128xf32>
    %921 = tpu.matmul %902, %0, %cst_290 {dimension_numbers = #tpu.dot_dimension_numbers<[1], [0], [0], [1], [0, 0, 1, 1], [], []>} : vector<1x128xf32>, vector<128x128xf32>, vector<1x128xf32> -> vector<1x128xf32>
    %922 = arith.addf %920, %921 : vector<1x128xf32>
    %923 = arith.negf %922 : vector<1x128xf32>
    %924 = math.exp %923 : vector<1x128xf32>
    %cst_291 = arith.constant 1.000000e+00 : f32
    %925 = vector.broadcast %cst_291 : f32 to vector<1x128xf32>
    %926 = arith.addf %925, %924 : vector<1x128xf32>
    %927 = arith.divf %925, %926 : vector<1x128xf32>
    %928 = math.tanh %922 : vector<1x128xf32>
    %c96_i32_292 = arith.constant 96 : i32
    %929 = tpu.dynamic_rotate %927 by %c96_i32_292 dim 1 : vector<1x128xf32>, i32 -> vector<1x128xf32>
    %c64_i32_293 = arith.constant 64 : i32
    %930 = tpu.dynamic_rotate %928 by %c64_i32_293 dim 1 : vector<1x128xf32>, i32 -> vector<1x128xf32>
    %c32_i32_294 = arith.constant 32 : i32
    %931 = tpu.dynamic_rotate %927 by %c32_i32_294 dim 1 : vector<1x128xf32>, i32 -> vector<1x128xf32>
    %932 = arith.mulf %929, %900 : vector<1x128xf32>
    %933 = arith.mulf %927, %930 : vector<1x128xf32>
    %934 = arith.addf %932, %933 : vector<1x128xf32>
    %935 = math.tanh %934 : vector<1x128xf32>
    %936 = arith.mulf %931, %935 : vector<1x128xf32>
    %937 = tpu.concatenate %936, %919 in 1 : vector<1x128xf32>, vector<1x128xf32> -> vector<1x256xf32>
    %cst_295 = arith.constant dense<0.000000e+00> : vector<1x128xf32>
    %938 = tpu.matmul %937, %1, %cst_295 {dimension_numbers = #tpu.dot_dimension_numbers<[1], [0], [0], [1], [0, 0, 1, 1], [], []>} : vector<1x256xf32>, vector<256x128xf32>, vector<1x128xf32> -> vector<1x128xf32>
    %939 = arith.addf %938, %3 : vector<1x128xf32>
    %940 = arith.negf %939 : vector<1x128xf32>
    %941 = math.exp %940 : vector<1x128xf32>
    %cst_296 = arith.constant 1.000000e+00 : f32
    %942 = vector.broadcast %cst_296 : f32 to vector<1x128xf32>
    %943 = arith.addf %942, %941 : vector<1x128xf32>
    %944 = arith.divf %942, %943 : vector<1x128xf32>
    %945 = math.tanh %939 : vector<1x128xf32>
    %c96_i32_297 = arith.constant 96 : i32
    %946 = tpu.dynamic_rotate %944 by %c96_i32_297 dim 1 : vector<1x128xf32>, i32 -> vector<1x128xf32>
    %c64_i32_298 = arith.constant 64 : i32
    %947 = tpu.dynamic_rotate %945 by %c64_i32_298 dim 1 : vector<1x128xf32>, i32 -> vector<1x128xf32>
    %c32_i32_299 = arith.constant 32 : i32
    %948 = tpu.dynamic_rotate %944 by %c32_i32_299 dim 1 : vector<1x128xf32>, i32 -> vector<1x128xf32>
    %949 = arith.mulf %946, %917 : vector<1x128xf32>
    %950 = arith.mulf %944, %947 : vector<1x128xf32>
    %951 = arith.addf %949, %950 : vector<1x128xf32>
    %952 = math.tanh %951 : vector<1x128xf32>
    %953 = arith.mulf %948, %952 : vector<1x128xf32>
    %954 = tpu.concatenate %715, %749, %783, %817, %851, %885, %919, %953 in 0 : vector<1x128xf32>, vector<1x128xf32>, vector<1x128xf32>, vector<1x128xf32>, vector<1x128xf32>, vector<1x128xf32>, vector<1x128xf32>, vector<1x128xf32> -> vector<8x128xf32>
    %c2 = arith.constant 2 : index
    %c0_300 = arith.constant 0 : index
    %c0_301 = arith.constant 0 : index
    %955 = vector.load %arg9[%c2, %c0_300, %c0_301] : memref<5x8x128xf32, #tpu.memory_space<vmem>>, vector<1x8x128xf32>
    %956 = vector.shape_cast %955 : vector<1x8x128xf32> to vector<8x128xf32>
    %957 = vector.shape_cast %954 : vector<8x128xf32> to vector<1x8x128xf32>
    tpu.vector_store %arg9[%c2, %c0_300, %c0_301], %957 {strides = array<i32>} : memref<5x8x128xf32, #tpu.memory_space<vmem>>, vector<1x8x128xf32>,
    %cst_302 = arith.constant dense<0.000000e+00> : vector<8x256xf32>
    %958 = tpu.matmul %954, %4, %cst_302 {dimension_numbers = #tpu.dot_dimension_numbers<[1], [0], [0], [1], [0, 0, 1, 1], [], []>} : vector<8x128xf32>, vector<128x256xf32>, vector<8x256xf32> -> vector<8x256xf32>
    %959 = vector.extract_strided_slice %958 {offsets = [0, 0], sizes = [8, 128], strides = [1, 1]} : vector<8x256xf32> to vector<8x128xf32>
    %960 = vector.broadcast %2 : vector<1x128xf32> to vector<8x128xf32>
    %961 = arith.addf %959, %960 : vector<8x128xf32>
    %962 = vector.extract_strided_slice %958 {offsets = [0, 128], sizes = [8, 128], strides = [1, 1]} : vector<8x256xf32> to vector<8x128xf32>
    %963 = vector.broadcast %5 : vector<1x128xf32> to vector<8x128xf32>
    %964 = arith.addf %962, %963 : vector<8x128xf32>
    %cst_303 = arith.constant 5.000000e-01 : f32
    %965 = vector.broadcast %cst_303 : f32 to vector<8x128xf32>
    %966 = arith.mulf %965, %964 : vector<8x128xf32>
    %cst_304 = arith.constant 0.707106769 : f32
    %967 = vector.broadcast %cst_304 : f32 to vector<8x128xf32>
    %968 = arith.mulf %964, %967 : vector<8x128xf32>
    %969 = math.absf %968 : vector<8x128xf32>
    %cst_305 = arith.constant 0.327591091 : f32
    %970 = vector.broadcast %cst_305 : f32 to vector<8x128xf32>
    %971 = arith.mulf %970, %969 : vector<8x128xf32>
    %cst_306 = arith.constant 1.000000e+00 : f32
    %972 = vector.broadcast %cst_306 : f32 to vector<8x128xf32>
    %973 = arith.addf %972, %971 : vector<8x128xf32>
    %cst_307 = arith.constant 1.000000e+00 : f32
    %974 = vector.broadcast %cst_307 : f32 to vector<8x128xf32>
    %975 = arith.divf %974, %973 : vector<8x128xf32>
    %cst_308 = arith.constant 1.06140542 : f32
    %976 = vector.broadcast %cst_308 : f32 to vector<8x128xf32>
    %977 = arith.mulf %976, %975 : vector<8x128xf32>
    %cst_309 = arith.constant -1.45315206 : f32
    %978 = vector.broadcast %cst_309 : f32 to vector<8x128xf32>
    %979 = arith.addf %977, %978 : vector<8x128xf32>
    %980 = arith.mulf %979, %975 : vector<8x128xf32>
    %cst_310 = arith.constant 1.42141378 : f32
    %981 = vector.broadcast %cst_310 : f32 to vector<8x128xf32>
    %982 = arith.addf %980, %981 : vector<8x128xf32>
    %983 = arith.mulf %982, %975 : vector<8x128xf32>
    %cst_311 = arith.constant -0.284496725 : f32
    %984 = vector.broadcast %cst_311 : f32 to vector<8x128xf32>
    %985 = arith.addf %983, %984 : vector<8x128xf32>
    %986 = arith.mulf %985, %975 : vector<8x128xf32>
    %cst_312 = arith.constant 0.254829586 : f32
    %987 = vector.broadcast %cst_312 : f32 to vector<8x128xf32>
    %988 = arith.addf %986, %987 : vector<8x128xf32>
    %989 = arith.mulf %988, %975 : vector<8x128xf32>
    %cst_313 = arith.constant 0.000000e+00 : f32
    %990 = vector.broadcast %cst_313 : f32 to vector<8x128xf32>
    %991 = arith.subf %990, %969 : vector<8x128xf32>
    %992 = arith.mulf %991, %969 : vector<8x128xf32>
    %993 = math.exp %992 : vector<8x128xf32>
    %994 = arith.mulf %989, %993 : vector<8x128xf32>
    %cst_314 = arith.constant 1.000000e+00 : f32
    %995 = vector.broadcast %cst_314 : f32 to vector<8x128xf32>
    %996 = arith.subf %995, %994 : vector<8x128xf32>
    %cst_315 = arith.constant 0.000000e+00 : f32
    %997 = vector.broadcast %cst_315 : f32 to vector<8x128xf32>
    %998 = arith.cmpf oge, %968, %997 : vector<8x128xf32>
    %cst_316 = arith.constant 0.000000e+00 : f32
    %999 = vector.broadcast %cst_316 : f32 to vector<8x128xf32>
    %1000 = arith.subf %999, %996 : vector<8x128xf32>
    %1001 = arith.select %998, %996, %1000 : vector<8x128xi1>, vector<8x128xf32>
    %cst_317 = arith.constant 1.000000e+00 : f32
    %1002 = vector.broadcast %cst_317 : f32 to vector<8x128xf32>
    %1003 = arith.addf %1002, %1001 : vector<8x128xf32>
    %1004 = arith.mulf %966, %1003 : vector<8x128xf32>
    %1005 = vector.broadcast %6 : vector<1x128xf32> to vector<8x128xf32>
    %1006 = arith.mulf %1004, %1005 : vector<8x128xf32>
    %cst_318 = arith.constant dense<0.000000e+00> : vector<8xf32>
    %1007 = vector.multi_reduction <add>, %1006, %cst_318 [1] : vector<8x128xf32> to vector<8xf32>
    %1008 = vector.shape_cast %1007 : vector<8xf32> to vector<8x1xf32>
    %1009 = vector.broadcast %7 : vector<1x1xf32> to vector<8x1xf32>
    %1010 = arith.addf %1008, %1009 : vector<8x1xf32>
    %1011 = vector.shape_cast %1010 : vector<8x1xf32> to vector<8x1xf32>
    %1012 = vector.broadcast %1011 : vector<8x1xf32> to vector<8x128xf32>
    %c2_319 = arith.constant 2 : index
    %c0_320 = arith.constant 0 : index
    %c0_321 = arith.constant 0 : index
    %1013 = vector.load %arg10[%c2_319, %c0_320, %c0_321] : memref<5x8x128xf32, #tpu.memory_space<vmem>>, vector<1x8x128xf32>
    %1014 = vector.shape_cast %1013 : vector<1x8x128xf32> to vector<8x128xf32>
    %1015 = vector.shape_cast %1012 : vector<8x128xf32> to vector<1x8x128xf32>
    tpu.vector_store %arg10[%c2_319, %c0_320, %c0_321], %1015 {strides = array<i32>} : memref<5x8x128xf32, #tpu.memory_space<vmem>>, vector<1x8x128xf32>,
    %1016 = vector.extract_strided_slice %961 {offsets = [0, 0], sizes = [1, 128], strides = [1, 1]} : vector<8x128xf32> to vector<1x128xf32>
    %cst_322 = arith.constant dense<0.000000e+00> : vector<1x128xf32>
    %1017 = tpu.matmul %8, %0, %cst_322 {dimension_numbers = #tpu.dot_dimension_numbers<[1], [0], [0], [1], [0, 0, 1, 1], [], []>} : vector<1x128xf32>, vector<128x128xf32>, vector<1x128xf32> -> vector<1x128xf32>
    %1018 = arith.addf %1016, %1017 : vector<1x128xf32>
    %1019 = arith.negf %1018 : vector<1x128xf32>
    %1020 = math.exp %1019 : vector<1x128xf32>
    %cst_323 = arith.constant 1.000000e+00 : f32
    %1021 = vector.broadcast %cst_323 : f32 to vector<1x128xf32>
    %1022 = arith.addf %1021, %1020 : vector<1x128xf32>
    %1023 = arith.divf %1021, %1022 : vector<1x128xf32>
    %1024 = math.tanh %1018 : vector<1x128xf32>
    %c96_i32_324 = arith.constant 96 : i32
    %1025 = tpu.dynamic_rotate %1023 by %c96_i32_324 dim 1 : vector<1x128xf32>, i32 -> vector<1x128xf32>
    %c64_i32_325 = arith.constant 64 : i32
    %1026 = tpu.dynamic_rotate %1024 by %c64_i32_325 dim 1 : vector<1x128xf32>, i32 -> vector<1x128xf32>
    %c32_i32_326 = arith.constant 32 : i32
    %1027 = tpu.dynamic_rotate %1023 by %c32_i32_326 dim 1 : vector<1x128xf32>, i32 -> vector<1x128xf32>
    %1028 = arith.mulf %1025, %8 : vector<1x128xf32>
    %1029 = arith.mulf %1023, %1026 : vector<1x128xf32>
    %1030 = arith.addf %1028, %1029 : vector<1x128xf32>
    %1031 = math.tanh %1030 : vector<1x128xf32>
    %1032 = arith.mulf %1027, %1031 : vector<1x128xf32>
    %1033 = tpu.concatenate %1032, %8 in 1 : vector<1x128xf32>, vector<1x128xf32> -> vector<1x256xf32>
    %cst_327 = arith.constant dense<0.000000e+00> : vector<1x128xf32>
    %1034 = tpu.matmul %1033, %1, %cst_327 {dimension_numbers = #tpu.dot_dimension_numbers<[1], [0], [0], [1], [0, 0, 1, 1], [], []>} : vector<1x256xf32>, vector<256x128xf32>, vector<1x128xf32> -> vector<1x128xf32>
    %1035 = arith.addf %1034, %3 : vector<1x128xf32>
    %1036 = arith.negf %1035 : vector<1x128xf32>
    %1037 = math.exp %1036 : vector<1x128xf32>
    %cst_328 = arith.constant 1.000000e+00 : f32
    %1038 = vector.broadcast %cst_328 : f32 to vector<1x128xf32>
    %1039 = arith.addf %1038, %1037 : vector<1x128xf32>
    %1040 = arith.divf %1038, %1039 : vector<1x128xf32>
    %1041 = math.tanh %1035 : vector<1x128xf32>
    %c96_i32_329 = arith.constant 96 : i32
    %1042 = tpu.dynamic_rotate %1040 by %c96_i32_329 dim 1 : vector<1x128xf32>, i32 -> vector<1x128xf32>
    %c64_i32_330 = arith.constant 64 : i32
    %1043 = tpu.dynamic_rotate %1041 by %c64_i32_330 dim 1 : vector<1x128xf32>, i32 -> vector<1x128xf32>
    %c32_i32_331 = arith.constant 32 : i32
    %1044 = tpu.dynamic_rotate %1040 by %c32_i32_331 dim 1 : vector<1x128xf32>, i32 -> vector<1x128xf32>
    %1045 = arith.mulf %1042, %8 : vector<1x128xf32>
    %1046 = arith.mulf %1040, %1043 : vector<1x128xf32>
    %1047 = arith.addf %1045, %1046 : vector<1x128xf32>
    %1048 = math.tanh %1047 : vector<1x128xf32>
    %1049 = arith.mulf %1044, %1048 : vector<1x128xf32>
    %1050 = vector.extract_strided_slice %961 {offsets = [1, 0], sizes = [1, 128], strides = [1, 1]} : vector<8x128xf32> to vector<1x128xf32>
    %cst_332 = arith.constant dense<0.000000e+00> : vector<1x128xf32>
    %1051 = tpu.matmul %1032, %0, %cst_332 {dimension_numbers = #tpu.dot_dimension_numbers<[1], [0], [0], [1], [0, 0, 1, 1], [], []>} : vector<1x128xf32>, vector<128x128xf32>, vector<1x128xf32> -> vector<1x128xf32>
    %1052 = arith.addf %1050, %1051 : vector<1x128xf32>
    %1053 = arith.negf %1052 : vector<1x128xf32>
    %1054 = math.exp %1053 : vector<1x128xf32>
    %cst_333 = arith.constant 1.000000e+00 : f32
    %1055 = vector.broadcast %cst_333 : f32 to vector<1x128xf32>
    %1056 = arith.addf %1055, %1054 : vector<1x128xf32>
    %1057 = arith.divf %1055, %1056 : vector<1x128xf32>
    %1058 = math.tanh %1052 : vector<1x128xf32>
    %c96_i32_334 = arith.constant 96 : i32
    %1059 = tpu.dynamic_rotate %1057 by %c96_i32_334 dim 1 : vector<1x128xf32>, i32 -> vector<1x128xf32>
    %c64_i32_335 = arith.constant 64 : i32
    %1060 = tpu.dynamic_rotate %1058 by %c64_i32_335 dim 1 : vector<1x128xf32>, i32 -> vector<1x128xf32>
    %c32_i32_336 = arith.constant 32 : i32
    %1061 = tpu.dynamic_rotate %1057 by %c32_i32_336 dim 1 : vector<1x128xf32>, i32 -> vector<1x128xf32>
    %1062 = arith.mulf %1059, %1030 : vector<1x128xf32>
    %1063 = arith.mulf %1057, %1060 : vector<1x128xf32>
    %1064 = arith.addf %1062, %1063 : vector<1x128xf32>
    %1065 = math.tanh %1064 : vector<1x128xf32>
    %1066 = arith.mulf %1061, %1065 : vector<1x128xf32>
    %1067 = tpu.concatenate %1066, %1049 in 1 : vector<1x128xf32>, vector<1x128xf32> -> vector<1x256xf32>
    %cst_337 = arith.constant dense<0.000000e+00> : vector<1x128xf32>
    %1068 = tpu.matmul %1067, %1, %cst_337 {dimension_numbers = #tpu.dot_dimension_numbers<[1], [0], [0], [1], [0, 0, 1, 1], [], []>} : vector<1x256xf32>, vector<256x128xf32>, vector<1x128xf32> -> vector<1x128xf32>
    %1069 = arith.addf %1068, %3 : vector<1x128xf32>
    %1070 = arith.negf %1069 : vector<1x128xf32>
    %1071 = math.exp %1070 : vector<1x128xf32>
    %cst_338 = arith.constant 1.000000e+00 : f32
    %1072 = vector.broadcast %cst_338 : f32 to vector<1x128xf32>
    %1073 = arith.addf %1072, %1071 : vector<1x128xf32>
    %1074 = arith.divf %1072, %1073 : vector<1x128xf32>
    %1075 = math.tanh %1069 : vector<1x128xf32>
    %c96_i32_339 = arith.constant 96 : i32
    %1076 = tpu.dynamic_rotate %1074 by %c96_i32_339 dim 1 : vector<1x128xf32>, i32 -> vector<1x128xf32>
    %c64_i32_340 = arith.constant 64 : i32
    %1077 = tpu.dynamic_rotate %1075 by %c64_i32_340 dim 1 : vector<1x128xf32>, i32 -> vector<1x128xf32>
    %c32_i32_341 = arith.constant 32 : i32
    %1078 = tpu.dynamic_rotate %1074 by %c32_i32_341 dim 1 : vector<1x128xf32>, i32 -> vector<1x128xf32>
    %1079 = arith.mulf %1076, %1047 : vector<1x128xf32>
    %1080 = arith.mulf %1074, %1077 : vector<1x128xf32>
    %1081 = arith.addf %1079, %1080 : vector<1x128xf32>
    %1082 = math.tanh %1081 : vector<1x128xf32>
    %1083 = arith.mulf %1078, %1082 : vector<1x128xf32>
    %1084 = vector.extract_strided_slice %961 {offsets = [2, 0], sizes = [1, 128], strides = [1, 1]} : vector<8x128xf32> to vector<1x128xf32>
    %cst_342 = arith.constant dense<0.000000e+00> : vector<1x128xf32>
    %1085 = tpu.matmul %1066, %0, %cst_342 {dimension_numbers = #tpu.dot_dimension_numbers<[1], [0], [0], [1], [0, 0, 1, 1], [], []>} : vector<1x128xf32>, vector<128x128xf32>, vector<1x128xf32> -> vector<1x128xf32>
    %1086 = arith.addf %1084, %1085 : vector<1x128xf32>
    %1087 = arith.negf %1086 : vector<1x128xf32>
    %1088 = math.exp %1087 : vector<1x128xf32>
    %cst_343 = arith.constant 1.000000e+00 : f32
    %1089 = vector.broadcast %cst_343 : f32 to vector<1x128xf32>
    %1090 = arith.addf %1089, %1088 : vector<1x128xf32>
    %1091 = arith.divf %1089, %1090 : vector<1x128xf32>
    %1092 = math.tanh %1086 : vector<1x128xf32>
    %c96_i32_344 = arith.constant 96 : i32
    %1093 = tpu.dynamic_rotate %1091 by %c96_i32_344 dim 1 : vector<1x128xf32>, i32 -> vector<1x128xf32>
    %c64_i32_345 = arith.constant 64 : i32
    %1094 = tpu.dynamic_rotate %1092 by %c64_i32_345 dim 1 : vector<1x128xf32>, i32 -> vector<1x128xf32>
    %c32_i32_346 = arith.constant 32 : i32
    %1095 = tpu.dynamic_rotate %1091 by %c32_i32_346 dim 1 : vector<1x128xf32>, i32 -> vector<1x128xf32>
    %1096 = arith.mulf %1093, %1064 : vector<1x128xf32>
    %1097 = arith.mulf %1091, %1094 : vector<1x128xf32>
    %1098 = arith.addf %1096, %1097 : vector<1x128xf32>
    %1099 = math.tanh %1098 : vector<1x128xf32>
    %1100 = arith.mulf %1095, %1099 : vector<1x128xf32>
    %1101 = tpu.concatenate %1100, %1083 in 1 : vector<1x128xf32>, vector<1x128xf32> -> vector<1x256xf32>
    %cst_347 = arith.constant dense<0.000000e+00> : vector<1x128xf32>
    %1102 = tpu.matmul %1101, %1, %cst_347 {dimension_numbers = #tpu.dot_dimension_numbers<[1], [0], [0], [1], [0, 0, 1, 1], [], []>} : vector<1x256xf32>, vector<256x128xf32>, vector<1x128xf32> -> vector<1x128xf32>
    %1103 = arith.addf %1102, %3 : vector<1x128xf32>
    %1104 = arith.negf %1103 : vector<1x128xf32>
    %1105 = math.exp %1104 : vector<1x128xf32>
    %cst_348 = arith.constant 1.000000e+00 : f32
    %1106 = vector.broadcast %cst_348 : f32 to vector<1x128xf32>
    %1107 = arith.addf %1106, %1105 : vector<1x128xf32>
    %1108 = arith.divf %1106, %1107 : vector<1x128xf32>
    %1109 = math.tanh %1103 : vector<1x128xf32>
    %c96_i32_349 = arith.constant 96 : i32
    %1110 = tpu.dynamic_rotate %1108 by %c96_i32_349 dim 1 : vector<1x128xf32>, i32 -> vector<1x128xf32>
    %c64_i32_350 = arith.constant 64 : i32
    %1111 = tpu.dynamic_rotate %1109 by %c64_i32_350 dim 1 : vector<1x128xf32>, i32 -> vector<1x128xf32>
    %c32_i32_351 = arith.constant 32 : i32
    %1112 = tpu.dynamic_rotate %1108 by %c32_i32_351 dim 1 : vector<1x128xf32>, i32 -> vector<1x128xf32>
    %1113 = arith.mulf %1110, %1081 : vector<1x128xf32>
    %1114 = arith.mulf %1108, %1111 : vector<1x128xf32>
    %1115 = arith.addf %1113, %1114 : vector<1x128xf32>
    %1116 = math.tanh %1115 : vector<1x128xf32>
    %1117 = arith.mulf %1112, %1116 : vector<1x128xf32>
    %1118 = vector.extract_strided_slice %961 {offsets = [3, 0], sizes = [1, 128], strides = [1, 1]} : vector<8x128xf32> to vector<1x128xf32>
    %cst_352 = arith.constant dense<0.000000e+00> : vector<1x128xf32>
    %1119 = tpu.matmul %1100, %0, %cst_352 {dimension_numbers = #tpu.dot_dimension_numbers<[1], [0], [0], [1], [0, 0, 1, 1], [], []>} : vector<1x128xf32>, vector<128x128xf32>, vector<1x128xf32> -> vector<1x128xf32>
    %1120 = arith.addf %1118, %1119 : vector<1x128xf32>
    %1121 = arith.negf %1120 : vector<1x128xf32>
    %1122 = math.exp %1121 : vector<1x128xf32>
    %cst_353 = arith.constant 1.000000e+00 : f32
    %1123 = vector.broadcast %cst_353 : f32 to vector<1x128xf32>
    %1124 = arith.addf %1123, %1122 : vector<1x128xf32>
    %1125 = arith.divf %1123, %1124 : vector<1x128xf32>
    %1126 = math.tanh %1120 : vector<1x128xf32>
    %c96_i32_354 = arith.constant 96 : i32
    %1127 = tpu.dynamic_rotate %1125 by %c96_i32_354 dim 1 : vector<1x128xf32>, i32 -> vector<1x128xf32>
    %c64_i32_355 = arith.constant 64 : i32
    %1128 = tpu.dynamic_rotate %1126 by %c64_i32_355 dim 1 : vector<1x128xf32>, i32 -> vector<1x128xf32>
    %c32_i32_356 = arith.constant 32 : i32
    %1129 = tpu.dynamic_rotate %1125 by %c32_i32_356 dim 1 : vector<1x128xf32>, i32 -> vector<1x128xf32>
    %1130 = arith.mulf %1127, %1098 : vector<1x128xf32>
    %1131 = arith.mulf %1125, %1128 : vector<1x128xf32>
    %1132 = arith.addf %1130, %1131 : vector<1x128xf32>
    %1133 = math.tanh %1132 : vector<1x128xf32>
    %1134 = arith.mulf %1129, %1133 : vector<1x128xf32>
    %1135 = tpu.concatenate %1134, %1117 in 1 : vector<1x128xf32>, vector<1x128xf32> -> vector<1x256xf32>
    %cst_357 = arith.constant dense<0.000000e+00> : vector<1x128xf32>
    %1136 = tpu.matmul %1135, %1, %cst_357 {dimension_numbers = #tpu.dot_dimension_numbers<[1], [0], [0], [1], [0, 0, 1, 1], [], []>} : vector<1x256xf32>, vector<256x128xf32>, vector<1x128xf32> -> vector<1x128xf32>
    %1137 = arith.addf %1136, %3 : vector<1x128xf32>
    %1138 = arith.negf %1137 : vector<1x128xf32>
    %1139 = math.exp %1138 : vector<1x128xf32>
    %cst_358 = arith.constant 1.000000e+00 : f32
    %1140 = vector.broadcast %cst_358 : f32 to vector<1x128xf32>
    %1141 = arith.addf %1140, %1139 : vector<1x128xf32>
    %1142 = arith.divf %1140, %1141 : vector<1x128xf32>
    %1143 = math.tanh %1137 : vector<1x128xf32>
    %c96_i32_359 = arith.constant 96 : i32
    %1144 = tpu.dynamic_rotate %1142 by %c96_i32_359 dim 1 : vector<1x128xf32>, i32 -> vector<1x128xf32>
    %c64_i32_360 = arith.constant 64 : i32
    %1145 = tpu.dynamic_rotate %1143 by %c64_i32_360 dim 1 : vector<1x128xf32>, i32 -> vector<1x128xf32>
    %c32_i32_361 = arith.constant 32 : i32
    %1146 = tpu.dynamic_rotate %1142 by %c32_i32_361 dim 1 : vector<1x128xf32>, i32 -> vector<1x128xf32>
    %1147 = arith.mulf %1144, %1115 : vector<1x128xf32>
    %1148 = arith.mulf %1142, %1145 : vector<1x128xf32>
    %1149 = arith.addf %1147, %1148 : vector<1x128xf32>
    %1150 = math.tanh %1149 : vector<1x128xf32>
    %1151 = arith.mulf %1146, %1150 : vector<1x128xf32>
    %1152 = vector.extract_strided_slice %961 {offsets = [4, 0], sizes = [1, 128], strides = [1, 1]} : vector<8x128xf32> to vector<1x128xf32>
    %cst_362 = arith.constant dense<0.000000e+00> : vector<1x128xf32>
    %1153 = tpu.matmul %1134, %0, %cst_362 {dimension_numbers = #tpu.dot_dimension_numbers<[1], [0], [0], [1], [0, 0, 1, 1], [], []>} : vector<1x128xf32>, vector<128x128xf32>, vector<1x128xf32> -> vector<1x128xf32>
    %1154 = arith.addf %1152, %1153 : vector<1x128xf32>
    %1155 = arith.negf %1154 : vector<1x128xf32>
    %1156 = math.exp %1155 : vector<1x128xf32>
    %cst_363 = arith.constant 1.000000e+00 : f32
    %1157 = vector.broadcast %cst_363 : f32 to vector<1x128xf32>
    %1158 = arith.addf %1157, %1156 : vector<1x128xf32>
    %1159 = arith.divf %1157, %1158 : vector<1x128xf32>
    %1160 = math.tanh %1154 : vector<1x128xf32>
    %c96_i32_364 = arith.constant 96 : i32
    %1161 = tpu.dynamic_rotate %1159 by %c96_i32_364 dim 1 : vector<1x128xf32>, i32 -> vector<1x128xf32>
    %c64_i32_365 = arith.constant 64 : i32
    %1162 = tpu.dynamic_rotate %1160 by %c64_i32_365 dim 1 : vector<1x128xf32>, i32 -> vector<1x128xf32>
    %c32_i32_366 = arith.constant 32 : i32
    %1163 = tpu.dynamic_rotate %1159 by %c32_i32_366 dim 1 : vector<1x128xf32>, i32 -> vector<1x128xf32>
    %1164 = arith.mulf %1161, %1132 : vector<1x128xf32>
    %1165 = arith.mulf %1159, %1162 : vector<1x128xf32>
    %1166 = arith.addf %1164, %1165 : vector<1x128xf32>
    %1167 = math.tanh %1166 : vector<1x128xf32>
    %1168 = arith.mulf %1163, %1167 : vector<1x128xf32>
    %1169 = tpu.concatenate %1168, %1151 in 1 : vector<1x128xf32>, vector<1x128xf32> -> vector<1x256xf32>
    %cst_367 = arith.constant dense<0.000000e+00> : vector<1x128xf32>
    %1170 = tpu.matmul %1169, %1, %cst_367 {dimension_numbers = #tpu.dot_dimension_numbers<[1], [0], [0], [1], [0, 0, 1, 1], [], []>} : vector<1x256xf32>, vector<256x128xf32>, vector<1x128xf32> -> vector<1x128xf32>
    %1171 = arith.addf %1170, %3 : vector<1x128xf32>
    %1172 = arith.negf %1171 : vector<1x128xf32>
    %1173 = math.exp %1172 : vector<1x128xf32>
    %cst_368 = arith.constant 1.000000e+00 : f32
    %1174 = vector.broadcast %cst_368 : f32 to vector<1x128xf32>
    %1175 = arith.addf %1174, %1173 : vector<1x128xf32>
    %1176 = arith.divf %1174, %1175 : vector<1x128xf32>
    %1177 = math.tanh %1171 : vector<1x128xf32>
    %c96_i32_369 = arith.constant 96 : i32
    %1178 = tpu.dynamic_rotate %1176 by %c96_i32_369 dim 1 : vector<1x128xf32>, i32 -> vector<1x128xf32>
    %c64_i32_370 = arith.constant 64 : i32
    %1179 = tpu.dynamic_rotate %1177 by %c64_i32_370 dim 1 : vector<1x128xf32>, i32 -> vector<1x128xf32>
    %c32_i32_371 = arith.constant 32 : i32
    %1180 = tpu.dynamic_rotate %1176 by %c32_i32_371 dim 1 : vector<1x128xf32>, i32 -> vector<1x128xf32>
    %1181 = arith.mulf %1178, %1149 : vector<1x128xf32>
    %1182 = arith.mulf %1176, %1179 : vector<1x128xf32>
    %1183 = arith.addf %1181, %1182 : vector<1x128xf32>
    %1184 = math.tanh %1183 : vector<1x128xf32>
    %1185 = arith.mulf %1180, %1184 : vector<1x128xf32>
    %1186 = vector.extract_strided_slice %961 {offsets = [5, 0], sizes = [1, 128], strides = [1, 1]} : vector<8x128xf32> to vector<1x128xf32>
    %cst_372 = arith.constant dense<0.000000e+00> : vector<1x128xf32>
    %1187 = tpu.matmul %1168, %0, %cst_372 {dimension_numbers = #tpu.dot_dimension_numbers<[1], [0], [0], [1], [0, 0, 1, 1], [], []>} : vector<1x128xf32>, vector<128x128xf32>, vector<1x128xf32> -> vector<1x128xf32>
    %1188 = arith.addf %1186, %1187 : vector<1x128xf32>
    %1189 = arith.negf %1188 : vector<1x128xf32>
    %1190 = math.exp %1189 : vector<1x128xf32>
    %cst_373 = arith.constant 1.000000e+00 : f32
    %1191 = vector.broadcast %cst_373 : f32 to vector<1x128xf32>
    %1192 = arith.addf %1191, %1190 : vector<1x128xf32>
    %1193 = arith.divf %1191, %1192 : vector<1x128xf32>
    %1194 = math.tanh %1188 : vector<1x128xf32>
    %c96_i32_374 = arith.constant 96 : i32
    %1195 = tpu.dynamic_rotate %1193 by %c96_i32_374 dim 1 : vector<1x128xf32>, i32 -> vector<1x128xf32>
    %c64_i32_375 = arith.constant 64 : i32
    %1196 = tpu.dynamic_rotate %1194 by %c64_i32_375 dim 1 : vector<1x128xf32>, i32 -> vector<1x128xf32>
    %c32_i32_376 = arith.constant 32 : i32
    %1197 = tpu.dynamic_rotate %1193 by %c32_i32_376 dim 1 : vector<1x128xf32>, i32 -> vector<1x128xf32>
    %1198 = arith.mulf %1195, %1166 : vector<1x128xf32>
    %1199 = arith.mulf %1193, %1196 : vector<1x128xf32>
    %1200 = arith.addf %1198, %1199 : vector<1x128xf32>
    %1201 = math.tanh %1200 : vector<1x128xf32>
    %1202 = arith.mulf %1197, %1201 : vector<1x128xf32>
    %1203 = tpu.concatenate %1202, %1185 in 1 : vector<1x128xf32>, vector<1x128xf32> -> vector<1x256xf32>
    %cst_377 = arith.constant dense<0.000000e+00> : vector<1x128xf32>
    %1204 = tpu.matmul %1203, %1, %cst_377 {dimension_numbers = #tpu.dot_dimension_numbers<[1], [0], [0], [1], [0, 0, 1, 1], [], []>} : vector<1x256xf32>, vector<256x128xf32>, vector<1x128xf32> -> vector<1x128xf32>
    %1205 = arith.addf %1204, %3 : vector<1x128xf32>
    %1206 = arith.negf %1205 : vector<1x128xf32>
    %1207 = math.exp %1206 : vector<1x128xf32>
    %cst_378 = arith.constant 1.000000e+00 : f32
    %1208 = vector.broadcast %cst_378 : f32 to vector<1x128xf32>
    %1209 = arith.addf %1208, %1207 : vector<1x128xf32>
    %1210 = arith.divf %1208, %1209 : vector<1x128xf32>
    %1211 = math.tanh %1205 : vector<1x128xf32>
    %c96_i32_379 = arith.constant 96 : i32
    %1212 = tpu.dynamic_rotate %1210 by %c96_i32_379 dim 1 : vector<1x128xf32>, i32 -> vector<1x128xf32>
    %c64_i32_380 = arith.constant 64 : i32
    %1213 = tpu.dynamic_rotate %1211 by %c64_i32_380 dim 1 : vector<1x128xf32>, i32 -> vector<1x128xf32>
    %c32_i32_381 = arith.constant 32 : i32
    %1214 = tpu.dynamic_rotate %1210 by %c32_i32_381 dim 1 : vector<1x128xf32>, i32 -> vector<1x128xf32>
    %1215 = arith.mulf %1212, %1183 : vector<1x128xf32>
    %1216 = arith.mulf %1210, %1213 : vector<1x128xf32>
    %1217 = arith.addf %1215, %1216 : vector<1x128xf32>
    %1218 = math.tanh %1217 : vector<1x128xf32>
    %1219 = arith.mulf %1214, %1218 : vector<1x128xf32>
    %1220 = vector.extract_strided_slice %961 {offsets = [6, 0], sizes = [1, 128], strides = [1, 1]} : vector<8x128xf32> to vector<1x128xf32>
    %cst_382 = arith.constant dense<0.000000e+00> : vector<1x128xf32>
    %1221 = tpu.matmul %1202, %0, %cst_382 {dimension_numbers = #tpu.dot_dimension_numbers<[1], [0], [0], [1], [0, 0, 1, 1], [], []>} : vector<1x128xf32>, vector<128x128xf32>, vector<1x128xf32> -> vector<1x128xf32>
    %1222 = arith.addf %1220, %1221 : vector<1x128xf32>
    %1223 = arith.negf %1222 : vector<1x128xf32>
    %1224 = math.exp %1223 : vector<1x128xf32>
    %cst_383 = arith.constant 1.000000e+00 : f32
    %1225 = vector.broadcast %cst_383 : f32 to vector<1x128xf32>
    %1226 = arith.addf %1225, %1224 : vector<1x128xf32>
    %1227 = arith.divf %1225, %1226 : vector<1x128xf32>
    %1228 = math.tanh %1222 : vector<1x128xf32>
    %c96_i32_384 = arith.constant 96 : i32
    %1229 = tpu.dynamic_rotate %1227 by %c96_i32_384 dim 1 : vector<1x128xf32>, i32 -> vector<1x128xf32>
    %c64_i32_385 = arith.constant 64 : i32
    %1230 = tpu.dynamic_rotate %1228 by %c64_i32_385 dim 1 : vector<1x128xf32>, i32 -> vector<1x128xf32>
    %c32_i32_386 = arith.constant 32 : i32
    %1231 = tpu.dynamic_rotate %1227 by %c32_i32_386 dim 1 : vector<1x128xf32>, i32 -> vector<1x128xf32>
    %1232 = arith.mulf %1229, %1200 : vector<1x128xf32>
    %1233 = arith.mulf %1227, %1230 : vector<1x128xf32>
    %1234 = arith.addf %1232, %1233 : vector<1x128xf32>
    %1235 = math.tanh %1234 : vector<1x128xf32>
    %1236 = arith.mulf %1231, %1235 : vector<1x128xf32>
    %1237 = tpu.concatenate %1236, %1219 in 1 : vector<1x128xf32>, vector<1x128xf32> -> vector<1x256xf32>
    %cst_387 = arith.constant dense<0.000000e+00> : vector<1x128xf32>
    %1238 = tpu.matmul %1237, %1, %cst_387 {dimension_numbers = #tpu.dot_dimension_numbers<[1], [0], [0], [1], [0, 0, 1, 1], [], []>} : vector<1x256xf32>, vector<256x128xf32>, vector<1x128xf32> -> vector<1x128xf32>
    %1239 = arith.addf %1238, %3 : vector<1x128xf32>
    %1240 = arith.negf %1239 : vector<1x128xf32>
    %1241 = math.exp %1240 : vector<1x128xf32>
    %cst_388 = arith.constant 1.000000e+00 : f32
    %1242 = vector.broadcast %cst_388 : f32 to vector<1x128xf32>
    %1243 = arith.addf %1242, %1241 : vector<1x128xf32>
    %1244 = arith.divf %1242, %1243 : vector<1x128xf32>
    %1245 = math.tanh %1239 : vector<1x128xf32>
    %c96_i32_389 = arith.constant 96 : i32
    %1246 = tpu.dynamic_rotate %1244 by %c96_i32_389 dim 1 : vector<1x128xf32>, i32 -> vector<1x128xf32>
    %c64_i32_390 = arith.constant 64 : i32
    %1247 = tpu.dynamic_rotate %1245 by %c64_i32_390 dim 1 : vector<1x128xf32>, i32 -> vector<1x128xf32>
    %c32_i32_391 = arith.constant 32 : i32
    %1248 = tpu.dynamic_rotate %1244 by %c32_i32_391 dim 1 : vector<1x128xf32>, i32 -> vector<1x128xf32>
    %1249 = arith.mulf %1246, %1217 : vector<1x128xf32>
    %1250 = arith.mulf %1244, %1247 : vector<1x128xf32>
    %1251 = arith.addf %1249, %1250 : vector<1x128xf32>
    %1252 = math.tanh %1251 : vector<1x128xf32>
    %1253 = arith.mulf %1248, %1252 : vector<1x128xf32>
    %1254 = vector.extract_strided_slice %961 {offsets = [7, 0], sizes = [1, 128], strides = [1, 1]} : vector<8x128xf32> to vector<1x128xf32>
    %cst_392 = arith.constant dense<0.000000e+00> : vector<1x128xf32>
    %1255 = tpu.matmul %1236, %0, %cst_392 {dimension_numbers = #tpu.dot_dimension_numbers<[1], [0], [0], [1], [0, 0, 1, 1], [], []>} : vector<1x128xf32>, vector<128x128xf32>, vector<1x128xf32> -> vector<1x128xf32>
    %1256 = arith.addf %1254, %1255 : vector<1x128xf32>
    %1257 = arith.negf %1256 : vector<1x128xf32>
    %1258 = math.exp %1257 : vector<1x128xf32>
    %cst_393 = arith.constant 1.000000e+00 : f32
    %1259 = vector.broadcast %cst_393 : f32 to vector<1x128xf32>
    %1260 = arith.addf %1259, %1258 : vector<1x128xf32>
    %1261 = arith.divf %1259, %1260 : vector<1x128xf32>
    %1262 = math.tanh %1256 : vector<1x128xf32>
    %c96_i32_394 = arith.constant 96 : i32
    %1263 = tpu.dynamic_rotate %1261 by %c96_i32_394 dim 1 : vector<1x128xf32>, i32 -> vector<1x128xf32>
    %c64_i32_395 = arith.constant 64 : i32
    %1264 = tpu.dynamic_rotate %1262 by %c64_i32_395 dim 1 : vector<1x128xf32>, i32 -> vector<1x128xf32>
    %c32_i32_396 = arith.constant 32 : i32
    %1265 = tpu.dynamic_rotate %1261 by %c32_i32_396 dim 1 : vector<1x128xf32>, i32 -> vector<1x128xf32>
    %1266 = arith.mulf %1263, %1234 : vector<1x128xf32>
    %1267 = arith.mulf %1261, %1264 : vector<1x128xf32>
    %1268 = arith.addf %1266, %1267 : vector<1x128xf32>
    %1269 = math.tanh %1268 : vector<1x128xf32>
    %1270 = arith.mulf %1265, %1269 : vector<1x128xf32>
    %1271 = tpu.concatenate %1270, %1253 in 1 : vector<1x128xf32>, vector<1x128xf32> -> vector<1x256xf32>
    %cst_397 = arith.constant dense<0.000000e+00> : vector<1x128xf32>
    %1272 = tpu.matmul %1271, %1, %cst_397 {dimension_numbers = #tpu.dot_dimension_numbers<[1], [0], [0], [1], [0, 0, 1, 1], [], []>} : vector<1x256xf32>, vector<256x128xf32>, vector<1x128xf32> -> vector<1x128xf32>
    %1273 = arith.addf %1272, %3 : vector<1x128xf32>
    %1274 = arith.negf %1273 : vector<1x128xf32>
    %1275 = math.exp %1274 : vector<1x128xf32>
    %cst_398 = arith.constant 1.000000e+00 : f32
    %1276 = vector.broadcast %cst_398 : f32 to vector<1x128xf32>
    %1277 = arith.addf %1276, %1275 : vector<1x128xf32>
    %1278 = arith.divf %1276, %1277 : vector<1x128xf32>
    %1279 = math.tanh %1273 : vector<1x128xf32>
    %c96_i32_399 = arith.constant 96 : i32
    %1280 = tpu.dynamic_rotate %1278 by %c96_i32_399 dim 1 : vector<1x128xf32>, i32 -> vector<1x128xf32>
    %c64_i32_400 = arith.constant 64 : i32
    %1281 = tpu.dynamic_rotate %1279 by %c64_i32_400 dim 1 : vector<1x128xf32>, i32 -> vector<1x128xf32>
    %c32_i32_401 = arith.constant 32 : i32
    %1282 = tpu.dynamic_rotate %1278 by %c32_i32_401 dim 1 : vector<1x128xf32>, i32 -> vector<1x128xf32>
    %1283 = arith.mulf %1280, %1251 : vector<1x128xf32>
    %1284 = arith.mulf %1278, %1281 : vector<1x128xf32>
    %1285 = arith.addf %1283, %1284 : vector<1x128xf32>
    %1286 = math.tanh %1285 : vector<1x128xf32>
    %1287 = arith.mulf %1282, %1286 : vector<1x128xf32>
    %1288 = tpu.concatenate %1049, %1083, %1117, %1151, %1185, %1219, %1253, %1287 in 0 : vector<1x128xf32>, vector<1x128xf32>, vector<1x128xf32>, vector<1x128xf32>, vector<1x128xf32>, vector<1x128xf32>, vector<1x128xf32>, vector<1x128xf32> -> vector<8x128xf32>
    %c3 = arith.constant 3 : index
    %c0_402 = arith.constant 0 : index
    %c0_403 = arith.constant 0 : index
    %1289 = vector.load %arg9[%c3, %c0_402, %c0_403] : memref<5x8x128xf32, #tpu.memory_space<vmem>>, vector<1x8x128xf32>
    %1290 = vector.shape_cast %1289 : vector<1x8x128xf32> to vector<8x128xf32>
    %1291 = vector.shape_cast %1288 : vector<8x128xf32> to vector<1x8x128xf32>
    tpu.vector_store %arg9[%c3, %c0_402, %c0_403], %1291 {strides = array<i32>} : memref<5x8x128xf32, #tpu.memory_space<vmem>>, vector<1x8x128xf32>,
    %cst_404 = arith.constant dense<0.000000e+00> : vector<8x256xf32>
    %1292 = tpu.matmul %1288, %4, %cst_404 {dimension_numbers = #tpu.dot_dimension_numbers<[1], [0], [0], [1], [0, 0, 1, 1], [], []>} : vector<8x128xf32>, vector<128x256xf32>, vector<8x256xf32> -> vector<8x256xf32>
    %1293 = vector.extract_strided_slice %1292 {offsets = [0, 0], sizes = [8, 128], strides = [1, 1]} : vector<8x256xf32> to vector<8x128xf32>
    %1294 = vector.broadcast %2 : vector<1x128xf32> to vector<8x128xf32>
    %1295 = arith.addf %1293, %1294 : vector<8x128xf32>
    %1296 = vector.extract_strided_slice %1292 {offsets = [0, 128], sizes = [8, 128], strides = [1, 1]} : vector<8x256xf32> to vector<8x128xf32>
    %1297 = vector.broadcast %5 : vector<1x128xf32> to vector<8x128xf32>
    %1298 = arith.addf %1296, %1297 : vector<8x128xf32>
    %cst_405 = arith.constant 5.000000e-01 : f32
    %1299 = vector.broadcast %cst_405 : f32 to vector<8x128xf32>
    %1300 = arith.mulf %1299, %1298 : vector<8x128xf32>
    %cst_406 = arith.constant 0.707106769 : f32
    %1301 = vector.broadcast %cst_406 : f32 to vector<8x128xf32>
    %1302 = arith.mulf %1298, %1301 : vector<8x128xf32>
    %1303 = math.absf %1302 : vector<8x128xf32>
    %cst_407 = arith.constant 0.327591091 : f32
    %1304 = vector.broadcast %cst_407 : f32 to vector<8x128xf32>
    %1305 = arith.mulf %1304, %1303 : vector<8x128xf32>
    %cst_408 = arith.constant 1.000000e+00 : f32
    %1306 = vector.broadcast %cst_408 : f32 to vector<8x128xf32>
    %1307 = arith.addf %1306, %1305 : vector<8x128xf32>
    %cst_409 = arith.constant 1.000000e+00 : f32
    %1308 = vector.broadcast %cst_409 : f32 to vector<8x128xf32>
    %1309 = arith.divf %1308, %1307 : vector<8x128xf32>
    %cst_410 = arith.constant 1.06140542 : f32
    %1310 = vector.broadcast %cst_410 : f32 to vector<8x128xf32>
    %1311 = arith.mulf %1310, %1309 : vector<8x128xf32>
    %cst_411 = arith.constant -1.45315206 : f32
    %1312 = vector.broadcast %cst_411 : f32 to vector<8x128xf32>
    %1313 = arith.addf %1311, %1312 : vector<8x128xf32>
    %1314 = arith.mulf %1313, %1309 : vector<8x128xf32>
    %cst_412 = arith.constant 1.42141378 : f32
    %1315 = vector.broadcast %cst_412 : f32 to vector<8x128xf32>
    %1316 = arith.addf %1314, %1315 : vector<8x128xf32>
    %1317 = arith.mulf %1316, %1309 : vector<8x128xf32>
    %cst_413 = arith.constant -0.284496725 : f32
    %1318 = vector.broadcast %cst_413 : f32 to vector<8x128xf32>
    %1319 = arith.addf %1317, %1318 : vector<8x128xf32>
    %1320 = arith.mulf %1319, %1309 : vector<8x128xf32>
    %cst_414 = arith.constant 0.254829586 : f32
    %1321 = vector.broadcast %cst_414 : f32 to vector<8x128xf32>
    %1322 = arith.addf %1320, %1321 : vector<8x128xf32>
    %1323 = arith.mulf %1322, %1309 : vector<8x128xf32>
    %cst_415 = arith.constant 0.000000e+00 : f32
    %1324 = vector.broadcast %cst_415 : f32 to vector<8x128xf32>
    %1325 = arith.subf %1324, %1303 : vector<8x128xf32>
    %1326 = arith.mulf %1325, %1303 : vector<8x128xf32>
    %1327 = math.exp %1326 : vector<8x128xf32>
    %1328 = arith.mulf %1323, %1327 : vector<8x128xf32>
    %cst_416 = arith.constant 1.000000e+00 : f32
    %1329 = vector.broadcast %cst_416 : f32 to vector<8x128xf32>
    %1330 = arith.subf %1329, %1328 : vector<8x128xf32>
    %cst_417 = arith.constant 0.000000e+00 : f32
    %1331 = vector.broadcast %cst_417 : f32 to vector<8x128xf32>
    %1332 = arith.cmpf oge, %1302, %1331 : vector<8x128xf32>
    %cst_418 = arith.constant 0.000000e+00 : f32
    %1333 = vector.broadcast %cst_418 : f32 to vector<8x128xf32>
    %1334 = arith.subf %1333, %1330 : vector<8x128xf32>
    %1335 = arith.select %1332, %1330, %1334 : vector<8x128xi1>, vector<8x128xf32>
    %cst_419 = arith.constant 1.000000e+00 : f32
    %1336 = vector.broadcast %cst_419 : f32 to vector<8x128xf32>
    %1337 = arith.addf %1336, %1335 : vector<8x128xf32>
    %1338 = arith.mulf %1300, %1337 : vector<8x128xf32>
    %1339 = vector.broadcast %6 : vector<1x128xf32> to vector<8x128xf32>
    %1340 = arith.mulf %1338, %1339 : vector<8x128xf32>
    %cst_420 = arith.constant dense<0.000000e+00> : vector<8xf32>
    %1341 = vector.multi_reduction <add>, %1340, %cst_420 [1] : vector<8x128xf32> to vector<8xf32>
    %1342 = vector.shape_cast %1341 : vector<8xf32> to vector<8x1xf32>
    %1343 = vector.broadcast %7 : vector<1x1xf32> to vector<8x1xf32>
    %1344 = arith.addf %1342, %1343 : vector<8x1xf32>
    %1345 = vector.shape_cast %1344 : vector<8x1xf32> to vector<8x1xf32>
    %1346 = vector.broadcast %1345 : vector<8x1xf32> to vector<8x128xf32>
    %c3_421 = arith.constant 3 : index
    %c0_422 = arith.constant 0 : index
    %c0_423 = arith.constant 0 : index
    %1347 = vector.load %arg10[%c3_421, %c0_422, %c0_423] : memref<5x8x128xf32, #tpu.memory_space<vmem>>, vector<1x8x128xf32>
    %1348 = vector.shape_cast %1347 : vector<1x8x128xf32> to vector<8x128xf32>
    %1349 = vector.shape_cast %1346 : vector<8x128xf32> to vector<1x8x128xf32>
    tpu.vector_store %arg10[%c3_421, %c0_422, %c0_423], %1349 {strides = array<i32>} : memref<5x8x128xf32, #tpu.memory_space<vmem>>, vector<1x8x128xf32>,
    %1350 = vector.extract_strided_slice %1295 {offsets = [0, 0], sizes = [1, 128], strides = [1, 1]} : vector<8x128xf32> to vector<1x128xf32>
    %cst_424 = arith.constant dense<0.000000e+00> : vector<1x128xf32>
    %1351 = tpu.matmul %8, %0, %cst_424 {dimension_numbers = #tpu.dot_dimension_numbers<[1], [0], [0], [1], [0, 0, 1, 1], [], []>} : vector<1x128xf32>, vector<128x128xf32>, vector<1x128xf32> -> vector<1x128xf32>
    %1352 = arith.addf %1350, %1351 : vector<1x128xf32>
    %1353 = arith.negf %1352 : vector<1x128xf32>
    %1354 = math.exp %1353 : vector<1x128xf32>
    %cst_425 = arith.constant 1.000000e+00 : f32
    %1355 = vector.broadcast %cst_425 : f32 to vector<1x128xf32>
    %1356 = arith.addf %1355, %1354 : vector<1x128xf32>
    %1357 = arith.divf %1355, %1356 : vector<1x128xf32>
    %1358 = math.tanh %1352 : vector<1x128xf32>
    %c96_i32_426 = arith.constant 96 : i32
    %1359 = tpu.dynamic_rotate %1357 by %c96_i32_426 dim 1 : vector<1x128xf32>, i32 -> vector<1x128xf32>
    %c64_i32_427 = arith.constant 64 : i32
    %1360 = tpu.dynamic_rotate %1358 by %c64_i32_427 dim 1 : vector<1x128xf32>, i32 -> vector<1x128xf32>
    %c32_i32_428 = arith.constant 32 : i32
    %1361 = tpu.dynamic_rotate %1357 by %c32_i32_428 dim 1 : vector<1x128xf32>, i32 -> vector<1x128xf32>
    %1362 = arith.mulf %1359, %8 : vector<1x128xf32>
    %1363 = arith.mulf %1357, %1360 : vector<1x128xf32>
    %1364 = arith.addf %1362, %1363 : vector<1x128xf32>
    %1365 = math.tanh %1364 : vector<1x128xf32>
    %1366 = arith.mulf %1361, %1365 : vector<1x128xf32>
    %1367 = tpu.concatenate %1366, %8 in 1 : vector<1x128xf32>, vector<1x128xf32> -> vector<1x256xf32>
    %cst_429 = arith.constant dense<0.000000e+00> : vector<1x128xf32>
    %1368 = tpu.matmul %1367, %1, %cst_429 {dimension_numbers = #tpu.dot_dimension_numbers<[1], [0], [0], [1], [0, 0, 1, 1], [], []>} : vector<1x256xf32>, vector<256x128xf32>, vector<1x128xf32> -> vector<1x128xf32>
    %1369 = arith.addf %1368, %3 : vector<1x128xf32>
    %1370 = arith.negf %1369 : vector<1x128xf32>
    %1371 = math.exp %1370 : vector<1x128xf32>
    %cst_430 = arith.constant 1.000000e+00 : f32
    %1372 = vector.broadcast %cst_430 : f32 to vector<1x128xf32>
    %1373 = arith.addf %1372, %1371 : vector<1x128xf32>
    %1374 = arith.divf %1372, %1373 : vector<1x128xf32>
    %1375 = math.tanh %1369 : vector<1x128xf32>
    %c96_i32_431 = arith.constant 96 : i32
    %1376 = tpu.dynamic_rotate %1374 by %c96_i32_431 dim 1 : vector<1x128xf32>, i32 -> vector<1x128xf32>
    %c64_i32_432 = arith.constant 64 : i32
    %1377 = tpu.dynamic_rotate %1375 by %c64_i32_432 dim 1 : vector<1x128xf32>, i32 -> vector<1x128xf32>
    %c32_i32_433 = arith.constant 32 : i32
    %1378 = tpu.dynamic_rotate %1374 by %c32_i32_433 dim 1 : vector<1x128xf32>, i32 -> vector<1x128xf32>
    %1379 = arith.mulf %1376, %8 : vector<1x128xf32>
    %1380 = arith.mulf %1374, %1377 : vector<1x128xf32>
    %1381 = arith.addf %1379, %1380 : vector<1x128xf32>
    %1382 = math.tanh %1381 : vector<1x128xf32>
    %1383 = arith.mulf %1378, %1382 : vector<1x128xf32>
    %1384 = vector.extract_strided_slice %1295 {offsets = [1, 0], sizes = [1, 128], strides = [1, 1]} : vector<8x128xf32> to vector<1x128xf32>
    %cst_434 = arith.constant dense<0.000000e+00> : vector<1x128xf32>
    %1385 = tpu.matmul %1366, %0, %cst_434 {dimension_numbers = #tpu.dot_dimension_numbers<[1], [0], [0], [1], [0, 0, 1, 1], [], []>} : vector<1x128xf32>, vector<128x128xf32>, vector<1x128xf32> -> vector<1x128xf32>
    %1386 = arith.addf %1384, %1385 : vector<1x128xf32>
    %1387 = arith.negf %1386 : vector<1x128xf32>
    %1388 = math.exp %1387 : vector<1x128xf32>
    %cst_435 = arith.constant 1.000000e+00 : f32
    %1389 = vector.broadcast %cst_435 : f32 to vector<1x128xf32>
    %1390 = arith.addf %1389, %1388 : vector<1x128xf32>
    %1391 = arith.divf %1389, %1390 : vector<1x128xf32>
    %1392 = math.tanh %1386 : vector<1x128xf32>
    %c96_i32_436 = arith.constant 96 : i32
    %1393 = tpu.dynamic_rotate %1391 by %c96_i32_436 dim 1 : vector<1x128xf32>, i32 -> vector<1x128xf32>
    %c64_i32_437 = arith.constant 64 : i32
    %1394 = tpu.dynamic_rotate %1392 by %c64_i32_437 dim 1 : vector<1x128xf32>, i32 -> vector<1x128xf32>
    %c32_i32_438 = arith.constant 32 : i32
    %1395 = tpu.dynamic_rotate %1391 by %c32_i32_438 dim 1 : vector<1x128xf32>, i32 -> vector<1x128xf32>
    %1396 = arith.mulf %1393, %1364 : vector<1x128xf32>
    %1397 = arith.mulf %1391, %1394 : vector<1x128xf32>
    %1398 = arith.addf %1396, %1397 : vector<1x128xf32>
    %1399 = math.tanh %1398 : vector<1x128xf32>
    %1400 = arith.mulf %1395, %1399 : vector<1x128xf32>
    %1401 = tpu.concatenate %1400, %1383 in 1 : vector<1x128xf32>, vector<1x128xf32> -> vector<1x256xf32>
    %cst_439 = arith.constant dense<0.000000e+00> : vector<1x128xf32>
    %1402 = tpu.matmul %1401, %1, %cst_439 {dimension_numbers = #tpu.dot_dimension_numbers<[1], [0], [0], [1], [0, 0, 1, 1], [], []>} : vector<1x256xf32>, vector<256x128xf32>, vector<1x128xf32> -> vector<1x128xf32>
    %1403 = arith.addf %1402, %3 : vector<1x128xf32>
    %1404 = arith.negf %1403 : vector<1x128xf32>
    %1405 = math.exp %1404 : vector<1x128xf32>
    %cst_440 = arith.constant 1.000000e+00 : f32
    %1406 = vector.broadcast %cst_440 : f32 to vector<1x128xf32>
    %1407 = arith.addf %1406, %1405 : vector<1x128xf32>
    %1408 = arith.divf %1406, %1407 : vector<1x128xf32>
    %1409 = math.tanh %1403 : vector<1x128xf32>
    %c96_i32_441 = arith.constant 96 : i32
    %1410 = tpu.dynamic_rotate %1408 by %c96_i32_441 dim 1 : vector<1x128xf32>, i32 -> vector<1x128xf32>
    %c64_i32_442 = arith.constant 64 : i32
    %1411 = tpu.dynamic_rotate %1409 by %c64_i32_442 dim 1 : vector<1x128xf32>, i32 -> vector<1x128xf32>
    %c32_i32_443 = arith.constant 32 : i32
    %1412 = tpu.dynamic_rotate %1408 by %c32_i32_443 dim 1 : vector<1x128xf32>, i32 -> vector<1x128xf32>
    %1413 = arith.mulf %1410, %1381 : vector<1x128xf32>
    %1414 = arith.mulf %1408, %1411 : vector<1x128xf32>
    %1415 = arith.addf %1413, %1414 : vector<1x128xf32>
    %1416 = math.tanh %1415 : vector<1x128xf32>
    %1417 = arith.mulf %1412, %1416 : vector<1x128xf32>
    %1418 = vector.extract_strided_slice %1295 {offsets = [2, 0], sizes = [1, 128], strides = [1, 1]} : vector<8x128xf32> to vector<1x128xf32>
    %cst_444 = arith.constant dense<0.000000e+00> : vector<1x128xf32>
    %1419 = tpu.matmul %1400, %0, %cst_444 {dimension_numbers = #tpu.dot_dimension_numbers<[1], [0], [0], [1], [0, 0, 1, 1], [], []>} : vector<1x128xf32>, vector<128x128xf32>, vector<1x128xf32> -> vector<1x128xf32>
    %1420 = arith.addf %1418, %1419 : vector<1x128xf32>
    %1421 = arith.negf %1420 : vector<1x128xf32>
    %1422 = math.exp %1421 : vector<1x128xf32>
    %cst_445 = arith.constant 1.000000e+00 : f32
    %1423 = vector.broadcast %cst_445 : f32 to vector<1x128xf32>
    %1424 = arith.addf %1423, %1422 : vector<1x128xf32>
    %1425 = arith.divf %1423, %1424 : vector<1x128xf32>
    %1426 = math.tanh %1420 : vector<1x128xf32>
    %c96_i32_446 = arith.constant 96 : i32
    %1427 = tpu.dynamic_rotate %1425 by %c96_i32_446 dim 1 : vector<1x128xf32>, i32 -> vector<1x128xf32>
    %c64_i32_447 = arith.constant 64 : i32
    %1428 = tpu.dynamic_rotate %1426 by %c64_i32_447 dim 1 : vector<1x128xf32>, i32 -> vector<1x128xf32>
    %c32_i32_448 = arith.constant 32 : i32
    %1429 = tpu.dynamic_rotate %1425 by %c32_i32_448 dim 1 : vector<1x128xf32>, i32 -> vector<1x128xf32>
    %1430 = arith.mulf %1427, %1398 : vector<1x128xf32>
    %1431 = arith.mulf %1425, %1428 : vector<1x128xf32>
    %1432 = arith.addf %1430, %1431 : vector<1x128xf32>
    %1433 = math.tanh %1432 : vector<1x128xf32>
    %1434 = arith.mulf %1429, %1433 : vector<1x128xf32>
    %1435 = tpu.concatenate %1434, %1417 in 1 : vector<1x128xf32>, vector<1x128xf32> -> vector<1x256xf32>
    %cst_449 = arith.constant dense<0.000000e+00> : vector<1x128xf32>
    %1436 = tpu.matmul %1435, %1, %cst_449 {dimension_numbers = #tpu.dot_dimension_numbers<[1], [0], [0], [1], [0, 0, 1, 1], [], []>} : vector<1x256xf32>, vector<256x128xf32>, vector<1x128xf32> -> vector<1x128xf32>
    %1437 = arith.addf %1436, %3 : vector<1x128xf32>
    %1438 = arith.negf %1437 : vector<1x128xf32>
    %1439 = math.exp %1438 : vector<1x128xf32>
    %cst_450 = arith.constant 1.000000e+00 : f32
    %1440 = vector.broadcast %cst_450 : f32 to vector<1x128xf32>
    %1441 = arith.addf %1440, %1439 : vector<1x128xf32>
    %1442 = arith.divf %1440, %1441 : vector<1x128xf32>
    %1443 = math.tanh %1437 : vector<1x128xf32>
    %c96_i32_451 = arith.constant 96 : i32
    %1444 = tpu.dynamic_rotate %1442 by %c96_i32_451 dim 1 : vector<1x128xf32>, i32 -> vector<1x128xf32>
    %c64_i32_452 = arith.constant 64 : i32
    %1445 = tpu.dynamic_rotate %1443 by %c64_i32_452 dim 1 : vector<1x128xf32>, i32 -> vector<1x128xf32>
    %c32_i32_453 = arith.constant 32 : i32
    %1446 = tpu.dynamic_rotate %1442 by %c32_i32_453 dim 1 : vector<1x128xf32>, i32 -> vector<1x128xf32>
    %1447 = arith.mulf %1444, %1415 : vector<1x128xf32>
    %1448 = arith.mulf %1442, %1445 : vector<1x128xf32>
    %1449 = arith.addf %1447, %1448 : vector<1x128xf32>
    %1450 = math.tanh %1449 : vector<1x128xf32>
    %1451 = arith.mulf %1446, %1450 : vector<1x128xf32>
    %1452 = vector.extract_strided_slice %1295 {offsets = [3, 0], sizes = [1, 128], strides = [1, 1]} : vector<8x128xf32> to vector<1x128xf32>
    %cst_454 = arith.constant dense<0.000000e+00> : vector<1x128xf32>
    %1453 = tpu.matmul %1434, %0, %cst_454 {dimension_numbers = #tpu.dot_dimension_numbers<[1], [0], [0], [1], [0, 0, 1, 1], [], []>} : vector<1x128xf32>, vector<128x128xf32>, vector<1x128xf32> -> vector<1x128xf32>
    %1454 = arith.addf %1452, %1453 : vector<1x128xf32>
    %1455 = arith.negf %1454 : vector<1x128xf32>
    %1456 = math.exp %1455 : vector<1x128xf32>
    %cst_455 = arith.constant 1.000000e+00 : f32
    %1457 = vector.broadcast %cst_455 : f32 to vector<1x128xf32>
    %1458 = arith.addf %1457, %1456 : vector<1x128xf32>
    %1459 = arith.divf %1457, %1458 : vector<1x128xf32>
    %1460 = math.tanh %1454 : vector<1x128xf32>
    %c96_i32_456 = arith.constant 96 : i32
    %1461 = tpu.dynamic_rotate %1459 by %c96_i32_456 dim 1 : vector<1x128xf32>, i32 -> vector<1x128xf32>
    %c64_i32_457 = arith.constant 64 : i32
    %1462 = tpu.dynamic_rotate %1460 by %c64_i32_457 dim 1 : vector<1x128xf32>, i32 -> vector<1x128xf32>
    %c32_i32_458 = arith.constant 32 : i32
    %1463 = tpu.dynamic_rotate %1459 by %c32_i32_458 dim 1 : vector<1x128xf32>, i32 -> vector<1x128xf32>
    %1464 = arith.mulf %1461, %1432 : vector<1x128xf32>
    %1465 = arith.mulf %1459, %1462 : vector<1x128xf32>
    %1466 = arith.addf %1464, %1465 : vector<1x128xf32>
    %1467 = math.tanh %1466 : vector<1x128xf32>
    %1468 = arith.mulf %1463, %1467 : vector<1x128xf32>
    %1469 = tpu.concatenate %1468, %1451 in 1 : vector<1x128xf32>, vector<1x128xf32> -> vector<1x256xf32>
    %cst_459 = arith.constant dense<0.000000e+00> : vector<1x128xf32>
    %1470 = tpu.matmul %1469, %1, %cst_459 {dimension_numbers = #tpu.dot_dimension_numbers<[1], [0], [0], [1], [0, 0, 1, 1], [], []>} : vector<1x256xf32>, vector<256x128xf32>, vector<1x128xf32> -> vector<1x128xf32>
    %1471 = arith.addf %1470, %3 : vector<1x128xf32>
    %1472 = arith.negf %1471 : vector<1x128xf32>
    %1473 = math.exp %1472 : vector<1x128xf32>
    %cst_460 = arith.constant 1.000000e+00 : f32
    %1474 = vector.broadcast %cst_460 : f32 to vector<1x128xf32>
    %1475 = arith.addf %1474, %1473 : vector<1x128xf32>
    %1476 = arith.divf %1474, %1475 : vector<1x128xf32>
    %1477 = math.tanh %1471 : vector<1x128xf32>
    %c96_i32_461 = arith.constant 96 : i32
    %1478 = tpu.dynamic_rotate %1476 by %c96_i32_461 dim 1 : vector<1x128xf32>, i32 -> vector<1x128xf32>
    %c64_i32_462 = arith.constant 64 : i32
    %1479 = tpu.dynamic_rotate %1477 by %c64_i32_462 dim 1 : vector<1x128xf32>, i32 -> vector<1x128xf32>
    %c32_i32_463 = arith.constant 32 : i32
    %1480 = tpu.dynamic_rotate %1476 by %c32_i32_463 dim 1 : vector<1x128xf32>, i32 -> vector<1x128xf32>
    %1481 = arith.mulf %1478, %1449 : vector<1x128xf32>
    %1482 = arith.mulf %1476, %1479 : vector<1x128xf32>
    %1483 = arith.addf %1481, %1482 : vector<1x128xf32>
    %1484 = math.tanh %1483 : vector<1x128xf32>
    %1485 = arith.mulf %1480, %1484 : vector<1x128xf32>
    %1486 = vector.extract_strided_slice %1295 {offsets = [4, 0], sizes = [1, 128], strides = [1, 1]} : vector<8x128xf32> to vector<1x128xf32>
    %cst_464 = arith.constant dense<0.000000e+00> : vector<1x128xf32>
    %1487 = tpu.matmul %1468, %0, %cst_464 {dimension_numbers = #tpu.dot_dimension_numbers<[1], [0], [0], [1], [0, 0, 1, 1], [], []>} : vector<1x128xf32>, vector<128x128xf32>, vector<1x128xf32> -> vector<1x128xf32>
    %1488 = arith.addf %1486, %1487 : vector<1x128xf32>
    %1489 = arith.negf %1488 : vector<1x128xf32>
    %1490 = math.exp %1489 : vector<1x128xf32>
    %cst_465 = arith.constant 1.000000e+00 : f32
    %1491 = vector.broadcast %cst_465 : f32 to vector<1x128xf32>
    %1492 = arith.addf %1491, %1490 : vector<1x128xf32>
    %1493 = arith.divf %1491, %1492 : vector<1x128xf32>
    %1494 = math.tanh %1488 : vector<1x128xf32>
    %c96_i32_466 = arith.constant 96 : i32
    %1495 = tpu.dynamic_rotate %1493 by %c96_i32_466 dim 1 : vector<1x128xf32>, i32 -> vector<1x128xf32>
    %c64_i32_467 = arith.constant 64 : i32
    %1496 = tpu.dynamic_rotate %1494 by %c64_i32_467 dim 1 : vector<1x128xf32>, i32 -> vector<1x128xf32>
    %c32_i32_468 = arith.constant 32 : i32
    %1497 = tpu.dynamic_rotate %1493 by %c32_i32_468 dim 1 : vector<1x128xf32>, i32 -> vector<1x128xf32>
    %1498 = arith.mulf %1495, %1466 : vector<1x128xf32>
    %1499 = arith.mulf %1493, %1496 : vector<1x128xf32>
    %1500 = arith.addf %1498, %1499 : vector<1x128xf32>
    %1501 = math.tanh %1500 : vector<1x128xf32>
    %1502 = arith.mulf %1497, %1501 : vector<1x128xf32>
    %1503 = tpu.concatenate %1502, %1485 in 1 : vector<1x128xf32>, vector<1x128xf32> -> vector<1x256xf32>
    %cst_469 = arith.constant dense<0.000000e+00> : vector<1x128xf32>
    %1504 = tpu.matmul %1503, %1, %cst_469 {dimension_numbers = #tpu.dot_dimension_numbers<[1], [0], [0], [1], [0, 0, 1, 1], [], []>} : vector<1x256xf32>, vector<256x128xf32>, vector<1x128xf32> -> vector<1x128xf32>
    %1505 = arith.addf %1504, %3 : vector<1x128xf32>
    %1506 = arith.negf %1505 : vector<1x128xf32>
    %1507 = math.exp %1506 : vector<1x128xf32>
    %cst_470 = arith.constant 1.000000e+00 : f32
    %1508 = vector.broadcast %cst_470 : f32 to vector<1x128xf32>
    %1509 = arith.addf %1508, %1507 : vector<1x128xf32>
    %1510 = arith.divf %1508, %1509 : vector<1x128xf32>
    %1511 = math.tanh %1505 : vector<1x128xf32>
    %c96_i32_471 = arith.constant 96 : i32
    %1512 = tpu.dynamic_rotate %1510 by %c96_i32_471 dim 1 : vector<1x128xf32>, i32 -> vector<1x128xf32>
    %c64_i32_472 = arith.constant 64 : i32
    %1513 = tpu.dynamic_rotate %1511 by %c64_i32_472 dim 1 : vector<1x128xf32>, i32 -> vector<1x128xf32>
    %c32_i32_473 = arith.constant 32 : i32
    %1514 = tpu.dynamic_rotate %1510 by %c32_i32_473 dim 1 : vector<1x128xf32>, i32 -> vector<1x128xf32>
    %1515 = arith.mulf %1512, %1483 : vector<1x128xf32>
    %1516 = arith.mulf %1510, %1513 : vector<1x128xf32>
    %1517 = arith.addf %1515, %1516 : vector<1x128xf32>
    %1518 = math.tanh %1517 : vector<1x128xf32>
    %1519 = arith.mulf %1514, %1518 : vector<1x128xf32>
    %1520 = vector.extract_strided_slice %1295 {offsets = [5, 0], sizes = [1, 128], strides = [1, 1]} : vector<8x128xf32> to vector<1x128xf32>
    %cst_474 = arith.constant dense<0.000000e+00> : vector<1x128xf32>
    %1521 = tpu.matmul %1502, %0, %cst_474 {dimension_numbers = #tpu.dot_dimension_numbers<[1], [0], [0], [1], [0, 0, 1, 1], [], []>} : vector<1x128xf32>, vector<128x128xf32>, vector<1x128xf32> -> vector<1x128xf32>
    %1522 = arith.addf %1520, %1521 : vector<1x128xf32>
    %1523 = arith.negf %1522 : vector<1x128xf32>
    %1524 = math.exp %1523 : vector<1x128xf32>
    %cst_475 = arith.constant 1.000000e+00 : f32
    %1525 = vector.broadcast %cst_475 : f32 to vector<1x128xf32>
    %1526 = arith.addf %1525, %1524 : vector<1x128xf32>
    %1527 = arith.divf %1525, %1526 : vector<1x128xf32>
    %1528 = math.tanh %1522 : vector<1x128xf32>
    %c96_i32_476 = arith.constant 96 : i32
    %1529 = tpu.dynamic_rotate %1527 by %c96_i32_476 dim 1 : vector<1x128xf32>, i32 -> vector<1x128xf32>
    %c64_i32_477 = arith.constant 64 : i32
    %1530 = tpu.dynamic_rotate %1528 by %c64_i32_477 dim 1 : vector<1x128xf32>, i32 -> vector<1x128xf32>
    %c32_i32_478 = arith.constant 32 : i32
    %1531 = tpu.dynamic_rotate %1527 by %c32_i32_478 dim 1 : vector<1x128xf32>, i32 -> vector<1x128xf32>
    %1532 = arith.mulf %1529, %1500 : vector<1x128xf32>
    %1533 = arith.mulf %1527, %1530 : vector<1x128xf32>
    %1534 = arith.addf %1532, %1533 : vector<1x128xf32>
    %1535 = math.tanh %1534 : vector<1x128xf32>
    %1536 = arith.mulf %1531, %1535 : vector<1x128xf32>
    %1537 = tpu.concatenate %1536, %1519 in 1 : vector<1x128xf32>, vector<1x128xf32> -> vector<1x256xf32>
    %cst_479 = arith.constant dense<0.000000e+00> : vector<1x128xf32>
    %1538 = tpu.matmul %1537, %1, %cst_479 {dimension_numbers = #tpu.dot_dimension_numbers<[1], [0], [0], [1], [0, 0, 1, 1], [], []>} : vector<1x256xf32>, vector<256x128xf32>, vector<1x128xf32> -> vector<1x128xf32>
    %1539 = arith.addf %1538, %3 : vector<1x128xf32>
    %1540 = arith.negf %1539 : vector<1x128xf32>
    %1541 = math.exp %1540 : vector<1x128xf32>
    %cst_480 = arith.constant 1.000000e+00 : f32
    %1542 = vector.broadcast %cst_480 : f32 to vector<1x128xf32>
    %1543 = arith.addf %1542, %1541 : vector<1x128xf32>
    %1544 = arith.divf %1542, %1543 : vector<1x128xf32>
    %1545 = math.tanh %1539 : vector<1x128xf32>
    %c96_i32_481 = arith.constant 96 : i32
    %1546 = tpu.dynamic_rotate %1544 by %c96_i32_481 dim 1 : vector<1x128xf32>, i32 -> vector<1x128xf32>
    %c64_i32_482 = arith.constant 64 : i32
    %1547 = tpu.dynamic_rotate %1545 by %c64_i32_482 dim 1 : vector<1x128xf32>, i32 -> vector<1x128xf32>
    %c32_i32_483 = arith.constant 32 : i32
    %1548 = tpu.dynamic_rotate %1544 by %c32_i32_483 dim 1 : vector<1x128xf32>, i32 -> vector<1x128xf32>
    %1549 = arith.mulf %1546, %1517 : vector<1x128xf32>
    %1550 = arith.mulf %1544, %1547 : vector<1x128xf32>
    %1551 = arith.addf %1549, %1550 : vector<1x128xf32>
    %1552 = math.tanh %1551 : vector<1x128xf32>
    %1553 = arith.mulf %1548, %1552 : vector<1x128xf32>
    %1554 = vector.extract_strided_slice %1295 {offsets = [6, 0], sizes = [1, 128], strides = [1, 1]} : vector<8x128xf32> to vector<1x128xf32>
    %cst_484 = arith.constant dense<0.000000e+00> : vector<1x128xf32>
    %1555 = tpu.matmul %1536, %0, %cst_484 {dimension_numbers = #tpu.dot_dimension_numbers<[1], [0], [0], [1], [0, 0, 1, 1], [], []>} : vector<1x128xf32>, vector<128x128xf32>, vector<1x128xf32> -> vector<1x128xf32>
    %1556 = arith.addf %1554, %1555 : vector<1x128xf32>
    %1557 = arith.negf %1556 : vector<1x128xf32>
    %1558 = math.exp %1557 : vector<1x128xf32>
    %cst_485 = arith.constant 1.000000e+00 : f32
    %1559 = vector.broadcast %cst_485 : f32 to vector<1x128xf32>
    %1560 = arith.addf %1559, %1558 : vector<1x128xf32>
    %1561 = arith.divf %1559, %1560 : vector<1x128xf32>
    %1562 = math.tanh %1556 : vector<1x128xf32>
    %c96_i32_486 = arith.constant 96 : i32
    %1563 = tpu.dynamic_rotate %1561 by %c96_i32_486 dim 1 : vector<1x128xf32>, i32 -> vector<1x128xf32>
    %c64_i32_487 = arith.constant 64 : i32
    %1564 = tpu.dynamic_rotate %1562 by %c64_i32_487 dim 1 : vector<1x128xf32>, i32 -> vector<1x128xf32>
    %c32_i32_488 = arith.constant 32 : i32
    %1565 = tpu.dynamic_rotate %1561 by %c32_i32_488 dim 1 : vector<1x128xf32>, i32 -> vector<1x128xf32>
    %1566 = arith.mulf %1563, %1534 : vector<1x128xf32>
    %1567 = arith.mulf %1561, %1564 : vector<1x128xf32>
    %1568 = arith.addf %1566, %1567 : vector<1x128xf32>
    %1569 = math.tanh %1568 : vector<1x128xf32>
    %1570 = arith.mulf %1565, %1569 : vector<1x128xf32>
    %1571 = tpu.concatenate %1570, %1553 in 1 : vector<1x128xf32>, vector<1x128xf32> -> vector<1x256xf32>
    %cst_489 = arith.constant dense<0.000000e+00> : vector<1x128xf32>
    %1572 = tpu.matmul %1571, %1, %cst_489 {dimension_numbers = #tpu.dot_dimension_numbers<[1], [0], [0], [1], [0, 0, 1, 1], [], []>} : vector<1x256xf32>, vector<256x128xf32>, vector<1x128xf32> -> vector<1x128xf32>
    %1573 = arith.addf %1572, %3 : vector<1x128xf32>
    %1574 = arith.negf %1573 : vector<1x128xf32>
    %1575 = math.exp %1574 : vector<1x128xf32>
    %cst_490 = arith.constant 1.000000e+00 : f32
    %1576 = vector.broadcast %cst_490 : f32 to vector<1x128xf32>
    %1577 = arith.addf %1576, %1575 : vector<1x128xf32>
    %1578 = arith.divf %1576, %1577 : vector<1x128xf32>
    %1579 = math.tanh %1573 : vector<1x128xf32>
    %c96_i32_491 = arith.constant 96 : i32
    %1580 = tpu.dynamic_rotate %1578 by %c96_i32_491 dim 1 : vector<1x128xf32>, i32 -> vector<1x128xf32>
    %c64_i32_492 = arith.constant 64 : i32
    %1581 = tpu.dynamic_rotate %1579 by %c64_i32_492 dim 1 : vector<1x128xf32>, i32 -> vector<1x128xf32>
    %c32_i32_493 = arith.constant 32 : i32
    %1582 = tpu.dynamic_rotate %1578 by %c32_i32_493 dim 1 : vector<1x128xf32>, i32 -> vector<1x128xf32>
    %1583 = arith.mulf %1580, %1551 : vector<1x128xf32>
    %1584 = arith.mulf %1578, %1581 : vector<1x128xf32>
    %1585 = arith.addf %1583, %1584 : vector<1x128xf32>
    %1586 = math.tanh %1585 : vector<1x128xf32>
    %1587 = arith.mulf %1582, %1586 : vector<1x128xf32>
    %1588 = vector.extract_strided_slice %1295 {offsets = [7, 0], sizes = [1, 128], strides = [1, 1]} : vector<8x128xf32> to vector<1x128xf32>
    %cst_494 = arith.constant dense<0.000000e+00> : vector<1x128xf32>
    %1589 = tpu.matmul %1570, %0, %cst_494 {dimension_numbers = #tpu.dot_dimension_numbers<[1], [0], [0], [1], [0, 0, 1, 1], [], []>} : vector<1x128xf32>, vector<128x128xf32>, vector<1x128xf32> -> vector<1x128xf32>
    %1590 = arith.addf %1588, %1589 : vector<1x128xf32>
    %1591 = arith.negf %1590 : vector<1x128xf32>
    %1592 = math.exp %1591 : vector<1x128xf32>
    %cst_495 = arith.constant 1.000000e+00 : f32
    %1593 = vector.broadcast %cst_495 : f32 to vector<1x128xf32>
    %1594 = arith.addf %1593, %1592 : vector<1x128xf32>
    %1595 = arith.divf %1593, %1594 : vector<1x128xf32>
    %1596 = math.tanh %1590 : vector<1x128xf32>
    %c96_i32_496 = arith.constant 96 : i32
    %1597 = tpu.dynamic_rotate %1595 by %c96_i32_496 dim 1 : vector<1x128xf32>, i32 -> vector<1x128xf32>
    %c64_i32_497 = arith.constant 64 : i32
    %1598 = tpu.dynamic_rotate %1596 by %c64_i32_497 dim 1 : vector<1x128xf32>, i32 -> vector<1x128xf32>
    %c32_i32_498 = arith.constant 32 : i32
    %1599 = tpu.dynamic_rotate %1595 by %c32_i32_498 dim 1 : vector<1x128xf32>, i32 -> vector<1x128xf32>
    %1600 = arith.mulf %1597, %1568 : vector<1x128xf32>
    %1601 = arith.mulf %1595, %1598 : vector<1x128xf32>
    %1602 = arith.addf %1600, %1601 : vector<1x128xf32>
    %1603 = math.tanh %1602 : vector<1x128xf32>
    %1604 = arith.mulf %1599, %1603 : vector<1x128xf32>
    %1605 = tpu.concatenate %1604, %1587 in 1 : vector<1x128xf32>, vector<1x128xf32> -> vector<1x256xf32>
    %cst_499 = arith.constant dense<0.000000e+00> : vector<1x128xf32>
    %1606 = tpu.matmul %1605, %1, %cst_499 {dimension_numbers = #tpu.dot_dimension_numbers<[1], [0], [0], [1], [0, 0, 1, 1], [], []>} : vector<1x256xf32>, vector<256x128xf32>, vector<1x128xf32> -> vector<1x128xf32>
    %1607 = arith.addf %1606, %3 : vector<1x128xf32>
    %1608 = arith.negf %1607 : vector<1x128xf32>
    %1609 = math.exp %1608 : vector<1x128xf32>
    %cst_500 = arith.constant 1.000000e+00 : f32
    %1610 = vector.broadcast %cst_500 : f32 to vector<1x128xf32>
    %1611 = arith.addf %1610, %1609 : vector<1x128xf32>
    %1612 = arith.divf %1610, %1611 : vector<1x128xf32>
    %1613 = math.tanh %1607 : vector<1x128xf32>
    %c96_i32_501 = arith.constant 96 : i32
    %1614 = tpu.dynamic_rotate %1612 by %c96_i32_501 dim 1 : vector<1x128xf32>, i32 -> vector<1x128xf32>
    %c64_i32_502 = arith.constant 64 : i32
    %1615 = tpu.dynamic_rotate %1613 by %c64_i32_502 dim 1 : vector<1x128xf32>, i32 -> vector<1x128xf32>
    %c32_i32_503 = arith.constant 32 : i32
    %1616 = tpu.dynamic_rotate %1612 by %c32_i32_503 dim 1 : vector<1x128xf32>, i32 -> vector<1x128xf32>
    %1617 = arith.mulf %1614, %1585 : vector<1x128xf32>
    %1618 = arith.mulf %1612, %1615 : vector<1x128xf32>
    %1619 = arith.addf %1617, %1618 : vector<1x128xf32>
    %1620 = math.tanh %1619 : vector<1x128xf32>
    %1621 = arith.mulf %1616, %1620 : vector<1x128xf32>
    %1622 = tpu.concatenate %1383, %1417, %1451, %1485, %1519, %1553, %1587, %1621 in 0 : vector<1x128xf32>, vector<1x128xf32>, vector<1x128xf32>, vector<1x128xf32>, vector<1x128xf32>, vector<1x128xf32>, vector<1x128xf32>, vector<1x128xf32> -> vector<8x128xf32>
    %c4 = arith.constant 4 : index
    %c0_504 = arith.constant 0 : index
    %c0_505 = arith.constant 0 : index
    %1623 = vector.load %arg9[%c4, %c0_504, %c0_505] : memref<5x8x128xf32, #tpu.memory_space<vmem>>, vector<1x8x128xf32>
    %1624 = vector.shape_cast %1623 : vector<1x8x128xf32> to vector<8x128xf32>
    %1625 = vector.shape_cast %1622 : vector<8x128xf32> to vector<1x8x128xf32>
    tpu.vector_store %arg9[%c4, %c0_504, %c0_505], %1625 {strides = array<i32>} : memref<5x8x128xf32, #tpu.memory_space<vmem>>, vector<1x8x128xf32>,
    %cst_506 = arith.constant dense<0.000000e+00> : vector<8x256xf32>
    %1626 = tpu.matmul %1622, %4, %cst_506 {dimension_numbers = #tpu.dot_dimension_numbers<[1], [0], [0], [1], [0, 0, 1, 1], [], []>} : vector<8x128xf32>, vector<128x256xf32>, vector<8x256xf32> -> vector<8x256xf32>
    %1627 = vector.extract_strided_slice %1626 {offsets = [0, 128], sizes = [8, 128], strides = [1, 1]} : vector<8x256xf32> to vector<8x128xf32>
    %1628 = vector.broadcast %5 : vector<1x128xf32> to vector<8x128xf32>
    %1629 = arith.addf %1627, %1628 : vector<8x128xf32>
    %cst_507 = arith.constant 5.000000e-01 : f32
    %1630 = vector.broadcast %cst_507 : f32 to vector<8x128xf32>
    %1631 = arith.mulf %1630, %1629 : vector<8x128xf32>
    %cst_508 = arith.constant 0.707106769 : f32
    %1632 = vector.broadcast %cst_508 : f32 to vector<8x128xf32>
    %1633 = arith.mulf %1629, %1632 : vector<8x128xf32>
    %1634 = math.absf %1633 : vector<8x128xf32>
    %cst_509 = arith.constant 0.327591091 : f32
    %1635 = vector.broadcast %cst_509 : f32 to vector<8x128xf32>
    %1636 = arith.mulf %1635, %1634 : vector<8x128xf32>
    %cst_510 = arith.constant 1.000000e+00 : f32
    %1637 = vector.broadcast %cst_510 : f32 to vector<8x128xf32>
    %1638 = arith.addf %1637, %1636 : vector<8x128xf32>
    %cst_511 = arith.constant 1.000000e+00 : f32
    %1639 = vector.broadcast %cst_511 : f32 to vector<8x128xf32>
    %1640 = arith.divf %1639, %1638 : vector<8x128xf32>
    %cst_512 = arith.constant 1.06140542 : f32
    %1641 = vector.broadcast %cst_512 : f32 to vector<8x128xf32>
    %1642 = arith.mulf %1641, %1640 : vector<8x128xf32>
    %cst_513 = arith.constant -1.45315206 : f32
    %1643 = vector.broadcast %cst_513 : f32 to vector<8x128xf32>
    %1644 = arith.addf %1642, %1643 : vector<8x128xf32>
    %1645 = arith.mulf %1644, %1640 : vector<8x128xf32>
    %cst_514 = arith.constant 1.42141378 : f32
    %1646 = vector.broadcast %cst_514 : f32 to vector<8x128xf32>
    %1647 = arith.addf %1645, %1646 : vector<8x128xf32>
    %1648 = arith.mulf %1647, %1640 : vector<8x128xf32>
    %cst_515 = arith.constant -0.284496725 : f32
    %1649 = vector.broadcast %cst_515 : f32 to vector<8x128xf32>
    %1650 = arith.addf %1648, %1649 : vector<8x128xf32>
    %1651 = arith.mulf %1650, %1640 : vector<8x128xf32>
    %cst_516 = arith.constant 0.254829586 : f32
    %1652 = vector.broadcast %cst_516 : f32 to vector<8x128xf32>
    %1653 = arith.addf %1651, %1652 : vector<8x128xf32>
    %1654 = arith.mulf %1653, %1640 : vector<8x128xf32>
    %cst_517 = arith.constant 0.000000e+00 : f32
    %1655 = vector.broadcast %cst_517 : f32 to vector<8x128xf32>
    %1656 = arith.subf %1655, %1634 : vector<8x128xf32>
    %1657 = arith.mulf %1656, %1634 : vector<8x128xf32>
    %1658 = math.exp %1657 : vector<8x128xf32>
    %1659 = arith.mulf %1654, %1658 : vector<8x128xf32>
    %cst_518 = arith.constant 1.000000e+00 : f32
    %1660 = vector.broadcast %cst_518 : f32 to vector<8x128xf32>
    %1661 = arith.subf %1660, %1659 : vector<8x128xf32>
    %cst_519 = arith.constant 0.000000e+00 : f32
    %1662 = vector.broadcast %cst_519 : f32 to vector<8x128xf32>
    %1663 = arith.cmpf oge, %1633, %1662 : vector<8x128xf32>
    %cst_520 = arith.constant 0.000000e+00 : f32
    %1664 = vector.broadcast %cst_520 : f32 to vector<8x128xf32>
    %1665 = arith.subf %1664, %1661 : vector<8x128xf32>
    %1666 = arith.select %1663, %1661, %1665 : vector<8x128xi1>, vector<8x128xf32>
    %cst_521 = arith.constant 1.000000e+00 : f32
    %1667 = vector.broadcast %cst_521 : f32 to vector<8x128xf32>
    %1668 = arith.addf %1667, %1666 : vector<8x128xf32>
    %1669 = arith.mulf %1631, %1668 : vector<8x128xf32>
    %1670 = vector.broadcast %6 : vector<1x128xf32> to vector<8x128xf32>
    %1671 = arith.mulf %1669, %1670 : vector<8x128xf32>
    %cst_522 = arith.constant dense<0.000000e+00> : vector<8xf32>
    %1672 = vector.multi_reduction <add>, %1671, %cst_522 [1] : vector<8x128xf32> to vector<8xf32>
    %1673 = vector.shape_cast %1672 : vector<8xf32> to vector<8x1xf32>
    %1674 = vector.broadcast %7 : vector<1x1xf32> to vector<8x1xf32>
    %1675 = arith.addf %1673, %1674 : vector<8x1xf32>
    %1676 = vector.shape_cast %1675 : vector<8x1xf32> to vector<8x1xf32>
    %1677 = vector.broadcast %1676 : vector<8x1xf32> to vector<8x128xf32>
    %c4_523 = arith.constant 4 : index
    %c0_524 = arith.constant 0 : index
    %c0_525 = arith.constant 0 : index
    %1678 = vector.load %arg10[%c4_523, %c0_524, %c0_525] : memref<5x8x128xf32, #tpu.memory_space<vmem>>, vector<1x8x128xf32>
    %1679 = vector.shape_cast %1678 : vector<1x8x128xf32> to vector<8x128xf32>
    %1680 = vector.shape_cast %1677 : vector<8x128xf32> to vector<1x8x128xf32>
    tpu.vector_store %arg10[%c4_523, %c0_524, %c0_525], %1680 {strides = array<i32>} : memref<5x8x128xf32, #tpu.memory_space<vmem>>, vector<1x8x128xf32>,
    return
  }
}

</mosaic_0001>

<bundles_post_ra>
// kernel: cot_chain.1
= control target key start
LH: loop header
LB: loop body
LE: loop exit
PB: predicated region body
PF: predicated region fallthrough
CT: control target
= control target key end

     0   :  { %s17287_s0 = inlined_call_operand.vmem [shape: f32[8,128], index: 0, kind: input, shape index: {}]   ;;  %s17288_s1 = inlined_call_operand.hbm [shape: f32[128,128], index: 1, kind: input, shape index: {}]   ;;  %s17289_s2 = inlined_call_operand.hbm [shape: f32[256,128], index: 2, kind: input, shape index: {}]   ;;  %s17290_s3 = inlined_call_operand.vmem [shape: f32[1,128], index: 3, kind: input, shape index: {}]   ;;  %s17291_s4 = inlined_call_operand.vmem [shape: f32[1,128], index: 4, kind: input, shape index: {}]   ;;  %s17292_s5 = inlined_call_operand.hbm [shape: f32[128,256], index: 5, kind: input, shape index: {}]   ;;  %s17293_s6 = inlined_call_operand.vmem [shape: f32[1,128], index: 6, kind: input, shape index: {}]   ;;  %s17294_s7 = inlined_call_operand.vmem [shape: f32[1,128], index: 7, kind: input, shape index: {}]   ;;  %s17295_s8 = inlined_call_operand.<no memory space> [shape: f32[1,1], index: 8, kind: input, shape index: {}]   ;;  %s17296_s9 = inlined_call_operand.hbm [shape: f32[5,8,128], index: 9, kind: output, shape index: {0}]   ;;  %s17297_s10 = inlined_call_operand.vmem [shape: f32[5,8,128], index: 10, kind: output, shape index: {1}]  }
   0x1   :  { %v16_v0 = vstv %s17295_s8 }
   0x2   :  { %17 = vst [vmem:[#allocation2] sm:$0x1] %v16_v0 }
   0x3   :  { %18 = vsyncpa [#allocation4], 0 }
   0x4   :  { %19 = vsyncpa [#allocation7], 0 }
   0x5   :  { %20 = vsyncpa [#allocation5], 0  ;;  %s14791_s15 = smov [#allocation6]   ;;  %s14792_s17 = smov [#allocation3]  }
   0x6   :  { %s40_s16 = sshll.u32 %s14791_s15, 4  ;;  %s28_s18 = sshll.u32 %s14792_s17, 4  ;;  %s41_s16 = int_to_ptr.vmem [resolvable:$true] %s40_s16  ;;  %s14864_s18 = int_to_ptr.vmem [resolvable:$true] %s28_s18 }
   0x7   :  { %s14697_s21 = scalar_lea.hbm %s17289_s2, 4096 }
   0x8   :  { %p14698_p0 = scmp.ne.s32.totalorder %s17289_s2, %s14697_s21  ;;  %p14701_p1 = scmp.lt.u32.totalorder %s14697_s21, %s17289_s2 }
   0xa   :  { %p14703_p2 = pnand %p14701_p1, %p14698_p0 }
   0xc   :  { %14706 = shalt.err (!%p14703_p2)
}
   0xd   :  { %s14707_s25 = scalar_lea.vmem %s41_s16, 4096  ;;  %p14712_p4 = scmp.lt.s32.totalorder %s41_s16, %s41_s16 }
   0xe   :  { %p14708_p3 = scmp.ne.s32.totalorder %s41_s16, %s14707_s25  ;;  %p14713_p5 = scmp.lt.s32.totalorder %s14707_s25, %s14707_s25 }
  0x10   :  { %p14714_p6 = por %p14713_p5, %p14712_p4 }
  0x12   :  { %p14715_p7 = pnand %p14714_p6, %p14708_p3 }
  0x14   :  { %14718 = shalt.err (!%p14715_p7)
}
  0x15   :  { %s14793_s26 = smov 128   ;;  %s14794_s27 = smov 8  }
  0x16   :  { %46 = dma.hbm_to_vmem [thread:$0]  %s17289_s2, 4096, %s41_s16, [#allocation7], %s14793_s26, %s14793_s26, %s14794_s27  }
  0x17   :  { %s14719_s12 = scalar_lea.hbm %s17288_s1, 2048 }
  0x18   :  { %p14720_p8 = scmp.ne.s32.totalorder %s17288_s1, %s14719_s12  ;;  %p14723_p9 = scmp.lt.u32.totalorder %s14719_s12, %s17288_s1 }
  0x1a   :  { %p14725_p10 = pnand %p14723_p9, %p14720_p8 }
  0x1c   :  { %14728 = shalt.err (!%p14725_p10)
}
  0x1d   :  { %s14729_s19 = scalar_lea.vmem %s14864_s18, 2048  ;;  %p14734_p12 = scmp.lt.s32.totalorder %s14864_s18, %s14864_s18 }
  0x1e   :  { %p14730_p11 = scmp.ne.s32.totalorder %s14864_s18, %s14729_s19  ;;  %p14735_p13 = scmp.lt.s32.totalorder %s14729_s19, %s14729_s19 }
  0x20   :  { %p14736_p0 = por %p14735_p13, %p14734_p12 }
  0x22   :  { %p14737_p1 = pnand %p14736_p0, %p14730_p11 }
  0x24   :  { %14740 = shalt.err (!%p14737_p1)
}
  0x25   :  { %34 = dma.hbm_to_vmem [thread:$0]  %s17288_s1, 2048, %s14864_s18, [#allocation4], %s14793_s26, %s14793_s26, %s14794_s27  }
  0x26   :  { %s14795_s20 = smov [#allocation8]   ;;  %s14741_s8 = scalar_lea.hbm %s17292_s5, 4096 }
  0x27   :  { %s56_s21 = sshll.u32 %s14795_s20, 4  ;;  %p14742_p2 = scmp.ne.s32.totalorder %s17292_s5, %s14741_s8  ;;  %s57_s21 = int_to_ptr.vmem [resolvable:$true] %s56_s21 }
  0x28   :  { %p14745_p3 = scmp.lt.u32.totalorder %s14741_s8, %s17292_s5 }
  0x2a   :  { %p14747_p4 = pnand %p14745_p3, %p14742_p2 }
  0x2c   :  { %14750 = shalt.err (!%p14747_p4)
}
  0x2d   :  { %s14751_s30 = scalar_lea.vmem %s57_s21, 4096  ;;  %p14756_p6 = scmp.lt.s32.totalorder %s57_s21, %s57_s21 }
  0x2e   :  { %p14752_p5 = scmp.ne.s32.totalorder %s57_s21, %s14751_s30  ;;  %p14757_p7 = scmp.lt.s32.totalorder %s14751_s30, %s14751_s30 }
  0x30   :  { %p14758_p8 = por %p14757_p7, %p14756_p6 }
  0x32   :  { %p14759_p9 = pnand %p14758_p8, %p14752_p5 }
  0x34   :  { %14762 = shalt.err (!%p14759_p9)
}
  0x35   :  { %s14796_s1 = smov 256   ;;  %s14797_s18 = smov 16  }
  0x36   :  { %62 = dma.hbm_to_vmem [thread:$0]  %s17292_s5, 4096, %s57_s21, [#allocation7], %s14796_s1, %s14796_s1, %s14797_s18  }
  0x37   :  { %14785 = dma.done.wait [#allocation4], 2048  }
  0x38   :  { %14786 = vsyncadd [#allocation4], 4294965248 }
  0x39   :  { %14787 = dma.done.wait [#allocation7], 8192  }
  0x3a   :  { %14788 = vsyncadd [#allocation7], 4294959104  ;;  %v17300_v1 = vmov 0.0|0.0   ;;  %v17298_v2 = vmov 0.0   ;;  %vm14800_vm0 = vmmov 0   ;;  %v129_v3 = vld [vmem:[#allocation8 + $0x8] sm:$0xff] }
  0x3b   :  { %11706 = vmatprep.subr.bf16.mxu1 %v17300_v1  ;;  %228 = vmatprep.mubr.f32.mxu0 %v17298_v2  ;;  %v131_v4 = vld [vmem:[#allocation8 + $0x18] sm:$0xff]  ;;  %v128_v5 = vld [vmem:[#allocation8] sm:$0xff]  ;;  %v130_v7 = vld [vmem:[#allocation8 + $0x10] sm:$0xff]  ;;  %s14801_s15 = smov 32   ;;  %s14802_s17 = smov 96   ;;  %vm1783_vm1 = vcmask 1040384  }
  0x3c   :  { %10446 = vmatprep.mubr.msk.f32.mxu1 %vm14800_vm0, %v17298_v2  ;;  %v14917_v6 = vpack.c.bf16 %v131_v4, %v129_v3  ;;  %v78_v8 = vld [vmem:[#allocation3] sm:$0xff]  ;;  %v79_v9 = vld [vmem:[#allocation3 + $0x8] sm:$0xff]  ;;  %v14919_v10 = vpack.c.bf16 %v130_v7, %v128_v5  ;;  %v135_v13 = vld [vmem:[#allocation8 + $0x38] sm:$0xff]  ;;  %s14803_s19 = smov 64   ;;  %vm1785_vm2 = vcmask 1041408   ;;  %vm1787_vm3 = vcmask 1042432  }
  0x3d   :  { %v14921_v11 = vpack.c.bf16 %v79_v9, %v78_v8  ;;  %v133_v12 = vld [vmem:[#allocation8 + $0x28] sm:$0xff]  ;;  %v132_v14 = vld [vmem:[#allocation8 + $0x20] sm:$0xff]  ;;  %v134_v16 = vld [vmem:[#allocation8 + $0x30] sm:$0xff]  ;;  %vm1789_vm4 = vcmask 1043456   ;;  %vm1791_vm5 = vcmask 1044480   ;;  %vm1793_vm6 = vcmask 1045504  }
  0x3e   :  { %11675 = vmatprep.subr.bf16.mxu0 %v14917_v6  ;;  %v14924_v15 = vpack.c.bf16 %v135_v13, %v133_v12  ;;  %v80_v17 = vld [vmem:[#allocation3 + $0x10] sm:$0xff]  ;;  %v81_v18 = vld [vmem:[#allocation3 + $0x18] sm:$0xff]  ;;  %v14928_v19 = vpack.c.bf16 %v134_v16, %v132_v14  ;;  %v137_v21 = vld [vmem:[#allocation8 + $0x48] sm:$0xff]  ;;  %vm1795_vm7 = vcmask 1046528   ;;  %s14805_s23 = smov [#allocation9]  }
  0x3f   :  { %11677 = vmatpush1.bf16.msra.mxu0 %v14919_v10  ;;  %11708 = vmatpush3.bf16.msra.mxu1 %v14921_v11  ;;  %v14930_v20 = vpack.c.bf16 %v81_v18, %v80_v17  ;;  %v139_v22 = vld [vmem:[#allocation8 + $0x58] sm:$0xff]  ;;  %v136_v23 = vld [vmem:[#allocation8 + $0x40] sm:$0xff]  ;;  %v138_v25 = vld [vmem:[#allocation8 + $0x50] sm:$0xff]  ;;  %s8297_s8 = sshll.u32 %s14805_s23, 4  ;;  %s8298_s8 = int_to_ptr.vmem [resolvable:$true] %s8297_s8 }
  0x40   :  { %11679 = vmatprep.subr.bf16.mxu0 %v14924_v15  ;;  %11709 = vmatprep.subr.bf16.mxu1 %v17300_v1  ;;  %v14934_v24 = vpack.c.bf16 %v139_v22, %v137_v21  ;;  %v82_v26 = vld [vmem:[#allocation3 + $0x20] sm:$0xff]  ;;  %v83_v27 = vld [vmem:[#allocation3 + $0x28] sm:$0xff]  ;;  %v143_v29 = vld [vmem:[#allocation8 + $0x78] sm:$0xff]  ;;  %v14938_v30 = vpack.c.bf16 %v138_v25, %v136_v23  ;;  %s14763_s24 = scalar_lea.vmem %s8298_s8, 640  ;;  %p14768_p11 = scmp.lt.s32.totalorder %s8298_s8, %s8298_s8 }
  0x41   :  { %v141_v28 = vld [vmem:[#allocation8 + $0x68] sm:$0xff]  ;;  %v14940_v31 = vpack.c.bf16 %v83_v27, %v82_v26  ;;  %v140_v32 = vld [vmem:[#allocation8 + $0x60] sm:$0xff]  ;;  %v142_v34 = vld [vmem:[#allocation8 + $0x70] sm:$0xff]  ;;  %p14764_p10 = scmp.ne.s32.totalorder %s8298_s8, %s14763_s24  ;;  %p14769_p12 = scmp.lt.s32.totalorder %s14763_s24, %s14763_s24 }
  0x42   :  { %v14944_v33 = vpack.c.bf16 %v143_v29, %v141_v28  ;;  %v84_v35 = vld [vmem:[#allocation3 + $0x30] sm:$0xff]  ;;  %v85_v36 = vld [vmem:[#allocation3 + $0x38] sm:$0xff]  ;;  %v145_v37 = vld [vmem:[#allocation8 + $0x88] sm:$0xff]  ;;  %v14948_v39 = vpack.c.bf16 %v142_v34, %v140_v32 }
  0x43   :  { %11681 = vmatpush1.bf16.msra.mxu0 %v14928_v19  ;;  %11711 = vmatpush3.bf16.msra.mxu1 %v14930_v20  ;;  %v147_v38 = vld [vmem:[#allocation8 + $0x98] sm:$0xff]  ;;  %v14950_v40 = vpack.c.bf16 %v85_v36, %v84_v35  ;;  %v144_v41 = vld [vmem:[#allocation8 + $0x80] sm:$0xff]  ;;  %v146_v43 = vld [vmem:[#allocation8 + $0x90] sm:$0xff]  ;;  %p14770_p13 = por %p14769_p12, %p14768_p11 }
  0x44   :  { %11683 = vmatprep.subr.bf16.mxu0 %v14934_v24  ;;  %11712 = vmatprep.subr.bf16.mxu1 %v17300_v1  ;;  %v14954_v42 = vpack.c.bf16 %v147_v38, %v145_v37  ;;  %v86_v44 = vld [vmem:[#allocation3 + $0x40] sm:$0xff]  ;;  %v87_v45 = vld [vmem:[#allocation3 + $0x48] sm:$0xff]  ;;  %v151_v47 = vld [vmem:[#allocation8 + $0xb8] sm:$0xff]  ;;  %v14958_v48 = vpack.c.bf16 %v146_v43, %v144_v41 }
  0x45   :  { %v149_v46 = vld [vmem:[#allocation8 + $0xa8] sm:$0xff]  ;;  %v14960_v49 = vpack.c.bf16 %v87_v45, %v86_v44  ;;  %v148_v50 = vld [vmem:[#allocation8 + $0xa0] sm:$0xff]  ;;  %v150_v52 = vld [vmem:[#allocation8 + $0xb0] sm:$0xff]  ;;  %p14771_p0 = pnand %p14770_p13, %p14764_p10 }
  0x46   :  { %v14964_v51 = vpack.c.bf16 %v151_v47, %v149_v46  ;;  %v88_v53 = vld [vmem:[#allocation3 + $0x50] sm:$0xff]  ;;  %v89_v54 = vld [vmem:[#allocation3 + $0x58] sm:$0xff]  ;;  %v153_v55 = vld [vmem:[#allocation8 + $0xc8] sm:$0xff]  ;;  %v14968_v57 = vpack.c.bf16 %v150_v52, %v148_v50 }
  0x47   :  { %11685 = vmatpush1.bf16.msra.mxu0 %v14938_v30  ;;  %11714 = vmatpush3.bf16.msra.mxu1 %v14940_v31  ;;  %v155_v56 = vld [vmem:[#allocation8 + $0xd8] sm:$0xff]  ;;  %v14970_v58 = vpack.c.bf16 %v89_v54, %v88_v53  ;;  %v152_v59 = vld [vmem:[#allocation8 + $0xc0] sm:$0xff]  ;;  %v154_v61 = vld [vmem:[#allocation8 + $0xd0] sm:$0xff] }
  0x48   :  { %11687 = vmatprep.subr.bf16.mxu0 %v14944_v33  ;;  %11715 = vmatprep.subr.bf16.mxu1 %v17300_v1  ;;  %v14974_v60 = vpack.c.bf16 %v155_v56, %v153_v55  ;;  %v90_v62 = vld [vmem:[#allocation3 + $0x60] sm:$0xff]  ;;  %v91_v63 = vld [vmem:[#allocation3 + $0x68] sm:$0xff]  ;;  %v159_v3 = vld [vmem:[#allocation8 + $0xf8] sm:$0xff]  ;;  %v14978_v4 = vpack.c.bf16 %v154_v61, %v152_v59 }
  0x49   :  { %v157_v0 = vld [vmem:[#allocation8 + $0xe8] sm:$0xff]  ;;  %v14980_v5 = vpack.c.bf16 %v91_v63, %v90_v62  ;;  %v156_v7 = vld [vmem:[#allocation8 + $0xe0] sm:$0xff]  ;;  %v158_v9 = vld [vmem:[#allocation8 + $0xf0] sm:$0xff] }
  0x4a   :  { %17308 = vst [vmem:[#allocation13_spill] sm:$0xff] %v14978_v4  ;;  %v14984_v8 = vpack.c.bf16 %v159_v3, %v157_v0  ;;  %v92_v12 = vld [vmem:[#allocation3 + $0x70] sm:$0xff]  ;;  %v93_v13 = vld [vmem:[#allocation3 + $0x78] sm:$0xff]  ;;  %v14988_v14 = vpack.c.bf16 %v158_v9, %v156_v7  ;;  %v110_v18 = vld [vmem:[#allocation6 + $0x80] sm:$0xff] }
  0x4b   :  { %11689 = vmatpush1.bf16.msra.mxu0 %v14948_v39  ;;  %11717 = vmatpush3.bf16.msra.mxu1 %v14950_v40  ;;  %v14990_v16 = vpack.c.bf16 %v93_v13, %v92_v12  ;;  %v163_v17 = vld [vmem:[%s17287_s0] sm:$0xff]  ;;  %v111_v21 = vld [vmem:[#allocation6 + $0x88] sm:$0xff]  ;;  %v112_v26 = vld [vmem:[#allocation6 + $0x90] sm:$0xff] }
  0x4c   :  { %11691 = vmatprep.subr.bf16.mxu0 %v14954_v42  ;;  %11718 = vmatprep.subr.bf16.mxu1 %v17300_v1  ;;  %17309 = vst [vmem:[#allocation14_spill] sm:$0xff] %v14984_v8  ;;  %17310 = vst [vmem:[#allocation15_spill] sm:$0xff] %v14988_v14  ;;  %v94_v22 = vld [vmem:[#allocation6] sm:$0xff]  ;;  %v15020_v23 = vpack.c.bf16 %v111_v21, %v110_v18  ;;  %v95_v25 = vld [vmem:[#allocation6 + $0x8] sm:$0xff] }
  0x4d   :  { %v113_v27 = vld [vmem:[#allocation6 + $0x98] sm:$0xff]  ;;  %v15022_v28 = vpack.c.bf16 %v95_v25, %v94_v22  ;;  %v96_v32 = vld [vmem:[#allocation6 + $0x10] sm:$0xff]  ;;  %v114_v35 = vld [vmem:[#allocation6 + $0xa0] sm:$0xff] }
  0x4e   :  { %v15024_v29 = vpack.c.bf16 %v113_v27, %v112_v26  ;;  %v97_v34 = vld [vmem:[#allocation6 + $0x18] sm:$0xff]  ;;  %v115_v36 = vld [vmem:[#allocation6 + $0xa8] sm:$0xff]  ;;  %v98_v41 = vld [vmem:[#allocation6 + $0x20] sm:$0xff] }
  0x4f   :  { %11693 = vmatpush1.bf16.msra.mxu0 %v14958_v48  ;;  %11720 = vmatpush3.bf16.msra.mxu1 %v14960_v49  ;;  %v15028_v37 = vpack.c.bf16 %v97_v34, %v96_v32  ;;  %v15031_v38 = vpack.c.bf16 %v115_v36, %v114_v35  ;;  %v99_v43 = vld [vmem:[#allocation6 + $0x28] sm:$0xff]  ;;  %v8314_v45 = vld [vmem:[%s17290_s3] ss:$0 sm:$0xff]  ;;  %v116_v56 = vld [vmem:[#allocation6 + $0xb0] sm:$0xff] }
  0x50   :  { %11695 = vmatprep.subr.bf16.mxu0 %v14964_v51  ;;  %11721 = vmatprep.subr.bf16.mxu1 %v17300_v1  ;;  %v15034_v44 = vpack.c.bf16 %v99_v43, %v98_v41  ;;  %v117_v59 = vld [vmem:[#allocation6 + $0xb8] sm:$0xff]  ;;  %v100_v63 = vld [vmem:[#allocation6 + $0x30] sm:$0xff]  ;;  %v118_v9 = vld [vmem:[#allocation6 + $0xc0] sm:$0xff] }
  0x51   :  { %v15047_v62 = vpack.c.bf16 %v117_v59, %v116_v56  ;;  %v101_v0 = vld [vmem:[#allocation6 + $0x38] sm:$0xff]  ;;  %v119_v12 = vld [vmem:[#allocation6 + $0xc8] sm:$0xff]  ;;  %v120_v22 = vld [vmem:[#allocation6 + $0xd0] sm:$0xff] }
  0x52   :  { %v15049_v7 = vpack.c.bf16 %v101_v0, %v100_v63  ;;  %v15053_v13 = vpack.c.bf16 %v119_v12, %v118_v9  ;;  %v103_v18 = vld [vmem:[#allocation6 + $0x48] sm:$0xff]  ;;  %v121_v25 = vld [vmem:[#allocation6 + $0xd8] sm:$0xff]  ;;  %v104_v27 = vld [vmem:[#allocation6 + $0x50] sm:$0xff] }
  0x53   :  { %11697 = vmatpush1.bf16.msra.mxu0 %v14968_v57  ;;  %11723 = vmatpush3.bf16.msra.mxu1 %v14970_v58  ;;  %v15059_v26 = vpack.c.bf16 %v121_v25, %v120_v22  ;;  %v105_v32 = vld [vmem:[#allocation6 + $0x58] sm:$0xff]  ;;  %v122_v35 = vld [vmem:[#allocation6 + $0xe0] sm:$0xff]  ;;  %v123_v36 = vld [vmem:[#allocation6 + $0xe8] sm:$0xff] }
  0x54   :  { %11699 = vmatprep.subr.bf16.mxu0 %v14974_v60  ;;  %11724 = vmatprep.subr.bf16.mxu1 %v17300_v1  ;;  %v15061_v34 = vpack.c.bf16 %v105_v32, %v104_v27  ;;  %v106_v41 = vld [vmem:[#allocation6 + $0x60] sm:$0xff]  ;;  %v15064_v43 = vpack.c.bf16 %v123_v36, %v122_v35  ;;  %v109_v56 = vld [vmem:[#allocation6 + $0x78] sm:$0xff] }
  0x55   :  { %v15121_v36 = vld [vmem:[%s17291_s4] sm:$0x1] }
  0x57   :  { %11701 = vmatpush1.bf16.msra.mxu0 %v14978_v4  ;;  %11726 = vmatpush3.bf16.msra.mxu1 %v14980_v5 }
  0x58   :  { %11703 = vmatprep.subr.bf16.mxu0 %v14984_v8  ;;  %11727 = vmatprep.subr.bf16.mxu1 %v17300_v1 }
  0x5b   :  { %11705 = vmatpush1.bf16.msra.mxu0 %v14988_v14  ;;  %11729 = vmatpush3.bf16.msra.mxu1 %v14990_v16 }
  0x5c   :  { %11762 = vmatprep.subr.bf16.mxu1 %v17300_v1  ;;  %11731 = vmatprep.subr.bf16.mxu0 %v15020_v23 }
  0x5e   :  { %229 = vmatmul.mubr.f32.vlgmr.msra.gmra.mrb[0].mxu0 %v163_v17  ;;  %10447 = vmatmul.mubr.f32.vlgmr.msra.gmra.mrb[0].mxu1 %v17298_v2  ;;  %v102_v17 = vld [vmem:[#allocation6 + $0x40] sm:$0xff] }
  0x5f   :  { %11764 = vmatpush3.bf16.msra.mxu1 %v14921_v11  ;;  %394 = vmatprep.mubr.f32.mxu0 %v17298_v2  ;;  %v15055_v21 = vpack.c.bf16 %v103_v18, %v102_v17 }
  0x60   :  { %11765 = vmatprep.subr.bf16.mxu1 %v17300_v1  ;;  %10481 = vmatprep.mubr.msk.f32.mxu1 %vm14800_vm0, %v17298_v2 }
  0x61   :  { %11733 = vmatpush3.bf16.msra.mxu0 %v15022_v28 }
  0x62   :  { %11735 = vmatprep.subr.bf16.mxu0 %v15024_v29 }
  0x63   :  { %11767 = vmatpush3.bf16.msra.mxu1 %v14930_v20 }
  0x64   :  { %11768 = vmatprep.subr.bf16.mxu1 %v17300_v1 }
  0x65   :  { %11737 = vmatpush3.bf16.msra.mxu0 %v15028_v37 }
  0x66   :  { %11739 = vmatprep.subr.bf16.mxu0 %v15031_v38 }
  0x67   :  { %11770 = vmatpush3.bf16.msra.mxu1 %v14940_v31 }
  0x68   :  { %11771 = vmatprep.subr.bf16.mxu1 %v17300_v1 }
  0x69   :  { %11741 = vmatpush3.bf16.msra.mxu0 %v15034_v44 }
  0x6a   :  { %11743 = vmatprep.subr.bf16.mxu0 %v15047_v62 }
  0x6b   :  { %11773 = vmatpush3.bf16.msra.mxu1 %v14950_v40 }
  0x6c   :  { %11774 = vmatprep.subr.bf16.mxu1 %v17300_v1 }
  0x6d   :  { %11745 = vmatpush3.bf16.msra.mxu0 %v15049_v7 }
  0x6e   :  { %11747 = vmatprep.subr.bf16.mxu0 %v15053_v13 }
  0x6f   :  { %11776 = vmatpush3.bf16.msra.mxu1 %v14960_v49 }
  0x70   :  { %11777 = vmatprep.subr.bf16.mxu1 %v17300_v1 }
  0x71   :  { %11749 = vmatpush3.bf16.msra.mxu0 %v15055_v21 }
  0x72   :  { %11751 = vmatprep.subr.bf16.mxu0 %v15059_v26 }
  0x73   :  { %11779 = vmatpush3.bf16.msra.mxu1 %v14970_v58 }
  0x74   :  { %11780 = vmatprep.subr.bf16.mxu1 %v17300_v1 }
  0x75   :  { %11753 = vmatpush3.bf16.msra.mxu0 %v15061_v34 }
  0x76   :  { %11755 = vmatprep.subr.bf16.mxu0 %v15064_v43 }
  0x77   :  { %11782 = vmatpush3.bf16.msra.mxu1 %v14980_v5 }
  0x78   :  { %11783 = vmatprep.subr.bf16.mxu1 %v17300_v1 }
  0x7b   :  { %11785 = vmatpush3.bf16.msra.mxu1 %v14990_v16 }
  0x7c   :  { %11818 = vmatprep.subr.bf16.mxu1 %v17300_v1 }
 0x131   :  { %v230_v46 = vpop.f32.mrb[0].mxu0  ;;  %v15041_v47 = vpop.f32.mrb[0].mxu1 }
 0x132   :  { %v15043_v50 = vadd.f32 %v8314_v45, %v230_v46  ;;  %v232_v52 = vpop.f32.mrb[1].mxu0  ;;  %v10448_v53 = vpop.f32.mrb[1].mxu1  ;;  %v107_v45 = vld [vmem:[#allocation6 + $0x68] sm:$0xff]  ;;  %v124_v46 = vld [vmem:[#allocation6 + $0xf0] sm:$0xff] }
 0x133   :  { %v125_v52 = vld [vmem:[#allocation6 + $0xf8] sm:$0xff]  ;;  %v15067_v53 = vpack.c.bf16 %v107_v45, %v106_v41 }
 0x134   :  { %v311_v54 = vadd.f32 %v15041_v47, %v15043_v50 }
 0x135   :  { %11757 = vmatpush3.bf16.msra.mxu0 %v15067_v53 }
 0x136   :  { %v8315_v55 = vmul.f32 -1.442695, %v311_v54 }
 0x138   :  { %14027 = vpow2.f32 %v8315_v55  ;;  %v108_v55 = vld [vmem:[#allocation6 + $0x70] sm:$0xff] }
 0x142   :  { %v14028_v61 = vpop.eup %14027 }
 0x143   :  { %v315_v3 = vadd.f32 1.0, %v14028_v61  ;;  %v15075_v61 = vpack.c.bf16 %v109_v56, %v108_v55 }
 0x145   :  { %14029 = vrcp.f32 %v315_v3 }
 0x146   :  { %14031 = vtanh.f32 %v311_v54  ;;  %v15070_v54 = vpack.c.bf16 %v125_v52, %v124_v46 }
 0x148   :  { %11759 = vmatprep.subr.bf16.mxu0 %v15070_v54 }
 0x149   :  { %11761 = vmatpush3.bf16.msra.mxu0 %v15075_v61 }
 0x14a   :  { %11787 = vmatprep.subr.bf16.mxu0 %v15020_v23 }
 0x14f   :  { %v14030_v59 = vpop.eup %14029 }
 0x150   :  { %323 = vrot.lane.b32.xlu1 %v14030_v59, %s14801_s15  ;;  %319 = vrot.lane.b32.xlu0 %v14030_v59, %s14802_s17  ;;  %v14032_v63 = vpop.eup %14031 }
 0x154   :  { %321 = vrot.lane.b32.xlu0 %v14032_v63, %s14803_s19 }
 0x1c2   :  { %v320_v0 = vpop.permute.xlu0 %319  ;;  %v324_v22 = vpop.permute.xlu1 %323 }
 0x1c3   :  { %v325_v9 = vmul.f32 0.0, %v320_v0 }
 0x1c6   :  { %v322_v3 = vpop.permute.xlu0 %321 }
 0x1c7   :  { %v326_v12 = vmul.f32 %v14030_v59, %v322_v3 }
 0x1c9   :  { %v15081_v17 = vadd.f32 %v326_v12, %v325_v9 }
 0x1cb   :  { %14033 = vtanh.f32 %v15081_v17 }
 0x1d5   :  { %v14034_v18 = vpop.eup %14033 }
 0x1d6   :  { %v329_v25 = vmul.f32 %v14034_v18, %v324_v22 }
 0x1d8   :  { %395 = vmatmul.mubr.f32.vlgmr.msra.gmra.mrb[2].mxu0 %v329_v25  ;;  %10482 = vmatmul.mubr.f32.vlgmr.msra.gmra.mrb[2].mxu1 %v329_v25 }
 0x1d9   :  { %11789 = vmatpush3.bf16.msra.mxu0 %v15022_v28  ;;  %11820 = vmatpush3.bf16.msra.mxu1 %v14921_v11 }
 0x1da   :  { %11791 = vmatprep.subr.bf16.mxu0 %v15024_v29  ;;  %11821 = vmatprep.subr.bf16.mxu1 %v17300_v1 }
 0x1db   :  { %10516 = vmatprep.mubr.msk.f32.mxu1 %vm14800_vm0, %v17298_v2 }
 0x1dd   :  { %11793 = vmatpush3.bf16.msra.mxu0 %v15028_v37  ;;  %11823 = vmatpush3.bf16.msra.mxu1 %v14930_v20 }
 0x1de   :  { %11795 = vmatprep.subr.bf16.mxu0 %v15031_v38  ;;  %11824 = vmatprep.subr.bf16.mxu1 %v17300_v1 }
 0x1e1   :  { %11797 = vmatpush3.bf16.msra.mxu0 %v15034_v44  ;;  %11826 = vmatpush3.bf16.msra.mxu1 %v14940_v31 }
 0x1e2   :  { %11799 = vmatprep.subr.bf16.mxu0 %v15047_v62  ;;  %11827 = vmatprep.subr.bf16.mxu1 %v17300_v1 }
 0x1e5   :  { %11801 = vmatpush3.bf16.msra.mxu0 %v15049_v7  ;;  %11829 = vmatpush3.bf16.msra.mxu1 %v14950_v40 }
 0x1e6   :  { %11803 = vmatprep.subr.bf16.mxu0 %v15053_v13  ;;  %11830 = vmatprep.subr.bf16.mxu1 %v17300_v1 }
 0x1e9   :  { %11805 = vmatpush3.bf16.msra.mxu0 %v15055_v21  ;;  %11832 = vmatpush3.bf16.msra.mxu1 %v14960_v49 }
 0x1ea   :  { %11807 = vmatprep.subr.bf16.mxu0 %v15059_v26  ;;  %11833 = vmatprep.subr.bf16.mxu1 %v17300_v1 }
 0x1ed   :  { %11809 = vmatpush3.bf16.msra.mxu0 %v15061_v34  ;;  %11835 = vmatpush3.bf16.msra.mxu1 %v14970_v58 }
 0x1ee   :  { %11811 = vmatprep.subr.bf16.mxu0 %v15064_v43  ;;  %11836 = vmatprep.subr.bf16.mxu1 %v17300_v1 }
 0x1f1   :  { %11813 = vmatpush3.bf16.msra.mxu0 %v15067_v53  ;;  %11838 = vmatpush3.bf16.msra.mxu1 %v14980_v5 }
 0x1f2   :  { %11815 = vmatprep.subr.bf16.mxu0 %v15070_v54  ;;  %11839 = vmatprep.subr.bf16.mxu1 %v17300_v1 }
 0x1f5   :  { %11817 = vmatpush3.bf16.msra.mxu0 %v15075_v61  ;;  %11841 = vmatpush3.bf16.msra.mxu1 %v14990_v16 }
 0x1f6   :  { %11843 = vmatprep.subr.bf16.mxu0 %v15020_v23  ;;  %11874 = vmatprep.subr.bf16.mxu1 %v17300_v1 }
 0x2ab   :  { %v8451_v27 = vpop.f32.mrb[2].mxu0  ;;  %v484_v32 = vpop.f32.mrb[2].mxu1 }
 0x2ac   :  { %v489_v35 = vrot.slane %v484_v32, 7  ;;  %v8452_v41 = vpop.f32.mrb[3].mxu0  ;;  %v10483_v45 = vpop.f32.mrb[3].mxu1 }
 0x2ad   :  { %v8453_v46 = vadd.f32 %v8452_v41, %v8451_v27 }
 0x2ae   :  { %v491_v52 = vadd.f32 %v489_v35, %v15043_v50 }
 0x2af   :  { %v397_v55 = vadd.f32 %v8453_v46, %v15121_v36 }
 0x2b0   :  { %v8317_v56 = vmul.f32 -1.442695, %v491_v52  ;;  %14035 = vtanh.f32 %v491_v52 }
 0x2b1   :  { %v8316_v59 = vmul.f32 -1.442695, %v397_v55 }
 0x2b2   :  { %14037 = vpow2.f32 %v8317_v56 }
 0x2b3   :  { %14039 = vpow2.f32 %v8316_v59 }
 0x2b4   :  { %14041 = vtanh.f32 %v397_v55 }
 0x2ba   :  { %v14036_v63 = vpop.eup %14035 }
 0x2bb   :  { %v505_v0 = vrot.slane %v14036_v63, 1 }
 0x2bc   :  { %v14038_v3 = vpop.eup %14037 }
 0x2bd   :  { %v14040_v9 = vpop.eup %14039  ;;  %v495_v12 = vadd.f32 1.0, %v14038_v3  ;;  %507 = vrot.lane.b32.xlu1 %v505_v0, %s14803_s19 }
 0x2be   :  { %v403_v18 = vadd.f32 1.0, %v14040_v9  ;;  %v14042_v22 = vpop.eup %14041 }
 0x2bf   :  { %14043 = vrcp.f32 %v495_v12 }
 0x2c0   :  { %14045 = vrcp.f32 %v403_v18 }
 0x2c1   :  { %409 = vrot.lane.b32.xlu1 %v14042_v22, %s14803_s19 }
 0x2c9   :  { %v14044_v25 = vpop.eup %14043 }
 0x2ca   :  { %v14046_v27 = vpop.eup %14045  ;;  %v500_v32 = vrot.slane %v14044_v25, 1 }
 0x2cb   :  { %407 = vrot.lane.b32.xlu0 %v14046_v27, %s14802_s17  ;;  %411 = vrot.lane.b32.xlu1 %v14046_v27, %s14801_s15 }
 0x2cf   :  { %502 = vrot.lane.b32.xlu0 %v500_v32, %s14802_s17 }
 0x2d3   :  { %509 = vrot.lane.b32.xlu0 %v500_v32, %s14801_s15 }
 0x32f   :  { %v508_v35 = vpop.permute.xlu1 %507 }
 0x330   :  { %v513_v41 = vrot.slane %v508_v35, 7 }
 0x332   :  { %v515_v52 = vmul.f32 %v14044_v25, %v513_v41 }
 0x333   :  { %v410_v45 = vpop.permute.xlu1 %409 }
 0x334   :  { %v414_v55 = vmul.f32 %v14046_v27, %v410_v45  ;;  %v517_v0 = vrot.slane %v515_v52, 1 }
 0x33d   :  { %v408_v46 = vpop.permute.xlu0 %407  ;;  %v412_v18 = vpop.permute.xlu1 %411 }
 0x33e   :  { %v413_v56 = vmul.f32 0.0, %v408_v46 }
 0x340   :  { %v15131_v59 = vadd.f32 %v414_v55, %v413_v56 }
 0x341   :  { %v503_v63 = vpop.permute.xlu0 %502 }
 0x342   :  { %14047 = vtanh.f32 %v15131_v59  ;;  %v511_v3 = vmul.f32 %v503_v63, %v15081_v17 }
 0x344   :  { %v15135_v9 = vadd.f32 %v517_v0, %v511_v3 }
 0x345   :  { %v510_v27 = vpop.permute.xlu0 %509 }
 0x346   :  { %14049 = vtanh.f32 %v15135_v9 }
 0x34c   :  { %v14048_v12 = vpop.eup %14047 }
 0x34d   :  { %v15138_v22 = vmul.f32 %v14048_v12, %v412_v18 }
 0x34f   :  { %586 = vmatprep.mubr.f32.mxu0 %v15138_v22 }
 0x350   :  { %v14050_v25 = vpop.eup %14049 }
 0x351   :  { %v521_v32 = vmul.f32 %v14050_v25, %v510_v27 }
 0x353   :  { %587 = vmatmul.mubr.f32.vlgmr.msra.gmra.mrb[4].mxu0 %v521_v32  ;;  %10517 = vmatmul.mubr.f32.vlgmr.msra.gmra.mrb[4].mxu1 %v521_v32 }
 0x354   :  { %11845 = vmatpush3.bf16.msra.mxu0 %v15022_v28  ;;  %11876 = vmatpush3.bf16.msra.mxu1 %v14921_v11 }
 0x355   :  { %11847 = vmatprep.subr.bf16.mxu0 %v15024_v29  ;;  %11877 = vmatprep.subr.bf16.mxu1 %v17300_v1 }
 0x356   :  { %10551 = vmatprep.mubr.msk.f32.mxu1 %vm14800_vm0, %v17298_v2 }
 0x358   :  { %11849 = vmatpush3.bf16.msra.mxu0 %v15028_v37  ;;  %11879 = vmatpush3.bf16.msra.mxu1 %v14930_v20 }
 0x359   :  { %11851 = vmatprep.subr.bf16.mxu0 %v15031_v38  ;;  %11880 = vmatprep.subr.bf16.mxu1 %v17300_v1 }
 0x35c   :  { %11853 = vmatpush3.bf16.msra.mxu0 %v15034_v44  ;;  %11882 = vmatpush3.bf16.msra.mxu1 %v14940_v31 }
 0x35d   :  { %11855 = vmatprep.subr.bf16.mxu0 %v15047_v62  ;;  %11883 = vmatprep.subr.bf16.mxu1 %v17300_v1 }
 0x360   :  { %11857 = vmatpush3.bf16.msra.mxu0 %v15049_v7  ;;  %11885 = vmatpush3.bf16.msra.mxu1 %v14950_v40 }
 0x361   :  { %11859 = vmatprep.subr.bf16.mxu0 %v15053_v13  ;;  %11886 = vmatprep.subr.bf16.mxu1 %v17300_v1 }
 0x364   :  { %11861 = vmatpush3.bf16.msra.mxu0 %v15055_v21  ;;  %11888 = vmatpush3.bf16.msra.mxu1 %v14960_v49 }
 0x365   :  { %11863 = vmatprep.subr.bf16.mxu0 %v15059_v26  ;;  %11889 = vmatprep.subr.bf16.mxu1 %v17300_v1 }
 0x368   :  { %11865 = vmatpush3.bf16.msra.mxu0 %v15061_v34  ;;  %11891 = vmatpush3.bf16.msra.mxu1 %v14970_v58 }
 0x369   :  { %11867 = vmatprep.subr.bf16.mxu0 %v15064_v43  ;;  %11892 = vmatprep.subr.bf16.mxu1 %v17300_v1 }
 0x36c   :  { %11869 = vmatpush3.bf16.msra.mxu0 %v15067_v53  ;;  %11894 = vmatpush3.bf16.msra.mxu1 %v14980_v5 }
 0x36d   :  { %11871 = vmatprep.subr.bf16.mxu0 %v15070_v54  ;;  %11895 = vmatprep.subr.bf16.mxu1 %v17300_v1 }
 0x370   :  { %11873 = vmatpush3.bf16.msra.mxu0 %v15075_v61  ;;  %11897 = vmatpush3.bf16.msra.mxu1 %v14990_v16 }
 0x371   :  { %11899 = vmatprep.subr.bf16.mxu0 %v15020_v23  ;;  %11930 = vmatprep.subr.bf16.mxu1 %v17300_v1 }
 0x426   :  { %v8503_v17 = vpop.f32.mrb[4].mxu0  ;;  %v676_v35 = vpop.f32.mrb[4].mxu1 }
 0x427   :  { %v681_v41 = vrot.slane %v676_v35, 6  ;;  %v8504_v45 = vpop.f32.mrb[5].mxu0  ;;  %v10518_v46 = vpop.f32.mrb[5].mxu1 }
 0x428   :  { %v8505_v52 = vadd.f32 %v8504_v45, %v8503_v17 }
 0x429   :  { %v683_v55 = vadd.f32 %v681_v41, %v15043_v50 }
 0x42a   :  { %v589_v56 = vadd.f32 %v8505_v52, %v15121_v36 }
 0x42b   :  { %v8319_v63 = vmul.f32 -1.442695, %v683_v55  ;;  %14051 = vtanh.f32 %v683_v55 }
 0x42c   :  { %v8318_v0 = vmul.f32 -1.442695, %v589_v56 }
 0x42d   :  { %14053 = vpow2.f32 %v8319_v63 }
 0x42e   :  { %14055 = vpow2.f32 %v8318_v0 }
 0x42f   :  { %14057 = vtanh.f32 %v589_v56 }
 0x435   :  { %v14052_v3 = vpop.eup %14051 }
 0x436   :  { %v697_v12 = vrot.slane %v14052_v3, 2 }
 0x437   :  { %v14054_v18 = vpop.eup %14053 }
 0x438   :  { %v14056_v25 = vpop.eup %14055  ;;  %v687_v27 = vadd.f32 1.0, %v14054_v18  ;;  %699 = vrot.lane.b32.xlu1 %v697_v12, %s14803_s19 }
 0x439   :  { %v595_v32 = vadd.f32 1.0, %v14056_v25  ;;  %v14058_v17 = vpop.eup %14057 }
 0x43a   :  { %14059 = vrcp.f32 %v687_v27 }
 0x43b   :  { %14061 = vrcp.f32 %v595_v32 }
 0x43c   :  { %601 = vrot.lane.b32.xlu1 %v14058_v17, %s14803_s19 }
 0x444   :  { %v14060_v35 = vpop.eup %14059 }
 0x445   :  { %v14062_v41 = vpop.eup %14061  ;;  %v692_v45 = vrot.slane %v14060_v35, 2 }
 0x446   :  { %599 = vrot.lane.b32.xlu0 %v14062_v41, %s14802_s17  ;;  %603 = vrot.lane.b32.xlu1 %v14062_v41, %s14801_s15 }
 0x44a   :  { %694 = vrot.lane.b32.xlu0 %v692_v45, %s14802_s17 }
 0x44e   :  { %701 = vrot.lane.b32.xlu0 %v692_v45, %s14801_s15 }
 0x4aa   :  { %v700_v46 = vpop.permute.xlu1 %699 }
 0x4ab   :  { %v705_v52 = vrot.slane %v700_v46, 6 }
 0x4ad   :  { %v707_v63 = vmul.f32 %v14060_v35, %v705_v52 }
 0x4ae   :  { %v602_v55 = vpop.permute.xlu1 %601 }
 0x4af   :  { %v606_v0 = vmul.f32 %v14062_v41, %v602_v55  ;;  %v709_v25 = vrot.slane %v707_v63, 2 }
 0x4b8   :  { %v600_v56 = vpop.permute.xlu0 %599  ;;  %v604_v45 = vpop.permute.xlu1 %603 }
 0x4b9   :  { %v605_v3 = vmul.f32 %v600_v56, %v15131_v59 }
 0x4bb   :  { %v15184_v12 = vadd.f32 %v606_v0, %v605_v3 }
 0x4bc   :  { %v695_v18 = vpop.permute.xlu0 %694 }
 0x4bd   :  { %14063 = vtanh.f32 %v15184_v12  ;;  %v703_v27 = vmul.f32 %v695_v18, %v15135_v9 }
 0x4bf   :  { %v15188_v32 = vadd.f32 %v709_v25, %v703_v27 }
 0x4c0   :  { %v702_v59 = vpop.permute.xlu0 %701 }
 0x4c1   :  { %14065 = vtanh.f32 %v15188_v32 }
 0x4c7   :  { %v14064_v17 = vpop.eup %14063 }
 0x4c8   :  { %v15191_v46 = vmul.f32 %v14064_v17, %v604_v45 }
 0x4ca   :  { %778 = vmatprep.mubr.f32.mxu0 %v15191_v46 }
 0x4cb   :  { %v14066_v35 = vpop.eup %14065 }
 0x4cc   :  { %v713_v41 = vmul.f32 %v14066_v35, %v702_v59 }
 0x4ce   :  { %779 = vmatmul.mubr.f32.vlgmr.msra.gmra.mrb[6].mxu0 %v713_v41  ;;  %10552 = vmatmul.mubr.f32.vlgmr.msra.gmra.mrb[6].mxu1 %v713_v41 }
 0x4cf   :  { %11901 = vmatpush3.bf16.msra.mxu0 %v15022_v28  ;;  %11932 = vmatpush3.bf16.msra.mxu1 %v14921_v11 }
 0x4d0   :  { %11903 = vmatprep.subr.bf16.mxu0 %v15024_v29  ;;  %11933 = vmatprep.subr.bf16.mxu1 %v17300_v1 }
 0x4d1   :  { %10586 = vmatprep.mubr.msk.f32.mxu1 %vm14800_vm0, %v17298_v2 }
 0x4d3   :  { %11905 = vmatpush3.bf16.msra.mxu0 %v15028_v37  ;;  %11935 = vmatpush3.bf16.msra.mxu1 %v14930_v20 }
 0x4d4   :  { %11907 = vmatprep.subr.bf16.mxu0 %v15031_v38  ;;  %11936 = vmatprep.subr.bf16.mxu1 %v17300_v1 }
 0x4d7   :  { %11909 = vmatpush3.bf16.msra.mxu0 %v15034_v44  ;;  %11938 = vmatpush3.bf16.msra.mxu1 %v14940_v31 }
 0x4d8   :  { %11911 = vmatprep.subr.bf16.mxu0 %v15047_v62  ;;  %11939 = vmatprep.subr.bf16.mxu1 %v17300_v1 }
 0x4db   :  { %11913 = vmatpush3.bf16.msra.mxu0 %v15049_v7  ;;  %11941 = vmatpush3.bf16.msra.mxu1 %v14950_v40 }
 0x4dc   :  { %11915 = vmatprep.subr.bf16.mxu0 %v15053_v13  ;;  %11942 = vmatprep.subr.bf16.mxu1 %v17300_v1 }
 0x4df   :  { %11917 = vmatpush3.bf16.msra.mxu0 %v15055_v21  ;;  %11944 = vmatpush3.bf16.msra.mxu1 %v14960_v49 }
 0x4e0   :  { %11919 = vmatprep.subr.bf16.mxu0 %v15059_v26  ;;  %11945 = vmatprep.subr.bf16.mxu1 %v17300_v1 }
 0x4e3   :  { %11921 = vmatpush3.bf16.msra.mxu0 %v15061_v34  ;;  %11947 = vmatpush3.bf16.msra.mxu1 %v14970_v58 }
 0x4e4   :  { %11923 = vmatprep.subr.bf16.mxu0 %v15064_v43  ;;  %11948 = vmatprep.subr.bf16.mxu1 %v17300_v1 }
 0x4e7   :  { %11925 = vmatpush3.bf16.msra.mxu0 %v15067_v53  ;;  %11950 = vmatpush3.bf16.msra.mxu1 %v14980_v5 }
 0x4e8   :  { %11927 = vmatprep.subr.bf16.mxu0 %v15070_v54  ;;  %11951 = vmatprep.subr.bf16.mxu1 %v17300_v1 }
 0x4eb   :  { %11929 = vmatpush3.bf16.msra.mxu0 %v15075_v61  ;;  %11953 = vmatpush3.bf16.msra.mxu1 %v14990_v16 }
 0x4ec   :  { %11955 = vmatprep.subr.bf16.mxu0 %v15020_v23  ;;  %11986 = vmatprep.subr.bf16.mxu1 %v17300_v1 }
 0x5a1   :  { %v8555_v9 = vpop.f32.mrb[6].mxu0  ;;  %v868_v52 = vpop.f32.mrb[6].mxu1 }
 0x5a2   :  { %v873_v55 = vrot.slane %v868_v52, 5  ;;  %v8556_v56 = vpop.f32.mrb[7].mxu0  ;;  %v10553_v63 = vpop.f32.mrb[7].mxu1 }
 0x5a3   :  { %v8557_v0 = vadd.f32 %v8556_v56, %v8555_v9 }
 0x5a4   :  { %v875_v3 = vadd.f32 %v873_v55, %v15043_v50 }
 0x5a5   :  { %v781_v18 = vadd.f32 %v8557_v0, %v15121_v36 }
 0x5a6   :  { %v8321_v25 = vmul.f32 -1.442695, %v875_v3  ;;  %14067 = vtanh.f32 %v875_v3 }
 0x5a7   :  { %v8320_v27 = vmul.f32 -1.442695, %v781_v18 }
 0x5a8   :  { %14069 = vpow2.f32 %v8321_v25 }
 0x5a9   :  { %14071 = vpow2.f32 %v8320_v27 }
 0x5aa   :  { %14073 = vtanh.f32 %v781_v18 }
 0x5b0   :  { %v14068_v17 = vpop.eup %14067 }
 0x5b1   :  { %v889_v45 = vrot.slane %v14068_v17, 3 }
 0x5b2   :  { %v14070_v35 = vpop.eup %14069 }
 0x5b3   :  { %v14072_v59 = vpop.eup %14071  ;;  %v879_v41 = vadd.f32 1.0, %v14070_v35  ;;  %891 = vrot.lane.b32.xlu1 %v889_v45, %s14803_s19 }
 0x5b4   :  { %v787_v52 = vadd.f32 1.0, %v14072_v59  ;;  %v14074_v9 = vpop.eup %14073 }
 0x5b5   :  { %14075 = vrcp.f32 %v879_v41 }
 0x5b6   :  { %14077 = vrcp.f32 %v787_v52 }
 0x5b7   :  { %793 = vrot.lane.b32.xlu1 %v14074_v9, %s14803_s19 }
 0x5bf   :  { %v14076_v55 = vpop.eup %14075 }
 0x5c0   :  { %v14078_v56 = vpop.eup %14077  ;;  %v884_v63 = vrot.slane %v14076_v55, 3 }
 0x5c1   :  { %791 = vrot.lane.b32.xlu0 %v14078_v56, %s14802_s17  ;;  %795 = vrot.lane.b32.xlu1 %v14078_v56, %s14801_s15 }
 0x5c5   :  { %886 = vrot.lane.b32.xlu0 %v884_v63, %s14802_s17 }
 0x5c9   :  { %893 = vrot.lane.b32.xlu0 %v884_v63, %s14801_s15 }
 0x625   :  { %v892_v0 = vpop.permute.xlu1 %891 }
 0x626   :  { %v897_v3 = vrot.slane %v892_v0, 5  ;;  %v1763_v0 = vrot.slane %v15191_v46, 7 }
 0x628   :  { %v899_v27 = vmul.f32 %v14076_v55, %v897_v3  ;;  %v1784_v3 = vsel %vm1783_vm1, %v15138_v22, %v1763_v0 }
 0x629   :  { %v794_v18 = vpop.permute.xlu1 %793 }
 0x62a   :  { %v798_v17 = vmul.f32 %v14078_v56, %v794_v18  ;;  %v901_v41 = vrot.slane %v899_v27, 3 }
 0x633   :  { %v792_v25 = vpop.permute.xlu0 %791  ;;  %v796_v2 = vpop.permute.xlu1 %795 }
 0x634   :  { %v797_v45 = vmul.f32 %v792_v25, %v15184_v12 }
 0x636   :  { %v15237_v35 = vadd.f32 %v798_v17, %v797_v45 }
 0x637   :  { %v887_v59 = vpop.permute.xlu0 %886 }
 0x638   :  { %14079 = vtanh.f32 %v15237_v35  ;;  %v895_v52 = vmul.f32 %v887_v59, %v15188_v32 }
 0x63a   :  { %v15241_v9 = vadd.f32 %v901_v41, %v895_v52 }
 0x63b   :  { %v894_v18 = vpop.permute.xlu0 %893 }
 0x63c   :  { %14081 = vtanh.f32 %v15241_v9 }
 0x642   :  { %v14080_v63 = vpop.eup %14079 }
 0x643   :  { %v801_v55 = vmul.f32 %v14080_v63, %v796_v2  ;;  %v17311_v2 = vmov 0.0  }
 0x645   :  { %v1766_v12 = vrot.slane %v801_v55, 6  ;;  %970 = vmatprep.mubr.f32.mxu0 %v801_v55 }
 0x646   :  { %v14082_v56 = vpop.eup %14081 }
 0x647   :  { %v15248_v32 = vsel %vm1785_vm2, %v1784_v3, %v1766_v12  ;;  %v905_v25 = vmul.f32 %v14082_v56, %v894_v18 }
 0x649   :  { %971 = vmatmul.mubr.f32.vlgmr.msra.gmra.mrb[8].mxu0 %v905_v25  ;;  %10587 = vmatmul.mubr.f32.vlgmr.msra.gmra.mrb[8].mxu1 %v905_v25 }
 0x64a   :  { %11957 = vmatpush3.bf16.msra.mxu0 %v15022_v28  ;;  %11988 = vmatpush3.bf16.msra.mxu1 %v14921_v11 }
 0x64b   :  { %11959 = vmatprep.subr.bf16.mxu0 %v15024_v29  ;;  %11989 = vmatprep.subr.bf16.mxu1 %v17300_v1 }
 0x64c   :  { %10621 = vmatprep.mubr.msk.f32.mxu1 %vm14800_vm0, %v17311_v2 }
 0x64e   :  { %11961 = vmatpush3.bf16.msra.mxu0 %v15028_v37  ;;  %11991 = vmatpush3.bf16.msra.mxu1 %v14930_v20 }
 0x64f   :  { %11963 = vmatprep.subr.bf16.mxu0 %v15031_v38  ;;  %11992 = vmatprep.subr.bf16.mxu1 %v17300_v1 }
 0x652   :  { %11965 = vmatpush3.bf16.msra.mxu0 %v15034_v44  ;;  %11994 = vmatpush3.bf16.msra.mxu1 %v14940_v31 }
 0x653   :  { %11967 = vmatprep.subr.bf16.mxu0 %v15047_v62  ;;  %11995 = vmatprep.subr.bf16.mxu1 %v17300_v1 }
 0x656   :  { %11969 = vmatpush3.bf16.msra.mxu0 %v15049_v7  ;;  %11997 = vmatpush3.bf16.msra.mxu1 %v14950_v40 }
 0x657   :  { %11971 = vmatprep.subr.bf16.mxu0 %v15053_v13  ;;  %11998 = vmatprep.subr.bf16.mxu1 %v17300_v1 }
 0x65a   :  { %11973 = vmatpush3.bf16.msra.mxu0 %v15055_v21  ;;  %12000 = vmatpush3.bf16.msra.mxu1 %v14960_v49 }
 0x65b   :  { %11975 = vmatprep.subr.bf16.mxu0 %v15059_v26  ;;  %12001 = vmatprep.subr.bf16.mxu1 %v17300_v1 }
 0x65e   :  { %11977 = vmatpush3.bf16.msra.mxu0 %v15061_v34  ;;  %12003 = vmatpush3.bf16.msra.mxu1 %v14970_v58 }
 0x65f   :  { %11979 = vmatprep.subr.bf16.mxu0 %v15064_v43  ;;  %12004 = vmatprep.subr.bf16.mxu1 %v17300_v1 }
 0x662   :  { %11981 = vmatpush3.bf16.msra.mxu0 %v15067_v53  ;;  %12006 = vmatpush3.bf16.msra.mxu1 %v14980_v5 }
 0x663   :  { %11983 = vmatprep.subr.bf16.mxu0 %v15070_v54  ;;  %12007 = vmatprep.subr.bf16.mxu1 %v17300_v1 }
 0x666   :  { %11985 = vmatpush3.bf16.msra.mxu0 %v15075_v61  ;;  %12009 = vmatpush3.bf16.msra.mxu1 %v14990_v16 }
 0x667   :  { %12011 = vmatprep.subr.bf16.mxu0 %v15020_v23  ;;  %12042 = vmatprep.subr.bf16.mxu1 %v17300_v1 }
 0x71c   :  { %v8607_v22 = vpop.f32.mrb[8].mxu0  ;;  %v1060_v46 = vpop.f32.mrb[8].mxu1 }
 0x71d   :  { %v1065_v27 = vrot.slane %v1060_v46, 4  ;;  %v8608_v17 = vpop.f32.mrb[9].mxu0  ;;  %v10588_v45 = vpop.f32.mrb[9].mxu1 }
 0x71e   :  { %v8609_v59 = vadd.f32 %v8608_v17, %v8607_v22 }
 0x71f   :  { %v1067_v41 = vadd.f32 %v1065_v27, %v15043_v50 }
 0x720   :  { %v973_v52 = vadd.f32 %v8609_v59, %v15121_v36 }
 0x721   :  { %v8323_v63 = vmul.f32 -1.442695, %v1067_v41  ;;  %14083 = vtanh.f32 %v1067_v41 }
 0x722   :  { %v8322_v0 = vmul.f32 -1.442695, %v973_v52 }
 0x723   :  { %14085 = vpow2.f32 %v8323_v63 }
 0x724   :  { %14087 = vpow2.f32 %v8322_v0 }
 0x725   :  { %14089 = vtanh.f32 %v973_v52 }
 0x72b   :  { %v14084_v55 = vpop.eup %14083 }
 0x72c   :  { %v1081_v12 = vrot.slane %v14084_v55, 4 }
 0x72d   :  { %v14086_v56 = vpop.eup %14085 }
 0x72e   :  { %v14088_v3 = vpop.eup %14087  ;;  %v1071_v18 = vadd.f32 1.0, %v14086_v56  ;;  %1083 = vrot.lane.b32.xlu1 %v1081_v12, %s14803_s19 }
 0x72f   :  { %v979_v25 = vadd.f32 1.0, %v14088_v3  ;;  %v14090_v22 = vpop.eup %14089 }
 0x730   :  { %14091 = vrcp.f32 %v1071_v18 }
 0x731   :  { %14093 = vrcp.f32 %v979_v25 }
 0x732   :  { %985 = vrot.lane.b32.xlu1 %v14090_v22, %s14803_s19 }
 0x73a   :  { %v14092_v46 = vpop.eup %14091 }
 0x73b   :  { %v14094_v27 = vpop.eup %14093  ;;  %v1076_v17 = vrot.slane %v14092_v46, 4 }
 0x73c   :  { %983 = vrot.lane.b32.xlu0 %v14094_v27, %s14802_s17  ;;  %987 = vrot.lane.b32.xlu1 %v14094_v27, %s14801_s15 }
 0x740   :  { %1078 = vrot.lane.b32.xlu0 %v1076_v17, %s14802_s17 }
 0x744   :  { %1085 = vrot.lane.b32.xlu0 %v1076_v17, %s14801_s15 }
 0x7a0   :  { %v1084_v45 = vpop.permute.xlu1 %1083 }
 0x7a1   :  { %v1089_v59 = vrot.slane %v1084_v45, 4 }
 0x7a3   :  { %v1091_v63 = vmul.f32 %v14092_v46, %v1089_v59 }
 0x7a4   :  { %v986_v41 = vpop.permute.xlu1 %985 }
 0x7a5   :  { %v990_v0 = vmul.f32 %v14094_v27, %v986_v41  ;;  %v1093_v3 = vrot.slane %v1091_v63, 4 }
 0x7ae   :  { %v984_v52 = vpop.permute.xlu0 %983  ;;  %v988_v17 = vpop.permute.xlu1 %987 }
 0x7af   :  { %v989_v55 = vmul.f32 %v984_v52, %v15237_v35 }
 0x7b1   :  { %v15293_v12 = vadd.f32 %v990_v0, %v989_v55 }
 0x7b2   :  { %v1079_v56 = vpop.permute.xlu0 %1078 }
 0x7b3   :  { %14095 = vtanh.f32 %v15293_v12  ;;  %v1087_v18 = vmul.f32 %v1079_v56, %v15241_v9 }
 0x7b5   :  { %v15297_v25 = vadd.f32 %v1093_v3, %v1087_v18 }
 0x7b6   :  { %v1086_v35 = vpop.permute.xlu0 %1085 }
 0x7b7   :  { %14097 = vtanh.f32 %v15297_v25 }
 0x7bd   :  { %v14096_v22 = vpop.eup %14095 }
 0x7be   :  { %v993_v45 = vmul.f32 %v14096_v22, %v988_v17 }
 0x7c0   :  { %v1769_v46 = vrot.slane %v993_v45, 5  ;;  %1162 = vmatprep.mubr.f32.mxu0 %v993_v45 }
 0x7c1   :  { %v14098_v27 = vpop.eup %14097 }
 0x7c2   :  { %v15302_v59 = vsel %vm1787_vm3, %v15248_v32, %v1769_v46  ;;  %v1097_v41 = vmul.f32 %v14098_v27, %v1086_v35 }
 0x7c4   :  { %1163 = vmatmul.mubr.f32.vlgmr.msra.gmra.mrb[10].mxu0 %v1097_v41  ;;  %10622 = vmatmul.mubr.f32.vlgmr.msra.gmra.mrb[10].mxu1 %v1097_v41 }
 0x7c5   :  { %12013 = vmatpush3.bf16.msra.mxu0 %v15022_v28  ;;  %12044 = vmatpush3.bf16.msra.mxu1 %v14921_v11 }
 0x7c6   :  { %12015 = vmatprep.subr.bf16.mxu0 %v15024_v29  ;;  %12045 = vmatprep.subr.bf16.mxu1 %v17300_v1 }
 0x7c7   :  { %10656 = vmatprep.mubr.msk.f32.mxu1 %vm14800_vm0, %v17311_v2 }
 0x7c9   :  { %12017 = vmatpush3.bf16.msra.mxu0 %v15028_v37  ;;  %12047 = vmatpush3.bf16.msra.mxu1 %v14930_v20 }
 0x7ca   :  { %12019 = vmatprep.subr.bf16.mxu0 %v15031_v38  ;;  %12048 = vmatprep.subr.bf16.mxu1 %v17300_v1 }
 0x7cd   :  { %12021 = vmatpush3.bf16.msra.mxu0 %v15034_v44  ;;  %12050 = vmatpush3.bf16.msra.mxu1 %v14940_v31 }
 0x7ce   :  { %12023 = vmatprep.subr.bf16.mxu0 %v15047_v62  ;;  %12051 = vmatprep.subr.bf16.mxu1 %v17300_v1 }
 0x7d1   :  { %12025 = vmatpush3.bf16.msra.mxu0 %v15049_v7  ;;  %12053 = vmatpush3.bf16.msra.mxu1 %v14950_v40 }
 0x7d2   :  { %12027 = vmatprep.subr.bf16.mxu0 %v15053_v13  ;;  %12054 = vmatprep.subr.bf16.mxu1 %v17300_v1 }
 0x7d5   :  { %12029 = vmatpush3.bf16.msra.mxu0 %v15055_v21  ;;  %12056 = vmatpush3.bf16.msra.mxu1 %v14960_v49 }
 0x7d6   :  { %12031 = vmatprep.subr.bf16.mxu0 %v15059_v26  ;;  %12057 = vmatprep.subr.bf16.mxu1 %v17300_v1 }
 0x7d9   :  { %12033 = vmatpush3.bf16.msra.mxu0 %v15061_v34  ;;  %12059 = vmatpush3.bf16.msra.mxu1 %v14970_v58 }
 0x7da   :  { %12035 = vmatprep.subr.bf16.mxu0 %v15064_v43  ;;  %12060 = vmatprep.subr.bf16.mxu1 %v17300_v1 }
 0x7dd   :  { %12037 = vmatpush3.bf16.msra.mxu0 %v15067_v53  ;;  %12062 = vmatpush3.bf16.msra.mxu1 %v14980_v5 }
 0x7de   :  { %12039 = vmatprep.subr.bf16.mxu0 %v15070_v54  ;;  %12063 = vmatprep.subr.bf16.mxu1 %v17300_v1 }
 0x7e1   :  { %12041 = vmatpush3.bf16.msra.mxu0 %v15075_v61  ;;  %12065 = vmatpush3.bf16.msra.mxu1 %v14990_v16 }
 0x7e2   :  { %12067 = vmatprep.subr.bf16.mxu0 %v15020_v23  ;;  %12098 = vmatprep.subr.bf16.mxu1 %v17300_v1 }
 0x897   :  { %v8659_v9 = vpop.f32.mrb[10].mxu0  ;;  %v1252_v32 = vpop.f32.mrb[10].mxu1 }
 0x898   :  { %v1257_v52 = vrot.slane %v1252_v32, 3  ;;  %v8660_v63 = vpop.f32.mrb[11].mxu0  ;;  %v10623_v0 = vpop.f32.mrb[11].mxu1 }
 0x899   :  { %v8661_v55 = vadd.f32 %v8660_v63, %v8659_v9 }
 0x89a   :  { %v1259_v56 = vadd.f32 %v1257_v52, %v15043_v50 }
 0x89b   :  { %v1165_v3 = vadd.f32 %v8661_v55, %v15121_v36 }
 0x89c   :  { %v8325_v18 = vmul.f32 -1.442695, %v1259_v56  ;;  %14099 = vtanh.f32 %v1259_v56 }
 0x89d   :  { %v8324_v22 = vmul.f32 -1.442695, %v1165_v3 }
 0x89e   :  { %14101 = vpow2.f32 %v8325_v18 }
 0x89f   :  { %14103 = vpow2.f32 %v8324_v22 }
 0x8a0   :  { %14105 = vtanh.f32 %v1165_v3 }
 0x8a6   :  { %v14100_v17 = vpop.eup %14099 }
 0x8a7   :  { %v1273_v45 = vrot.slane %v14100_v17, 5 }
 0x8a8   :  { %v14102_v46 = vpop.eup %14101 }
 0x8a9   :  { %v14104_v27 = vpop.eup %14103  ;;  %v1263_v35 = vadd.f32 1.0, %v14102_v46  ;;  %1275 = vrot.lane.b32.xlu1 %v1273_v45, %s14803_s19 }
 0x8aa   :  { %v1171_v41 = vadd.f32 1.0, %v14104_v27  ;;  %v14106_v9 = vpop.eup %14105 }
 0x8ab   :  { %14107 = vrcp.f32 %v1263_v35 }
 0x8ac   :  { %14109 = vrcp.f32 %v1171_v41 }
 0x8ad   :  { %1177 = vrot.lane.b32.xlu1 %v14106_v9, %s14803_s19 }
 0x8b5   :  { %v14108_v32 = vpop.eup %14107 }
 0x8b6   :  { %v14110_v52 = vpop.eup %14109  ;;  %v1268_v63 = vrot.slane %v14108_v32, 5 }
 0x8b7   :  { %1175 = vrot.lane.b32.xlu0 %v14110_v52, %s14802_s17  ;;  %1179 = vrot.lane.b32.xlu1 %v14110_v52, %s14801_s15 }
 0x8bb   :  { %1270 = vrot.lane.b32.xlu0 %v1268_v63, %s14802_s17 }
 0x8bf   :  { %1277 = vrot.lane.b32.xlu0 %v1268_v63, %s14801_s15 }
 0x91b   :  { %v1276_v0 = vpop.permute.xlu1 %1275 }
 0x91c   :  { %v1281_v55 = vrot.slane %v1276_v0, 3 }
 0x91e   :  { %v1283_v18 = vmul.f32 %v14108_v32, %v1281_v55 }
 0x91f   :  { %v1178_v56 = vpop.permute.xlu1 %1177 }
 0x920   :  { %v1182_v22 = vmul.f32 %v14110_v52, %v1178_v56  ;;  %v1285_v27 = vrot.slane %v1283_v18, 5 }
 0x929   :  { %v1176_v3 = vpop.permute.xlu0 %1175  ;;  %v1180_v63 = vpop.permute.xlu1 %1179 }
 0x92a   :  { %v1181_v17 = vmul.f32 %v1176_v3, %v15293_v12 }
 0x92c   :  { %v15347_v45 = vadd.f32 %v1182_v22, %v1181_v17 }
 0x92d   :  { %v1271_v46 = vpop.permute.xlu0 %1270 }
 0x92e   :  { %14111 = vtanh.f32 %v15347_v45  ;;  %v1279_v35 = vmul.f32 %v1271_v46, %v15297_v25 }
 0x930   :  { %v15351_v41 = vadd.f32 %v1285_v27, %v1279_v35 }
 0x931   :  { %v1278_v12 = vpop.permute.xlu0 %1277 }
 0x932   :  { %14113 = vtanh.f32 %v15351_v41 }
 0x938   :  { %v14112_v9 = vpop.eup %14111 }
 0x939   :  { %v1185_v0 = vmul.f32 %v14112_v9, %v1180_v63 }
 0x93b   :  { %v1772_v32 = vrot.slane %v1185_v0, 4  ;;  %1354 = vmatprep.mubr.f32.mxu0 %v1185_v0 }
 0x93c   :  { %v14114_v52 = vpop.eup %14113 }
 0x93d   :  { %v15356_v55 = vsel %vm1789_vm4, %v15302_v59, %v1772_v32  ;;  %v1289_v56 = vmul.f32 %v14114_v52, %v1278_v12 }
 0x93f   :  { %1355 = vmatmul.mubr.f32.vlgmr.msra.gmra.mrb[12].mxu0 %v1289_v56  ;;  %10657 = vmatmul.mubr.f32.vlgmr.msra.gmra.mrb[12].mxu1 %v1289_v56 }
 0x940   :  { %12069 = vmatpush3.bf16.msra.mxu0 %v15022_v28  ;;  %12100 = vmatpush3.bf16.msra.mxu1 %v14921_v11 }
 0x941   :  { %12071 = vmatprep.subr.bf16.mxu0 %v15024_v29  ;;  %12101 = vmatprep.subr.bf16.mxu1 %v17300_v1 }
 0x942   :  { %10691 = vmatprep.mubr.msk.f32.mxu1 %vm14800_vm0, %v17311_v2 }
 0x944   :  { %12073 = vmatpush3.bf16.msra.mxu0 %v15028_v37  ;;  %12103 = vmatpush3.bf16.msra.mxu1 %v14930_v20 }
 0x945   :  { %12075 = vmatprep.subr.bf16.mxu0 %v15031_v38  ;;  %12104 = vmatprep.subr.bf16.mxu1 %v17300_v1 }
 0x948   :  { %12077 = vmatpush3.bf16.msra.mxu0 %v15034_v44  ;;  %12106 = vmatpush3.bf16.msra.mxu1 %v14940_v31 }
 0x949   :  { %12079 = vmatprep.subr.bf16.mxu0 %v15047_v62  ;;  %12107 = vmatprep.subr.bf16.mxu1 %v17300_v1 }
 0x94c   :  { %12081 = vmatpush3.bf16.msra.mxu0 %v15049_v7  ;;  %12109 = vmatpush3.bf16.msra.mxu1 %v14950_v40 }
 0x94d   :  { %12083 = vmatprep.subr.bf16.mxu0 %v15053_v13  ;;  %12110 = vmatprep.subr.bf16.mxu1 %v17300_v1 }
 0x950   :  { %12085 = vmatpush3.bf16.msra.mxu0 %v15055_v21  ;;  %12112 = vmatpush3.bf16.msra.mxu1 %v14960_v49 }
 0x951   :  { %12087 = vmatprep.subr.bf16.mxu0 %v15059_v26  ;;  %12113 = vmatprep.subr.bf16.mxu1 %v17300_v1 }
 0x954   :  { %12089 = vmatpush3.bf16.msra.mxu0 %v15061_v34  ;;  %12115 = vmatpush3.bf16.msra.mxu1 %v14970_v58 }
 0x955   :  { %12091 = vmatprep.subr.bf16.mxu0 %v15064_v43  ;;  %12116 = vmatprep.subr.bf16.mxu1 %v17300_v1 }
 0x958   :  { %12093 = vmatpush3.bf16.msra.mxu0 %v15067_v53  ;;  %12118 = vmatpush3.bf16.msra.mxu1 %v14980_v5 }
 0x959   :  { %12095 = vmatprep.subr.bf16.mxu0 %v15070_v54  ;;  %12119 = vmatprep.subr.bf16.mxu1 %v17300_v1 }
 0x95c   :  { %12097 = vmatpush3.bf16.msra.mxu0 %v15075_v61  ;;  %12121 = vmatpush3.bf16.msra.mxu1 %v14990_v16 }
 0x95d   :  { %12123 = vmatprep.subr.bf16.mxu0 %v15020_v23  ;;  %12155 = vmatprep.subr.bf16.mxu1 %v14917_v6 }
 0xa12   :  { %v8711_v25 = vpop.f32.mrb[12].mxu0  ;;  %v1444_v59 = vpop.f32.mrb[12].mxu1 }
 0xa13   :  { %v1449_v3 = vrot.slane %v1444_v59, 2  ;;  %v8712_v18 = vpop.f32.mrb[13].mxu0  ;;  %v10658_v22 = vpop.f32.mrb[13].mxu1 }
 0xa14   :  { %v8713_v17 = vadd.f32 %v8712_v18, %v8711_v25 }
 0xa15   :  { %v1451_v46 = vadd.f32 %v1449_v3, %v15043_v50 }
 0xa16   :  { %v1357_v27 = vadd.f32 %v8713_v17, %v15121_v36 }
 0xa17   :  { %v8327_v35 = vmul.f32 -1.442695, %v1451_v46  ;;  %14115 = vtanh.f32 %v1451_v46 }
 0xa18   :  { %v8326_v9 = vmul.f32 -1.442695, %v1357_v27 }
 0xa19   :  { %14117 = vpow2.f32 %v8327_v35 }
 0xa1a   :  { %14119 = vpow2.f32 %v8326_v9 }
 0xa1b   :  { %14121 = vtanh.f32 %v1357_v27 }
 0xa21   :  { %v14116_v63 = vpop.eup %14115 }
 0xa22   :  { %v1465_v0 = vrot.slane %v14116_v63, 6 }
 0xa23   :  { %v14118_v32 = vpop.eup %14117 }
 0xa24   :  { %v14120_v52 = vpop.eup %14119  ;;  %v1455_v12 = vadd.f32 1.0, %v14118_v32  ;;  %1467 = vrot.lane.b32.xlu1 %v1465_v0, %s14803_s19 }
 0xa25   :  { %v1363_v56 = vadd.f32 1.0, %v14120_v52  ;;  %v14122_v25 = vpop.eup %14121 }
 0xa26   :  { %14123 = vrcp.f32 %v1455_v12 }
 0xa27   :  { %14125 = vrcp.f32 %v1363_v56 }
 0xa28   :  { %1369 = vrot.lane.b32.xlu1 %v14122_v25, %s14803_s19 }
 0xa30   :  { %v14124_v36 = vpop.eup %14123 }
 0xa31   :  { %v14126_v59 = vpop.eup %14125  ;;  %v1460_v3 = vrot.slane %v14124_v36, 6 }
 0xa32   :  { %1367 = vrot.lane.b32.xlu0 %v14126_v59, %s14802_s17  ;;  %1371 = vrot.lane.b32.xlu1 %v14126_v59, %s14801_s15 }
 0xa36   :  { %1462 = vrot.lane.b32.xlu0 %v1460_v3, %s14802_s17 }
 0xa3a   :  { %1469 = vrot.lane.b32.xlu0 %v1460_v3, %s14801_s15 }
 0xa96   :  { %v1468_v18 = vpop.permute.xlu1 %1467 }
 0xa97   :  { %v1473_v22 = vrot.slane %v1468_v18, 2 }
 0xa99   :  { %v1475_v27 = vmul.f32 %v14124_v36, %v1473_v22 }
 0xa9a   :  { %v1370_v17 = vpop.permute.xlu1 %1369 }
 0xa9b   :  { %v1374_v35 = vmul.f32 %v14126_v59, %v1370_v17  ;;  %v1477_v32 = vrot.slane %v1475_v27, 6 }
 0xaa4   :  { %v1368_v46 = vpop.permute.xlu0 %1367  ;;  %v1372_v25 = vpop.permute.xlu1 %1371 }
 0xaa5   :  { %v1373_v9 = vmul.f32 %v1368_v46, %v15347_v45 }
 0xaa7   :  { %v15401_v63 = vadd.f32 %v1374_v35, %v1373_v9 }
 0xaa8   :  { %v1463_v0 = vpop.permute.xlu0 %1462 }
 0xaa9   :  { %14127 = vtanh.f32 %v15401_v63  ;;  %v1471_v52 = vmul.f32 %v1463_v0, %v15351_v41  ;;  %v15449_v0 = vld [vmem:[%s17291_s4] sm:$0x1] }
 0xaab   :  { %v15405_v12 = vadd.f32 %v1477_v32, %v1471_v52 }
 0xaac   :  { %v1470_v45 = vpop.permute.xlu0 %1469 }
 0xaad   :  { %14129 = vtanh.f32 %v15405_v12 }
 0xab3   :  { %v14128_v56 = vpop.eup %14127 }
 0xab4   :  { %v1377_v3 = vmul.f32 %v14128_v56, %v1372_v25 }
 0xab6   :  { %v1775_v36 = vrot.slane %v1377_v3, 3  ;;  %1546 = vmatprep.mubr.f32.mxu0 %v1377_v3 }
 0xab7   :  { %v14130_v59 = vpop.eup %14129 }
 0xab8   :  { %v1481_v18 = vmul.f32 %v14130_v59, %v1470_v45  ;;  %v15410_v22 = vsel %vm1791_vm5, %v15356_v55, %v1775_v36 }
 0xaba   :  { %1547 = vmatmul.mubr.f32.vlgmr.msra.gmra.mrb[14].mxu0 %v1481_v18  ;;  %10692 = vmatmul.mubr.f32.vlgmr.msra.gmra.mrb[14].mxu1 %v1481_v18 }
 0xabb   :  { %12125 = vmatpush3.bf16.msra.mxu0 %v15022_v28  ;;  %12157 = vmatpush1.bf16.msra.mxu1 %v14919_v10 }
 0xabc   :  { %12127 = vmatprep.subr.bf16.mxu0 %v15024_v29  ;;  %12159 = vmatprep.subr.bf16.mxu1 %v14924_v15 }
 0xabd   :  { %1862 = vmatprep.mubr.f32.mxu1 %v17311_v2 }
 0xabf   :  { %12129 = vmatpush3.bf16.msra.mxu0 %v15028_v37  ;;  %12161 = vmatpush1.bf16.msra.mxu1 %v14928_v19 }
 0xac0   :  { %12131 = vmatprep.subr.bf16.mxu0 %v15031_v38  ;;  %12163 = vmatprep.subr.bf16.mxu1 %v14934_v24 }
 0xac3   :  { %12133 = vmatpush3.bf16.msra.mxu0 %v15034_v44  ;;  %12165 = vmatpush1.bf16.msra.mxu1 %v14938_v30 }
 0xac4   :  { %12135 = vmatprep.subr.bf16.mxu0 %v15047_v62  ;;  %12167 = vmatprep.subr.bf16.mxu1 %v14944_v33 }
 0xac7   :  { %12137 = vmatpush3.bf16.msra.mxu0 %v15049_v7  ;;  %12169 = vmatpush1.bf16.msra.mxu1 %v14948_v39 }
 0xac8   :  { %12139 = vmatprep.subr.bf16.mxu0 %v15053_v13  ;;  %12171 = vmatprep.subr.bf16.mxu1 %v14954_v42 }
 0xacb   :  { %12141 = vmatpush3.bf16.msra.mxu0 %v15055_v21  ;;  %12173 = vmatpush1.bf16.msra.mxu1 %v14958_v48 }
 0xacc   :  { %12143 = vmatprep.subr.bf16.mxu0 %v15059_v26  ;;  %12175 = vmatprep.subr.bf16.mxu1 %v14964_v51 }
 0xacf   :  { %12145 = vmatpush3.bf16.msra.mxu0 %v15061_v34  ;;  %12177 = vmatpush1.bf16.msra.mxu1 %v14968_v57 }
 0xad0   :  { %12147 = vmatprep.subr.bf16.mxu0 %v15064_v43  ;;  %12179 = vmatprep.subr.bf16.mxu1 %v14974_v60 }
 0xad3   :  { %12149 = vmatpush3.bf16.msra.mxu0 %v15067_v53  ;;  %12181 = vmatpush1.bf16.msra.mxu1 %v14978_v4 }
 0xad4   :  { %12151 = vmatprep.subr.bf16.mxu0 %v15070_v54  ;;  %12183 = vmatprep.subr.bf16.mxu1 %v14984_v8 }
 0xad7   :  { %12153 = vmatpush3.bf16.msra.mxu0 %v15075_v61  ;;  %12185 = vmatpush1.bf16.msra.mxu1 %v14988_v14 }
 0xad8   :  { %12187 = vmatprep.subr.bf16.mxu0 %v15020_v23  ;;  %12218 = vmatprep.subr.bf16.mxu1 %v17300_v1 }
 0xb8d   :  { %v8763_v41 = vpop.f32.mrb[14].mxu0  ;;  %v1636_v55 = vpop.f32.mrb[14].mxu1 }
 0xb8e   :  { %v1641_v17 = vrot.slane %v1636_v55, 1  ;;  %v8764_v46 = vpop.f32.mrb[15].mxu0  ;;  %v10693_v27 = vpop.f32.mrb[15].mxu1 }
 0xb8f   :  { %v8765_v35 = vadd.f32 %v8764_v46, %v8763_v41 }
 0xb90   :  { %v1643_v9 = vadd.f32 %v1641_v17, %v15043_v50 }
 0xb91   :  { %v1549_v32 = vadd.f32 %v15449_v0, %v8765_v35 }
 0xb92   :  { %v8329_v52 = vmul.f32 -1.442695, %v1643_v9  ;;  %14131 = vtanh.f32 %v1643_v9 }
 0xb93   :  { %v8328_v56 = vmul.f32 -1.442695, %v1549_v32 }
 0xb94   :  { %14133 = vpow2.f32 %v8329_v52 }
 0xb95   :  { %14135 = vpow2.f32 %v8328_v56 }
 0xb96   :  { %14137 = vtanh.f32 %v1549_v32 }
 0xb9c   :  { %v14132_v25 = vpop.eup %14131 }
 0xb9d   :  { %v1657_v3 = vrot.slane %v14132_v25, 7 }
 0xb9e   :  { %v14134_v36 = vpop.eup %14133 }
 0xb9f   :  { %v14136_v59 = vpop.eup %14135  ;;  %v1647_v45 = vadd.f32 1.0, %v14134_v36  ;;  %1659 = vrot.lane.b32.xlu1 %v1657_v3, %s14803_s19 }
 0xba0   :  { %v1555_v50 = vadd.f32 1.0, %v14136_v59  ;;  %v14138_v18 = vpop.eup %14137 }
 0xba1   :  { %14139 = vrcp.f32 %v1647_v45 }
 0xba2   :  { %14141 = vrcp.f32 %v1555_v50 }
 0xba3   :  { %1561 = vrot.lane.b32.xlu1 %v14138_v18, %s14803_s19 }
 0xbab   :  { %v14140_v41 = vpop.eup %14139 }
 0xbac   :  { %v14142_v55 = vpop.eup %14141  ;;  %v1652_v17 = vrot.slane %v14140_v41, 7 }
 0xbad   :  { %1559 = vrot.lane.b32.xlu0 %v14142_v55, %s14802_s17  ;;  %1563 = vrot.lane.b32.xlu1 %v14142_v55, %s14801_s15 }
 0xbb1   :  { %1654 = vrot.lane.b32.xlu0 %v1652_v17, %s14802_s17 }
 0xbb5   :  { %1661 = vrot.lane.b32.xlu0 %v1652_v17, %s14801_s15 }
 0xc11   :  { %v1660_v46 = vpop.permute.xlu1 %1659 }
 0xc12   :  { %v1665_v27 = vrot.slane %v1660_v46, 1 }
 0xc14   :  { %v1667_v32 = vmul.f32 %v14140_v41, %v1665_v27 }
 0xc15   :  { %v1562_v35 = vpop.permute.xlu1 %1561 }
 0xc16   :  { %v1566_v52 = vmul.f32 %v14142_v55, %v1562_v35  ;;  %v1669_v36 = vrot.slane %v1667_v32, 7 }
 0xc1f   :  { %v1560_v9 = vpop.permute.xlu0 %1559  ;;  %v1564_v18 = vpop.permute.xlu1 %1563 }
 0xc20   :  { %v1565_v56 = vmul.f32 %v1560_v9, %v15401_v63 }
 0xc22   :  { %v1567_v25 = vadd.f32 %v1566_v52, %v1565_v56 }
 0xc23   :  { %v1655_v3 = vpop.permute.xlu0 %1654 }
 0xc24   :  { %14143 = vtanh.f32 %v1567_v25  ;;  %v1663_v59 = vmul.f32 %v1655_v3, %v15405_v12 }
 0xc26   :  { %v1671_v45 = vadd.f32 %v1669_v36, %v1663_v59 }
 0xc27   :  { %v1662_v14 = vpop.permute.xlu0 %1661 }
 0xc28   :  { %14145 = vtanh.f32 %v1671_v45 }
 0xc2e   :  { %v14144_v50 = vpop.eup %14143 }
 0xc2f   :  { %v1569_v1 = vmul.f32 %v14144_v50, %v1564_v18 }
 0xc31   :  { %v1778_v17 = vrot.slane %v1569_v1, 2  ;;  %1738 = vmatprep.mubr.f32.mxu0 %v1569_v1 }
 0xc32   :  { %v14146_v46 = vpop.eup %14145 }
 0xc33   :  { %v1673_v41 = vmul.f32 %v14146_v46, %v1662_v14  ;;  %v1794_v63 = vsel %vm1793_vm6, %v15410_v22, %v1778_v17 }
 0xc35   :  { %1739 = vmatmul.mubr.f32.vlgmr.msra.gmra.mrb[16].mxu0 %v1673_v41  ;;  %v17312_v41 = vmov 0.0|0.0  }
 0xc36   :  { %12189 = vmatpush3.bf16.msra.mxu0 %v15022_v28  ;;  %2009 = vmatprep.mubr.f32.mxu0 %v17311_v2 }
 0xc37   :  { %12191 = vmatprep.subr.bf16.mxu0 %v15024_v29 }
 0xc3a   :  { %12193 = vmatpush3.bf16.msra.mxu0 %v15028_v37 }
 0xc3b   :  { %12195 = vmatprep.subr.bf16.mxu0 %v15031_v38 }
 0xc3e   :  { %12197 = vmatpush3.bf16.msra.mxu0 %v15034_v44 }
 0xc3f   :  { %12199 = vmatprep.subr.bf16.mxu0 %v15047_v62 }
 0xc42   :  { %12201 = vmatpush3.bf16.msra.mxu0 %v15049_v7 }
 0xc43   :  { %12203 = vmatprep.subr.bf16.mxu0 %v15053_v13 }
 0xc46   :  { %12205 = vmatpush3.bf16.msra.mxu0 %v15055_v21 }
 0xc47   :  { %12207 = vmatprep.subr.bf16.mxu0 %v15059_v26 }
 0xc4a   :  { %12209 = vmatpush3.bf16.msra.mxu0 %v15061_v34 }
 0xc4b   :  { %12211 = vmatprep.subr.bf16.mxu0 %v15064_v43 }
 0xc4e   :  { %12213 = vmatpush3.bf16.msra.mxu0 %v15067_v53 }
 0xc4f   :  { %12215 = vmatprep.subr.bf16.mxu0 %v15070_v54 }
 0xc52   :  { %12217 = vmatpush3.bf16.msra.mxu0 %v15075_v61 }
 0xc53   :  { %12243 = vmatprep.subr.bf16.mxu0 %v15020_v23 }
 0xd08   :  { %v8815_v1 = vpop.f32.mrb[16].mxu0 }
 0xd09   :  { %v8816_v14 = vpop.f32.mrb[17].mxu0 }
 0xd0a   :  { %v8817_v12 = vadd.f32 %v8816_v14, %v8815_v1 }
 0xd0c   :  { %v1741_v22 = vadd.f32 %v15449_v0, %v8817_v12 }
 0xd0e   :  { %v8330_v55 = vmul.f32 -1.442695, %v1741_v22  ;;  %14147 = vtanh.f32 %v1741_v22 }
 0xd10   :  { %14149 = vpow2.f32 %v8330_v55 }
 0xd18   :  { %v14148_v27 = vpop.eup %14147 }
 0xd19   :  { %1753 = vrot.lane.b32.xlu0 %v14148_v27, %s14803_s19 }
 0xd1a   :  { %v14150_v35 = vpop.eup %14149 }
 0xd1b   :  { %v1747_v9 = vadd.f32 1.0, %v14150_v35 }
 0xd1d   :  { %14151 = vrcp.f32 %v1747_v9 }
 0xd27   :  { %v14152_v32 = vpop.eup %14151 }
 0xd28   :  { %1751 = vrot.lane.b32.xlu1 %v14152_v32, %s14802_s17 }
 0xd2c   :  { %1755 = vrot.lane.b32.xlu1 %v14152_v32, %s14801_s15 }
 0xd8b   :  { %v1754_v52 = vpop.permute.xlu0 %1753 }
 0xd8c   :  { %v1758_v3 = vmul.f32 %v14152_v32, %v1754_v52 }
 0xd9a   :  { %v1752_v56 = vpop.permute.xlu1 %1751 }
 0xd9b   :  { %v1757_v36 = vmul.f32 %v1752_v56, %v1567_v25 }
 0xd9d   :  { %v1759_v59 = vadd.f32 %v1758_v3, %v1757_v36 }
 0xd9e   :  { %v1756_v50 = vpop.permute.xlu1 %1755 }
 0xd9f   :  { %14153 = vtanh.f32 %v1759_v59 }
 0xda9   :  { %v14154_v45 = vpop.eup %14153 }
 0xdaa   :  { %v1761_v18 = vmul.f32 %v14154_v45, %v1756_v50 }
 0xdac   :  { %v1781_v17 = vrot.slane %v1761_v18, 1 }
 0xdae   :  { %v1796_v46 = vsel %vm1795_vm7, %v1794_v63, %v1781_v17  ;;  %v14688_v63 = vld [vmem:[%s17290_s3] ss:$0 sm:$0xff] }
 0xdaf   :  { %1797 = vst [vmem:[#allocation9] sm:$0xff] %v1796_v46  ;;  %1863 = vmatmul.mubr.f32.vlgmr.msra.gmra.mrb[16].mxu1 %v1796_v46 }
 0xdb0   :  { %12220 = vmatpush3.bf16.msra.mxu1 %v14921_v11  ;;  %10726 = vmatprep.mubr.msk.f32.mxu1 %vm14800_vm0, %v17311_v2 }
 0xdb1   :  { %12221 = vmatprep.subr.bf16.mxu1 %v17312_v41 }
 0xdb4   :  { %12223 = vmatpush3.bf16.msra.mxu1 %v14930_v20 }
 0xdb5   :  { %12224 = vmatprep.subr.bf16.mxu1 %v17312_v41 }
 0xdb8   :  { %12226 = vmatpush3.bf16.msra.mxu1 %v14940_v31 }
 0xdb9   :  { %12227 = vmatprep.subr.bf16.mxu1 %v17312_v41 }
 0xdbc   :  { %12229 = vmatpush3.bf16.msra.mxu1 %v14950_v40 }
 0xdbd   :  { %12230 = vmatprep.subr.bf16.mxu1 %v17312_v41 }
 0xdc0   :  { %12232 = vmatpush3.bf16.msra.mxu1 %v14960_v49 }
 0xdc1   :  { %12233 = vmatprep.subr.bf16.mxu1 %v17312_v41 }
 0xdc4   :  { %12235 = vmatpush3.bf16.msra.mxu1 %v14970_v58 }
 0xdc5   :  { %12236 = vmatprep.subr.bf16.mxu1 %v17312_v41 }
 0xdc8   :  { %12238 = vmatpush3.bf16.msra.mxu1 %v14980_v5 }
 0xdc9   :  { %12239 = vmatprep.subr.bf16.mxu1 %v17312_v41 }
 0xdcc   :  { %12241 = vmatpush3.bf16.msra.mxu1 %v14990_v16 }
 0xdcd   :  { %12274 = vmatprep.subr.bf16.mxu1 %v17312_v41 }
 0xe82   :  { %v1864_v25 = vpop.f32.mrb[16].mxu1 }
 0xe83   :  { %v15505_v1 = vadd.f32 %v14688_v63, %v1864_v25  ;;  %v15507_v14 = vpop.f32.mrb[17].mxu1 }
 0xe84   :  { %17313 = vst [vmem:[#allocation16_spill] sm:$0xff] %v15507_v14 }
 0xe85   :  { %v1926_v12 = vadd.f32 %v15505_v1, %v15041_v47 }
 0xe87   :  { %14155 = vtanh.f32 %v1926_v12  ;;  %v8334_v22 = vmul.f32 -1.442695, %v1926_v12 }
 0xe89   :  { %14157 = vpow2.f32 %v8334_v22 }
 0xe91   :  { %v14156_v55 = vpop.eup %14155 }
 0xe92   :  { %1936 = vrot.lane.b32.xlu1 %v14156_v55, %s14803_s19 }
 0xe93   :  { %v14158_v27 = vpop.eup %14157 }
 0xe94   :  { %v1930_v35 = vadd.f32 1.0, %v14158_v27 }
 0xe96   :  { %14159 = vrcp.f32 %v1930_v35 }
 0xea0   :  { %v14160_v9 = vpop.eup %14159 }
 0xea1   :  { %1934 = vrot.lane.b32.xlu0 %v14160_v9, %s14802_s17 }
 0xea5   :  { %1938 = vrot.lane.b32.xlu0 %v14160_v9, %s14801_s15 }
 0xf04   :  { %v1937_v32 = vpop.permute.xlu1 %1936 }
 0xf05   :  { %v1941_v56 = vmul.f32 %v14160_v9, %v1937_v32 }
 0xf13   :  { %v1935_v52 = vpop.permute.xlu0 %1934 }
 0xf14   :  { %v1940_v3 = vmul.f32 0.0, %v1935_v52 }
 0xf16   :  { %v15514_v36 = vadd.f32 %v1941_v56, %v1940_v3 }
 0xf17   :  { %v1939_v45 = vpop.permute.xlu0 %1938 }
 0xf18   :  { %14161 = vtanh.f32 %v15514_v36 }
 0xf22   :  { %v14162_v59 = vpop.eup %14161 }
 0xf23   :  { %v1944_v50 = vmul.f32 %v14162_v59, %v1939_v45 }
 0xf25   :  { %2010 = vmatmul.mubr.f32.vlgmr.msra.gmra.mrb[18].mxu0 %v1944_v50  ;;  %10727 = vmatmul.mubr.f32.vlgmr.msra.gmra.mrb[18].mxu1 %v1944_v50 }
 0xf26   :  { %12245 = vmatpush3.bf16.msra.mxu0 %v15022_v28  ;;  %12276 = vmatpush3.bf16.msra.mxu1 %v14921_v11 }
 0xf27   :  { %12247 = vmatprep.subr.bf16.mxu0 %v15024_v29  ;;  %12277 = vmatprep.subr.bf16.mxu1 %v17312_v41 }
 0xf28   :  { %10761 = vmatprep.mubr.msk.f32.mxu1 %vm14800_vm0, %v17311_v2 }
 0xf2a   :  { %12249 = vmatpush3.bf16.msra.mxu0 %v15028_v37  ;;  %12279 = vmatpush3.bf16.msra.mxu1 %v14930_v20 }
 0xf2b   :  { %12251 = vmatprep.subr.bf16.mxu0 %v15031_v38  ;;  %12280 = vmatprep.subr.bf16.mxu1 %v17312_v41 }
 0xf2e   :  { %12253 = vmatpush3.bf16.msra.mxu0 %v15034_v44  ;;  %12282 = vmatpush3.bf16.msra.mxu1 %v14940_v31 }
 0xf2f   :  { %12255 = vmatprep.subr.bf16.mxu0 %v15047_v62  ;;  %12283 = vmatprep.subr.bf16.mxu1 %v17312_v41 }
 0xf32   :  { %12257 = vmatpush3.bf16.msra.mxu0 %v15049_v7  ;;  %12285 = vmatpush3.bf16.msra.mxu1 %v14950_v40 }
 0xf33   :  { %12259 = vmatprep.subr.bf16.mxu0 %v15053_v13  ;;  %12286 = vmatprep.subr.bf16.mxu1 %v17312_v41 }
 0xf36   :  { %12261 = vmatpush3.bf16.msra.mxu0 %v15055_v21  ;;  %12288 = vmatpush3.bf16.msra.mxu1 %v14960_v49 }
 0xf37   :  { %12263 = vmatprep.subr.bf16.mxu0 %v15059_v26  ;;  %12289 = vmatprep.subr.bf16.mxu1 %v17312_v41 }
 0xf3a   :  { %12265 = vmatpush3.bf16.msra.mxu0 %v15061_v34  ;;  %12291 = vmatpush3.bf16.msra.mxu1 %v14970_v58 }
 0xf3b   :  { %12267 = vmatprep.subr.bf16.mxu0 %v15064_v43  ;;  %12292 = vmatprep.subr.bf16.mxu1 %v17312_v41 }
 0xf3e   :  { %12269 = vmatpush3.bf16.msra.mxu0 %v15067_v53  ;;  %12294 = vmatpush3.bf16.msra.mxu1 %v14980_v5 }
 0xf3f   :  { %12271 = vmatprep.subr.bf16.mxu0 %v15070_v54  ;;  %12295 = vmatprep.subr.bf16.mxu1 %v17312_v41 }
 0xf42   :  { %12273 = vmatpush3.bf16.msra.mxu0 %v15075_v61  ;;  %12297 = vmatpush3.bf16.msra.mxu1 %v14990_v16 }
 0xf43   :  { %12299 = vmatprep.subr.bf16.mxu0 %v15020_v23  ;;  %12330 = vmatprep.subr.bf16.mxu1 %v17312_v41 }
 0xff8   :  { %v8850_v18 = vpop.f32.mrb[18].mxu0  ;;  %v2099_v17 = vpop.f32.mrb[18].mxu1 }
 0xff9   :  { %v2104_v46 = vrot.slane %v2099_v17, 7  ;;  %v8851_v25 = vpop.f32.mrb[19].mxu0  ;;  %v10728_v63 = vpop.f32.mrb[19].mxu1 }
 0xffa   :  { %v8852_v12 = vadd.f32 %v8851_v25, %v8850_v18 }
 0xffb   :  { %v2106_v22 = vadd.f32 %v2104_v46, %v15505_v1 }
 0xffc   :  { %v2012_v55 = vadd.f32 %v15449_v0, %v8852_v12 }
 0xffd   :  { %v8336_v27 = vmul.f32 -1.442695, %v2106_v22  ;;  %14163 = vtanh.f32 %v2106_v22 }
 0xffe   :  { %v8335_v35 = vmul.f32 -1.442695, %v2012_v55 }
 0xfff   :  { %14165 = vpow2.f32 %v8336_v27 }
0x1000   :  { %14167 = vpow2.f32 %v8335_v35 }
0x1001   :  { %14169 = vtanh.f32 %v2012_v55 }
0x1007   :  { %v14164_v9 = vpop.eup %14163 }
0x1008   :  { %v2120_v32 = vrot.slane %v14164_v9, 1 }
0x1009   :  { %v14166_v52 = vpop.eup %14165 }
0x100a   :  { %v14168_v56 = vpop.eup %14167  ;;  %v2110_v3 = vadd.f32 1.0, %v14166_v52  ;;  %2122 = vrot.lane.b32.xlu1 %v2120_v32, %s14803_s19 }
0x100b   :  { %v2018_v59 = vadd.f32 1.0, %v14168_v56  ;;  %v14170_v45 = vpop.eup %14169 }
0x100c   :  { %14171 = vrcp.f32 %v2110_v3 }
0x100d   :  { %14173 = vrcp.f32 %v2018_v59 }
0x100e   :  { %2024 = vrot.lane.b32.xlu1 %v14170_v45, %s14803_s19 }
0x1016   :  { %v14172_v50 = vpop.eup %14171 }
0x1017   :  { %v14174_v18 = vpop.eup %14173  ;;  %v2115_v17 = vrot.slane %v14172_v50, 1 }
0x1018   :  { %2022 = vrot.lane.b32.xlu0 %v14174_v18, %s14802_s17  ;;  %2026 = vrot.lane.b32.xlu1 %v14174_v18, %s14801_s15 }
0x101c   :  { %2117 = vrot.lane.b32.xlu0 %v2115_v17, %s14802_s17 }
0x1020   :  { %2124 = vrot.lane.b32.xlu0 %v2115_v17, %s14801_s15 }
0x107c   :  { %v2123_v46 = vpop.permute.xlu1 %2122 }
0x107d   :  { %v2128_v25 = vrot.slane %v2123_v46, 7 }
0x107f   :  { %v2130_v22 = vmul.f32 %v14172_v50, %v2128_v25 }
0x1080   :  { %v2025_v63 = vpop.permute.xlu1 %2024 }
0x1081   :  { %v2029_v55 = vmul.f32 %v14174_v18, %v2025_v63  ;;  %v2132_v32 = vrot.slane %v2130_v22, 1 }
0x108a   :  { %v2023_v12 = vpop.permute.xlu0 %2022  ;;  %v2027_v59 = vpop.permute.xlu1 %2026 }
0x108b   :  { %v2028_v27 = vmul.f32 0.0, %v2023_v12 }
0x108d   :  { %v15559_v35 = vadd.f32 %v2029_v55, %v2028_v27 }
0x108e   :  { %v2118_v9 = vpop.permute.xlu0 %2117 }
0x108f   :  { %14175 = vtanh.f32 %v15559_v35  ;;  %v2126_v52 = vmul.f32 %v2118_v9, %v15514_v36 }
0x1091   :  { %v15563_v56 = vadd.f32 %v2132_v32, %v2126_v52 }
0x1092   :  { %v2125_v18 = vpop.permute.xlu0 %2124 }
0x1093   :  { %14177 = vtanh.f32 %v15563_v56 }
0x1099   :  { %v14176_v3 = vpop.eup %14175 }
0x109a   :  { %v15566_v45 = vmul.f32 %v14176_v3, %v2027_v59 }
0x109c   :  { %2201 = vmatprep.mubr.f32.mxu0 %v15566_v45 }
0x109d   :  { %v14178_v50 = vpop.eup %14177 }
0x109e   :  { %v2136_v17 = vmul.f32 %v14178_v50, %v2125_v18 }
0x10a0   :  { %2202 = vmatmul.mubr.f32.vlgmr.msra.gmra.mrb[20].mxu0 %v2136_v17  ;;  %10762 = vmatmul.mubr.f32.vlgmr.msra.gmra.mrb[20].mxu1 %v2136_v17 }
0x10a1   :  { %12301 = vmatpush3.bf16.msra.mxu0 %v15022_v28  ;;  %12332 = vmatpush3.bf16.msra.mxu1 %v14921_v11 }
0x10a2   :  { %12303 = vmatprep.subr.bf16.mxu0 %v15024_v29  ;;  %12333 = vmatprep.subr.bf16.mxu1 %v17312_v41 }
0x10a3   :  { %10796 = vmatprep.mubr.msk.f32.mxu1 %vm14800_vm0, %v17311_v2 }
0x10a5   :  { %12305 = vmatpush3.bf16.msra.mxu0 %v15028_v37  ;;  %12335 = vmatpush3.bf16.msra.mxu1 %v14930_v20 }
0x10a6   :  { %12307 = vmatprep.subr.bf16.mxu0 %v15031_v38  ;;  %12336 = vmatprep.subr.bf16.mxu1 %v17312_v41 }
0x10a9   :  { %12309 = vmatpush3.bf16.msra.mxu0 %v15034_v44  ;;  %12338 = vmatpush3.bf16.msra.mxu1 %v14940_v31 }
0x10aa   :  { %12311 = vmatprep.subr.bf16.mxu0 %v15047_v62  ;;  %12339 = vmatprep.subr.bf16.mxu1 %v17312_v41 }
0x10ad   :  { %12313 = vmatpush3.bf16.msra.mxu0 %v15049_v7  ;;  %12341 = vmatpush3.bf16.msra.mxu1 %v14950_v40 }
0x10ae   :  { %12315 = vmatprep.subr.bf16.mxu0 %v15053_v13  ;;  %12342 = vmatprep.subr.bf16.mxu1 %v17312_v41 }
0x10b1   :  { %12317 = vmatpush3.bf16.msra.mxu0 %v15055_v21  ;;  %12344 = vmatpush3.bf16.msra.mxu1 %v14960_v49 }
0x10b2   :  { %12319 = vmatprep.subr.bf16.mxu0 %v15059_v26  ;;  %12345 = vmatprep.subr.bf16.mxu1 %v17312_v41 }
0x10b5   :  { %12321 = vmatpush3.bf16.msra.mxu0 %v15061_v34  ;;  %12347 = vmatpush3.bf16.msra.mxu1 %v14970_v58 }
0x10b6   :  { %12323 = vmatprep.subr.bf16.mxu0 %v15064_v43  ;;  %12348 = vmatprep.subr.bf16.mxu1 %v17312_v41 }
0x10b9   :  { %12325 = vmatpush3.bf16.msra.mxu0 %v15067_v53  ;;  %12350 = vmatpush3.bf16.msra.mxu1 %v14980_v5 }
0x10ba   :  { %12327 = vmatprep.subr.bf16.mxu0 %v15070_v54  ;;  %12351 = vmatprep.subr.bf16.mxu1 %v17312_v41 }
0x10bd   :  { %12329 = vmatpush3.bf16.msra.mxu0 %v15075_v61  ;;  %12353 = vmatpush3.bf16.msra.mxu1 %v14990_v16 }
0x10be   :  { %12355 = vmatprep.subr.bf16.mxu0 %v15020_v23  ;;  %12386 = vmatprep.subr.bf16.mxu1 %v17312_v41 }
0x1173   :  { %v8902_v36 = vpop.f32.mrb[20].mxu0  ;;  %v2291_v46 = vpop.f32.mrb[20].mxu1 }
0x1174   :  { %v2296_v25 = vrot.slane %v2291_v46, 6  ;;  %v8903_v63 = vpop.f32.mrb[21].mxu0  ;;  %v10763_v12 = vpop.f32.mrb[21].mxu1 }
0x1175   :  { %v8904_v22 = vadd.f32 %v8903_v63, %v8902_v36 }
0x1176   :  { %v2298_v55 = vadd.f32 %v2296_v25, %v15505_v1 }
0x1177   :  { %v2204_v27 = vadd.f32 %v15449_v0, %v8904_v22 }
0x1178   :  { %v8338_v9 = vmul.f32 -1.442695, %v2298_v55  ;;  %14179 = vtanh.f32 %v2298_v55 }
0x1179   :  { %v8337_v32 = vmul.f32 -1.442695, %v2204_v27 }
0x117a   :  { %14181 = vpow2.f32 %v8338_v9 }
0x117b   :  { %14183 = vpow2.f32 %v8337_v32 }
0x117c   :  { %14185 = vtanh.f32 %v2204_v27 }
0x1182   :  { %v14180_v52 = vpop.eup %14179 }
0x1183   :  { %v2312_v3 = vrot.slane %v14180_v52, 2 }
0x1184   :  { %v14182_v59 = vpop.eup %14181 }
0x1185   :  { %v14184_v50 = vpop.eup %14183  ;;  %v2302_v18 = vadd.f32 1.0, %v14182_v59  ;;  %2314 = vrot.lane.b32.xlu1 %v2312_v3, %s14803_s19 }
0x1186   :  { %v2210_v17 = vadd.f32 1.0, %v14184_v50  ;;  %v14186_v36 = vpop.eup %14185 }
0x1187   :  { %14187 = vrcp.f32 %v2302_v18 }
0x1188   :  { %14189 = vrcp.f32 %v2210_v17 }
0x1189   :  { %2216 = vrot.lane.b32.xlu1 %v14186_v36, %s14803_s19 }
0x1191   :  { %v14188_v46 = vpop.eup %14187 }
0x1192   :  { %v14190_v25 = vpop.eup %14189  ;;  %v2307_v63 = vrot.slane %v14188_v46, 2 }
0x1193   :  { %2214 = vrot.lane.b32.xlu0 %v14190_v25, %s14802_s17  ;;  %2218 = vrot.lane.b32.xlu1 %v14190_v25, %s14801_s15 }
0x1197   :  { %2309 = vrot.lane.b32.xlu0 %v2307_v63, %s14802_s17 }
0x119b   :  { %2316 = vrot.lane.b32.xlu0 %v2307_v63, %s14801_s15 }
0x11f7   :  { %v2315_v12 = vpop.permute.xlu1 %2314 }
0x11f8   :  { %v2320_v22 = vrot.slane %v2315_v12, 6 }
0x11fa   :  { %v2322_v9 = vmul.f32 %v14188_v46, %v2320_v22 }
0x11fb   :  { %v2217_v55 = vpop.permute.xlu1 %2216 }
0x11fc   :  { %v2221_v32 = vmul.f32 %v14190_v25, %v2217_v55  ;;  %v2324_v50 = vrot.slane %v2322_v9, 2 }
0x1205   :  { %v2215_v27 = vpop.permute.xlu0 %2214  ;;  %v2219_v63 = vpop.permute.xlu1 %2218 }
0x1206   :  { %v2220_v52 = vmul.f32 %v2215_v27, %v15559_v35 }
0x1208   :  { %v15612_v3 = vadd.f32 %v2221_v32, %v2220_v52 }
0x1209   :  { %v2310_v59 = vpop.permute.xlu0 %2309 }
0x120a   :  { %14191 = vtanh.f32 %v15612_v3  ;;  %v2318_v18 = vmul.f32 %v2310_v59, %v15563_v56 }
0x120c   :  { %v15616_v17 = vadd.f32 %v2324_v50, %v2318_v18 }
0x120d   :  { %v2317_v35 = vpop.permute.xlu0 %2316 }
0x120e   :  { %14193 = vtanh.f32 %v15616_v17 }
0x1214   :  { %v14192_v36 = vpop.eup %14191 }
0x1215   :  { %v15619_v12 = vmul.f32 %v14192_v36, %v2219_v63 }
0x1217   :  { %2393 = vmatprep.mubr.f32.mxu0 %v15619_v12 }
0x1218   :  { %v14194_v46 = vpop.eup %14193 }
0x1219   :  { %v2328_v25 = vmul.f32 %v14194_v46, %v2317_v35 }
0x121b   :  { %2394 = vmatmul.mubr.f32.vlgmr.msra.gmra.mrb[22].mxu0 %v2328_v25  ;;  %10797 = vmatmul.mubr.f32.vlgmr.msra.gmra.mrb[22].mxu1 %v2328_v25 }
0x121c   :  { %12357 = vmatpush3.bf16.msra.mxu0 %v15022_v28  ;;  %12388 = vmatpush3.bf16.msra.mxu1 %v14921_v11 }
0x121d   :  { %12359 = vmatprep.subr.bf16.mxu0 %v15024_v29  ;;  %12389 = vmatprep.subr.bf16.mxu1 %v17312_v41 }
0x121e   :  { %10831 = vmatprep.mubr.msk.f32.mxu1 %vm14800_vm0, %v17311_v2 }
0x1220   :  { %12361 = vmatpush3.bf16.msra.mxu0 %v15028_v37  ;;  %12391 = vmatpush3.bf16.msra.mxu1 %v14930_v20 }
0x1221   :  { %12363 = vmatprep.subr.bf16.mxu0 %v15031_v38  ;;  %12392 = vmatprep.subr.bf16.mxu1 %v17312_v41 }
0x1224   :  { %12365 = vmatpush3.bf16.msra.mxu0 %v15034_v44  ;;  %12394 = vmatpush3.bf16.msra.mxu1 %v14940_v31 }
0x1225   :  { %12367 = vmatprep.subr.bf16.mxu0 %v15047_v62  ;;  %12395 = vmatprep.subr.bf16.mxu1 %v17312_v41 }
0x1228   :  { %12369 = vmatpush3.bf16.msra.mxu0 %v15049_v7  ;;  %12397 = vmatpush3.bf16.msra.mxu1 %v14950_v40 }
0x1229   :  { %12371 = vmatprep.subr.bf16.mxu0 %v15053_v13  ;;  %12398 = vmatprep.subr.bf16.mxu1 %v17312_v41 }
0x122c   :  { %12373 = vmatpush3.bf16.msra.mxu0 %v15055_v21  ;;  %12400 = vmatpush3.bf16.msra.mxu1 %v14960_v49 }
0x122d   :  { %12375 = vmatprep.subr.bf16.mxu0 %v15059_v26  ;;  %12401 = vmatprep.subr.bf16.mxu1 %v17312_v41 }
0x1230   :  { %12377 = vmatpush3.bf16.msra.mxu0 %v15061_v34  ;;  %12403 = vmatpush3.bf16.msra.mxu1 %v14970_v58 }
0x1231   :  { %12379 = vmatprep.subr.bf16.mxu0 %v15064_v43  ;;  %12404 = vmatprep.subr.bf16.mxu1 %v17312_v41 }
0x1234   :  { %12381 = vmatpush3.bf16.msra.mxu0 %v15067_v53  ;;  %12406 = vmatpush3.bf16.msra.mxu1 %v14980_v5 }
0x1235   :  { %12383 = vmatprep.subr.bf16.mxu0 %v15070_v54  ;;  %12407 = vmatprep.subr.bf16.mxu1 %v17312_v41 }
0x1238   :  { %12385 = vmatpush3.bf16.msra.mxu0 %v15075_v61  ;;  %12409 = vmatpush3.bf16.msra.mxu1 %v14990_v16 }
0x1239   :  { %12411 = vmatprep.subr.bf16.mxu0 %v15020_v23  ;;  %12442 = vmatprep.subr.bf16.mxu1 %v17312_v41 }
0x12ee   :  { %v8954_v56 = vpop.f32.mrb[22].mxu0  ;;  %v2483_v22 = vpop.f32.mrb[22].mxu1 }
0x12ef   :  { %v2488_v55 = vrot.slane %v2483_v22, 5  ;;  %v8955_v27 = vpop.f32.mrb[23].mxu0  ;;  %v10798_v9 = vpop.f32.mrb[23].mxu1 }
0x12f0   :  { %v8956_v32 = vadd.f32 %v8955_v27, %v8954_v56 }
0x12f1   :  { %v2490_v52 = vadd.f32 %v2488_v55, %v15505_v1 }
0x12f2   :  { %v2396_v59 = vadd.f32 %v15449_v0, %v8956_v32 }
0x12f3   :  { %v8340_v50 = vmul.f32 -1.442695, %v2490_v52  ;;  %14195 = vtanh.f32 %v2490_v52 }
0x12f4   :  { %v8339_v18 = vmul.f32 -1.442695, %v2396_v59 }
0x12f5   :  { %14197 = vpow2.f32 %v8340_v50 }
0x12f6   :  { %14199 = vpow2.f32 %v8339_v18 }
0x12f7   :  { %14201 = vtanh.f32 %v2396_v59 }
0x12fd   :  { %v14196_v36 = vpop.eup %14195 }
0x12fe   :  { %v2504_v63 = vrot.slane %v14196_v36, 3 }
0x12ff   :  { %v14198_v46 = vpop.eup %14197 }
0x1300   :  { %v14200_v35 = vpop.eup %14199  ;;  %v2494_v25 = vadd.f32 1.0, %v14198_v46  ;;  %2506 = vrot.lane.b32.xlu1 %v2504_v63, %s14803_s19 }
0x1301   :  { %v2402_v22 = vadd.f32 1.0, %v14200_v35  ;;  %v14202_v56 = vpop.eup %14201 }
0x1302   :  { %14203 = vrcp.f32 %v2494_v25 }
0x1303   :  { %14205 = vrcp.f32 %v2402_v22 }
0x1304   :  { %2408 = vrot.lane.b32.xlu1 %v14202_v56, %s14803_s19 }
0x130c   :  { %v14204_v55 = vpop.eup %14203 }
0x130d   :  { %v14206_v27 = vpop.eup %14205  ;;  %v2499_v9 = vrot.slane %v14204_v55, 3 }
0x130e   :  { %2406 = vrot.lane.b32.xlu0 %v14206_v27, %s14802_s17  ;;  %2410 = vrot.lane.b32.xlu1 %v14206_v27, %s14801_s15 }
0x1312   :  { %2501 = vrot.lane.b32.xlu0 %v2499_v9, %s14802_s17 }
0x1316   :  { %2508 = vrot.lane.b32.xlu0 %v2499_v9, %s14801_s15 }
0x1372   :  { %v2507_v32 = vpop.permute.xlu1 %2506 }
0x1373   :  { %v2512_v52 = vrot.slane %v2507_v32, 5  ;;  %v3378_v32 = vrot.slane %v15619_v12, 7 }
0x1375   :  { %v2514_v18 = vmul.f32 %v14204_v55, %v2512_v52  ;;  %v3398_v52 = vsel %vm1783_vm1, %v15566_v45, %v3378_v32 }
0x1376   :  { %v2409_v59 = vpop.permute.xlu1 %2408 }
0x1377   :  { %v2413_v36 = vmul.f32 %v14206_v27, %v2409_v59  ;;  %v2516_v25 = vrot.slane %v2514_v18, 3 }
0x1380   :  { %v2407_v50 = vpop.permute.xlu0 %2406  ;;  %v2411_v14 = vpop.permute.xlu1 %2410 }
0x1381   :  { %v2412_v63 = vmul.f32 %v2407_v50, %v15612_v3 }
0x1383   :  { %v15665_v46 = vadd.f32 %v2413_v36, %v2412_v63 }
0x1384   :  { %v2502_v35 = vpop.permute.xlu0 %2501 }
0x1385   :  { %14207 = vtanh.f32 %v15665_v46  ;;  %v2510_v22 = vmul.f32 %v2502_v35, %v15616_v17 }
0x1387   :  { %v15669_v56 = vadd.f32 %v2516_v25, %v2510_v22 }
0x1388   :  { %v2509_v59 = vpop.permute.xlu0 %2508 }
0x1389   :  { %14209 = vtanh.f32 %v15669_v56 }
0x138f   :  { %v14208_v9 = vpop.eup %14207 }
0x1390   :  { %v2416_v55 = vmul.f32 %v14208_v9, %v2411_v14 }
0x1392   :  { %v3381_v27 = vrot.slane %v2416_v55, 6  ;;  %2585 = vmatprep.mubr.f32.mxu0 %v2416_v55 }
0x1393   :  { %v14210_v3 = vpop.eup %14209 }
0x1394   :  { %v15676_v50 = vsel %vm1785_vm2, %v3398_v52, %v3381_v27  ;;  %v2520_v17 = vmul.f32 %v14210_v3, %v2509_v59 }
0x1396   :  { %2586 = vmatmul.mubr.f32.vlgmr.msra.gmra.mrb[24].mxu0 %v2520_v17  ;;  %10832 = vmatmul.mubr.f32.vlgmr.msra.gmra.mrb[24].mxu1 %v2520_v17 }
0x1397   :  { %12413 = vmatpush3.bf16.msra.mxu0 %v15022_v28  ;;  %12444 = vmatpush3.bf16.msra.mxu1 %v14921_v11 }
0x1398   :  { %12415 = vmatprep.subr.bf16.mxu0 %v15024_v29  ;;  %12445 = vmatprep.subr.bf16.mxu1 %v17312_v41 }
0x1399   :  { %10866 = vmatprep.mubr.msk.f32.mxu1 %vm14800_vm0, %v17311_v2 }
0x139b   :  { %12417 = vmatpush3.bf16.msra.mxu0 %v15028_v37  ;;  %12447 = vmatpush3.bf16.msra.mxu1 %v14930_v20 }
0x139c   :  { %12419 = vmatprep.subr.bf16.mxu0 %v15031_v38  ;;  %12448 = vmatprep.subr.bf16.mxu1 %v17312_v41 }
0x139f   :  { %12421 = vmatpush3.bf16.msra.mxu0 %v15034_v44  ;;  %12450 = vmatpush3.bf16.msra.mxu1 %v14940_v31 }
0x13a0   :  { %12423 = vmatprep.subr.bf16.mxu0 %v15047_v62  ;;  %12451 = vmatprep.subr.bf16.mxu1 %v17312_v41 }
0x13a3   :  { %12425 = vmatpush3.bf16.msra.mxu0 %v15049_v7  ;;  %12453 = vmatpush3.bf16.msra.mxu1 %v14950_v40 }
0x13a4   :  { %12427 = vmatprep.subr.bf16.mxu0 %v15053_v13  ;;  %12454 = vmatprep.subr.bf16.mxu1 %v17312_v41 }
0x13a7   :  { %12429 = vmatpush3.bf16.msra.mxu0 %v15055_v21  ;;  %12456 = vmatpush3.bf16.msra.mxu1 %v14960_v49 }
0x13a8   :  { %12431 = vmatprep.subr.bf16.mxu0 %v15059_v26  ;;  %12457 = vmatprep.subr.bf16.mxu1 %v17312_v41 }
0x13ab   :  { %12433 = vmatpush3.bf16.msra.mxu0 %v15061_v34  ;;  %12459 = vmatpush3.bf16.msra.mxu1 %v14970_v58 }
0x13ac   :  { %12435 = vmatprep.subr.bf16.mxu0 %v15064_v43  ;;  %12460 = vmatprep.subr.bf16.mxu1 %v17312_v41 }
0x13af   :  { %12437 = vmatpush3.bf16.msra.mxu0 %v15067_v53  ;;  %12462 = vmatpush3.bf16.msra.mxu1 %v14980_v5 }
0x13b0   :  { %12439 = vmatprep.subr.bf16.mxu0 %v15070_v54  ;;  %12463 = vmatprep.subr.bf16.mxu1 %v17312_v41 }
0x13b3   :  { %12441 = vmatpush3.bf16.msra.mxu0 %v15075_v61  ;;  %12465 = vmatpush3.bf16.msra.mxu1 %v14990_v16 }
0x13b4   :  { %12467 = vmatprep.subr.bf16.mxu0 %v15020_v23  ;;  %12498 = vmatprep.subr.bf16.mxu1 %v17312_v41 }
0x1469   :  { %v9006_v14 = vpop.f32.mrb[24].mxu0  ;;  %v2675_v45 = vpop.f32.mrb[24].mxu1 }
0x146a   :  { %v2680_v12 = vrot.slane %v2675_v45, 4  ;;  %v9007_v18 = vpop.f32.mrb[25].mxu0  ;;  %v10833_v36 = vpop.f32.mrb[25].mxu1 }
0x146b   :  { %v9008_v63 = vadd.f32 %v9007_v18, %v9006_v14 }
0x146c   :  { %v2682_v35 = vadd.f32 %v2680_v12, %v15505_v1 }
0x146d   :  { %v2588_v25 = vadd.f32 %v15449_v0, %v9008_v63 }
0x146e   :  { %v8342_v22 = vmul.f32 -1.442695, %v2682_v35  ;;  %14211 = vtanh.f32 %v2682_v35 }
0x146f   :  { %v8341_v9 = vmul.f32 -1.442695, %v2588_v25 }
0x1470   :  { %14213 = vpow2.f32 %v8342_v22 }
0x1471   :  { %14215 = vpow2.f32 %v8341_v9 }
0x1472   :  { %14217 = vtanh.f32 %v2588_v25 }
0x1478   :  { %v14212_v32 = vpop.eup %14211 }
0x1479   :  { %v2696_v55 = vrot.slane %v14212_v32, 4 }
0x147a   :  { %v14214_v27 = vpop.eup %14213 }
0x147b   :  { %v14216_v3 = vpop.eup %14215  ;;  %v2686_v52 = vadd.f32 1.0, %v14214_v27  ;;  %2698 = vrot.lane.b32.xlu1 %v2696_v55, %s14803_s19 }
0x147c   :  { %v2594_v59 = vadd.f32 1.0, %v14216_v3  ;;  %v14218_v17 = vpop.eup %14217 }
0x147d   :  { %14219 = vrcp.f32 %v2686_v52 }
0x147e   :  { %14221 = vrcp.f32 %v2594_v59 }
0x147f   :  { %2600 = vrot.lane.b32.xlu1 %v14218_v17, %s14803_s19 }
0x1487   :  { %v14220_v0 = vpop.eup %14219 }
0x1488   :  { %v14222_v14 = vpop.eup %14221  ;;  %v2691_v45 = vrot.slane %v14220_v0, 4 }
0x1489   :  { %2598 = vrot.lane.b32.xlu0 %v14222_v14, %s14802_s17  ;;  %2602 = vrot.lane.b32.xlu1 %v14222_v14, %s14801_s15 }
0x148d   :  { %2693 = vrot.lane.b32.xlu0 %v2691_v45, %s14802_s17 }
0x1491   :  { %2700 = vrot.lane.b32.xlu0 %v2691_v45, %s14801_s15 }
0x14ed   :  { %v2699_v12 = vpop.permute.xlu1 %2698 }
0x14ee   :  { %v2704_v18 = vrot.slane %v2699_v12, 4 }
0x14f0   :  { %v2706_v35 = vmul.f32 %v14220_v0, %v2704_v18 }
0x14f1   :  { %v2601_v36 = vpop.permute.xlu1 %2600 }
0x14f2   :  { %v2605_v25 = vmul.f32 %v14222_v14, %v2601_v36  ;;  %v2708_v55 = vrot.slane %v2706_v35, 4 }
0x14fb   :  { %v2599_v63 = vpop.permute.xlu0 %2598  ;;  %v2603_v59 = vpop.permute.xlu1 %2602 }
0x14fc   :  { %v2604_v22 = vmul.f32 %v2599_v63, %v15665_v46 }
0x14fe   :  { %v15721_v9 = vadd.f32 %v2605_v25, %v2604_v22  ;;  %v15770_v22 = vld [vmem:[%s17291_s4] sm:$0x1] }
0x14ff   :  { %v2694_v32 = vpop.permute.xlu0 %2693 }
0x1500   :  { %14223 = vtanh.f32 %v15721_v9  ;;  %v2702_v27 = vmul.f32 %v2694_v32, %v15669_v56 }
0x1502   :  { %v15725_v3 = vadd.f32 %v2708_v55, %v2702_v27 }
0x1503   :  { %v2701_v14 = vpop.permute.xlu0 %2700 }
0x1504   :  { %14225 = vtanh.f32 %v15725_v3 }
0x150a   :  { %v14224_v52 = vpop.eup %14223 }
0x150b   :  { %v2608_v17 = vmul.f32 %v14224_v52, %v2603_v59 }
0x150d   :  { %v3384_v45 = vrot.slane %v2608_v17, 5  ;;  %2777 = vmatprep.mubr.f32.mxu0 %v2608_v17 }
0x150e   :  { %v14226_v0 = vpop.eup %14225 }
0x150f   :  { %v15730_v46 = vsel %vm1787_vm3, %v15676_v50, %v3384_v45  ;;  %v2712_v12 = vmul.f32 %v14226_v0, %v2701_v14 }
0x1511   :  { %2778 = vmatmul.mubr.f32.vlgmr.msra.gmra.mrb[26].mxu0 %v2712_v12  ;;  %10867 = vmatmul.mubr.f32.vlgmr.msra.gmra.mrb[26].mxu1 %v2712_v12 }
0x1512   :  { %12469 = vmatpush3.bf16.msra.mxu0 %v15022_v28  ;;  %12500 = vmatpush3.bf16.msra.mxu1 %v14921_v11 }
0x1513   :  { %12471 = vmatprep.subr.bf16.mxu0 %v15024_v29  ;;  %12501 = vmatprep.subr.bf16.mxu1 %v17312_v41 }
0x1514   :  { %10901 = vmatprep.mubr.msk.f32.mxu1 %vm14800_vm0, %v17311_v2 }
0x1516   :  { %12473 = vmatpush3.bf16.msra.mxu0 %v15028_v37  ;;  %12503 = vmatpush3.bf16.msra.mxu1 %v14930_v20 }
0x1517   :  { %12475 = vmatprep.subr.bf16.mxu0 %v15031_v38  ;;  %12504 = vmatprep.subr.bf16.mxu1 %v17312_v41 }
0x151a   :  { %12477 = vmatpush3.bf16.msra.mxu0 %v15034_v44  ;;  %12506 = vmatpush3.bf16.msra.mxu1 %v14940_v31 }
0x151b   :  { %12479 = vmatprep.subr.bf16.mxu0 %v15047_v62  ;;  %12507 = vmatprep.subr.bf16.mxu1 %v17312_v41 }
0x151e   :  { %12481 = vmatpush3.bf16.msra.mxu0 %v15049_v7  ;;  %12509 = vmatpush3.bf16.msra.mxu1 %v14950_v40 }
0x151f   :  { %12483 = vmatprep.subr.bf16.mxu0 %v15053_v13  ;;  %12510 = vmatprep.subr.bf16.mxu1 %v17312_v41 }
0x1522   :  { %12485 = vmatpush3.bf16.msra.mxu0 %v15055_v21  ;;  %12512 = vmatpush3.bf16.msra.mxu1 %v14960_v49 }
0x1523   :  { %12487 = vmatprep.subr.bf16.mxu0 %v15059_v26  ;;  %12513 = vmatprep.subr.bf16.mxu1 %v17312_v41 }
0x1526   :  { %12489 = vmatpush3.bf16.msra.mxu0 %v15061_v34  ;;  %12515 = vmatpush3.bf16.msra.mxu1 %v14970_v58 }
0x1527   :  { %12491 = vmatprep.subr.bf16.mxu0 %v15064_v43  ;;  %12516 = vmatprep.subr.bf16.mxu1 %v17312_v41 }
0x152a   :  { %12493 = vmatpush3.bf16.msra.mxu0 %v15067_v53  ;;  %12518 = vmatpush3.bf16.msra.mxu1 %v14980_v5 }
0x152b   :  { %12495 = vmatprep.subr.bf16.mxu0 %v15070_v54  ;;  %12519 = vmatprep.subr.bf16.mxu1 %v17312_v41 }
0x152e   :  { %12497 = vmatpush3.bf16.msra.mxu0 %v15075_v61  ;;  %12521 = vmatpush3.bf16.msra.mxu1 %v14990_v16 }
0x152f   :  { %12523 = vmatprep.subr.bf16.mxu0 %v15020_v23  ;;  %12554 = vmatprep.subr.bf16.mxu1 %v17312_v41 }
0x15e4   :  { %v9058_v56 = vpop.f32.mrb[26].mxu0  ;;  %v2867_v50 = vpop.f32.mrb[26].mxu1 }
0x15e5   :  { %v2872_v18 = vrot.slane %v2867_v50, 3  ;;  %v9059_v36 = vpop.f32.mrb[27].mxu0  ;;  %v10868_v63 = vpop.f32.mrb[27].mxu1 }
0x15e6   :  { %v9060_v35 = vadd.f32 %v9059_v36, %v9058_v56 }
0x15e7   :  { %v2874_v25 = vadd.f32 %v2872_v18, %v15505_v1 }
0x15e8   :  { %v2780_v32 = vadd.f32 %v15770_v22, %v9060_v35 }
0x15e9   :  { %v8344_v55 = vmul.f32 -1.442695, %v2874_v25  ;;  %14227 = vtanh.f32 %v2874_v25 }
0x15ea   :  { %v8343_v27 = vmul.f32 -1.442695, %v2780_v32 }
0x15eb   :  { %14229 = vpow2.f32 %v8344_v55 }
0x15ec   :  { %14231 = vpow2.f32 %v8343_v27 }
0x15ed   :  { %14233 = vtanh.f32 %v2780_v32 }
0x15f3   :  { %v14228_v52 = vpop.eup %14227 }
0x15f4   :  { %v2888_v59 = vrot.slane %v14228_v52, 5 }
0x15f5   :  { %v14230_v17 = vpop.eup %14229 }
0x15f6   :  { %v14232_v45 = vpop.eup %14231  ;;  %v2878_v0 = vadd.f32 1.0, %v14230_v17  ;;  %2890 = vrot.lane.b32.xlu1 %v2888_v59, %s14803_s19 }
0x15f7   :  { %v2786_v14 = vadd.f32 1.0, %v14232_v45  ;;  %v14234_v12 = vpop.eup %14233 }
0x15f8   :  { %14235 = vrcp.f32 %v2878_v0 }
0x15f9   :  { %14237 = vrcp.f32 %v2786_v14 }
0x15fa   :  { %2792 = vrot.lane.b32.xlu1 %v14234_v12, %s14803_s19 }
0x1602   :  { %v14236_v56 = vpop.eup %14235 }
0x1603   :  { %v14238_v50 = vpop.eup %14237  ;;  %v2883_v18 = vrot.slane %v14236_v56, 5 }
0x1604   :  { %2790 = vrot.lane.b32.xlu0 %v14238_v50, %s14802_s17  ;;  %2794 = vrot.lane.b32.xlu1 %v14238_v50, %s14801_s15 }
0x1608   :  { %2885 = vrot.lane.b32.xlu0 %v2883_v18, %s14802_s17 }
0x160c   :  { %2892 = vrot.lane.b32.xlu0 %v2883_v18, %s14801_s15 }
0x1668   :  { %v2891_v36 = vpop.permute.xlu1 %2890 }
0x1669   :  { %v2896_v63 = vrot.slane %v2891_v36, 3 }
0x166b   :  { %v2898_v32 = vmul.f32 %v14236_v56, %v2896_v63 }
0x166c   :  { %v2793_v35 = vpop.permute.xlu1 %2792 }
0x166d   :  { %v2797_v55 = vmul.f32 %v14238_v50, %v2793_v35  ;;  %v2900_v17 = vrot.slane %v2898_v32, 5 }
0x1676   :  { %v2791_v25 = vpop.permute.xlu0 %2790  ;;  %v2795_v12 = vpop.permute.xlu1 %2794 }
0x1677   :  { %v2796_v27 = vmul.f32 %v2791_v25, %v15721_v9 }
0x1679   :  { %v15780_v52 = vadd.f32 %v2797_v55, %v2796_v27 }
0x167a   :  { %v2886_v59 = vpop.permute.xlu0 %2885 }
0x167b   :  { %14239 = vtanh.f32 %v15780_v52  ;;  %v2894_v45 = vmul.f32 %v2886_v59, %v15725_v3 }
0x167d   :  { %v15784_v0 = vadd.f32 %v2900_v17, %v2894_v45 }
0x167e   :  { %v2893_v50 = vpop.permute.xlu0 %2892 }
0x167f   :  { %14241 = vtanh.f32 %v15784_v0 }
0x1685   :  { %v14240_v14 = vpop.eup %14239 }
0x1686   :  { %v2800_v18 = vmul.f32 %v14240_v14, %v2795_v12 }
0x1688   :  { %v3387_v36 = vrot.slane %v2800_v18, 4  ;;  %2969 = vmatprep.mubr.f32.mxu0 %v2800_v18 }
0x1689   :  { %v14242_v56 = vpop.eup %14241 }
0x168a   :  { %v15789_v9 = vsel %vm1789_vm4, %v15730_v46, %v3387_v36  ;;  %v2904_v63 = vmul.f32 %v14242_v56, %v2893_v50 }
0x168c   :  { %2970 = vmatmul.mubr.f32.vlgmr.msra.gmra.mrb[28].mxu0 %v2904_v63  ;;  %10902 = vmatmul.mubr.f32.vlgmr.msra.gmra.mrb[28].mxu1 %v2904_v63 }
0x168d   :  { %12525 = vmatpush3.bf16.msra.mxu0 %v15022_v28  ;;  %12556 = vmatpush3.bf16.msra.mxu1 %v14921_v11 }
0x168e   :  { %12527 = vmatprep.subr.bf16.mxu0 %v15024_v29  ;;  %12557 = vmatprep.subr.bf16.mxu1 %v17312_v41 }
0x168f   :  { %10936 = vmatprep.mubr.msk.f32.mxu1 %vm14800_vm0, %v17311_v2 }
0x1691   :  { %12529 = vmatpush3.bf16.msra.mxu0 %v15028_v37  ;;  %12559 = vmatpush3.bf16.msra.mxu1 %v14930_v20 }
0x1692   :  { %12531 = vmatprep.subr.bf16.mxu0 %v15031_v38  ;;  %12560 = vmatprep.subr.bf16.mxu1 %v17312_v41 }
0x1695   :  { %12533 = vmatpush3.bf16.msra.mxu0 %v15034_v44  ;;  %12562 = vmatpush3.bf16.msra.mxu1 %v14940_v31 }
0x1696   :  { %12535 = vmatprep.subr.bf16.mxu0 %v15047_v62  ;;  %12563 = vmatprep.subr.bf16.mxu1 %v17312_v41 }
0x1699   :  { %12537 = vmatpush3.bf16.msra.mxu0 %v15049_v7  ;;  %12565 = vmatpush3.bf16.msra.mxu1 %v14950_v40 }
0x169a   :  { %12539 = vmatprep.subr.bf16.mxu0 %v15053_v13  ;;  %12566 = vmatprep.subr.bf16.mxu1 %v17312_v41 }
0x169d   :  { %12541 = vmatpush3.bf16.msra.mxu0 %v15055_v21  ;;  %12568 = vmatpush3.bf16.msra.mxu1 %v14960_v49 }
0x169e   :  { %12543 = vmatprep.subr.bf16.mxu0 %v15059_v26  ;;  %12569 = vmatprep.subr.bf16.mxu1 %v17312_v41 }
0x16a1   :  { %12545 = vmatpush3.bf16.msra.mxu0 %v15061_v34  ;;  %12571 = vmatpush3.bf16.msra.mxu1 %v14970_v58 }
0x16a2   :  { %12547 = vmatprep.subr.bf16.mxu0 %v15064_v43  ;;  %12572 = vmatprep.subr.bf16.mxu1 %v17312_v41 }
0x16a5   :  { %12549 = vmatpush3.bf16.msra.mxu0 %v15067_v53  ;;  %12574 = vmatpush3.bf16.msra.mxu1 %v14980_v5 }
0x16a6   :  { %12551 = vmatprep.subr.bf16.mxu0 %v15070_v54  ;;  %12575 = vmatprep.subr.bf16.mxu1 %v17312_v41 }
0x16a9   :  { %12553 = vmatpush3.bf16.msra.mxu0 %v15075_v61  ;;  %12577 = vmatpush3.bf16.msra.mxu1 %v14990_v16 }
0x16aa   :  { %12579 = vmatprep.subr.bf16.mxu0 %v15020_v23  ;;  %12611 = vmatprep.subr.bf16.mxu1 %v14917_v6 }
0x175f   :  { %v9110_v3 = vpop.f32.mrb[28].mxu0  ;;  %v3059_v46 = vpop.f32.mrb[28].mxu1 }
0x1760   :  { %v3064_v35 = vrot.slane %v3059_v46, 2  ;;  %v9111_v25 = vpop.f32.mrb[29].mxu0  ;;  %v10903_v32 = vpop.f32.mrb[29].mxu1 }
0x1761   :  { %v9112_v55 = vadd.f32 %v9111_v25, %v9110_v3 }
0x1762   :  { %v3066_v27 = vadd.f32 %v3064_v35, %v15505_v1 }
0x1763   :  { %v2972_v59 = vadd.f32 %v15770_v22, %v9112_v55 }
0x1764   :  { %v8346_v17 = vmul.f32 -1.442695, %v3066_v27  ;;  %14243 = vtanh.f32 %v3066_v27 }
0x1765   :  { %v8345_v45 = vmul.f32 -1.442695, %v2972_v59 }
0x1766   :  { %14245 = vpow2.f32 %v8346_v17 }
0x1767   :  { %14247 = vpow2.f32 %v8345_v45 }
0x1768   :  { %14249 = vtanh.f32 %v2972_v59 }
0x176e   :  { %v14244_v14 = vpop.eup %14243 }
0x176f   :  { %v3080_v12 = vrot.slane %v14244_v14, 6 }
0x1770   :  { %v14246_v18 = vpop.eup %14245 }
0x1771   :  { %v14248_v36 = vpop.eup %14247  ;;  %v3070_v56 = vadd.f32 1.0, %v14246_v18  ;;  %3082 = vrot.lane.b32.xlu1 %v3080_v12, %s14803_s19 }
0x1772   :  { %v2978_v50 = vadd.f32 1.0, %v14248_v36  ;;  %v14250_v63 = vpop.eup %14249 }
0x1773   :  { %14251 = vrcp.f32 %v3070_v56 }
0x1774   :  { %14253 = vrcp.f32 %v2978_v50 }
0x1775   :  { %2984 = vrot.lane.b32.xlu1 %v14250_v63, %s14803_s19 }
0x177d   :  { %v14252_v3 = vpop.eup %14251 }
0x177e   :  { %v14254_v46 = vpop.eup %14253  ;;  %v3075_v35 = vrot.slane %v14252_v3, 6 }
0x177f   :  { %2982 = vrot.lane.b32.xlu0 %v14254_v46, %s14802_s17  ;;  %2986 = vrot.lane.b32.xlu1 %v14254_v46, %s14801_s15 }
0x1783   :  { %3077 = vrot.lane.b32.xlu0 %v3075_v35, %s14802_s17 }
0x1787   :  { %3084 = vrot.lane.b32.xlu0 %v3075_v35, %s14801_s15 }
0x17e3   :  { %v3083_v25 = vpop.permute.xlu1 %3082 }
0x17e4   :  { %v3088_v32 = vrot.slane %v3083_v25, 2 }
0x17e6   :  { %v3090_v59 = vmul.f32 %v14252_v3, %v3088_v32 }
0x17e7   :  { %v2985_v55 = vpop.permute.xlu1 %2984 }
0x17e8   :  { %v2989_v17 = vmul.f32 %v14254_v46, %v2985_v55  ;;  %v3092_v18 = vrot.slane %v3090_v59, 6 }
0x17f1   :  { %v2983_v27 = vpop.permute.xlu0 %2982  ;;  %v2987_v63 = vpop.permute.xlu1 %2986 }
0x17f2   :  { %v2988_v45 = vmul.f32 %v2983_v27, %v15780_v52 }
0x17f4   :  { %v15834_v14 = vadd.f32 %v2989_v17, %v2988_v45 }
0x17f5   :  { %v3078_v12 = vpop.permute.xlu0 %3077 }
0x17f6   :  { %14255 = vtanh.f32 %v15834_v14  ;;  %v3086_v36 = vmul.f32 %v3078_v12, %v15784_v0  ;;  %v17314_v0 = vld [vmem:[#allocation15_spill] sm:$0xff] }
0x17f8   :  { %v15838_v56 = vadd.f32 %v3092_v18, %v3086_v36 }
0x17f9   :  { %v3085_v46 = vpop.permute.xlu0 %3084 }
0x17fa   :  { %14257 = vtanh.f32 %v15838_v56 }
0x1800   :  { %v14256_v50 = vpop.eup %14255 }
0x1801   :  { %v2992_v35 = vmul.f32 %v14256_v50, %v2987_v63 }
0x1803   :  { %v3390_v25 = vrot.slane %v2992_v35, 3  ;;  %3161 = vmatprep.mubr.f32.mxu0 %v2992_v35 }
0x1804   :  { %v14258_v3 = vpop.eup %14257 }
0x1805   :  { %v3096_v52 = vmul.f32 %v14258_v3, %v3085_v46  ;;  %v15843_v32 = vsel %vm1791_vm5, %v15789_v9, %v3390_v25 }
0x1807   :  { %3162 = vmatmul.mubr.f32.vlgmr.msra.gmra.mrb[30].mxu0 %v3096_v52  ;;  %10937 = vmatmul.mubr.f32.vlgmr.msra.gmra.mrb[30].mxu1 %v3096_v52 }
0x1808   :  { %12581 = vmatpush3.bf16.msra.mxu0 %v15022_v28  ;;  %12613 = vmatpush1.bf16.msra.mxu1 %v14919_v10 }
0x1809   :  { %12583 = vmatprep.subr.bf16.mxu0 %v15024_v29  ;;  %12615 = vmatprep.subr.bf16.mxu1 %v14924_v15 }
0x180a   :  { %3471 = vmatprep.mubr.f32.mxu1 %v17311_v2 }
0x180c   :  { %12585 = vmatpush3.bf16.msra.mxu0 %v15028_v37  ;;  %12617 = vmatpush1.bf16.msra.mxu1 %v14928_v19 }
0x180d   :  { %12587 = vmatprep.subr.bf16.mxu0 %v15031_v38  ;;  %12619 = vmatprep.subr.bf16.mxu1 %v14934_v24 }
0x1810   :  { %12589 = vmatpush3.bf16.msra.mxu0 %v15034_v44  ;;  %12621 = vmatpush1.bf16.msra.mxu1 %v14938_v30 }
0x1811   :  { %12591 = vmatprep.subr.bf16.mxu0 %v15047_v62  ;;  %12623 = vmatprep.subr.bf16.mxu1 %v14944_v33 }
0x1814   :  { %12593 = vmatpush3.bf16.msra.mxu0 %v15049_v7  ;;  %12625 = vmatpush1.bf16.msra.mxu1 %v14948_v39 }
0x1815   :  { %12595 = vmatprep.subr.bf16.mxu0 %v15053_v13  ;;  %12627 = vmatprep.subr.bf16.mxu1 %v14954_v42 }
0x1818   :  { %12597 = vmatpush3.bf16.msra.mxu0 %v15055_v21  ;;  %12629 = vmatpush1.bf16.msra.mxu1 %v14958_v48 }
0x1819   :  { %12599 = vmatprep.subr.bf16.mxu0 %v15059_v26  ;;  %12631 = vmatprep.subr.bf16.mxu1 %v14964_v51 }
0x181c   :  { %12601 = vmatpush3.bf16.msra.mxu0 %v15061_v34  ;;  %12633 = vmatpush1.bf16.msra.mxu1 %v14968_v57 }
0x181d   :  { %12603 = vmatprep.subr.bf16.mxu0 %v15064_v43  ;;  %12635 = vmatprep.subr.bf16.mxu1 %v14974_v60 }
0x1820   :  { %12605 = vmatpush3.bf16.msra.mxu0 %v15067_v53  ;;  %12637 = vmatpush1.bf16.msra.mxu1 %v14978_v4 }
0x1821   :  { %12607 = vmatprep.subr.bf16.mxu0 %v15070_v54  ;;  %12639 = vmatprep.subr.bf16.mxu1 %v14984_v8 }
0x1824   :  { %12609 = vmatpush3.bf16.msra.mxu0 %v15075_v61  ;;  %12641 = vmatpush1.bf16.msra.mxu1 %v17314_v0 }
0x1825   :  { %12643 = vmatprep.subr.bf16.mxu0 %v15020_v23  ;;  %12674 = vmatprep.subr.bf16.mxu1 %v17312_v41 }
0x18da   :  { %v9162_v9 = vpop.f32.mrb[30].mxu0  ;;  %v3251_v55 = vpop.f32.mrb[30].mxu1 }
0x18db   :  { %v3256_v27 = vrot.slane %v3251_v55, 1  ;;  %v9163_v59 = vpop.f32.mrb[31].mxu0  ;;  %v10938_v17 = vpop.f32.mrb[31].mxu1 }
0x18dc   :  { %v9164_v45 = vadd.f32 %v9163_v59, %v9162_v9 }
0x18dd   :  { %v3258_v12 = vadd.f32 %v3256_v27, %v15505_v1 }
0x18de   :  { %v3164_v18 = vadd.f32 %v15770_v22, %v9164_v45 }
0x18df   :  { %v8348_v36 = vmul.f32 -1.442695, %v3258_v12  ;;  %14259 = vtanh.f32 %v3258_v12 }
0x18e0   :  { %v8347_v50 = vmul.f32 -1.442695, %v3164_v18 }
0x18e1   :  { %14261 = vpow2.f32 %v8348_v36 }
0x18e2   :  { %14263 = vpow2.f32 %v8347_v50 }
0x18e3   :  { %14265 = vtanh.f32 %v3164_v18 }
0x18e9   :  { %v14260_v63 = vpop.eup %14259 }
0x18ea   :  { %v3272_v35 = vrot.slane %v14260_v63, 7 }
0x18eb   :  { %v14262_v25 = vpop.eup %14261 }
0x18ec   :  { %v14264_v3 = vpop.eup %14263  ;;  %v3262_v46 = vadd.f32 1.0, %v14262_v25  ;;  %3274 = vrot.lane.b32.xlu1 %v3272_v35, %s14803_s19 }
0x18ed   :  { %v3170_v52 = vadd.f32 1.0, %v14264_v3  ;;  %v14266_v9 = vpop.eup %14265 }
0x18ee   :  { %14267 = vrcp.f32 %v3262_v46 }
0x18ef   :  { %14269 = vrcp.f32 %v3170_v52 }
0x18f0   :  { %3176 = vrot.lane.b32.xlu1 %v14266_v9, %s14803_s19 }
0x18f8   :  { %v14268_v1 = vpop.eup %14267 }
0x18f9   :  { %v14270_v55 = vpop.eup %14269  ;;  %v3267_v27 = vrot.slane %v14268_v1, 7 }
0x18fa   :  { %3174 = vrot.lane.b32.xlu0 %v14270_v55, %s14802_s17  ;;  %3178 = vrot.lane.b32.xlu1 %v14270_v55, %s14801_s15 }
0x18fe   :  { %3269 = vrot.lane.b32.xlu0 %v3267_v27, %s14802_s17 }
0x1902   :  { %3276 = vrot.lane.b32.xlu0 %v3267_v27, %s14801_s15 }
0x195e   :  { %v3275_v59 = vpop.permute.xlu1 %3274 }
0x195f   :  { %v3280_v17 = vrot.slane %v3275_v59, 1 }
0x1961   :  { %v3282_v18 = vmul.f32 %v14268_v1, %v3280_v17 }
0x1962   :  { %v3177_v45 = vpop.permute.xlu1 %3176 }
0x1963   :  { %v3181_v36 = vmul.f32 %v14270_v55, %v3177_v45  ;;  %v3284_v25 = vrot.slane %v3282_v18, 7 }
0x196c   :  { %v3175_v12 = vpop.permute.xlu0 %3174  ;;  %v3179_v9 = vpop.permute.xlu1 %3178 }
0x196d   :  { %v3180_v50 = vmul.f32 %v3175_v12, %v15834_v14 }
0x196f   :  { %v3182_v63 = vadd.f32 %v3181_v36, %v3180_v50 }
0x1970   :  { %v3270_v35 = vpop.permute.xlu0 %3269 }
0x1971   :  { %14271 = vtanh.f32 %v3182_v63  ;;  %v3278_v3 = vmul.f32 %v3270_v35, %v15838_v56 }
0x1973   :  { %v3286_v46 = vadd.f32 %v3284_v25, %v3278_v3 }
0x1974   :  { %v3277_v8 = vpop.permute.xlu0 %3276 }
0x1975   :  { %14273 = vtanh.f32 %v3286_v46 }
0x197b   :  { %v14272_v52 = vpop.eup %14271 }
0x197c   :  { %v3184_v0 = vmul.f32 %v14272_v52, %v3179_v9 }
0x197e   :  { %v3393_v27 = vrot.slane %v3184_v0, 2  ;;  %3353 = vmatprep.mubr.f32.mxu0 %v3184_v0 }
0x197f   :  { %v14274_v59 = vpop.eup %14273 }
0x1980   :  { %v3288_v4 = vmul.f32 %v14274_v59, %v3277_v8  ;;  %v3403_v1 = vsel %vm1793_vm6, %v15843_v32, %v3393_v27  ;;  %v14690_v27 = vld [vmem:[%s17290_s3] ss:$0 sm:$0xff] }
0x1982   :  { %3354 = vmatmul.mubr.f32.vlgmr.msra.gmra.mrb[32].mxu0 %v3288_v4 }
0x1983   :  { %12645 = vmatpush3.bf16.msra.mxu0 %v15022_v28  ;;  %3601 = vmatprep.mubr.f32.mxu0 %v17311_v2 }
0x1984   :  { %12647 = vmatprep.subr.bf16.mxu0 %v15024_v29 }
0x1987   :  { %12649 = vmatpush3.bf16.msra.mxu0 %v15028_v37 }
0x1988   :  { %12651 = vmatprep.subr.bf16.mxu0 %v15031_v38 }
0x198b   :  { %12653 = vmatpush3.bf16.msra.mxu0 %v15034_v44 }
0x198c   :  { %12655 = vmatprep.subr.bf16.mxu0 %v15047_v62 }
0x198f   :  { %12657 = vmatpush3.bf16.msra.mxu0 %v15049_v7 }
0x1990   :  { %12659 = vmatprep.subr.bf16.mxu0 %v15053_v13 }
0x1993   :  { %12661 = vmatpush3.bf16.msra.mxu0 %v15055_v21 }
0x1994   :  { %12663 = vmatprep.subr.bf16.mxu0 %v15059_v26 }
0x1997   :  { %12665 = vmatpush3.bf16.msra.mxu0 %v15061_v34 }
0x1998   :  { %12667 = vmatprep.subr.bf16.mxu0 %v15064_v43 }
0x199b   :  { %12669 = vmatpush3.bf16.msra.mxu0 %v15067_v53 }
0x199c   :  { %12671 = vmatprep.subr.bf16.mxu0 %v15070_v54 }
0x199f   :  { %12673 = vmatpush3.bf16.msra.mxu0 %v15075_v61 }
0x19a0   :  { %12699 = vmatprep.subr.bf16.mxu0 %v15020_v23 }
0x1a55   :  { %v9214_v4 = vpop.f32.mrb[32].mxu0 }
0x1a56   :  { %v9215_v8 = vpop.f32.mrb[33].mxu0 }
0x1a57   :  { %v9216_v14 = vadd.f32 %v9215_v8, %v9214_v4 }
0x1a59   :  { %v3356_v56 = vadd.f32 %v15770_v22, %v9216_v14 }
0x1a5b   :  { %v8349_v32 = vmul.f32 -1.442695, %v3356_v56  ;;  %14275 = vtanh.f32 %v3356_v56 }
0x1a5d   :  { %14277 = vpow2.f32 %v8349_v32 }
0x1a65   :  { %v14276_v0 = vpop.eup %14275 }
0x1a66   :  { %3368 = vrot.lane.b32.xlu0 %v14276_v0, %s14803_s19 }
0x1a67   :  { %v14278_v55 = vpop.eup %14277 }
0x1a68   :  { %v3362_v17 = vadd.f32 1.0, %v14278_v55 }
0x1a6a   :  { %14279 = vrcp.f32 %v3362_v17 }
0x1a74   :  { %v14280_v45 = vpop.eup %14279 }
0x1a75   :  { %3366 = vrot.lane.b32.xlu1 %v14280_v45, %s14802_s17 }
0x1a79   :  { %3370 = vrot.lane.b32.xlu1 %v14280_v45, %s14801_s15 }
0x1ad8   :  { %v3369_v12 = vpop.permute.xlu0 %3368 }
0x1ad9   :  { %v3373_v36 = vmul.f32 %v14280_v45, %v3369_v12 }
0x1ae7   :  { %v3367_v18 = vpop.permute.xlu1 %3366 }
0x1ae8   :  { %v3372_v50 = vmul.f32 %v3367_v18, %v3182_v63 }
0x1aea   :  { %v3374_v35 = vadd.f32 %v3373_v36, %v3372_v50 }
0x1aeb   :  { %v3371_v3 = vpop.permute.xlu1 %3370 }
0x1aec   :  { %14281 = vtanh.f32 %v3374_v35 }
0x1af6   :  { %v14282_v25 = vpop.eup %14281 }
0x1af7   :  { %v3376_v46 = vmul.f32 %v14282_v25, %v3371_v3 }
0x1af9   :  { %v3396_v52 = vrot.slane %v3376_v46, 1 }
0x1afb   :  { %v3404_v9 = vsel %vm1795_vm7, %v3403_v1, %v3396_v52 }
0x1afc   :  { %3406 = vst [vmem:[#allocation9 + $0x8] sm:$0xff] %v3404_v9  ;;  %3472 = vmatmul.mubr.f32.vlgmr.msra.gmra.mrb[32].mxu1 %v3404_v9 }
0x1afd   :  { %12676 = vmatpush3.bf16.msra.mxu1 %v14921_v11  ;;  %10971 = vmatprep.mubr.msk.f32.mxu1 %vm14800_vm0, %v17311_v2 }
0x1afe   :  { %12677 = vmatprep.subr.bf16.mxu1 %v17312_v41 }
0x1b01   :  { %12679 = vmatpush3.bf16.msra.mxu1 %v14930_v20 }
0x1b02   :  { %12680 = vmatprep.subr.bf16.mxu1 %v17312_v41 }
0x1b05   :  { %12682 = vmatpush3.bf16.msra.mxu1 %v14940_v31 }
0x1b06   :  { %12683 = vmatprep.subr.bf16.mxu1 %v17312_v41 }
0x1b09   :  { %12685 = vmatpush3.bf16.msra.mxu1 %v14950_v40 }
0x1b0a   :  { %12686 = vmatprep.subr.bf16.mxu1 %v17312_v41 }
0x1b0d   :  { %12688 = vmatpush3.bf16.msra.mxu1 %v14960_v49 }
0x1b0e   :  { %12689 = vmatprep.subr.bf16.mxu1 %v17312_v41 }
0x1b11   :  { %12691 = vmatpush3.bf16.msra.mxu1 %v14970_v58 }
0x1b12   :  { %12692 = vmatprep.subr.bf16.mxu1 %v17312_v41 }
0x1b15   :  { %12694 = vmatpush3.bf16.msra.mxu1 %v14980_v5 }
0x1b16   :  { %12695 = vmatprep.subr.bf16.mxu1 %v17312_v41 }
0x1b19   :  { %12697 = vmatpush3.bf16.msra.mxu1 %v14990_v16 }
0x1b1a   :  { %12730 = vmatprep.subr.bf16.mxu1 %v17312_v41 }
0x1bcf   :  { %v3473_v63 = vpop.f32.mrb[32].mxu1 }
0x1bd0   :  { %v15933_v59 = vadd.f32 %v14690_v27, %v3473_v63  ;;  %v15935_v1 = vpop.f32.mrb[33].mxu1 }
0x1bd1   :  { %17315 = vst [vmem:[#allocation17_spill] sm:$0xff] %v15935_v1 }
0x1bd2   :  { %v3518_v4 = vadd.f32 %v15933_v59, %v15041_v47 }
0x1bd4   :  { %14283 = vtanh.f32 %v3518_v4  ;;  %v8351_v8 = vmul.f32 -1.442695, %v3518_v4 }
0x1bd6   :  { %14285 = vpow2.f32 %v8351_v8 }
0x1bde   :  { %v14284_v14 = vpop.eup %14283 }
0x1bdf   :  { %3528 = vrot.lane.b32.xlu1 %v14284_v14, %s14803_s19 }
0x1be0   :  { %v14286_v56 = vpop.eup %14285 }
0x1be1   :  { %v3522_v32 = vadd.f32 1.0, %v14286_v56 }
0x1be3   :  { %14287 = vrcp.f32 %v3522_v32 }
0x1bed   :  { %v14288_v0 = vpop.eup %14287 }
0x1bee   :  { %3526 = vrot.lane.b32.xlu0 %v14288_v0, %s14802_s17 }
0x1bf2   :  { %3530 = vrot.lane.b32.xlu0 %v14288_v0, %s14801_s15 }
0x1c51   :  { %v3529_v55 = vpop.permute.xlu1 %3528 }
0x1c52   :  { %v3533_v45 = vmul.f32 %v14288_v0, %v3529_v55 }
0x1c60   :  { %v3527_v17 = vpop.permute.xlu0 %3526 }
0x1c61   :  { %v3532_v12 = vmul.f32 0.0, %v3527_v17 }
0x1c63   :  { %v15942_v18 = vadd.f32 %v3533_v45, %v3532_v12 }
0x1c64   :  { %v3531_v50 = vpop.permute.xlu0 %3530 }
0x1c65   :  { %14289 = vtanh.f32 %v15942_v18 }
0x1c6f   :  { %v14290_v36 = vpop.eup %14289 }
0x1c70   :  { %v3536_v35 = vmul.f32 %v14290_v36, %v3531_v50 }
0x1c72   :  { %3602 = vmatmul.mubr.f32.vlgmr.msra.gmra.mrb[34].mxu0 %v3536_v35  ;;  %10972 = vmatmul.mubr.f32.vlgmr.msra.gmra.mrb[34].mxu1 %v3536_v35 }
0x1c73   :  { %12701 = vmatpush3.bf16.msra.mxu0 %v15022_v28  ;;  %12732 = vmatpush3.bf16.msra.mxu1 %v14921_v11 }
0x1c74   :  { %12703 = vmatprep.subr.bf16.mxu0 %v15024_v29  ;;  %12733 = vmatprep.subr.bf16.mxu1 %v17312_v41 }
0x1c75   :  { %11006 = vmatprep.mubr.msk.f32.mxu1 %vm14800_vm0, %v17311_v2 }
0x1c77   :  { %12705 = vmatpush3.bf16.msra.mxu0 %v15028_v37  ;;  %12735 = vmatpush3.bf16.msra.mxu1 %v14930_v20 }
0x1c78   :  { %12707 = vmatprep.subr.bf16.mxu0 %v15031_v38  ;;  %12736 = vmatprep.subr.bf16.mxu1 %v17312_v41 }
0x1c7b   :  { %12709 = vmatpush3.bf16.msra.mxu0 %v15034_v44  ;;  %12738 = vmatpush3.bf16.msra.mxu1 %v14940_v31 }
0x1c7c   :  { %12711 = vmatprep.subr.bf16.mxu0 %v15047_v62  ;;  %12739 = vmatprep.subr.bf16.mxu1 %v17312_v41 }
0x1c7f   :  { %12713 = vmatpush3.bf16.msra.mxu0 %v15049_v7  ;;  %12741 = vmatpush3.bf16.msra.mxu1 %v14950_v40 }
0x1c80   :  { %12715 = vmatprep.subr.bf16.mxu0 %v15053_v13  ;;  %12742 = vmatprep.subr.bf16.mxu1 %v17312_v41 }
0x1c83   :  { %12717 = vmatpush3.bf16.msra.mxu0 %v15055_v21  ;;  %12744 = vmatpush3.bf16.msra.mxu1 %v14960_v49 }
0x1c84   :  { %12719 = vmatprep.subr.bf16.mxu0 %v15059_v26  ;;  %12745 = vmatprep.subr.bf16.mxu1 %v17312_v41 }
0x1c87   :  { %12721 = vmatpush3.bf16.msra.mxu0 %v15061_v34  ;;  %12747 = vmatpush3.bf16.msra.mxu1 %v14970_v58 }
0x1c88   :  { %12723 = vmatprep.subr.bf16.mxu0 %v15064_v43  ;;  %12748 = vmatprep.subr.bf16.mxu1 %v17312_v41 }
0x1c8b   :  { %12725 = vmatpush3.bf16.msra.mxu0 %v15067_v53  ;;  %12750 = vmatpush3.bf16.msra.mxu1 %v14980_v5 }
0x1c8c   :  { %12727 = vmatprep.subr.bf16.mxu0 %v15070_v54  ;;  %12751 = vmatprep.subr.bf16.mxu1 %v17312_v41 }
0x1c8f   :  { %12729 = vmatpush3.bf16.msra.mxu0 %v15075_v61  ;;  %12753 = vmatpush3.bf16.msra.mxu1 %v14990_v16 }
0x1c90   :  { %12755 = vmatprep.subr.bf16.mxu0 %v15020_v23  ;;  %12786 = vmatprep.subr.bf16.mxu1 %v17312_v41 }
0x1d45   :  { %v9249_v25 = vpop.f32.mrb[34].mxu0  ;;  %v3691_v3 = vpop.f32.mrb[34].mxu1 }
0x1d46   :  { %v3696_v46 = vrot.slane %v3691_v3, 7  ;;  %v9250_v52 = vpop.f32.mrb[35].mxu0  ;;  %v10973_v9 = vpop.f32.mrb[35].mxu1 }
0x1d47   :  { %v9251_v63 = vadd.f32 %v9250_v52, %v9249_v25 }
0x1d48   :  { %v3698_v27 = vadd.f32 %v3696_v46, %v15933_v59 }
0x1d49   :  { %v3604_v4 = vadd.f32 %v15770_v22, %v9251_v63 }
0x1d4a   :  { %v8353_v8 = vmul.f32 -1.442695, %v3698_v27  ;;  %14291 = vtanh.f32 %v3698_v27 }
0x1d4b   :  { %v8352_v14 = vmul.f32 -1.442695, %v3604_v4 }
0x1d4c   :  { %14293 = vpow2.f32 %v8353_v8 }
0x1d4d   :  { %14295 = vpow2.f32 %v8352_v14 }
0x1d4e   :  { %14297 = vtanh.f32 %v3604_v4 }
0x1d54   :  { %v14292_v56 = vpop.eup %14291 }
0x1d55   :  { %v3712_v32 = vrot.slane %v14292_v56, 1 }
0x1d56   :  { %v14294_v0 = vpop.eup %14293 }
0x1d57   :  { %v14296_v55 = vpop.eup %14295  ;;  %v3702_v17 = vadd.f32 1.0, %v14294_v0  ;;  %3714 = vrot.lane.b32.xlu1 %v3712_v32, %s14803_s19 }
0x1d58   :  { %v3610_v45 = vadd.f32 1.0, %v14296_v55  ;;  %v14298_v12 = vpop.eup %14297 }
0x1d59   :  { %14299 = vrcp.f32 %v3702_v17 }
0x1d5a   :  { %14301 = vrcp.f32 %v3610_v45 }
0x1d5b   :  { %3616 = vrot.lane.b32.xlu1 %v14298_v12, %s14803_s19 }
0x1d63   :  { %v14300_v36 = vpop.eup %14299 }
0x1d64   :  { %v14302_v50 = vpop.eup %14301  ;;  %v3707_v35 = vrot.slane %v14300_v36, 1 }
0x1d65   :  { %3614 = vrot.lane.b32.xlu0 %v14302_v50, %s14802_s17  ;;  %3618 = vrot.lane.b32.xlu1 %v14302_v50, %s14801_s15 }
0x1d69   :  { %3709 = vrot.lane.b32.xlu0 %v3707_v35, %s14802_s17 }
0x1d6d   :  { %3716 = vrot.lane.b32.xlu0 %v3707_v35, %s14801_s15 }
0x1dc9   :  { %v3715_v25 = vpop.permute.xlu1 %3714 }
0x1dca   :  { %v3720_v3 = vrot.slane %v3715_v25, 7 }
0x1dcc   :  { %v3722_v9 = vmul.f32 %v14300_v36, %v3720_v3 }
0x1dcd   :  { %v3617_v46 = vpop.permute.xlu1 %3616 }
0x1dce   :  { %v3621_v63 = vmul.f32 %v14302_v50, %v3617_v46  ;;  %v3724_v14 = vrot.slane %v3722_v9, 1 }
0x1dd7   :  { %v3615_v52 = vpop.permute.xlu0 %3614  ;;  %v3619_v55 = vpop.permute.xlu1 %3618 }
0x1dd8   :  { %v3620_v27 = vmul.f32 0.0, %v3615_v52 }
0x1dda   :  { %v15987_v4 = vadd.f32 %v3621_v63, %v3620_v27 }
0x1ddb   :  { %v3710_v8 = vpop.permute.xlu0 %3709 }
0x1ddc   :  { %14303 = vtanh.f32 %v15987_v4  ;;  %v3718_v56 = vmul.f32 %v3710_v8, %v15942_v18 }
0x1dde   :  { %v15991_v32 = vadd.f32 %v3724_v14, %v3718_v56 }
0x1ddf   :  { %v3717_v12 = vpop.permute.xlu0 %3716 }
0x1de0   :  { %14305 = vtanh.f32 %v15991_v32 }
0x1de6   :  { %v14304_v0 = vpop.eup %14303 }
0x1de7   :  { %v15994_v17 = vmul.f32 %v14304_v0, %v3619_v55 }
0x1de9   :  { %3793 = vmatprep.mubr.f32.mxu0 %v15994_v17 }
0x1dea   :  { %v14306_v45 = vpop.eup %14305 }
0x1deb   :  { %v3728_v36 = vmul.f32 %v14306_v45, %v3717_v12 }
0x1ded   :  { %3794 = vmatmul.mubr.f32.vlgmr.msra.gmra.mrb[36].mxu0 %v3728_v36  ;;  %11007 = vmatmul.mubr.f32.vlgmr.msra.gmra.mrb[36].mxu1 %v3728_v36 }
0x1dee   :  { %12757 = vmatpush3.bf16.msra.mxu0 %v15022_v28  ;;  %12788 = vmatpush3.bf16.msra.mxu1 %v14921_v11 }
0x1def   :  { %12759 = vmatprep.subr.bf16.mxu0 %v15024_v29  ;;  %12789 = vmatprep.subr.bf16.mxu1 %v17312_v41 }
0x1df0   :  { %11041 = vmatprep.mubr.msk.f32.mxu1 %vm14800_vm0, %v17311_v2 }
0x1df2   :  { %12761 = vmatpush3.bf16.msra.mxu0 %v15028_v37  ;;  %12791 = vmatpush3.bf16.msra.mxu1 %v14930_v20 }
0x1df3   :  { %12763 = vmatprep.subr.bf16.mxu0 %v15031_v38  ;;  %12792 = vmatprep.subr.bf16.mxu1 %v17312_v41 }
0x1df6   :  { %12765 = vmatpush3.bf16.msra.mxu0 %v15034_v44  ;;  %12794 = vmatpush3.bf16.msra.mxu1 %v14940_v31 }
0x1df7   :  { %12767 = vmatprep.subr.bf16.mxu0 %v15047_v62  ;;  %12795 = vmatprep.subr.bf16.mxu1 %v17312_v41 }
0x1dfa   :  { %12769 = vmatpush3.bf16.msra.mxu0 %v15049_v7  ;;  %12797 = vmatpush3.bf16.msra.mxu1 %v14950_v40 }
0x1dfb   :  { %12771 = vmatprep.subr.bf16.mxu0 %v15053_v13  ;;  %12798 = vmatprep.subr.bf16.mxu1 %v17312_v41 }
0x1dfe   :  { %12773 = vmatpush3.bf16.msra.mxu0 %v15055_v21  ;;  %12800 = vmatpush3.bf16.msra.mxu1 %v14960_v49 }
0x1dff   :  { %12775 = vmatprep.subr.bf16.mxu0 %v15059_v26  ;;  %12801 = vmatprep.subr.bf16.mxu1 %v17312_v41 }
0x1e02   :  { %12777 = vmatpush3.bf16.msra.mxu0 %v15061_v34  ;;  %12803 = vmatpush3.bf16.msra.mxu1 %v14970_v58 }
0x1e03   :  { %12779 = vmatprep.subr.bf16.mxu0 %v15064_v43  ;;  %12804 = vmatprep.subr.bf16.mxu1 %v17312_v41 }
0x1e06   :  { %12781 = vmatpush3.bf16.msra.mxu0 %v15067_v53  ;;  %12806 = vmatpush3.bf16.msra.mxu1 %v14980_v5 }
0x1e07   :  { %12783 = vmatprep.subr.bf16.mxu0 %v15070_v54  ;;  %12807 = vmatprep.subr.bf16.mxu1 %v17312_v41 }
0x1e0a   :  { %12785 = vmatpush3.bf16.msra.mxu0 %v15075_v61  ;;  %12809 = vmatpush3.bf16.msra.mxu1 %v14990_v16 }
0x1e0b   :  { %12811 = vmatprep.subr.bf16.mxu0 %v15020_v23  ;;  %12842 = vmatprep.subr.bf16.mxu1 %v17312_v41 }
0x1ec0   :  { %v9301_v18 = vpop.f32.mrb[36].mxu0  ;;  %v3883_v50 = vpop.f32.mrb[36].mxu1 }
0x1ec1   :  { %v3888_v35 = vrot.slane %v3883_v50, 6  ;;  %v9302_v25 = vpop.f32.mrb[37].mxu0  ;;  %v11008_v3 = vpop.f32.mrb[37].mxu1 }
0x1ec2   :  { %v9303_v46 = vadd.f32 %v9302_v25, %v9301_v18 }
0x1ec3   :  { %v3890_v52 = vadd.f32 %v3888_v35, %v15933_v59 }
0x1ec4   :  { %v3796_v9 = vadd.f32 %v15770_v22, %v9303_v46 }
0x1ec5   :  { %v8355_v63 = vmul.f32 -1.442695, %v3890_v52  ;;  %14307 = vtanh.f32 %v3890_v52 }
0x1ec6   :  { %v8354_v27 = vmul.f32 -1.442695, %v3796_v9 }
0x1ec7   :  { %14309 = vpow2.f32 %v8355_v63 }
0x1ec8   :  { %14311 = vpow2.f32 %v8354_v27 }
0x1ec9   :  { %14313 = vtanh.f32 %v3796_v9 }
0x1ecf   :  { %v14308_v8 = vpop.eup %14307 }
0x1ed0   :  { %v3904_v14 = vrot.slane %v14308_v8, 2 }
0x1ed1   :  { %v14310_v56 = vpop.eup %14309 }
0x1ed2   :  { %v14312_v0 = vpop.eup %14311  ;;  %v3894_v55 = vadd.f32 1.0, %v14310_v56  ;;  %3906 = vrot.lane.b32.xlu1 %v3904_v14, %s14803_s19 }
0x1ed3   :  { %v3802_v45 = vadd.f32 1.0, %v14312_v0  ;;  %v14314_v12 = vpop.eup %14313 }
0x1ed4   :  { %14315 = vrcp.f32 %v3894_v55 }
0x1ed5   :  { %14317 = vrcp.f32 %v3802_v45 }
0x1ed6   :  { %3808 = vrot.lane.b32.xlu1 %v14314_v12, %s14803_s19 }
0x1ede   :  { %v14316_v22 = vpop.eup %14315 }
0x1edf   :  { %v14318_v36 = vpop.eup %14317  ;;  %v3899_v18 = vrot.slane %v14316_v22, 2 }
0x1ee0   :  { %3806 = vrot.lane.b32.xlu0 %v14318_v36, %s14802_s17  ;;  %3810 = vrot.lane.b32.xlu1 %v14318_v36, %s14801_s15 }
0x1ee4   :  { %3901 = vrot.lane.b32.xlu0 %v3899_v18, %s14802_s17 }
0x1ee8   :  { %3908 = vrot.lane.b32.xlu0 %v3899_v18, %s14801_s15 }
0x1f44   :  { %v3907_v50 = vpop.permute.xlu1 %3906 }
0x1f45   :  { %v3912_v35 = vrot.slane %v3907_v50, 6 }
0x1f47   :  { %v3914_v46 = vmul.f32 %v14316_v22, %v3912_v35 }
0x1f48   :  { %v3809_v25 = vpop.permute.xlu1 %3808 }
0x1f49   :  { %v3813_v52 = vmul.f32 %v14318_v36, %v3809_v25  ;;  %v3916_v8 = vrot.slane %v3914_v46, 2  ;;  %v16088_v46 = vld [vmem:[%s17291_s4] sm:$0x1] }
0x1f52   :  { %v3807_v3 = vpop.permute.xlu0 %3806  ;;  %v3811_v55 = vpop.permute.xlu1 %3810 }
0x1f53   :  { %v3812_v9 = vmul.f32 %v3807_v3, %v15987_v4 }
0x1f55   :  { %v16040_v63 = vadd.f32 %v3813_v52, %v3812_v9 }
0x1f56   :  { %v3902_v27 = vpop.permute.xlu0 %3901 }
0x1f57   :  { %14319 = vtanh.f32 %v16040_v63  ;;  %v3910_v14 = vmul.f32 %v3902_v27, %v15991_v32 }
0x1f59   :  { %v16044_v56 = vadd.f32 %v3916_v8, %v3910_v14 }
0x1f5a   :  { %v3909_v4 = vpop.permute.xlu0 %3908 }
0x1f5b   :  { %14321 = vtanh.f32 %v16044_v56 }
0x1f61   :  { %v14320_v0 = vpop.eup %14319 }
0x1f62   :  { %v16047_v45 = vmul.f32 %v14320_v0, %v3811_v55 }
0x1f64   :  { %3985 = vmatprep.mubr.f32.mxu0 %v16047_v45 }
0x1f65   :  { %v14322_v12 = vpop.eup %14321 }
0x1f66   :  { %v3920_v22 = vmul.f32 %v14322_v12, %v3909_v4 }
0x1f68   :  { %3986 = vmatmul.mubr.f32.vlgmr.msra.gmra.mrb[38].mxu0 %v3920_v22  ;;  %11042 = vmatmul.mubr.f32.vlgmr.msra.gmra.mrb[38].mxu1 %v3920_v22 }
0x1f69   :  { %12813 = vmatpush3.bf16.msra.mxu0 %v15022_v28  ;;  %12844 = vmatpush3.bf16.msra.mxu1 %v14921_v11 }
0x1f6a   :  { %12815 = vmatprep.subr.bf16.mxu0 %v15024_v29  ;;  %12845 = vmatprep.subr.bf16.mxu1 %v17312_v41 }
0x1f6b   :  { %11076 = vmatprep.mubr.msk.f32.mxu1 %vm14800_vm0, %v17311_v2 }
0x1f6d   :  { %12817 = vmatpush3.bf16.msra.mxu0 %v15028_v37  ;;  %12847 = vmatpush3.bf16.msra.mxu1 %v14930_v20 }
0x1f6e   :  { %12819 = vmatprep.subr.bf16.mxu0 %v15031_v38  ;;  %12848 = vmatprep.subr.bf16.mxu1 %v17312_v41 }
0x1f71   :  { %12821 = vmatpush3.bf16.msra.mxu0 %v15034_v44  ;;  %12850 = vmatpush3.bf16.msra.mxu1 %v14940_v31 }
0x1f72   :  { %12823 = vmatprep.subr.bf16.mxu0 %v15047_v62  ;;  %12851 = vmatprep.subr.bf16.mxu1 %v17312_v41 }
0x1f75   :  { %12825 = vmatpush3.bf16.msra.mxu0 %v15049_v7  ;;  %12853 = vmatpush3.bf16.msra.mxu1 %v14950_v40 }
0x1f76   :  { %12827 = vmatprep.subr.bf16.mxu0 %v15053_v13  ;;  %12854 = vmatprep.subr.bf16.mxu1 %v17312_v41 }
0x1f79   :  { %12829 = vmatpush3.bf16.msra.mxu0 %v15055_v21  ;;  %12856 = vmatpush3.bf16.msra.mxu1 %v14960_v49 }
0x1f7a   :  { %12831 = vmatprep.subr.bf16.mxu0 %v15059_v26  ;;  %12857 = vmatprep.subr.bf16.mxu1 %v17312_v41 }
0x1f7d   :  { %12833 = vmatpush3.bf16.msra.mxu0 %v15061_v34  ;;  %12859 = vmatpush3.bf16.msra.mxu1 %v14970_v58 }
0x1f7e   :  { %12835 = vmatprep.subr.bf16.mxu0 %v15064_v43  ;;  %12860 = vmatprep.subr.bf16.mxu1 %v17312_v41 }
0x1f81   :  { %12837 = vmatpush3.bf16.msra.mxu0 %v15067_v53  ;;  %12862 = vmatpush3.bf16.msra.mxu1 %v14980_v5 }
0x1f82   :  { %12839 = vmatprep.subr.bf16.mxu0 %v15070_v54  ;;  %12863 = vmatprep.subr.bf16.mxu1 %v17312_v41 }
0x1f85   :  { %12841 = vmatpush3.bf16.msra.mxu0 %v15075_v61  ;;  %12865 = vmatpush3.bf16.msra.mxu1 %v14990_v16 }
0x1f86   :  { %12867 = vmatprep.subr.bf16.mxu0 %v15020_v23  ;;  %12898 = vmatprep.subr.bf16.mxu1 %v17312_v41 }
0x203b   :  { %v9353_v32 = vpop.f32.mrb[38].mxu0  ;;  %v4075_v36 = vpop.f32.mrb[38].mxu1 }
0x203c   :  { %v4080_v18 = vrot.slane %v4075_v36, 5  ;;  %v9354_v50 = vpop.f32.mrb[39].mxu0  ;;  %v11043_v35 = vpop.f32.mrb[39].mxu1 }
0x203d   :  { %v9355_v25 = vadd.f32 %v9354_v50, %v9353_v32 }
0x203e   :  { %v4082_v3 = vadd.f32 %v4080_v18, %v15933_v59 }
0x203f   :  { %v3988_v52 = vadd.f32 %v16088_v46, %v9355_v25 }
0x2040   :  { %v8357_v9 = vmul.f32 -1.442695, %v4082_v3  ;;  %14323 = vtanh.f32 %v4082_v3 }
0x2041   :  { %v8356_v27 = vmul.f32 -1.442695, %v3988_v52 }
0x2042   :  { %14325 = vpow2.f32 %v8357_v9 }
0x2043   :  { %14327 = vpow2.f32 %v8356_v27 }
0x2044   :  { %14329 = vtanh.f32 %v3988_v52 }
0x204a   :  { %v14324_v8 = vpop.eup %14323 }
0x204b   :  { %v4096_v14 = vrot.slane %v14324_v8, 3 }
0x204c   :  { %v14326_v0 = vpop.eup %14325 }
0x204d   :  { %v14328_v55 = vpop.eup %14327  ;;  %v4086_v12 = vadd.f32 1.0, %v14326_v0  ;;  %4098 = vrot.lane.b32.xlu1 %v4096_v14, %s14803_s19 }
0x204e   :  { %v3994_v4 = vadd.f32 1.0, %v14328_v55  ;;  %v14330_v22 = vpop.eup %14329 }
0x204f   :  { %14331 = vrcp.f32 %v4086_v12 }
0x2050   :  { %14333 = vrcp.f32 %v3994_v4 }
0x2051   :  { %4000 = vrot.lane.b32.xlu1 %v14330_v22, %s14803_s19  ;;  %v4970_v22 = vrot.slane %v16047_v45, 7 }
0x2059   :  { %v14332_v32 = vpop.eup %14331 }
0x205a   :  { %v14334_v36 = vpop.eup %14333  ;;  %v4091_v18 = vrot.slane %v14332_v32, 3 }
0x205b   :  { %3998 = vrot.lane.b32.xlu0 %v14334_v36, %s14802_s17  ;;  %4002 = vrot.lane.b32.xlu1 %v14334_v36, %s14801_s15 }
0x205f   :  { %4093 = vrot.lane.b32.xlu0 %v4091_v18, %s14802_s17 }
0x2063   :  { %4100 = vrot.lane.b32.xlu0 %v4091_v18, %s14801_s15 }
0x20bf   :  { %v4099_v50 = vpop.permute.xlu1 %4098 }
0x20c0   :  { %v4104_v35 = vrot.slane %v4099_v50, 5  ;;  %v4990_v50 = vsel %vm1783_vm1, %v15994_v17, %v4970_v22 }
0x20c2   :  { %v4106_v52 = vmul.f32 %v14332_v32, %v4104_v35 }
0x20c3   :  { %v4001_v25 = vpop.permute.xlu1 %4000 }
0x20c4   :  { %v4005_v9 = vmul.f32 %v14334_v36, %v4001_v25  ;;  %v4108_v0 = vrot.slane %v4106_v52, 3 }
0x20cd   :  { %v3999_v3 = vpop.permute.xlu0 %3998  ;;  %v4003_v18 = vpop.permute.xlu1 %4002 }
0x20ce   :  { %v4004_v27 = vmul.f32 %v3999_v3, %v16040_v63 }
0x20d0   :  { %v16098_v8 = vadd.f32 %v4005_v9, %v4004_v27 }
0x20d1   :  { %v4094_v14 = vpop.permute.xlu0 %4093 }
0x20d2   :  { %14335 = vtanh.f32 %v16098_v8  ;;  %v4102_v55 = vmul.f32 %v4094_v14, %v16044_v56 }
0x20d4   :  { %v16102_v12 = vadd.f32 %v4108_v0, %v4102_v55 }
0x20d5   :  { %v4101_v35 = vpop.permute.xlu0 %4100 }
0x20d6   :  { %14337 = vtanh.f32 %v16102_v12 }
0x20dc   :  { %v14336_v4 = vpop.eup %14335 }
0x20dd   :  { %v4008_v32 = vmul.f32 %v14336_v4, %v4003_v18 }
0x20df   :  { %v4973_v36 = vrot.slane %v4008_v32, 6  ;;  %4177 = vmatprep.mubr.f32.mxu0 %v4008_v32 }
0x20e0   :  { %v14338_v63 = vpop.eup %14337 }
0x20e1   :  { %v16109_v25 = vsel %vm1785_vm2, %v4990_v50, %v4973_v36  ;;  %v4112_v56 = vmul.f32 %v14338_v63, %v4101_v35 }
0x20e3   :  { %4178 = vmatmul.mubr.f32.vlgmr.msra.gmra.mrb[40].mxu0 %v4112_v56  ;;  %11077 = vmatmul.mubr.f32.vlgmr.msra.gmra.mrb[40].mxu1 %v4112_v56 }
0x20e4   :  { %12869 = vmatpush3.bf16.msra.mxu0 %v15022_v28  ;;  %12900 = vmatpush3.bf16.msra.mxu1 %v14921_v11 }
0x20e5   :  { %12871 = vmatprep.subr.bf16.mxu0 %v15024_v29  ;;  %12901 = vmatprep.subr.bf16.mxu1 %v17312_v41 }
0x20e6   :  { %11111 = vmatprep.mubr.msk.f32.mxu1 %vm14800_vm0, %v17311_v2 }
0x20e8   :  { %12873 = vmatpush3.bf16.msra.mxu0 %v15028_v37  ;;  %12903 = vmatpush3.bf16.msra.mxu1 %v14930_v20 }
0x20e9   :  { %12875 = vmatprep.subr.bf16.mxu0 %v15031_v38  ;;  %12904 = vmatprep.subr.bf16.mxu1 %v17312_v41 }
0x20ec   :  { %12877 = vmatpush3.bf16.msra.mxu0 %v15034_v44  ;;  %12906 = vmatpush3.bf16.msra.mxu1 %v14940_v31 }
0x20ed   :  { %12879 = vmatprep.subr.bf16.mxu0 %v15047_v62  ;;  %12907 = vmatprep.subr.bf16.mxu1 %v17312_v41 }
0x20f0   :  { %12881 = vmatpush3.bf16.msra.mxu0 %v15049_v7  ;;  %12909 = vmatpush3.bf16.msra.mxu1 %v14950_v40 }
0x20f1   :  { %12883 = vmatprep.subr.bf16.mxu0 %v15053_v13  ;;  %12910 = vmatprep.subr.bf16.mxu1 %v17312_v41 }
0x20f4   :  { %12885 = vmatpush3.bf16.msra.mxu0 %v15055_v21  ;;  %12912 = vmatpush3.bf16.msra.mxu1 %v14960_v49 }
0x20f5   :  { %12887 = vmatprep.subr.bf16.mxu0 %v15059_v26  ;;  %12913 = vmatprep.subr.bf16.mxu1 %v17312_v41 }
0x20f8   :  { %12889 = vmatpush3.bf16.msra.mxu0 %v15061_v34  ;;  %12915 = vmatpush3.bf16.msra.mxu1 %v14970_v58 }
0x20f9   :  { %12891 = vmatprep.subr.bf16.mxu0 %v15064_v43  ;;  %12916 = vmatprep.subr.bf16.mxu1 %v17312_v41 }
0x20fc   :  { %12893 = vmatpush3.bf16.msra.mxu0 %v15067_v53  ;;  %12918 = vmatpush3.bf16.msra.mxu1 %v14980_v5 }
0x20fd   :  { %12895 = vmatprep.subr.bf16.mxu0 %v15070_v54  ;;  %12919 = vmatprep.subr.bf16.mxu1 %v17312_v41 }
0x2100   :  { %12897 = vmatpush3.bf16.msra.mxu0 %v15075_v61  ;;  %12921 = vmatpush3.bf16.msra.mxu1 %v14990_v16 }
0x2101   :  { %12923 = vmatprep.subr.bf16.mxu0 %v15020_v23  ;;  %12954 = vmatprep.subr.bf16.mxu1 %v17312_v41 }
0x21b6   :  { %v9405_v17 = vpop.f32.mrb[40].mxu0  ;;  %v4267_v45 = vpop.f32.mrb[40].mxu1 }
0x21b7   :  { %v4272_v3 = vrot.slane %v4267_v45, 4  ;;  %v9406_v52 = vpop.f32.mrb[41].mxu0  ;;  %v11078_v9 = vpop.f32.mrb[41].mxu1 }
0x21b8   :  { %v9407_v27 = vadd.f32 %v9406_v52, %v9405_v17 }
0x21b9   :  { %v4274_v14 = vadd.f32 %v4272_v3, %v15933_v59 }
0x21ba   :  { %v4180_v0 = vadd.f32 %v16088_v46, %v9407_v27 }
0x21bb   :  { %v8359_v55 = vmul.f32 -1.442695, %v4274_v14  ;;  %14339 = vtanh.f32 %v4274_v14 }
0x21bc   :  { %v8358_v4 = vmul.f32 -1.442695, %v4180_v0 }
0x21bd   :  { %14341 = vpow2.f32 %v8359_v55 }
0x21be   :  { %14343 = vpow2.f32 %v8358_v4 }
0x21bf   :  { %14345 = vtanh.f32 %v4180_v0 }
0x21c5   :  { %v14340_v22 = vpop.eup %14339 }
0x21c6   :  { %v4288_v18 = vrot.slane %v14340_v22, 4 }
0x21c7   :  { %v14342_v32 = vpop.eup %14341 }
0x21c8   :  { %v14344_v36 = vpop.eup %14343  ;;  %v4278_v63 = vadd.f32 1.0, %v14342_v32  ;;  %4290 = vrot.lane.b32.xlu1 %v4288_v18, %s14803_s19 }
0x21c9   :  { %v4186_v50 = vadd.f32 1.0, %v14344_v36  ;;  %v14346_v35 = vpop.eup %14345 }
0x21ca   :  { %14347 = vrcp.f32 %v4278_v63 }
0x21cb   :  { %14349 = vrcp.f32 %v4186_v50 }
0x21cc   :  { %4192 = vrot.lane.b32.xlu1 %v14346_v35, %s14803_s19 }
0x21d4   :  { %v14348_v56 = vpop.eup %14347 }
0x21d5   :  { %v14350_v17 = vpop.eup %14349  ;;  %v4283_v45 = vrot.slane %v14348_v56, 4 }
0x21d6   :  { %4190 = vrot.lane.b32.xlu0 %v14350_v17, %s14802_s17  ;;  %4194 = vrot.lane.b32.xlu1 %v14350_v17, %s14801_s15 }
0x21da   :  { %4285 = vrot.lane.b32.xlu0 %v4283_v45, %s14802_s17 }
0x21de   :  { %4292 = vrot.lane.b32.xlu0 %v4283_v45, %s14801_s15 }
0x223a   :  { %v4291_v3 = vpop.permute.xlu1 %4290 }
0x223b   :  { %v4296_v52 = vrot.slane %v4291_v3, 4 }
0x223d   :  { %v4298_v14 = vmul.f32 %v14348_v56, %v4296_v52 }
0x223e   :  { %v4193_v9 = vpop.permute.xlu1 %4192 }
0x223f   :  { %v4197_v0 = vmul.f32 %v14350_v17, %v4193_v9  ;;  %v4300_v18 = vrot.slane %v4298_v14, 4 }
0x2248   :  { %v4191_v27 = vpop.permute.xlu0 %4190  ;;  %v4195_v50 = vpop.permute.xlu1 %4194 }
0x2249   :  { %v4196_v55 = vmul.f32 %v4191_v27, %v16098_v8 }
0x224b   :  { %v16154_v4 = vadd.f32 %v4197_v0, %v4196_v55 }
0x224c   :  { %v4286_v22 = vpop.permute.xlu0 %4285 }
0x224d   :  { %14351 = vtanh.f32 %v16154_v4  ;;  %v4294_v32 = vmul.f32 %v4286_v22, %v16102_v12 }
0x224f   :  { %v16158_v36 = vadd.f32 %v4300_v18, %v4294_v32 }
0x2250   :  { %v4293_v17 = vpop.permute.xlu0 %4292 }
0x2251   :  { %14353 = vtanh.f32 %v16158_v36 }
0x2257   :  { %v14352_v63 = vpop.eup %14351 }
0x2258   :  { %v4200_v35 = vmul.f32 %v14352_v63, %v4195_v50 }
0x225a   :  { %v4976_v45 = vrot.slane %v4200_v35, 5  ;;  %4369 = vmatprep.mubr.f32.mxu0 %v4200_v35 }
0x225b   :  { %v14354_v56 = vpop.eup %14353 }
0x225c   :  { %v16163_v8 = vsel %vm1787_vm3, %v16109_v25, %v4976_v45  ;;  %v4304_v3 = vmul.f32 %v14354_v56, %v4293_v17 }
0x225e   :  { %4370 = vmatmul.mubr.f32.vlgmr.msra.gmra.mrb[42].mxu0 %v4304_v3  ;;  %11112 = vmatmul.mubr.f32.vlgmr.msra.gmra.mrb[42].mxu1 %v4304_v3 }
0x225f   :  { %12925 = vmatpush3.bf16.msra.mxu0 %v15022_v28  ;;  %12956 = vmatpush3.bf16.msra.mxu1 %v14921_v11 }
0x2260   :  { %12927 = vmatprep.subr.bf16.mxu0 %v15024_v29  ;;  %12957 = vmatprep.subr.bf16.mxu1 %v17312_v41 }
0x2261   :  { %11146 = vmatprep.mubr.msk.f32.mxu1 %vm14800_vm0, %v17311_v2 }
0x2263   :  { %12929 = vmatpush3.bf16.msra.mxu0 %v15028_v37  ;;  %12959 = vmatpush3.bf16.msra.mxu1 %v14930_v20 }
0x2264   :  { %12931 = vmatprep.subr.bf16.mxu0 %v15031_v38  ;;  %12960 = vmatprep.subr.bf16.mxu1 %v17312_v41 }
0x2267   :  { %12933 = vmatpush3.bf16.msra.mxu0 %v15034_v44  ;;  %12962 = vmatpush3.bf16.msra.mxu1 %v14940_v31 }
0x2268   :  { %12935 = vmatprep.subr.bf16.mxu0 %v15047_v62  ;;  %12963 = vmatprep.subr.bf16.mxu1 %v17312_v41 }
0x226b   :  { %12937 = vmatpush3.bf16.msra.mxu0 %v15049_v7  ;;  %12965 = vmatpush3.bf16.msra.mxu1 %v14950_v40 }
0x226c   :  { %12939 = vmatprep.subr.bf16.mxu0 %v15053_v13  ;;  %12966 = vmatprep.subr.bf16.mxu1 %v17312_v41 }
0x226f   :  { %12941 = vmatpush3.bf16.msra.mxu0 %v15055_v21  ;;  %12968 = vmatpush3.bf16.msra.mxu1 %v14960_v49 }
0x2270   :  { %12943 = vmatprep.subr.bf16.mxu0 %v15059_v26  ;;  %12969 = vmatprep.subr.bf16.mxu1 %v17312_v41 }
0x2273   :  { %12945 = vmatpush3.bf16.msra.mxu0 %v15061_v34  ;;  %12971 = vmatpush3.bf16.msra.mxu1 %v14970_v58 }
0x2274   :  { %12947 = vmatprep.subr.bf16.mxu0 %v15064_v43  ;;  %12972 = vmatprep.subr.bf16.mxu1 %v17312_v41 }
0x2277   :  { %12949 = vmatpush3.bf16.msra.mxu0 %v15067_v53  ;;  %12974 = vmatpush3.bf16.msra.mxu1 %v14980_v5 }
0x2278   :  { %12951 = vmatprep.subr.bf16.mxu0 %v15070_v54  ;;  %12975 = vmatprep.subr.bf16.mxu1 %v17312_v41 }
0x227b   :  { %12953 = vmatpush3.bf16.msra.mxu0 %v15075_v61  ;;  %12977 = vmatpush3.bf16.msra.mxu1 %v14990_v16 }
0x227c   :  { %12979 = vmatprep.subr.bf16.mxu0 %v15020_v23  ;;  %13010 = vmatprep.subr.bf16.mxu1 %v17312_v41 }
0x2331   :  { %v9457_v12 = vpop.f32.mrb[42].mxu0  ;;  %v4459_v25 = vpop.f32.mrb[42].mxu1 }
0x2332   :  { %v4464_v52 = vrot.slane %v4459_v25, 3  ;;  %v9458_v9 = vpop.f32.mrb[43].mxu0  ;;  %v11113_v27 = vpop.f32.mrb[43].mxu1 }
0x2333   :  { %v9459_v14 = vadd.f32 %v9458_v9, %v9457_v12 }
0x2334   :  { %v4466_v0 = vadd.f32 %v4464_v52, %v15933_v59 }
0x2335   :  { %v4372_v55 = vadd.f32 %v16088_v46, %v9459_v14 }
0x2336   :  { %v8361_v22 = vmul.f32 -1.442695, %v4466_v0  ;;  %14355 = vtanh.f32 %v4466_v0 }
0x2337   :  { %v8360_v18 = vmul.f32 -1.442695, %v4372_v55 }
0x2338   :  { %14357 = vpow2.f32 %v8361_v22 }
0x2339   :  { %14359 = vpow2.f32 %v8360_v18 }
0x233a   :  { %14361 = vtanh.f32 %v4372_v55 }
0x2340   :  { %v14356_v32 = vpop.eup %14355 }
0x2341   :  { %v4480_v63 = vrot.slane %v14356_v32, 5 }
0x2342   :  { %v14358_v50 = vpop.eup %14357 }
0x2343   :  { %v14360_v35 = vpop.eup %14359  ;;  %v4470_v45 = vadd.f32 1.0, %v14358_v50  ;;  %4482 = vrot.lane.b32.xlu1 %v4480_v63, %s14803_s19 }
0x2344   :  { %v4378_v56 = vadd.f32 1.0, %v14360_v35  ;;  %v14362_v17 = vpop.eup %14361 }
0x2345   :  { %14363 = vrcp.f32 %v4470_v45 }
0x2346   :  { %14365 = vrcp.f32 %v4378_v56 }
0x2347   :  { %4384 = vrot.lane.b32.xlu1 %v14362_v17, %s14803_s19 }
0x234f   :  { %v14364_v3 = vpop.eup %14363 }
0x2350   :  { %v14366_v12 = vpop.eup %14365  ;;  %v4475_v25 = vrot.slane %v14364_v3, 5 }
0x2351   :  { %4382 = vrot.lane.b32.xlu0 %v14366_v12, %s14802_s17  ;;  %4386 = vrot.lane.b32.xlu1 %v14366_v12, %s14801_s15 }
0x2355   :  { %4477 = vrot.lane.b32.xlu0 %v4475_v25, %s14802_s17 }
0x2359   :  { %4484 = vrot.lane.b32.xlu0 %v4475_v25, %s14801_s15 }
0x23b5   :  { %v4483_v52 = vpop.permute.xlu1 %4482 }
0x23b6   :  { %v4488_v9 = vrot.slane %v4483_v52, 3 }
0x23b8   :  { %v4490_v0 = vmul.f32 %v14364_v3, %v4488_v9 }
0x23b9   :  { %v4385_v27 = vpop.permute.xlu1 %4384 }
0x23ba   :  { %v4389_v55 = vmul.f32 %v14366_v12, %v4385_v27  ;;  %v4492_v63 = vrot.slane %v4490_v0, 5 }
0x23c3   :  { %v4383_v14 = vpop.permute.xlu0 %4382  ;;  %v4387_v56 = vpop.permute.xlu1 %4386 }
0x23c4   :  { %v4388_v22 = vmul.f32 %v4383_v14, %v16154_v4 }
0x23c6   :  { %v16208_v18 = vadd.f32 %v4389_v55, %v4388_v22 }
0x23c7   :  { %v4478_v32 = vpop.permute.xlu0 %4477 }
0x23c8   :  { %14367 = vtanh.f32 %v16208_v18  ;;  %v4486_v50 = vmul.f32 %v4478_v32, %v16158_v36 }
0x23ca   :  { %v16212_v35 = vadd.f32 %v4492_v63, %v4486_v50 }
0x23cb   :  { %v4485_v12 = vpop.permute.xlu0 %4484 }
0x23cc   :  { %14369 = vtanh.f32 %v16212_v35 }
0x23d2   :  { %v14368_v45 = vpop.eup %14367 }
0x23d3   :  { %v4392_v17 = vmul.f32 %v14368_v45, %v4387_v56 }
0x23d5   :  { %v4979_v25 = vrot.slane %v4392_v17, 4  ;;  %4561 = vmatprep.mubr.f32.mxu0 %v4392_v17 }
0x23d6   :  { %v14370_v3 = vpop.eup %14369 }
0x23d7   :  { %v16217_v4 = vsel %vm1789_vm4, %v16163_v8, %v4979_v25  ;;  %v4496_v52 = vmul.f32 %v14370_v3, %v4485_v12 }
0x23d9   :  { %4562 = vmatmul.mubr.f32.vlgmr.msra.gmra.mrb[44].mxu0 %v4496_v52  ;;  %11147 = vmatmul.mubr.f32.vlgmr.msra.gmra.mrb[44].mxu1 %v4496_v52 }
0x23da   :  { %12981 = vmatpush3.bf16.msra.mxu0 %v15022_v28  ;;  %13012 = vmatpush3.bf16.msra.mxu1 %v14921_v11 }
0x23db   :  { %12983 = vmatprep.subr.bf16.mxu0 %v15024_v29  ;;  %13013 = vmatprep.subr.bf16.mxu1 %v17312_v41 }
0x23dc   :  { %11181 = vmatprep.mubr.msk.f32.mxu1 %vm14800_vm0, %v17311_v2 }
0x23de   :  { %12985 = vmatpush3.bf16.msra.mxu0 %v15028_v37  ;;  %13015 = vmatpush3.bf16.msra.mxu1 %v14930_v20 }
0x23df   :  { %12987 = vmatprep.subr.bf16.mxu0 %v15031_v38  ;;  %13016 = vmatprep.subr.bf16.mxu1 %v17312_v41 }
0x23e2   :  { %12989 = vmatpush3.bf16.msra.mxu0 %v15034_v44  ;;  %13018 = vmatpush3.bf16.msra.mxu1 %v14940_v31 }
0x23e3   :  { %12991 = vmatprep.subr.bf16.mxu0 %v15047_v62  ;;  %13019 = vmatprep.subr.bf16.mxu1 %v17312_v41 }
0x23e6   :  { %12993 = vmatpush3.bf16.msra.mxu0 %v15049_v7  ;;  %13021 = vmatpush3.bf16.msra.mxu1 %v14950_v40 }
0x23e7   :  { %12995 = vmatprep.subr.bf16.mxu0 %v15053_v13  ;;  %13022 = vmatprep.subr.bf16.mxu1 %v17312_v41 }
0x23ea   :  { %12997 = vmatpush3.bf16.msra.mxu0 %v15055_v21  ;;  %13024 = vmatpush3.bf16.msra.mxu1 %v14960_v49 }
0x23eb   :  { %12999 = vmatprep.subr.bf16.mxu0 %v15059_v26  ;;  %13025 = vmatprep.subr.bf16.mxu1 %v17312_v41 }
0x23ee   :  { %13001 = vmatpush3.bf16.msra.mxu0 %v15061_v34  ;;  %13027 = vmatpush3.bf16.msra.mxu1 %v14970_v58 }
0x23ef   :  { %13003 = vmatprep.subr.bf16.mxu0 %v15064_v43  ;;  %13028 = vmatprep.subr.bf16.mxu1 %v17312_v41 }
0x23f2   :  { %13005 = vmatpush3.bf16.msra.mxu0 %v15067_v53  ;;  %13030 = vmatpush3.bf16.msra.mxu1 %v14980_v5 }
0x23f3   :  { %13007 = vmatprep.subr.bf16.mxu0 %v15070_v54  ;;  %13031 = vmatprep.subr.bf16.mxu1 %v17312_v41 }
0x23f6   :  { %13009 = vmatpush3.bf16.msra.mxu0 %v15075_v61  ;;  %13033 = vmatpush3.bf16.msra.mxu1 %v14990_v16 }
0x23f7   :  { %13035 = vmatprep.subr.bf16.mxu0 %v15020_v23  ;;  %13067 = vmatprep.subr.bf16.mxu1 %v14917_v6 }
0x24ac   :  { %v9509_v36 = vpop.f32.mrb[44].mxu0  ;;  %v4651_v8 = vpop.f32.mrb[44].mxu1 }
0x24ad   :  { %v4656_v9 = vrot.slane %v4651_v8, 2  ;;  %v9510_v27 = vpop.f32.mrb[45].mxu0  ;;  %v11148_v14 = vpop.f32.mrb[45].mxu1 }
0x24ae   :  { %v9511_v0 = vadd.f32 %v9510_v27, %v9509_v36 }
0x24af   :  { %v4658_v55 = vadd.f32 %v4656_v9, %v15933_v59 }
0x24b0   :  { %v4564_v22 = vadd.f32 %v16088_v46, %v9511_v0 }
0x24b1   :  { %v8363_v32 = vmul.f32 -1.442695, %v4658_v55  ;;  %14371 = vtanh.f32 %v4658_v55 }
0x24b2   :  { %v8362_v63 = vmul.f32 -1.442695, %v4564_v22 }
0x24b3   :  { %14373 = vpow2.f32 %v8363_v32 }
0x24b4   :  { %14375 = vpow2.f32 %v8362_v63 }
0x24b5   :  { %14377 = vtanh.f32 %v4564_v22 }
0x24bb   :  { %v14372_v50 = vpop.eup %14371 }
0x24bc   :  { %v4672_v45 = vrot.slane %v14372_v50, 6 }
0x24bd   :  { %v14374_v56 = vpop.eup %14373 }
0x24be   :  { %v14376_v17 = vpop.eup %14375  ;;  %v4662_v25 = vadd.f32 1.0, %v14374_v56  ;;  %4674 = vrot.lane.b32.xlu1 %v4672_v45, %s14803_s19 }
0x24bf   :  { %v4570_v3 = vadd.f32 1.0, %v14376_v17  ;;  %v14378_v12 = vpop.eup %14377 }
0x24c0   :  { %14379 = vrcp.f32 %v4662_v25 }
0x24c1   :  { %14381 = vrcp.f32 %v4570_v3 }
0x24c2   :  { %4576 = vrot.lane.b32.xlu1 %v14378_v12, %s14803_s19 }
0x24ca   :  { %v14380_v52 = vpop.eup %14379 }
0x24cb   :  { %v14382_v36 = vpop.eup %14381  ;;  %v4667_v8 = vrot.slane %v14380_v52, 6 }
0x24cc   :  { %4574 = vrot.lane.b32.xlu0 %v14382_v36, %s14802_s17  ;;  %4578 = vrot.lane.b32.xlu1 %v14382_v36, %s14801_s15 }
0x24d0   :  { %4669 = vrot.lane.b32.xlu0 %v4667_v8, %s14802_s17 }
0x24d4   :  { %4676 = vrot.lane.b32.xlu0 %v4667_v8, %s14801_s15 }
0x2530   :  { %v4675_v9 = vpop.permute.xlu1 %4674 }
0x2531   :  { %v4680_v27 = vrot.slane %v4675_v9, 2 }
0x2533   :  { %v4682_v55 = vmul.f32 %v14380_v52, %v4680_v27  ;;  %v17318_v27 = vld [vmem:[#allocation15_spill] sm:$0xff] }
0x2534   :  { %v4577_v14 = vpop.permute.xlu1 %4576 }
0x2535   :  { %v4581_v22 = vmul.f32 %v14382_v36, %v4577_v14  ;;  %v4684_v45 = vrot.slane %v4682_v55, 6 }
0x253e   :  { %v4575_v0 = vpop.permute.xlu0 %4574  ;;  %v4579_v3 = vpop.permute.xlu1 %4578 }
0x253f   :  { %v4580_v32 = vmul.f32 %v4575_v0, %v16208_v18 }
0x2541   :  { %v16262_v63 = vadd.f32 %v4581_v22, %v4580_v32 }
0x2542   :  { %v4670_v50 = vpop.permute.xlu0 %4669 }
0x2543   :  { %14383 = vtanh.f32 %v16262_v63  ;;  %v4678_v56 = vmul.f32 %v4670_v50, %v16212_v35  ;;  %v17316_v35 = vld [vmem:[#allocation13_spill] sm:$0xff] }
0x2545   :  { %v16266_v17 = vadd.f32 %v4684_v45, %v4678_v56 }
0x2546   :  { %v4677_v36 = vpop.permute.xlu0 %4676 }
0x2547   :  { %14385 = vtanh.f32 %v16266_v17 }
0x254d   :  { %v14384_v25 = vpop.eup %14383 }
0x254e   :  { %v4584_v12 = vmul.f32 %v14384_v25, %v4579_v3 }
0x2550   :  { %v4982_v8 = vrot.slane %v4584_v12, 3  ;;  %4753 = vmatprep.mubr.f32.mxu0 %v4584_v12 }
0x2551   :  { %v14386_v52 = vpop.eup %14385 }
0x2552   :  { %v4688_v18 = vmul.f32 %v14386_v52, %v4677_v36  ;;  %v16271_v9 = vsel %vm1791_vm5, %v16217_v4, %v4982_v8  ;;  %v17317_v4 = vld [vmem:[#allocation14_spill] sm:$0xff] }
0x2554   :  { %4754 = vmatmul.mubr.f32.vlgmr.msra.gmra.mrb[46].mxu0 %v4688_v18  ;;  %11182 = vmatmul.mubr.f32.vlgmr.msra.gmra.mrb[46].mxu1 %v4688_v18 }
0x2555   :  { %13037 = vmatpush3.bf16.msra.mxu0 %v15022_v28  ;;  %13069 = vmatpush1.bf16.msra.mxu1 %v14919_v10 }
0x2556   :  { %13039 = vmatprep.subr.bf16.mxu0 %v15024_v29  ;;  %13071 = vmatprep.subr.bf16.mxu1 %v14924_v15 }
0x2557   :  { %5063 = vmatprep.mubr.f32.mxu1 %v17311_v2 }
0x2559   :  { %13041 = vmatpush3.bf16.msra.mxu0 %v15028_v37  ;;  %13073 = vmatpush1.bf16.msra.mxu1 %v14928_v19 }
0x255a   :  { %13043 = vmatprep.subr.bf16.mxu0 %v15031_v38  ;;  %13075 = vmatprep.subr.bf16.mxu1 %v14934_v24 }
0x255d   :  { %13045 = vmatpush3.bf16.msra.mxu0 %v15034_v44  ;;  %13077 = vmatpush1.bf16.msra.mxu1 %v14938_v30 }
0x255e   :  { %13047 = vmatprep.subr.bf16.mxu0 %v15047_v62  ;;  %13079 = vmatprep.subr.bf16.mxu1 %v14944_v33 }
0x2561   :  { %13049 = vmatpush3.bf16.msra.mxu0 %v15049_v7  ;;  %13081 = vmatpush1.bf16.msra.mxu1 %v14948_v39 }
0x2562   :  { %13051 = vmatprep.subr.bf16.mxu0 %v15053_v13  ;;  %13083 = vmatprep.subr.bf16.mxu1 %v14954_v42 }
0x2565   :  { %13053 = vmatpush3.bf16.msra.mxu0 %v15055_v21  ;;  %13085 = vmatpush1.bf16.msra.mxu1 %v14958_v48 }
0x2566   :  { %13055 = vmatprep.subr.bf16.mxu0 %v15059_v26  ;;  %13087 = vmatprep.subr.bf16.mxu1 %v14964_v51 }
0x2569   :  { %13057 = vmatpush3.bf16.msra.mxu0 %v15061_v34  ;;  %13089 = vmatpush1.bf16.msra.mxu1 %v14968_v57 }
0x256a   :  { %13059 = vmatprep.subr.bf16.mxu0 %v15064_v43  ;;  %13091 = vmatprep.subr.bf16.mxu1 %v14974_v60 }
0x256d   :  { %13061 = vmatpush3.bf16.msra.mxu0 %v15067_v53  ;;  %13093 = vmatpush1.bf16.msra.mxu1 %v17316_v35 }
0x256e   :  { %13063 = vmatprep.subr.bf16.mxu0 %v15070_v54  ;;  %13095 = vmatprep.subr.bf16.mxu1 %v17317_v4 }
0x2571   :  { %13065 = vmatpush3.bf16.msra.mxu0 %v15075_v61  ;;  %13097 = vmatpush1.bf16.msra.mxu1 %v17318_v27 }
0x2572   :  { %13099 = vmatprep.subr.bf16.mxu0 %v15020_v23  ;;  %13130 = vmatprep.subr.bf16.mxu1 %v17312_v41 }
0x2627   :  { %v9561_v14 = vpop.f32.mrb[46].mxu0  ;;  %v4843_v0 = vpop.f32.mrb[46].mxu1 }
0x2628   :  { %v4848_v55 = vrot.slane %v4843_v0, 1  ;;  %v9562_v22 = vpop.f32.mrb[47].mxu0  ;;  %v11183_v32 = vpop.f32.mrb[47].mxu1 }
0x2629   :  { %v9563_v50 = vadd.f32 %v9562_v22, %v9561_v14 }
0x262a   :  { %v4850_v45 = vadd.f32 %v4848_v55, %v15933_v59 }
0x262b   :  { %v4756_v56 = vadd.f32 %v16088_v46, %v9563_v50 }
0x262c   :  { %v8365_v25 = vmul.f32 -1.442695, %v4850_v45  ;;  %14387 = vtanh.f32 %v4850_v45 }
0x262d   :  { %v8364_v3 = vmul.f32 -1.442695, %v4756_v56 }
0x262e   :  { %14389 = vpow2.f32 %v8365_v25 }
0x262f   :  { %14391 = vpow2.f32 %v8364_v3 }
0x2630   :  { %14393 = vtanh.f32 %v4756_v56 }
0x2636   :  { %v14388_v12 = vpop.eup %14387 }
0x2637   :  { %v4864_v8 = vrot.slane %v14388_v12, 7 }
0x2638   :  { %v14390_v52 = vpop.eup %14389 }
0x2639   :  { %v14392_v36 = vpop.eup %14391  ;;  %v4854_v18 = vadd.f32 1.0, %v14390_v52  ;;  %4866 = vrot.lane.b32.xlu1 %v4864_v8, %s14803_s19 }
0x263a   :  { %v4762_v0 = vadd.f32 1.0, %v14392_v36  ;;  %v14394_v14 = vpop.eup %14393 }
0x263b   :  { %14395 = vrcp.f32 %v4854_v18 }
0x263c   :  { %14397 = vrcp.f32 %v4762_v0 }
0x263d   :  { %4768 = vrot.lane.b32.xlu1 %v14394_v14, %s14803_s19 }
0x2645   :  { %v14396_v59 = vpop.eup %14395 }
0x2646   :  { %v14398_v55 = vpop.eup %14397  ;;  %v4859_v22 = vrot.slane %v14396_v59, 7 }
0x2647   :  { %4766 = vrot.lane.b32.xlu0 %v14398_v55, %s14802_s17  ;;  %4770 = vrot.lane.b32.xlu1 %v14398_v55, %s14801_s15 }
0x264b   :  { %4861 = vrot.lane.b32.xlu0 %v4859_v22, %s14802_s17 }
0x264f   :  { %4868 = vrot.lane.b32.xlu0 %v4859_v22, %s14801_s15 }
0x26ab   :  { %v4867_v32 = vpop.permute.xlu1 %4866 }
0x26ac   :  { %v4872_v50 = vrot.slane %v4867_v32, 1 }
0x26ae   :  { %v4874_v25 = vmul.f32 %v14396_v59, %v4872_v50 }
0x26af   :  { %v4769_v45 = vpop.permute.xlu1 %4768 }
0x26b0   :  { %v4773_v3 = vmul.f32 %v14398_v55, %v4769_v45  ;;  %v4876_v36 = vrot.slane %v4874_v25, 7 }
0x26b9   :  { %v4767_v56 = vpop.permute.xlu0 %4766  ;;  %v4771_v1 = vpop.permute.xlu1 %4770 }
0x26ba   :  { %v4772_v12 = vmul.f32 %v4767_v56, %v16262_v63 }
0x26bc   :  { %v4774_v8 = vadd.f32 %v4773_v3, %v4772_v12 }
0x26bd   :  { %v4862_v52 = vpop.permute.xlu0 %4861 }
0x26be   :  { %14399 = vtanh.f32 %v4774_v8  ;;  %v4870_v18 = vmul.f32 %v4862_v52, %v16266_v17 }
0x26c0   :  { %v4878_v0 = vadd.f32 %v4876_v36, %v4870_v18 }
0x26c1   :  { %v4869_v4 = vpop.permute.xlu0 %4868 }
0x26c2   :  { %14401 = vtanh.f32 %v4878_v0 }
0x26c8   :  { %v14400_v14 = vpop.eup %14399 }
0x26c9   :  { %v4776_v27 = vmul.f32 %v14400_v14, %v4771_v1  ;;  %v14692_v14 = vld [vmem:[%s17290_s3] ss:$0 sm:$0xff] }
0x26cb   :  { %v4985_v22 = vrot.slane %v4776_v27, 2  ;;  %4945 = vmatprep.mubr.f32.mxu0 %v4776_v27 }
0x26cc   :  { %v14402_v32 = vpop.eup %14401 }
0x26cd   :  { %v4880_v35 = vmul.f32 %v14402_v32, %v4869_v4  ;;  %v4995_v59 = vsel %vm1793_vm6, %v16271_v9, %v4985_v22 }
0x26cf   :  { %4946 = vmatmul.mubr.f32.vlgmr.msra.gmra.mrb[48].mxu0 %v4880_v35 }
0x26d0   :  { %13101 = vmatpush3.bf16.msra.mxu0 %v15022_v28  ;;  %5193 = vmatprep.mubr.f32.mxu0 %v17311_v2 }
0x26d1   :  { %13103 = vmatprep.subr.bf16.mxu0 %v15024_v29 }
0x26d4   :  { %13105 = vmatpush3.bf16.msra.mxu0 %v15028_v37 }
0x26d5   :  { %13107 = vmatprep.subr.bf16.mxu0 %v15031_v38 }
0x26d8   :  { %13109 = vmatpush3.bf16.msra.mxu0 %v15034_v44 }
0x26d9   :  { %13111 = vmatprep.subr.bf16.mxu0 %v15047_v62 }
0x26dc   :  { %13113 = vmatpush3.bf16.msra.mxu0 %v15049_v7 }
0x26dd   :  { %13115 = vmatprep.subr.bf16.mxu0 %v15053_v13 }
0x26e0   :  { %13117 = vmatpush3.bf16.msra.mxu0 %v15055_v21 }
0x26e1   :  { %13119 = vmatprep.subr.bf16.mxu0 %v15059_v26 }
0x26e4   :  { %13121 = vmatpush3.bf16.msra.mxu0 %v15061_v34 }
0x26e5   :  { %13123 = vmatprep.subr.bf16.mxu0 %v15064_v43 }
0x26e8   :  { %13125 = vmatpush3.bf16.msra.mxu0 %v15067_v53 }
0x26e9   :  { %13127 = vmatprep.subr.bf16.mxu0 %v15070_v54 }
0x26ec   :  { %13129 = vmatpush3.bf16.msra.mxu0 %v15075_v61 }
0x26ed   :  { %13155 = vmatprep.subr.bf16.mxu0 %v15020_v23 }
0x27a2   :  { %v9613_v1 = vpop.f32.mrb[48].mxu0 }
0x27a3   :  { %v9614_v63 = vpop.f32.mrb[49].mxu0 }
0x27a4   :  { %v9615_v17 = vadd.f32 %v9614_v63, %v9613_v1 }
0x27a6   :  { %v4948_v9 = vadd.f32 %v16088_v46, %v9615_v17 }
0x27a8   :  { %v8366_v35 = vmul.f32 -1.442695, %v4948_v9  ;;  %14403 = vtanh.f32 %v4948_v9 }
0x27aa   :  { %14405 = vpow2.f32 %v8366_v35 }
0x27b2   :  { %v14404_v4 = vpop.eup %14403 }
0x27b3   :  { %4960 = vrot.lane.b32.xlu0 %v14404_v4, %s14803_s19 }
0x27b4   :  { %v14406_v27 = vpop.eup %14405 }
0x27b5   :  { %v4954_v55 = vadd.f32 1.0, %v14406_v27 }
0x27b7   :  { %14407 = vrcp.f32 %v4954_v55 }
0x27c1   :  { %v14408_v50 = vpop.eup %14407 }
0x27c2   :  { %4958 = vrot.lane.b32.xlu1 %v14408_v50, %s14802_s17 }
0x27c6   :  { %4962 = vrot.lane.b32.xlu1 %v14408_v50, %s14801_s15 }
0x2825   :  { %v4961_v45 = vpop.permute.xlu0 %4960 }
0x2826   :  { %v4965_v25 = vmul.f32 %v14408_v50, %v4961_v45 }
0x2834   :  { %v4959_v56 = vpop.permute.xlu1 %4958 }
0x2835   :  { %v4964_v3 = vmul.f32 %v4959_v56, %v4774_v8 }
0x2837   :  { %v4966_v12 = vadd.f32 %v4965_v25, %v4964_v3 }
0x2838   :  { %v4963_v52 = vpop.permute.xlu1 %4962 }
0x2839   :  { %14409 = vtanh.f32 %v4966_v12 }
0x2843   :  { %v14410_v46 = vpop.eup %14409 }
0x2844   :  { %v4968_v36 = vmul.f32 %v14410_v46, %v4963_v52 }
0x2846   :  { %v4988_v18 = vrot.slane %v4968_v36, 1 }
0x2848   :  { %v4996_v0 = vsel %vm1795_vm7, %v4995_v59, %v4988_v18 }
0x2849   :  { %4998 = vst [vmem:[#allocation9 + $0x10] sm:$0xff] %v4996_v0  ;;  %5064 = vmatmul.mubr.f32.vlgmr.msra.gmra.mrb[48].mxu1 %v4996_v0 }
0x284a   :  { %13132 = vmatpush3.bf16.msra.mxu1 %v14921_v11  ;;  %11216 = vmatprep.mubr.msk.f32.mxu1 %vm14800_vm0, %v17311_v2 }
0x284b   :  { %13133 = vmatprep.subr.bf16.mxu1 %v17312_v41 }
0x284e   :  { %13135 = vmatpush3.bf16.msra.mxu1 %v14930_v20 }
0x284f   :  { %13136 = vmatprep.subr.bf16.mxu1 %v17312_v41 }
0x2852   :  { %13138 = vmatpush3.bf16.msra.mxu1 %v14940_v31 }
0x2853   :  { %13139 = vmatprep.subr.bf16.mxu1 %v17312_v41 }
0x2856   :  { %13141 = vmatpush3.bf16.msra.mxu1 %v14950_v40 }
0x2857   :  { %13142 = vmatprep.subr.bf16.mxu1 %v17312_v41 }
0x285a   :  { %13144 = vmatpush3.bf16.msra.mxu1 %v14960_v49 }
0x285b   :  { %13145 = vmatprep.subr.bf16.mxu1 %v17312_v41 }
0x285e   :  { %13147 = vmatpush3.bf16.msra.mxu1 %v14970_v58 }
0x285f   :  { %13148 = vmatprep.subr.bf16.mxu1 %v17312_v41 }
0x2862   :  { %13150 = vmatpush3.bf16.msra.mxu1 %v14980_v5 }
0x2863   :  { %13151 = vmatprep.subr.bf16.mxu1 %v17312_v41 }
0x2866   :  { %13153 = vmatpush3.bf16.msra.mxu1 %v14990_v16 }
0x2867   :  { %13186 = vmatprep.subr.bf16.mxu1 %v17312_v41 }
0x291c   :  { %v5065_v8 = vpop.f32.mrb[48].mxu1 }
0x291d   :  { %v16361_v22 = vadd.f32 %v14692_v14, %v5065_v8  ;;  %v16363_v32 = vpop.f32.mrb[49].mxu1  ;;  %v16411_v14 = vld [vmem:[%s17291_s4] sm:$0x1] }
0x291e   :  { %17319 = vst [vmem:[#allocation18_spill] sm:$0xff] %v16363_v32 }
0x291f   :  { %v5110_v59 = vadd.f32 %v16361_v22, %v15041_v47 }
0x2921   :  { %v8368_v1 = vmul.f32 -1.442695, %v5110_v59  ;;  %14411 = vtanh.f32 %v5110_v59 }
0x2923   :  { %14413 = vpow2.f32 %v8368_v1 }
0x292b   :  { %v14412_v63 = vpop.eup %14411 }
0x292c   :  { %5120 = vrot.lane.b32.xlu1 %v14412_v63, %s14803_s19 }
0x292d   :  { %v14414_v17 = vpop.eup %14413 }
0x292e   :  { %v5114_v9 = vadd.f32 1.0, %v14414_v17 }
0x2930   :  { %14415 = vrcp.f32 %v5114_v9 }
0x293a   :  { %v14416_v35 = vpop.eup %14415 }
0x293b   :  { %5118 = vrot.lane.b32.xlu0 %v14416_v35, %s14802_s17 }
0x293f   :  { %5122 = vrot.lane.b32.xlu0 %v14416_v35, %s14801_s15 }
0x299e   :  { %v5121_v4 = vpop.permute.xlu1 %5120 }
0x299f   :  { %v5125_v55 = vmul.f32 %v14416_v35, %v5121_v4 }
0x29ad   :  { %v5119_v27 = vpop.permute.xlu0 %5118 }
0x29ae   :  { %v5124_v50 = vmul.f32 0.0, %v5119_v27 }
0x29b0   :  { %v16370_v45 = vadd.f32 %v5125_v55, %v5124_v50 }
0x29b1   :  { %v5123_v25 = vpop.permute.xlu0 %5122 }
0x29b2   :  { %14417 = vtanh.f32 %v16370_v45 }
0x29bc   :  { %v14418_v56 = vpop.eup %14417 }
0x29bd   :  { %v5128_v3 = vmul.f32 %v14418_v56, %v5123_v25 }
0x29bf   :  { %5194 = vmatmul.mubr.f32.vlgmr.msra.gmra.mrb[50].mxu0 %v5128_v3  ;;  %11217 = vmatmul.mubr.f32.vlgmr.msra.gmra.mrb[50].mxu1 %v5128_v3 }
0x29c0   :  { %13157 = vmatpush3.bf16.msra.mxu0 %v15022_v28  ;;  %13188 = vmatpush3.bf16.msra.mxu1 %v14921_v11 }
0x29c1   :  { %13159 = vmatprep.subr.bf16.mxu0 %v15024_v29  ;;  %13189 = vmatprep.subr.bf16.mxu1 %v17312_v41 }
0x29c2   :  { %11251 = vmatprep.mubr.msk.f32.mxu1 %vm14800_vm0, %v17311_v2 }
0x29c4   :  { %13161 = vmatpush3.bf16.msra.mxu0 %v15028_v37  ;;  %13191 = vmatpush3.bf16.msra.mxu1 %v14930_v20 }
0x29c5   :  { %13163 = vmatprep.subr.bf16.mxu0 %v15031_v38  ;;  %13192 = vmatprep.subr.bf16.mxu1 %v17312_v41 }
0x29c8   :  { %13165 = vmatpush3.bf16.msra.mxu0 %v15034_v44  ;;  %13194 = vmatpush3.bf16.msra.mxu1 %v14940_v31 }
0x29c9   :  { %13167 = vmatprep.subr.bf16.mxu0 %v15047_v62  ;;  %13195 = vmatprep.subr.bf16.mxu1 %v17312_v41 }
0x29cc   :  { %13169 = vmatpush3.bf16.msra.mxu0 %v15049_v7  ;;  %13197 = vmatpush3.bf16.msra.mxu1 %v14950_v40 }
0x29cd   :  { %13171 = vmatprep.subr.bf16.mxu0 %v15053_v13  ;;  %13198 = vmatprep.subr.bf16.mxu1 %v17312_v41 }
0x29d0   :  { %13173 = vmatpush3.bf16.msra.mxu0 %v15055_v21  ;;  %13200 = vmatpush3.bf16.msra.mxu1 %v14960_v49 }
0x29d1   :  { %13175 = vmatprep.subr.bf16.mxu0 %v15059_v26  ;;  %13201 = vmatprep.subr.bf16.mxu1 %v17312_v41 }
0x29d4   :  { %13177 = vmatpush3.bf16.msra.mxu0 %v15061_v34  ;;  %13203 = vmatpush3.bf16.msra.mxu1 %v14970_v58 }
0x29d5   :  { %13179 = vmatprep.subr.bf16.mxu0 %v15064_v43  ;;  %13204 = vmatprep.subr.bf16.mxu1 %v17312_v41 }
0x29d8   :  { %13181 = vmatpush3.bf16.msra.mxu0 %v15067_v53  ;;  %13206 = vmatpush3.bf16.msra.mxu1 %v14980_v5 }
0x29d9   :  { %13183 = vmatprep.subr.bf16.mxu0 %v15070_v54  ;;  %13207 = vmatprep.subr.bf16.mxu1 %v17312_v41 }
0x29dc   :  { %13185 = vmatpush3.bf16.msra.mxu0 %v15075_v61  ;;  %13209 = vmatpush3.bf16.msra.mxu1 %v14990_v16 }
0x29dd   :  { %13211 = vmatprep.subr.bf16.mxu0 %v15020_v23  ;;  %13242 = vmatprep.subr.bf16.mxu1 %v17312_v41 }
0x2a92   :  { %v9648_v12 = vpop.f32.mrb[50].mxu0  ;;  %v5283_v46 = vpop.f32.mrb[50].mxu1 }
0x2a93   :  { %v5288_v52 = vrot.slane %v5283_v46, 7  ;;  %v9649_v36 = vpop.f32.mrb[51].mxu0  ;;  %v11218_v18 = vpop.f32.mrb[51].mxu1 }
0x2a94   :  { %v9650_v0 = vadd.f32 %v9649_v36, %v9648_v12 }
0x2a95   :  { %v5290_v8 = vadd.f32 %v5288_v52, %v16361_v22 }
0x2a96   :  { %v5196_v59 = vadd.f32 %v16411_v14, %v9650_v0 }
0x2a97   :  { %v8370_v1 = vmul.f32 -1.442695, %v5290_v8  ;;  %14419 = vtanh.f32 %v5290_v8 }
0x2a98   :  { %v8369_v63 = vmul.f32 -1.442695, %v5196_v59 }
0x2a99   :  { %14421 = vpow2.f32 %v8370_v1 }
0x2a9a   :  { %14423 = vpow2.f32 %v8369_v63 }
0x2a9b   :  { %14425 = vtanh.f32 %v5196_v59 }
0x2aa1   :  { %v14420_v17 = vpop.eup %14419 }
0x2aa2   :  { %v5304_v9 = vrot.slane %v14420_v17, 1 }
0x2aa3   :  { %v14422_v35 = vpop.eup %14421 }
0x2aa4   :  { %v14424_v4 = vpop.eup %14423  ;;  %v5294_v27 = vadd.f32 1.0, %v14422_v35  ;;  %5306 = vrot.lane.b32.xlu1 %v5304_v9, %s14803_s19 }
0x2aa5   :  { %v5202_v55 = vadd.f32 1.0, %v14424_v4  ;;  %v14426_v50 = vpop.eup %14425 }
0x2aa6   :  { %14427 = vrcp.f32 %v5294_v27 }
0x2aa7   :  { %14429 = vrcp.f32 %v5202_v55 }
0x2aa8   :  { %5208 = vrot.lane.b32.xlu1 %v14426_v50, %s14803_s19 }
0x2ab0   :  { %v14428_v56 = vpop.eup %14427 }
0x2ab1   :  { %v14430_v25 = vpop.eup %14429  ;;  %v5299_v3 = vrot.slane %v14428_v56, 1 }
0x2ab2   :  { %5206 = vrot.lane.b32.xlu0 %v14430_v25, %s14802_s17  ;;  %5210 = vrot.lane.b32.xlu1 %v14430_v25, %s14801_s15 }
0x2ab6   :  { %5301 = vrot.lane.b32.xlu0 %v5299_v3, %s14802_s17 }
0x2aba   :  { %5308 = vrot.lane.b32.xlu0 %v5299_v3, %s14801_s15 }
0x2b16   :  { %v5307_v12 = vpop.permute.xlu1 %5306 }
0x2b17   :  { %v5312_v46 = vrot.slane %v5307_v12, 7 }
0x2b19   :  { %v5314_v18 = vmul.f32 %v14428_v56, %v5312_v46 }
0x2b1a   :  { %v5209_v52 = vpop.permute.xlu1 %5208 }
0x2b1b   :  { %v5213_v0 = vmul.f32 %v14430_v25, %v5209_v52  ;;  %v5316_v63 = vrot.slane %v5314_v18, 1 }
0x2b24   :  { %v5207_v36 = vpop.permute.xlu0 %5206  ;;  %v5211_v4 = vpop.permute.xlu1 %5210 }
0x2b25   :  { %v5212_v8 = vmul.f32 0.0, %v5207_v36 }
0x2b27   :  { %v16420_v59 = vadd.f32 %v5213_v0, %v5212_v8 }
0x2b28   :  { %v5302_v1 = vpop.permute.xlu0 %5301 }
0x2b29   :  { %14431 = vtanh.f32 %v16420_v59  ;;  %v5310_v17 = vmul.f32 %v5302_v1, %v16370_v45 }
0x2b2b   :  { %v16424_v9 = vadd.f32 %v5316_v63, %v5310_v17 }
0x2b2c   :  { %v5309_v50 = vpop.permute.xlu0 %5308 }
0x2b2d   :  { %14433 = vtanh.f32 %v16424_v9 }
0x2b33   :  { %v14432_v35 = vpop.eup %14431 }
0x2b34   :  { %v16427_v27 = vmul.f32 %v14432_v35, %v5211_v4 }
0x2b36   :  { %5385 = vmatprep.mubr.f32.mxu0 %v16427_v27 }
0x2b37   :  { %v14434_v55 = vpop.eup %14433 }
0x2b38   :  { %v5320_v56 = vmul.f32 %v14434_v55, %v5309_v50 }
0x2b3a   :  { %5386 = vmatmul.mubr.f32.vlgmr.msra.gmra.mrb[52].mxu0 %v5320_v56  ;;  %11252 = vmatmul.mubr.f32.vlgmr.msra.gmra.mrb[52].mxu1 %v5320_v56 }
0x2b3b   :  { %13213 = vmatpush3.bf16.msra.mxu0 %v15022_v28  ;;  %13244 = vmatpush3.bf16.msra.mxu1 %v14921_v11 }
0x2b3c   :  { %13215 = vmatprep.subr.bf16.mxu0 %v15024_v29  ;;  %13245 = vmatprep.subr.bf16.mxu1 %v17312_v41 }
0x2b3d   :  { %11286 = vmatprep.mubr.msk.f32.mxu1 %vm14800_vm0, %v17311_v2 }
0x2b3f   :  { %13217 = vmatpush3.bf16.msra.mxu0 %v15028_v37  ;;  %13247 = vmatpush3.bf16.msra.mxu1 %v14930_v20 }
0x2b40   :  { %13219 = vmatprep.subr.bf16.mxu0 %v15031_v38  ;;  %13248 = vmatprep.subr.bf16.mxu1 %v17312_v41 }
0x2b43   :  { %13221 = vmatpush3.bf16.msra.mxu0 %v15034_v44  ;;  %13250 = vmatpush3.bf16.msra.mxu1 %v14940_v31 }
0x2b44   :  { %13223 = vmatprep.subr.bf16.mxu0 %v15047_v62  ;;  %13251 = vmatprep.subr.bf16.mxu1 %v17312_v41 }
0x2b47   :  { %13225 = vmatpush3.bf16.msra.mxu0 %v15049_v7  ;;  %13253 = vmatpush3.bf16.msra.mxu1 %v14950_v40 }
0x2b48   :  { %13227 = vmatprep.subr.bf16.mxu0 %v15053_v13  ;;  %13254 = vmatprep.subr.bf16.mxu1 %v17312_v41 }
0x2b4b   :  { %13229 = vmatpush3.bf16.msra.mxu0 %v15055_v21  ;;  %13256 = vmatpush3.bf16.msra.mxu1 %v14960_v49 }
0x2b4c   :  { %13231 = vmatprep.subr.bf16.mxu0 %v15059_v26  ;;  %13257 = vmatprep.subr.bf16.mxu1 %v17312_v41 }
0x2b4f   :  { %13233 = vmatpush3.bf16.msra.mxu0 %v15061_v34  ;;  %13259 = vmatpush3.bf16.msra.mxu1 %v14970_v58 }
0x2b50   :  { %13235 = vmatprep.subr.bf16.mxu0 %v15064_v43  ;;  %13260 = vmatprep.subr.bf16.mxu1 %v17312_v41 }
0x2b53   :  { %13237 = vmatpush3.bf16.msra.mxu0 %v15067_v53  ;;  %13262 = vmatpush3.bf16.msra.mxu1 %v14980_v5 }
0x2b54   :  { %13239 = vmatprep.subr.bf16.mxu0 %v15070_v54  ;;  %13263 = vmatprep.subr.bf16.mxu1 %v17312_v41 }
0x2b57   :  { %13241 = vmatpush3.bf16.msra.mxu0 %v15075_v61  ;;  %13265 = vmatpush3.bf16.msra.mxu1 %v14990_v16 }
0x2b58   :  { %13267 = vmatprep.subr.bf16.mxu0 %v15020_v23  ;;  %13298 = vmatprep.subr.bf16.mxu1 %v17312_v41 }
0x2c0d   :  { %v9700_v45 = vpop.f32.mrb[52].mxu0  ;;  %v5475_v25 = vpop.f32.mrb[52].mxu1 }
0x2c0e   :  { %v5480_v3 = vrot.slane %v5475_v25, 6  ;;  %v9701_v12 = vpop.f32.mrb[53].mxu0  ;;  %v11253_v46 = vpop.f32.mrb[53].mxu1 }
0x2c0f   :  { %v9702_v52 = vadd.f32 %v9701_v12, %v9700_v45 }
0x2c10   :  { %v5482_v36 = vadd.f32 %v5480_v3, %v16361_v22 }
0x2c11   :  { %v5388_v18 = vadd.f32 %v16411_v14, %v9702_v52 }
0x2c12   :  { %v8372_v0 = vmul.f32 -1.442695, %v5482_v36  ;;  %14435 = vtanh.f32 %v5482_v36 }
0x2c13   :  { %v8371_v8 = vmul.f32 -1.442695, %v5388_v18 }
0x2c14   :  { %14437 = vpow2.f32 %v8372_v0 }
0x2c15   :  { %14439 = vpow2.f32 %v8371_v8 }
0x2c16   :  { %14441 = vtanh.f32 %v5388_v18 }
0x2c1c   :  { %v14436_v1 = vpop.eup %14435 }
0x2c1d   :  { %v5496_v63 = vrot.slane %v14436_v1, 2 }
0x2c1e   :  { %v14438_v17 = vpop.eup %14437 }
0x2c1f   :  { %v14440_v35 = vpop.eup %14439  ;;  %v5486_v4 = vadd.f32 1.0, %v14438_v17  ;;  %5498 = vrot.lane.b32.xlu1 %v5496_v63, %s14803_s19 }
0x2c20   :  { %v5394_v55 = vadd.f32 1.0, %v14440_v35  ;;  %v14442_v50 = vpop.eup %14441 }
0x2c21   :  { %14443 = vrcp.f32 %v5486_v4 }
0x2c22   :  { %14445 = vrcp.f32 %v5394_v55 }
0x2c23   :  { %5400 = vrot.lane.b32.xlu1 %v14442_v50, %s14803_s19 }
0x2c2b   :  { %v14444_v56 = vpop.eup %14443 }
0x2c2c   :  { %v14446_v45 = vpop.eup %14445  ;;  %v5491_v25 = vrot.slane %v14444_v56, 2 }
0x2c2d   :  { %5398 = vrot.lane.b32.xlu0 %v14446_v45, %s14802_s17  ;;  %5402 = vrot.lane.b32.xlu1 %v14446_v45, %s14801_s15 }
0x2c31   :  { %5493 = vrot.lane.b32.xlu0 %v5491_v25, %s14802_s17 }
0x2c35   :  { %5500 = vrot.lane.b32.xlu0 %v5491_v25, %s14801_s15 }
0x2c91   :  { %v5499_v3 = vpop.permute.xlu1 %5498 }
0x2c92   :  { %v5504_v12 = vrot.slane %v5499_v3, 6 }
0x2c94   :  { %v5506_v36 = vmul.f32 %v14444_v56, %v5504_v12 }
0x2c95   :  { %v5401_v46 = vpop.permute.xlu1 %5400 }
0x2c96   :  { %v5405_v18 = vmul.f32 %v14446_v45, %v5401_v46  ;;  %v5508_v63 = vrot.slane %v5506_v36, 2 }
0x2c9f   :  { %v5399_v52 = vpop.permute.xlu0 %5398  ;;  %v5403_v55 = vpop.permute.xlu1 %5402 }
0x2ca0   :  { %v5404_v0 = vmul.f32 %v5399_v52, %v16420_v59 }
0x2ca2   :  { %v16473_v8 = vadd.f32 %v5405_v18, %v5404_v0 }
0x2ca3   :  { %v5494_v1 = vpop.permute.xlu0 %5493 }
0x2ca4   :  { %14447 = vtanh.f32 %v16473_v8  ;;  %v5502_v17 = vmul.f32 %v5494_v1, %v16424_v9 }
0x2ca6   :  { %v16477_v35 = vadd.f32 %v5508_v63, %v5502_v17 }
0x2ca7   :  { %v5501_v59 = vpop.permute.xlu0 %5500 }
0x2ca8   :  { %14449 = vtanh.f32 %v16477_v35 }
0x2cae   :  { %v14448_v4 = vpop.eup %14447 }
0x2caf   :  { %v16480_v50 = vmul.f32 %v14448_v4, %v5403_v55 }
0x2cb1   :  { %5577 = vmatprep.mubr.f32.mxu0 %v16480_v50 }
0x2cb2   :  { %v14450_v56 = vpop.eup %14449 }
0x2cb3   :  { %v5512_v45 = vmul.f32 %v14450_v56, %v5501_v59 }
0x2cb5   :  { %5578 = vmatmul.mubr.f32.vlgmr.msra.gmra.mrb[54].mxu0 %v5512_v45  ;;  %11287 = vmatmul.mubr.f32.vlgmr.msra.gmra.mrb[54].mxu1 %v5512_v45 }
0x2cb6   :  { %13269 = vmatpush3.bf16.msra.mxu0 %v15022_v28  ;;  %13300 = vmatpush3.bf16.msra.mxu1 %v14921_v11 }
0x2cb7   :  { %13271 = vmatprep.subr.bf16.mxu0 %v15024_v29  ;;  %13301 = vmatprep.subr.bf16.mxu1 %v17312_v41 }
0x2cb8   :  { %11321 = vmatprep.mubr.msk.f32.mxu1 %vm14800_vm0, %v17311_v2 }
0x2cba   :  { %13273 = vmatpush3.bf16.msra.mxu0 %v15028_v37  ;;  %13303 = vmatpush3.bf16.msra.mxu1 %v14930_v20 }
0x2cbb   :  { %13275 = vmatprep.subr.bf16.mxu0 %v15031_v38  ;;  %13304 = vmatprep.subr.bf16.mxu1 %v17312_v41 }
0x2cbe   :  { %13277 = vmatpush3.bf16.msra.mxu0 %v15034_v44  ;;  %13306 = vmatpush3.bf16.msra.mxu1 %v14940_v31 }
0x2cbf   :  { %13279 = vmatprep.subr.bf16.mxu0 %v15047_v62  ;;  %13307 = vmatprep.subr.bf16.mxu1 %v17312_v41 }
0x2cc2   :  { %13281 = vmatpush3.bf16.msra.mxu0 %v15049_v7  ;;  %13309 = vmatpush3.bf16.msra.mxu1 %v14950_v40 }
0x2cc3   :  { %13283 = vmatprep.subr.bf16.mxu0 %v15053_v13  ;;  %13310 = vmatprep.subr.bf16.mxu1 %v17312_v41 }
0x2cc6   :  { %13285 = vmatpush3.bf16.msra.mxu0 %v15055_v21  ;;  %13312 = vmatpush3.bf16.msra.mxu1 %v14960_v49 }
0x2cc7   :  { %13287 = vmatprep.subr.bf16.mxu0 %v15059_v26  ;;  %13313 = vmatprep.subr.bf16.mxu1 %v17312_v41 }
0x2cca   :  { %13289 = vmatpush3.bf16.msra.mxu0 %v15061_v34  ;;  %13315 = vmatpush3.bf16.msra.mxu1 %v14970_v58 }
0x2ccb   :  { %13291 = vmatprep.subr.bf16.mxu0 %v15064_v43  ;;  %13316 = vmatprep.subr.bf16.mxu1 %v17312_v41 }
0x2cce   :  { %13293 = vmatpush3.bf16.msra.mxu0 %v15067_v53  ;;  %13318 = vmatpush3.bf16.msra.mxu1 %v14980_v5 }
0x2ccf   :  { %13295 = vmatprep.subr.bf16.mxu0 %v15070_v54  ;;  %13319 = vmatprep.subr.bf16.mxu1 %v17312_v41 }
0x2cd2   :  { %13297 = vmatpush3.bf16.msra.mxu0 %v15075_v61  ;;  %13321 = vmatpush3.bf16.msra.mxu1 %v14990_v16 }
0x2cd3   :  { %13323 = vmatprep.subr.bf16.mxu0 %v15020_v23  ;;  %13354 = vmatprep.subr.bf16.mxu1 %v17312_v41 }
0x2d88   :  { %v9752_v9 = vpop.f32.mrb[54].mxu0  ;;  %v5667_v25 = vpop.f32.mrb[54].mxu1 }
0x2d89   :  { %v5672_v3 = vrot.slane %v5667_v25, 5  ;;  %v9753_v12 = vpop.f32.mrb[55].mxu0  ;;  %v11288_v46 = vpop.f32.mrb[55].mxu1 }
0x2d8a   :  { %v9754_v52 = vadd.f32 %v9753_v12, %v9752_v9 }
0x2d8b   :  { %v5674_v36 = vadd.f32 %v5672_v3, %v16361_v22 }
0x2d8c   :  { %v5580_v18 = vadd.f32 %v16411_v14, %v9754_v52 }
0x2d8d   :  { %v8374_v0 = vmul.f32 -1.442695, %v5674_v36  ;;  %14451 = vtanh.f32 %v5674_v36 }
0x2d8e   :  { %v8373_v1 = vmul.f32 -1.442695, %v5580_v18 }
0x2d8f   :  { %14453 = vpow2.f32 %v8374_v0 }
0x2d90   :  { %14455 = vpow2.f32 %v8373_v1 }
0x2d91   :  { %14457 = vtanh.f32 %v5580_v18 }
0x2d97   :  { %v14452_v63 = vpop.eup %14451 }
0x2d98   :  { %v5688_v17 = vrot.slane %v14452_v63, 3 }
0x2d99   :  { %v14454_v4 = vpop.eup %14453 }
0x2d9a   :  { %v14456_v55 = vpop.eup %14455  ;;  %v5678_v56 = vadd.f32 1.0, %v14454_v4  ;;  %5690 = vrot.lane.b32.xlu1 %v5688_v17, %s14803_s19 }
0x2d9b   :  { %v5586_v59 = vadd.f32 1.0, %v14456_v55  ;;  %v14458_v45 = vpop.eup %14457 }
0x2d9c   :  { %14459 = vrcp.f32 %v5678_v56 }
0x2d9d   :  { %14461 = vrcp.f32 %v5586_v59 }
0x2d9e   :  { %5592 = vrot.lane.b32.xlu1 %v14458_v45, %s14803_s19  ;;  %v6562_v45 = vrot.slane %v16480_v50, 7 }
0x2da6   :  { %v14460_v9 = vpop.eup %14459 }
0x2da7   :  { %v14462_v25 = vpop.eup %14461  ;;  %v5683_v3 = vrot.slane %v14460_v9, 3 }
0x2da8   :  { %5590 = vrot.lane.b32.xlu0 %v14462_v25, %s14802_s17  ;;  %5594 = vrot.lane.b32.xlu1 %v14462_v25, %s14801_s15 }
0x2dac   :  { %5685 = vrot.lane.b32.xlu0 %v5683_v3, %s14802_s17 }
0x2db0   :  { %5692 = vrot.lane.b32.xlu0 %v5683_v3, %s14801_s15 }
0x2e0c   :  { %v5691_v12 = vpop.permute.xlu1 %5690 }
0x2e0d   :  { %v5696_v46 = vrot.slane %v5691_v12, 5  ;;  %v6582_v12 = vsel %vm1783_vm1, %v16427_v27, %v6562_v45 }
0x2e0f   :  { %v5698_v18 = vmul.f32 %v14460_v9, %v5696_v46 }
0x2e10   :  { %v5593_v52 = vpop.permute.xlu1 %5592 }
0x2e11   :  { %v5597_v0 = vmul.f32 %v14462_v25, %v5593_v52  ;;  %v5700_v4 = vrot.slane %v5698_v18, 3 }
0x2e1a   :  { %v5591_v36 = vpop.permute.xlu0 %5590  ;;  %v5595_v3 = vpop.permute.xlu1 %5594 }
0x2e1b   :  { %v5596_v1 = vmul.f32 %v5591_v36, %v16473_v8 }
0x2e1d   :  { %v16526_v63 = vadd.f32 %v5597_v0, %v5596_v1 }
0x2e1e   :  { %v5686_v17 = vpop.permute.xlu0 %5685 }
0x2e1f   :  { %14463 = vtanh.f32 %v16526_v63  ;;  %v5694_v55 = vmul.f32 %v5686_v17, %v16477_v35 }
0x2e21   :  { %v16530_v56 = vadd.f32 %v5700_v4, %v5694_v55 }
0x2e22   :  { %v5693_v46 = vpop.permute.xlu0 %5692 }
0x2e23   :  { %14465 = vtanh.f32 %v16530_v56 }
0x2e29   :  { %v14464_v59 = vpop.eup %14463 }
0x2e2a   :  { %v5600_v9 = vmul.f32 %v14464_v59, %v5595_v3 }
0x2e2c   :  { %v6565_v25 = vrot.slane %v5600_v9, 6  ;;  %5769 = vmatprep.mubr.f32.mxu0 %v5600_v9 }
0x2e2d   :  { %v14466_v8 = vpop.eup %14465 }
0x2e2e   :  { %v16537_v52 = vsel %vm1785_vm2, %v6582_v12, %v6565_v25  ;;  %v5704_v35 = vmul.f32 %v14466_v8, %v5693_v46 }
0x2e30   :  { %5770 = vmatmul.mubr.f32.vlgmr.msra.gmra.mrb[56].mxu0 %v5704_v35  ;;  %11322 = vmatmul.mubr.f32.vlgmr.msra.gmra.mrb[56].mxu1 %v5704_v35 }
0x2e31   :  { %13325 = vmatpush3.bf16.msra.mxu0 %v15022_v28  ;;  %13356 = vmatpush3.bf16.msra.mxu1 %v14921_v11 }
0x2e32   :  { %13327 = vmatprep.subr.bf16.mxu0 %v15024_v29  ;;  %13357 = vmatprep.subr.bf16.mxu1 %v17312_v41 }
0x2e33   :  { %11356 = vmatprep.mubr.msk.f32.mxu1 %vm14800_vm0, %v17311_v2 }
0x2e35   :  { %13329 = vmatpush3.bf16.msra.mxu0 %v15028_v37  ;;  %13359 = vmatpush3.bf16.msra.mxu1 %v14930_v20 }
0x2e36   :  { %13331 = vmatprep.subr.bf16.mxu0 %v15031_v38  ;;  %13360 = vmatprep.subr.bf16.mxu1 %v17312_v41 }
0x2e39   :  { %13333 = vmatpush3.bf16.msra.mxu0 %v15034_v44  ;;  %13362 = vmatpush3.bf16.msra.mxu1 %v14940_v31 }
0x2e3a   :  { %13335 = vmatprep.subr.bf16.mxu0 %v15047_v62  ;;  %13363 = vmatprep.subr.bf16.mxu1 %v17312_v41 }
0x2e3d   :  { %13337 = vmatpush3.bf16.msra.mxu0 %v15049_v7  ;;  %13365 = vmatpush3.bf16.msra.mxu1 %v14950_v40 }
0x2e3e   :  { %13339 = vmatprep.subr.bf16.mxu0 %v15053_v13  ;;  %13366 = vmatprep.subr.bf16.mxu1 %v17312_v41 }
0x2e41   :  { %13341 = vmatpush3.bf16.msra.mxu0 %v15055_v21  ;;  %13368 = vmatpush3.bf16.msra.mxu1 %v14960_v49 }
0x2e42   :  { %13343 = vmatprep.subr.bf16.mxu0 %v15059_v26  ;;  %13369 = vmatprep.subr.bf16.mxu1 %v17312_v41 }
0x2e45   :  { %13345 = vmatpush3.bf16.msra.mxu0 %v15061_v34  ;;  %13371 = vmatpush3.bf16.msra.mxu1 %v14970_v58 }
0x2e46   :  { %13347 = vmatprep.subr.bf16.mxu0 %v15064_v43  ;;  %13372 = vmatprep.subr.bf16.mxu1 %v17312_v41 }
0x2e49   :  { %13349 = vmatpush3.bf16.msra.mxu0 %v15067_v53  ;;  %13374 = vmatpush3.bf16.msra.mxu1 %v14980_v5 }
0x2e4a   :  { %13351 = vmatprep.subr.bf16.mxu0 %v15070_v54  ;;  %13375 = vmatprep.subr.bf16.mxu1 %v17312_v41 }
0x2e4d   :  { %13353 = vmatpush3.bf16.msra.mxu0 %v15075_v61  ;;  %13377 = vmatpush3.bf16.msra.mxu1 %v14990_v16 }
0x2e4e   :  { %13379 = vmatprep.subr.bf16.mxu0 %v15020_v23  ;;  %13410 = vmatprep.subr.bf16.mxu1 %v17312_v41 }
0x2f03   :  { %v9804_v27 = vpop.f32.mrb[56].mxu0  ;;  %v5859_v50 = vpop.f32.mrb[56].mxu1 }
0x2f04   :  { %v5864_v36 = vrot.slane %v5859_v50, 4  ;;  %v9805_v18 = vpop.f32.mrb[57].mxu0  ;;  %v11323_v0 = vpop.f32.mrb[57].mxu1 }
0x2f05   :  { %v9806_v1 = vadd.f32 %v9805_v18, %v9804_v27 }
0x2f06   :  { %v5866_v17 = vadd.f32 %v5864_v36, %v16361_v22 }
0x2f07   :  { %v5772_v4 = vadd.f32 %v16411_v14, %v9806_v1 }
0x2f08   :  { %v8376_v55 = vmul.f32 -1.442695, %v5866_v17  ;;  %14467 = vtanh.f32 %v5866_v17 }
0x2f09   :  { %v8375_v59 = vmul.f32 -1.442695, %v5772_v4 }
0x2f0a   :  { %14469 = vpow2.f32 %v8376_v55 }
0x2f0b   :  { %14471 = vpow2.f32 %v8375_v59 }
0x2f0c   :  { %14473 = vtanh.f32 %v5772_v4 }
0x2f12   :  { %v14468_v45 = vpop.eup %14467 }
0x2f13   :  { %v5880_v3 = vrot.slane %v14468_v45, 4 }
0x2f14   :  { %v14470_v9 = vpop.eup %14469 }
0x2f15   :  { %v14472_v25 = vpop.eup %14471  ;;  %v5870_v8 = vadd.f32 1.0, %v14470_v9  ;;  %5882 = vrot.lane.b32.xlu1 %v5880_v3, %s14803_s19 }
0x2f16   :  { %v5778_v12 = vadd.f32 1.0, %v14472_v25  ;;  %v14474_v46 = vpop.eup %14473 }
0x2f17   :  { %14475 = vrcp.f32 %v5870_v8 }
0x2f18   :  { %14477 = vrcp.f32 %v5778_v12 }
0x2f19   :  { %5784 = vrot.lane.b32.xlu1 %v14474_v46, %s14803_s19 }
0x2f21   :  { %v14476_v35 = vpop.eup %14475 }
0x2f22   :  { %v14478_v27 = vpop.eup %14477  ;;  %v5875_v50 = vrot.slane %v14476_v35, 4 }
0x2f23   :  { %5782 = vrot.lane.b32.xlu0 %v14478_v27, %s14802_s17  ;;  %5786 = vrot.lane.b32.xlu1 %v14478_v27, %s14801_s15 }
0x2f27   :  { %5877 = vrot.lane.b32.xlu0 %v5875_v50, %s14802_s17 }
0x2f2b   :  { %5884 = vrot.lane.b32.xlu0 %v5875_v50, %s14801_s15 }
0x2f87   :  { %v5883_v36 = vpop.permute.xlu1 %5882 }
0x2f88   :  { %v5888_v18 = vrot.slane %v5883_v36, 4 }
0x2f8a   :  { %v5890_v17 = vmul.f32 %v14476_v35, %v5888_v18 }
0x2f8b   :  { %v5785_v0 = vpop.permute.xlu1 %5784 }
0x2f8c   :  { %v5789_v4 = vmul.f32 %v14478_v27, %v5785_v0  ;;  %v5892_v3 = vrot.slane %v5890_v17, 4 }
0x2f95   :  { %v5783_v1 = vpop.permute.xlu0 %5782  ;;  %v5787_v12 = vpop.permute.xlu1 %5786 }
0x2f96   :  { %v5788_v55 = vmul.f32 %v5783_v1, %v16526_v63 }
0x2f98   :  { %v16582_v59 = vadd.f32 %v5789_v4, %v5788_v55 }
0x2f99   :  { %v5878_v45 = vpop.permute.xlu0 %5877 }
0x2f9a   :  { %14479 = vtanh.f32 %v16582_v59  ;;  %v5886_v9 = vmul.f32 %v5878_v45, %v16530_v56 }
0x2f9c   :  { %v16586_v25 = vadd.f32 %v5892_v3, %v5886_v9 }
0x2f9d   :  { %v5885_v27 = vpop.permute.xlu0 %5884 }
0x2f9e   :  { %14481 = vtanh.f32 %v16586_v25 }
0x2fa4   :  { %v14480_v8 = vpop.eup %14479 }
0x2fa5   :  { %v5792_v46 = vmul.f32 %v14480_v8, %v5787_v12 }
0x2fa7   :  { %v6568_v50 = vrot.slane %v5792_v46, 5  ;;  %5961 = vmatprep.mubr.f32.mxu0 %v5792_v46 }
0x2fa8   :  { %v14482_v35 = vpop.eup %14481 }
0x2fa9   :  { %v16591_v63 = vsel %vm1787_vm3, %v16537_v52, %v6568_v50  ;;  %v5896_v36 = vmul.f32 %v14482_v35, %v5885_v27 }
0x2fab   :  { %5962 = vmatmul.mubr.f32.vlgmr.msra.gmra.mrb[58].mxu0 %v5896_v36  ;;  %11357 = vmatmul.mubr.f32.vlgmr.msra.gmra.mrb[58].mxu1 %v5896_v36 }
0x2fac   :  { %13381 = vmatpush3.bf16.msra.mxu0 %v15022_v28  ;;  %13412 = vmatpush3.bf16.msra.mxu1 %v14921_v11 }
0x2fad   :  { %13383 = vmatprep.subr.bf16.mxu0 %v15024_v29  ;;  %13413 = vmatprep.subr.bf16.mxu1 %v17312_v41 }
0x2fae   :  { %11391 = vmatprep.mubr.msk.f32.mxu1 %vm14800_vm0, %v17311_v2 }
0x2fb0   :  { %13385 = vmatpush3.bf16.msra.mxu0 %v15028_v37  ;;  %13415 = vmatpush3.bf16.msra.mxu1 %v14930_v20 }
0x2fb1   :  { %13387 = vmatprep.subr.bf16.mxu0 %v15031_v38  ;;  %13416 = vmatprep.subr.bf16.mxu1 %v17312_v41 }
0x2fb4   :  { %13389 = vmatpush3.bf16.msra.mxu0 %v15034_v44  ;;  %13418 = vmatpush3.bf16.msra.mxu1 %v14940_v31 }
0x2fb5   :  { %13391 = vmatprep.subr.bf16.mxu0 %v15047_v62  ;;  %13419 = vmatprep.subr.bf16.mxu1 %v17312_v41 }
0x2fb8   :  { %13393 = vmatpush3.bf16.msra.mxu0 %v15049_v7  ;;  %13421 = vmatpush3.bf16.msra.mxu1 %v14950_v40 }
0x2fb9   :  { %13395 = vmatprep.subr.bf16.mxu0 %v15053_v13  ;;  %13422 = vmatprep.subr.bf16.mxu1 %v17312_v41 }
0x2fbc   :  { %13397 = vmatpush3.bf16.msra.mxu0 %v15055_v21  ;;  %13424 = vmatpush3.bf16.msra.mxu1 %v14960_v49 }
0x2fbd   :  { %13399 = vmatprep.subr.bf16.mxu0 %v15059_v26  ;;  %13425 = vmatprep.subr.bf16.mxu1 %v17312_v41 }
0x2fc0   :  { %13401 = vmatpush3.bf16.msra.mxu0 %v15061_v34  ;;  %13427 = vmatpush3.bf16.msra.mxu1 %v14970_v58 }
0x2fc1   :  { %13403 = vmatprep.subr.bf16.mxu0 %v15064_v43  ;;  %13428 = vmatprep.subr.bf16.mxu1 %v17312_v41 }
0x2fc4   :  { %13405 = vmatpush3.bf16.msra.mxu0 %v15067_v53  ;;  %13430 = vmatpush3.bf16.msra.mxu1 %v14980_v5 }
0x2fc5   :  { %13407 = vmatprep.subr.bf16.mxu0 %v15070_v54  ;;  %13431 = vmatprep.subr.bf16.mxu1 %v17312_v41 }
0x2fc8   :  { %13409 = vmatpush3.bf16.msra.mxu0 %v15075_v61  ;;  %13433 = vmatpush3.bf16.msra.mxu1 %v14990_v16 }
0x2fc9   :  { %13435 = vmatprep.subr.bf16.mxu0 %v15020_v23  ;;  %13466 = vmatprep.subr.bf16.mxu1 %v17312_v41 }
0x307e   :  { %v9856_v56 = vpop.f32.mrb[58].mxu0  ;;  %v6051_v52 = vpop.f32.mrb[58].mxu1 }
0x307f   :  { %v6056_v18 = vrot.slane %v6051_v52, 3  ;;  %v9857_v0 = vpop.f32.mrb[59].mxu0  ;;  %v11358_v1 = vpop.f32.mrb[59].mxu1 }
0x3080   :  { %v9858_v17 = vadd.f32 %v9857_v0, %v9856_v56 }
0x3081   :  { %v6058_v4 = vadd.f32 %v6056_v18, %v16361_v22 }
0x3082   :  { %v5964_v55 = vadd.f32 %v16411_v14, %v9858_v17 }
0x3083   :  { %v8378_v45 = vmul.f32 -1.442695, %v6058_v4  ;;  %14483 = vtanh.f32 %v6058_v4 }
0x3084   :  { %v8377_v3 = vmul.f32 -1.442695, %v5964_v55 }
0x3085   :  { %14485 = vpow2.f32 %v8378_v45 }
0x3086   :  { %14487 = vpow2.f32 %v8377_v3 }
0x3087   :  { %14489 = vtanh.f32 %v5964_v55 }
0x308d   :  { %v14484_v9 = vpop.eup %14483 }
0x308e   :  { %v6072_v8 = vrot.slane %v14484_v9, 5 }
0x308f   :  { %v14486_v12 = vpop.eup %14485 }
0x3090   :  { %v14488_v46 = vpop.eup %14487  ;;  %v6062_v50 = vadd.f32 1.0, %v14486_v12  ;;  %6074 = vrot.lane.b32.xlu1 %v6072_v8, %s14803_s19 }
0x3091   :  { %v5970_v35 = vadd.f32 1.0, %v14488_v46  ;;  %v14490_v27 = vpop.eup %14489 }
0x3092   :  { %14491 = vrcp.f32 %v6062_v50 }
0x3093   :  { %14493 = vrcp.f32 %v5970_v35 }
0x3094   :  { %5976 = vrot.lane.b32.xlu1 %v14490_v27, %s14803_s19 }
0x309c   :  { %v14492_v36 = vpop.eup %14491 }
0x309d   :  { %v14494_v56 = vpop.eup %14493  ;;  %v6067_v52 = vrot.slane %v14492_v36, 5 }
0x309e   :  { %5974 = vrot.lane.b32.xlu0 %v14494_v56, %s14802_s17  ;;  %5978 = vrot.lane.b32.xlu1 %v14494_v56, %s14801_s15 }
0x30a2   :  { %6069 = vrot.lane.b32.xlu0 %v6067_v52, %s14802_s17 }
0x30a6   :  { %6076 = vrot.lane.b32.xlu0 %v6067_v52, %s14801_s15 }
0x3102   :  { %v6075_v18 = vpop.permute.xlu1 %6074 }
0x3103   :  { %v6080_v0 = vrot.slane %v6075_v18, 3 }
0x3105   :  { %v6082_v4 = vmul.f32 %v14492_v36, %v6080_v0 }
0x3106   :  { %v5977_v1 = vpop.permute.xlu1 %5976 }
0x3107   :  { %v5981_v55 = vmul.f32 %v14494_v56, %v5977_v1  ;;  %v6084_v8 = vrot.slane %v6082_v4, 5 }
0x3110   :  { %v5975_v17 = vpop.permute.xlu0 %5974  ;;  %v5979_v35 = vpop.permute.xlu1 %5978 }
0x3111   :  { %v5980_v45 = vmul.f32 %v5975_v17, %v16582_v59 }
0x3113   :  { %v16636_v3 = vadd.f32 %v5981_v55, %v5980_v45 }
0x3114   :  { %v6070_v9 = vpop.permute.xlu0 %6069 }
0x3115   :  { %14495 = vtanh.f32 %v16636_v3  ;;  %v6078_v12 = vmul.f32 %v6070_v9, %v16586_v25 }
0x3117   :  { %v16640_v46 = vadd.f32 %v6084_v8, %v6078_v12 }
0x3118   :  { %v6077_v56 = vpop.permute.xlu0 %6076 }
0x3119   :  { %14497 = vtanh.f32 %v16640_v46 }
0x311f   :  { %v14496_v50 = vpop.eup %14495 }
0x3120   :  { %v5984_v27 = vmul.f32 %v14496_v50, %v5979_v35 }
0x3122   :  { %v6571_v52 = vrot.slane %v5984_v27, 4  ;;  %6153 = vmatprep.mubr.f32.mxu0 %v5984_v27 }
0x3123   :  { %v14498_v36 = vpop.eup %14497 }
0x3124   :  { %v16645_v59 = vsel %vm1789_vm4, %v16591_v63, %v6571_v52  ;;  %v6088_v18 = vmul.f32 %v14498_v36, %v6077_v56 }
0x3126   :  { %6154 = vmatmul.mubr.f32.vlgmr.msra.gmra.mrb[60].mxu0 %v6088_v18  ;;  %11392 = vmatmul.mubr.f32.vlgmr.msra.gmra.mrb[60].mxu1 %v6088_v18 }
0x3127   :  { %13437 = vmatpush3.bf16.msra.mxu0 %v15022_v28  ;;  %13468 = vmatpush3.bf16.msra.mxu1 %v14921_v11 }
0x3128   :  { %13439 = vmatprep.subr.bf16.mxu0 %v15024_v29  ;;  %13469 = vmatprep.subr.bf16.mxu1 %v17312_v41 }
0x3129   :  { %11426 = vmatprep.mubr.msk.f32.mxu1 %vm14800_vm0, %v17311_v2 }
0x312b   :  { %13441 = vmatpush3.bf16.msra.mxu0 %v15028_v37  ;;  %13471 = vmatpush3.bf16.msra.mxu1 %v14930_v20 }
0x312c   :  { %13443 = vmatprep.subr.bf16.mxu0 %v15031_v38  ;;  %13472 = vmatprep.subr.bf16.mxu1 %v17312_v41 }
0x312f   :  { %13445 = vmatpush3.bf16.msra.mxu0 %v15034_v44  ;;  %13474 = vmatpush3.bf16.msra.mxu1 %v14940_v31 }
0x3130   :  { %13447 = vmatprep.subr.bf16.mxu0 %v15047_v62  ;;  %13475 = vmatprep.subr.bf16.mxu1 %v17312_v41 }
0x3133   :  { %13449 = vmatpush3.bf16.msra.mxu0 %v15049_v7  ;;  %13477 = vmatpush3.bf16.msra.mxu1 %v14950_v40 }
0x3134   :  { %13451 = vmatprep.subr.bf16.mxu0 %v15053_v13  ;;  %13478 = vmatprep.subr.bf16.mxu1 %v17312_v41 }
0x3137   :  { %13453 = vmatpush3.bf16.msra.mxu0 %v15055_v21  ;;  %13480 = vmatpush3.bf16.msra.mxu1 %v14960_v49 }
0x3138   :  { %13455 = vmatprep.subr.bf16.mxu0 %v15059_v26  ;;  %13481 = vmatprep.subr.bf16.mxu1 %v17312_v41 }
0x313b   :  { %13457 = vmatpush3.bf16.msra.mxu0 %v15061_v34  ;;  %13483 = vmatpush3.bf16.msra.mxu1 %v14970_v58 }
0x313c   :  { %13459 = vmatprep.subr.bf16.mxu0 %v15064_v43  ;;  %13484 = vmatprep.subr.bf16.mxu1 %v17312_v41 }
0x313f   :  { %13461 = vmatpush3.bf16.msra.mxu0 %v15067_v53  ;;  %13486 = vmatpush3.bf16.msra.mxu1 %v14980_v5 }
0x3140   :  { %13463 = vmatprep.subr.bf16.mxu0 %v15070_v54  ;;  %13487 = vmatprep.subr.bf16.mxu1 %v17312_v41 }
0x3143   :  { %13465 = vmatpush3.bf16.msra.mxu0 %v15075_v61  ;;  %13489 = vmatpush3.bf16.msra.mxu1 %v14990_v16 }
0x3144   :  { %13491 = vmatprep.subr.bf16.mxu0 %v15020_v23  ;;  %13523 = vmatprep.subr.bf16.mxu1 %v14917_v6 }
0x31f9   :  { %v9908_v25 = vpop.f32.mrb[60].mxu0  ;;  %v6243_v63 = vpop.f32.mrb[60].mxu1 }
0x31fa   :  { %v6248_v0 = vrot.slane %v6243_v63, 2  ;;  %v9909_v1 = vpop.f32.mrb[61].mxu0  ;;  %v11393_v17 = vpop.f32.mrb[61].mxu1 }
0x31fb   :  { %v9910_v4 = vadd.f32 %v9909_v1, %v9908_v25 }
0x31fc   :  { %v6250_v55 = vadd.f32 %v6248_v0, %v16361_v22 }
0x31fd   :  { %v6156_v45 = vadd.f32 %v16411_v14, %v9910_v4 }
0x31fe   :  { %v8380_v9 = vmul.f32 -1.442695, %v6250_v55  ;;  %14499 = vtanh.f32 %v6250_v55 }
0x31ff   :  { %v8379_v8 = vmul.f32 -1.442695, %v6156_v45 }
0x3200   :  { %14501 = vpow2.f32 %v8380_v9 }
0x3201   :  { %14503 = vpow2.f32 %v8379_v8 }
0x3202   :  { %14505 = vtanh.f32 %v6156_v45 }
0x3208   :  { %v14500_v12 = vpop.eup %14499 }
0x3209   :  { %v6264_v50 = vrot.slane %v14500_v12, 6 }
0x320a   :  { %v14502_v35 = vpop.eup %14501 }
0x320b   :  { %v14504_v27 = vpop.eup %14503  ;;  %v6254_v52 = vadd.f32 1.0, %v14502_v35  ;;  %6266 = vrot.lane.b32.xlu1 %v6264_v50, %s14803_s19 }
0x320c   :  { %v6162_v36 = vadd.f32 1.0, %v14504_v27  ;;  %v14506_v56 = vpop.eup %14505 }
0x320d   :  { %14507 = vrcp.f32 %v6254_v52 }
0x320e   :  { %14509 = vrcp.f32 %v6162_v36 }
0x320f   :  { %6168 = vrot.lane.b32.xlu1 %v14506_v56, %s14803_s19 }
0x3217   :  { %v14508_v14 = vpop.eup %14507 }
0x3218   :  { %v14510_v18 = vpop.eup %14509  ;;  %v6259_v25 = vrot.slane %v14508_v14, 6 }
0x3219   :  { %6166 = vrot.lane.b32.xlu0 %v14510_v18, %s14802_s17  ;;  %6170 = vrot.lane.b32.xlu1 %v14510_v18, %s14801_s15 }
0x321d   :  { %6261 = vrot.lane.b32.xlu0 %v6259_v25, %s14802_s17 }
0x3221   :  { %6268 = vrot.lane.b32.xlu0 %v6259_v25, %s14801_s15 }
0x327d   :  { %v6267_v63 = vpop.permute.xlu1 %6266 }
0x327e   :  { %v6272_v0 = vrot.slane %v6267_v63, 2  ;;  %v17322_v63 = vld [vmem:[#allocation15_spill] sm:$0xff] }
0x3280   :  { %v6274_v4 = vmul.f32 %v14508_v14, %v6272_v0 }
0x3281   :  { %v6169_v1 = vpop.permute.xlu1 %6168 }
0x3282   :  { %v6173_v55 = vmul.f32 %v14510_v18, %v6169_v1  ;;  %v6276_v12 = vrot.slane %v6274_v4, 6 }
0x328b   :  { %v6167_v17 = vpop.permute.xlu0 %6166  ;;  %v6171_v52 = vpop.permute.xlu1 %6170 }
0x328c   :  { %v6172_v45 = vmul.f32 %v6167_v17, %v16636_v3 }
0x328e   :  { %v16690_v9 = vadd.f32 %v6173_v55, %v6172_v45 }
0x328f   :  { %v6262_v8 = vpop.permute.xlu0 %6261 }
0x3290   :  { %14511 = vtanh.f32 %v16690_v9  ;;  %v6270_v50 = vmul.f32 %v6262_v8, %v16640_v46  ;;  %v17320_v46 = vld [vmem:[#allocation13_spill] sm:$0xff] }
0x3292   :  { %v16694_v35 = vadd.f32 %v6276_v12, %v6270_v50  ;;  %v16738_v12 = vld [vmem:[%s17291_s4] sm:$0x1] }
0x3293   :  { %v6269_v18 = vpop.permute.xlu0 %6268 }
0x3294   :  { %14513 = vtanh.f32 %v16694_v35 }
0x329a   :  { %v14512_v27 = vpop.eup %14511 }
0x329b   :  { %v6176_v36 = vmul.f32 %v14512_v27, %v6171_v52 }
0x329d   :  { %v6574_v56 = vrot.slane %v6176_v36, 3  ;;  %6345 = vmatprep.mubr.f32.mxu0 %v6176_v36 }
0x329e   :  { %v14514_v14 = vpop.eup %14513 }
0x329f   :  { %v16699_v3 = vsel %vm1791_vm5, %v16645_v59, %v6574_v56  ;;  %v6280_v25 = vmul.f32 %v14514_v14, %v6269_v18  ;;  %v17321_v59 = vld [vmem:[#allocation14_spill] sm:$0xff] }
0x32a1   :  { %6346 = vmatmul.mubr.f32.vlgmr.msra.gmra.mrb[62].mxu0 %v6280_v25  ;;  %11427 = vmatmul.mubr.f32.vlgmr.msra.gmra.mrb[62].mxu1 %v6280_v25 }
0x32a2   :  { %13493 = vmatpush3.bf16.msra.mxu0 %v15022_v28  ;;  %13525 = vmatpush1.bf16.msra.mxu1 %v14919_v10 }
0x32a3   :  { %13495 = vmatprep.subr.bf16.mxu0 %v15024_v29  ;;  %13527 = vmatprep.subr.bf16.mxu1 %v14924_v15 }
0x32a4   :  { %6655 = vmatprep.mubr.f32.mxu1 %v17311_v2 }
0x32a6   :  { %13497 = vmatpush3.bf16.msra.mxu0 %v15028_v37  ;;  %13529 = vmatpush1.bf16.msra.mxu1 %v14928_v19 }
0x32a7   :  { %13499 = vmatprep.subr.bf16.mxu0 %v15031_v38  ;;  %13531 = vmatprep.subr.bf16.mxu1 %v14934_v24 }
0x32aa   :  { %13501 = vmatpush3.bf16.msra.mxu0 %v15034_v44  ;;  %13533 = vmatpush1.bf16.msra.mxu1 %v14938_v30 }
0x32ab   :  { %13503 = vmatprep.subr.bf16.mxu0 %v15047_v62  ;;  %13535 = vmatprep.subr.bf16.mxu1 %v14944_v33 }
0x32ae   :  { %13505 = vmatpush3.bf16.msra.mxu0 %v15049_v7  ;;  %13537 = vmatpush1.bf16.msra.mxu1 %v14948_v39 }
0x32af   :  { %13507 = vmatprep.subr.bf16.mxu0 %v15053_v13  ;;  %13539 = vmatprep.subr.bf16.mxu1 %v14954_v42 }
0x32b2   :  { %13509 = vmatpush3.bf16.msra.mxu0 %v15055_v21  ;;  %13541 = vmatpush1.bf16.msra.mxu1 %v14958_v48 }
0x32b3   :  { %13511 = vmatprep.subr.bf16.mxu0 %v15059_v26  ;;  %13543 = vmatprep.subr.bf16.mxu1 %v14964_v51 }
0x32b6   :  { %13513 = vmatpush3.bf16.msra.mxu0 %v15061_v34  ;;  %13545 = vmatpush1.bf16.msra.mxu1 %v14968_v57 }
0x32b7   :  { %13515 = vmatprep.subr.bf16.mxu0 %v15064_v43  ;;  %13547 = vmatprep.subr.bf16.mxu1 %v14974_v60 }
0x32ba   :  { %13517 = vmatpush3.bf16.msra.mxu0 %v15067_v53  ;;  %13549 = vmatpush1.bf16.msra.mxu1 %v17320_v46 }
0x32bb   :  { %13519 = vmatprep.subr.bf16.mxu0 %v15070_v54  ;;  %13551 = vmatprep.subr.bf16.mxu1 %v17321_v59 }
0x32be   :  { %13521 = vmatpush3.bf16.msra.mxu0 %v15075_v61  ;;  %13553 = vmatpush1.bf16.msra.mxu1 %v17322_v63 }
0x32bf   :  { %13555 = vmatprep.subr.bf16.mxu0 %v15020_v23  ;;  %13586 = vmatprep.subr.bf16.mxu1 %v17312_v41 }
0x3374   :  { %v9960_v0 = vpop.f32.mrb[62].mxu0  ;;  %v6435_v1 = vpop.f32.mrb[62].mxu1 }
0x3375   :  { %v6440_v17 = vrot.slane %v6435_v1, 1  ;;  %v9961_v4 = vpop.f32.mrb[63].mxu0  ;;  %v11428_v55 = vpop.f32.mrb[63].mxu1 }
0x3376   :  { %v9962_v45 = vadd.f32 %v9961_v4, %v9960_v0 }
0x3377   :  { %v6442_v8 = vadd.f32 %v6440_v17, %v16361_v22 }
0x3378   :  { %v6348_v50 = vadd.f32 %v16738_v12, %v9962_v45 }
0x3379   :  { %v8382_v27 = vmul.f32 -1.442695, %v6442_v8  ;;  %14515 = vtanh.f32 %v6442_v8 }
0x337a   :  { %v8381_v52 = vmul.f32 -1.442695, %v6348_v50 }
0x337b   :  { %14517 = vpow2.f32 %v8382_v27 }
0x337c   :  { %14519 = vpow2.f32 %v8381_v52 }
0x337d   :  { %14521 = vtanh.f32 %v6348_v50 }
0x3383   :  { %v14516_v36 = vpop.eup %14515 }
0x3384   :  { %v6456_v56 = vrot.slane %v14516_v36, 7 }
0x3385   :  { %v14518_v14 = vpop.eup %14517 }
0x3386   :  { %v14520_v18 = vpop.eup %14519  ;;  %v6446_v25 = vadd.f32 1.0, %v14518_v14  ;;  %6458 = vrot.lane.b32.xlu1 %v6456_v56, %s14803_s19 }
0x3387   :  { %v6354_v22 = vadd.f32 1.0, %v14520_v18  ;;  %v14522_v0 = vpop.eup %14521 }
0x3388   :  { %14523 = vrcp.f32 %v6446_v25 }
0x3389   :  { %14525 = vrcp.f32 %v6354_v22 }
0x338a   :  { %6360 = vrot.lane.b32.xlu1 %v14522_v0, %s14803_s19 }
0x3392   :  { %v14524_v1 = vpop.eup %14523 }
0x3393   :  { %v14526_v17 = vpop.eup %14525  ;;  %v6451_v4 = vrot.slane %v14524_v1, 7 }
0x3394   :  { %6358 = vrot.lane.b32.xlu0 %v14526_v17, %s14802_s17  ;;  %6362 = vrot.lane.b32.xlu1 %v14526_v17, %s14801_s15 }
0x3398   :  { %6453 = vrot.lane.b32.xlu0 %v6451_v4, %s14802_s17 }
0x339c   :  { %6460 = vrot.lane.b32.xlu0 %v6451_v4, %s14801_s15 }
0x33f8   :  { %v6459_v55 = vpop.permute.xlu1 %6458 }
0x33f9   :  { %v6464_v45 = vrot.slane %v6459_v55, 1 }
0x33fb   :  { %v6466_v27 = vmul.f32 %v14524_v1, %v6464_v45 }
0x33fc   :  { %v6361_v8 = vpop.permute.xlu1 %6360 }
0x33fd   :  { %v6365_v52 = vmul.f32 %v14526_v17, %v6361_v8  ;;  %v6468_v18 = vrot.slane %v6466_v27, 7 }
0x3406   :  { %v6359_v50 = vpop.permute.xlu0 %6358  ;;  %v6363_v32 = vpop.permute.xlu1 %6362 }
0x3407   :  { %v6364_v36 = vmul.f32 %v6359_v50, %v16690_v9 }
0x3409   :  { %v6366_v56 = vadd.f32 %v6365_v52, %v6364_v36 }
0x340a   :  { %v6454_v14 = vpop.permute.xlu0 %6453 }
0x340b   :  { %14527 = vtanh.f32 %v6366_v56  ;;  %v6462_v25 = vmul.f32 %v6454_v14, %v16694_v35 }
0x340d   :  { %v6470_v22 = vadd.f32 %v6468_v18, %v6462_v25 }
0x340e   :  { %v6461_v59 = vpop.permute.xlu0 %6460 }
0x340f   :  { %14529 = vtanh.f32 %v6470_v22 }
0x3415   :  { %v14528_v0 = vpop.eup %14527 }
0x3416   :  { %v6368_v63 = vmul.f32 %v14528_v0, %v6363_v32 }
0x3418   :  { %v6577_v4 = vrot.slane %v6368_v63, 2  ;;  %6537 = vmatprep.mubr.f32.mxu0 %v6368_v63 }
0x3419   :  { %v14530_v55 = vpop.eup %14529 }
0x341a   :  { %v6472_v46 = vmul.f32 %v14530_v55, %v6461_v59  ;;  %v6587_v1 = vsel %vm1793_vm6, %v16699_v3, %v6577_v4  ;;  %v14695_v4 = vld [vmem:[%s17290_s3] ss:$0 sm:$0xff] }
0x341c   :  { %6538 = vmatmul.mubr.f32.vlgmr.msra.gmra.mrb[64].mxu0 %v6472_v46 }
0x341d   :  { %13557 = vmatpush3.bf16.msra.mxu0 %v15022_v28  ;;  %6785 = vmatprep.mubr.f32.mxu0 %v17311_v2 }
0x341e   :  { %13559 = vmatprep.subr.bf16.mxu0 %v15024_v29 }
0x3421   :  { %13561 = vmatpush3.bf16.msra.mxu0 %v15028_v37 }
0x3422   :  { %13563 = vmatprep.subr.bf16.mxu0 %v15031_v38 }
0x3425   :  { %13565 = vmatpush3.bf16.msra.mxu0 %v15034_v44 }
0x3426   :  { %13567 = vmatprep.subr.bf16.mxu0 %v15047_v62 }
0x3429   :  { %13569 = vmatpush3.bf16.msra.mxu0 %v15049_v7 }
0x342a   :  { %13571 = vmatprep.subr.bf16.mxu0 %v15053_v13 }
0x342d   :  { %13573 = vmatpush3.bf16.msra.mxu0 %v15055_v21 }
0x342e   :  { %13575 = vmatprep.subr.bf16.mxu0 %v15059_v26 }
0x3431   :  { %13577 = vmatpush3.bf16.msra.mxu0 %v15061_v34 }
0x3432   :  { %13579 = vmatprep.subr.bf16.mxu0 %v15064_v43 }
0x3435   :  { %13581 = vmatpush3.bf16.msra.mxu0 %v15067_v53 }
0x3436   :  { %13583 = vmatprep.subr.bf16.mxu0 %v15070_v54 }
0x3439   :  { %13585 = vmatpush3.bf16.msra.mxu0 %v15075_v61 }
0x343a   :  { %13611 = vmatprep.subr.bf16.mxu0 %v15020_v23 }
0x34ef   :  { %v10012_v32 = vpop.f32.mrb[64].mxu0 }
0x34f0   :  { %v10013_v9 = vpop.f32.mrb[65].mxu0 }
0x34f1   :  { %v10014_v35 = vadd.f32 %v10013_v9, %v10012_v32 }
0x34f3   :  { %v6540_v3 = vadd.f32 %v16738_v12, %v10014_v35 }
0x34f5   :  { %v8383_v46 = vmul.f32 -1.442695, %v6540_v3  ;;  %14531 = vtanh.f32 %v6540_v3 }
0x34f7   :  { %14533 = vpow2.f32 %v8383_v46 }
0x34ff   :  { %v14532_v59 = vpop.eup %14531 }
0x3500   :  { %6552 = vrot.lane.b32.xlu0 %v14532_v59, %s14803_s19 }
0x3501   :  { %v14534_v63 = vpop.eup %14533 }
0x3502   :  { %v6546_v17 = vadd.f32 1.0, %v14534_v63 }
0x3504   :  { %14535 = vrcp.f32 %v6546_v17 }
0x350e   :  { %v14536_v45 = vpop.eup %14535 }
0x350f   :  { %6550 = vrot.lane.b32.xlu1 %v14536_v45, %s14802_s17 }
0x3513   :  { %6554 = vrot.lane.b32.xlu1 %v14536_v45, %s14801_s15 }
0x3572   :  { %v6553_v8 = vpop.permute.xlu0 %6552 }
0x3573   :  { %v6557_v27 = vmul.f32 %v14536_v45, %v6553_v8 }
0x3581   :  { %v6551_v50 = vpop.permute.xlu1 %6550 }
0x3582   :  { %v6556_v52 = vmul.f32 %v6551_v50, %v6366_v56 }
0x3584   :  { %v6558_v36 = vadd.f32 %v6557_v27, %v6556_v52 }
0x3585   :  { %v6555_v18 = vpop.permute.xlu1 %6554 }
0x3586   :  { %14537 = vtanh.f32 %v6558_v36 }
0x3590   :  { %v14538_v14 = vpop.eup %14537 }
0x3591   :  { %v6560_v25 = vmul.f32 %v14538_v14, %v6555_v18 }
0x3593   :  { %v6580_v22 = vrot.slane %v6560_v25, 1 }
0x3595   :  { %v6588_v0 = vsel %vm1795_vm7, %v6587_v1, %v6580_v22 }
0x3596   :  { %6590 = vst [vmem:[#allocation9 + $0x18] sm:$0xff] %v6588_v0  ;;  %6656 = vmatmul.mubr.f32.vlgmr.msra.gmra.mrb[64].mxu1 %v6588_v0 }
0x3597   :  { %13588 = vmatpush3.bf16.msra.mxu1 %v14921_v11  ;;  %11461 = vmatprep.mubr.msk.f32.mxu1 %vm14800_vm0, %v17311_v2 }
0x3598   :  { %13589 = vmatprep.subr.bf16.mxu1 %v17312_v41 }
0x359b   :  { %13591 = vmatpush3.bf16.msra.mxu1 %v14930_v20 }
0x359c   :  { %13592 = vmatprep.subr.bf16.mxu1 %v17312_v41 }
0x359f   :  { %13594 = vmatpush3.bf16.msra.mxu1 %v14940_v31 }
0x35a0   :  { %13595 = vmatprep.subr.bf16.mxu1 %v17312_v41 }
0x35a3   :  { %13597 = vmatpush3.bf16.msra.mxu1 %v14950_v40 }
0x35a4   :  { %13598 = vmatprep.subr.bf16.mxu1 %v17312_v41 }
0x35a7   :  { %13600 = vmatpush3.bf16.msra.mxu1 %v14960_v49 }
0x35a8   :  { %13601 = vmatprep.subr.bf16.mxu1 %v17312_v41 }
0x35ab   :  { %13603 = vmatpush3.bf16.msra.mxu1 %v14970_v58 }
0x35ac   :  { %13604 = vmatprep.subr.bf16.mxu1 %v17312_v41 }
0x35af   :  { %13606 = vmatpush3.bf16.msra.mxu1 %v14980_v5 }
0x35b0   :  { %13607 = vmatprep.subr.bf16.mxu1 %v17312_v41 }
0x35b3   :  { %13609 = vmatpush3.bf16.msra.mxu1 %v14990_v16 }
0x35b4   :  { %13642 = vmatprep.subr.bf16.mxu1 %v17312_v41 }
0x3669   :  { %v6657_v56 = vpop.f32.mrb[64].mxu1 }
0x366a   :  { %v16794_v55 = vadd.f32 %v14695_v4, %v6657_v56  ;;  %v16796_v1 = vpop.f32.mrb[65].mxu1 }
0x366c   :  { %v6702_v32 = vadd.f32 %v16794_v55, %v15041_v47 }
0x366e   :  { %v8385_v9 = vmul.f32 -1.442695, %v6702_v32  ;;  %14539 = vtanh.f32 %v6702_v32 }
0x3670   :  { %14541 = vpow2.f32 %v8385_v9 }
0x3678   :  { %v14540_v35 = vpop.eup %14539 }
0x3679   :  { %6712 = vrot.lane.b32.xlu1 %v14540_v35, %s14803_s19 }
0x367a   :  { %v14542_v3 = vpop.eup %14541 }
0x367b   :  { %v6706_v46 = vadd.f32 1.0, %v14542_v3 }
0x367d   :  { %14543 = vrcp.f32 %v6706_v46 }
0x3687   :  { %v14544_v59 = vpop.eup %14543 }
0x3688   :  { %6710 = vrot.lane.b32.xlu0 %v14544_v59, %s14802_s17 }
0x368c   :  { %6714 = vrot.lane.b32.xlu0 %v14544_v59, %s14801_s15 }
0x36eb   :  { %v6713_v63 = vpop.permute.xlu1 %6712 }
0x36ec   :  { %v6717_v45 = vmul.f32 %v14544_v59, %v6713_v63 }
0x36fa   :  { %v6711_v17 = vpop.permute.xlu0 %6710 }
0x36fb   :  { %v6716_v8 = vmul.f32 0.0, %v6711_v17 }
0x36fd   :  { %v16803_v50 = vadd.f32 %v6717_v45, %v6716_v8 }
0x36fe   :  { %v6715_v27 = vpop.permute.xlu0 %6714 }
0x36ff   :  { %14545 = vtanh.f32 %v16803_v50 }
0x3709   :  { %v14546_v47 = vpop.eup %14545 }
0x370a   :  { %v6720_v52 = vmul.f32 %v14546_v47, %v6715_v27 }
0x370c   :  { %6786 = vmatmul.mubr.f32.vlgmr.msra.gmra.mrb[66].mxu0 %v6720_v52  ;;  %11462 = vmatmul.mubr.f32.vlgmr.msra.gmra.mrb[66].mxu1 %v6720_v52 }
0x370d   :  { %13613 = vmatpush3.bf16.msra.mxu0 %v15022_v28  ;;  %13644 = vmatpush3.bf16.msra.mxu1 %v14921_v11 }
0x370e   :  { %13615 = vmatprep.subr.bf16.mxu0 %v15024_v29  ;;  %13645 = vmatprep.subr.bf16.mxu1 %v17312_v41 }
0x370f   :  { %11496 = vmatprep.mubr.msk.f32.mxu1 %vm14800_vm0, %v17311_v2 }
0x3711   :  { %13617 = vmatpush3.bf16.msra.mxu0 %v15028_v37  ;;  %13647 = vmatpush3.bf16.msra.mxu1 %v14930_v20 }
0x3712   :  { %13619 = vmatprep.subr.bf16.mxu0 %v15031_v38  ;;  %13648 = vmatprep.subr.bf16.mxu1 %v17312_v41 }
0x3715   :  { %13621 = vmatpush3.bf16.msra.mxu0 %v15034_v44  ;;  %13650 = vmatpush3.bf16.msra.mxu1 %v14940_v31 }
0x3716   :  { %13623 = vmatprep.subr.bf16.mxu0 %v15047_v62  ;;  %13651 = vmatprep.subr.bf16.mxu1 %v17312_v41 }
0x3719   :  { %13625 = vmatpush3.bf16.msra.mxu0 %v15049_v7  ;;  %13653 = vmatpush3.bf16.msra.mxu1 %v14950_v40 }
0x371a   :  { %13627 = vmatprep.subr.bf16.mxu0 %v15053_v13  ;;  %13654 = vmatprep.subr.bf16.mxu1 %v17312_v41 }
0x371d   :  { %13629 = vmatpush3.bf16.msra.mxu0 %v15055_v21  ;;  %13656 = vmatpush3.bf16.msra.mxu1 %v14960_v49 }
0x371e   :  { %13631 = vmatprep.subr.bf16.mxu0 %v15059_v26  ;;  %13657 = vmatprep.subr.bf16.mxu1 %v17312_v41 }
0x3721   :  { %13633 = vmatpush3.bf16.msra.mxu0 %v15061_v34  ;;  %13659 = vmatpush3.bf16.msra.mxu1 %v14970_v58 }
0x3722   :  { %13635 = vmatprep.subr.bf16.mxu0 %v15064_v43  ;;  %13660 = vmatprep.subr.bf16.mxu1 %v17312_v41 }
0x3725   :  { %13637 = vmatpush3.bf16.msra.mxu0 %v15067_v53  ;;  %13662 = vmatpush3.bf16.msra.mxu1 %v14980_v5 }
0x3726   :  { %13639 = vmatprep.subr.bf16.mxu0 %v15070_v54  ;;  %13663 = vmatprep.subr.bf16.mxu1 %v17312_v41 }
0x3729   :  { %13641 = vmatpush3.bf16.msra.mxu0 %v15075_v61  ;;  %13665 = vmatpush3.bf16.msra.mxu1 %v14990_v16 }
0x372a   :  { %13667 = vmatprep.subr.bf16.mxu0 %v15020_v23  ;;  %13698 = vmatprep.subr.bf16.mxu1 %v17312_v41 }
0x37df   :  { %v10047_v36 = vpop.f32.mrb[66].mxu0  ;;  %v6875_v14 = vpop.f32.mrb[66].mxu1 }
0x37e0   :  { %v6880_v18 = vrot.slane %v6875_v14, 7  ;;  %v10048_v25 = vpop.f32.mrb[67].mxu0  ;;  %v11463_v22 = vpop.f32.mrb[67].mxu1 }
0x37e1   :  { %v10049_v0 = vadd.f32 %v10048_v25, %v10047_v36 }
0x37e2   :  { %v6882_v56 = vadd.f32 %v6880_v18, %v16794_v55 }
0x37e3   :  { %v6788_v4 = vadd.f32 %v16738_v12, %v10049_v0 }
0x37e4   :  { %v8387_v32 = vmul.f32 -1.442695, %v6882_v56  ;;  %14547 = vtanh.f32 %v6882_v56 }
0x37e5   :  { %v8386_v9 = vmul.f32 -1.442695, %v6788_v4 }
0x37e6   :  { %14549 = vpow2.f32 %v8387_v32 }
0x37e7   :  { %14551 = vpow2.f32 %v8386_v9 }
0x37e8   :  { %14553 = vtanh.f32 %v6788_v4 }
0x37ee   :  { %v14548_v35 = vpop.eup %14547 }
0x37ef   :  { %v6896_v3 = vrot.slane %v14548_v35, 1 }
0x37f0   :  { %v14550_v46 = vpop.eup %14549 }
0x37f1   :  { %v14552_v59 = vpop.eup %14551  ;;  %v6886_v63 = vadd.f32 1.0, %v14550_v46  ;;  %6898 = vrot.lane.b32.xlu1 %v6896_v3, %s14803_s19 }
0x37f2   :  { %v6794_v17 = vadd.f32 1.0, %v14552_v59  ;;  %v14554_v45 = vpop.eup %14553 }
0x37f3   :  { %14555 = vrcp.f32 %v6886_v63 }
0x37f4   :  { %14557 = vrcp.f32 %v6794_v17 }
0x37f5   :  { %6800 = vrot.lane.b32.xlu1 %v14554_v45, %s14803_s19 }
0x37fd   :  { %v14556_v8 = vpop.eup %14555 }
0x37fe   :  { %v14558_v47 = vpop.eup %14557  ;;  %v6891_v27 = vrot.slane %v14556_v8, 1 }
0x37ff   :  { %6798 = vrot.lane.b32.xlu0 %v14558_v47, %s14802_s17  ;;  %6802 = vrot.lane.b32.xlu1 %v14558_v47, %s14801_s15 }
0x3803   :  { %6893 = vrot.lane.b32.xlu0 %v6891_v27, %s14802_s17 }
0x3807   :  { %6900 = vrot.lane.b32.xlu0 %v6891_v27, %s14801_s15 }
0x3863   :  { %v6899_v52 = vpop.permute.xlu1 %6898 }
0x3864   :  { %v6904_v36 = vrot.slane %v6899_v52, 7 }
0x3866   :  { %v6906_v25 = vmul.f32 %v14556_v8, %v6904_v36 }
0x3867   :  { %v6801_v14 = vpop.permute.xlu1 %6800 }
0x3868   :  { %v6805_v22 = vmul.f32 %v14558_v47, %v6801_v14  ;;  %v6908_v32 = vrot.slane %v6906_v25, 1 }
0x3871   :  { %v6799_v18 = vpop.permute.xlu0 %6798  ;;  %v6803_v46 = vpop.permute.xlu1 %6802 }
0x3872   :  { %v6804_v0 = vmul.f32 0.0, %v6799_v18 }
0x3874   :  { %v16848_v56 = vadd.f32 %v6805_v22, %v6804_v0 }
0x3875   :  { %v6894_v4 = vpop.permute.xlu0 %6893 }
0x3876   :  { %14559 = vtanh.f32 %v16848_v56  ;;  %v6902_v9 = vmul.f32 %v6894_v4, %v16803_v50 }
0x3878   :  { %v16852_v35 = vadd.f32 %v6908_v32, %v6902_v9 }
0x3879   :  { %v6901_v17 = vpop.permute.xlu0 %6900 }
0x387a   :  { %14561 = vtanh.f32 %v16852_v35 }
0x3880   :  { %v14560_v3 = vpop.eup %14559 }
0x3881   :  { %v16855_v59 = vmul.f32 %v14560_v3, %v6803_v46 }
0x3883   :  { %6977 = vmatprep.mubr.f32.mxu0 %v16855_v59 }
0x3884   :  { %v14562_v63 = vpop.eup %14561 }
0x3885   :  { %v6912_v45 = vmul.f32 %v14562_v63, %v6901_v17 }
0x3887   :  { %6978 = vmatmul.mubr.f32.vlgmr.msra.gmra.mrb[68].mxu0 %v6912_v45  ;;  %11497 = vmatmul.mubr.f32.vlgmr.msra.gmra.mrb[68].mxu1 %v6912_v45 }
0x3888   :  { %13669 = vmatpush3.bf16.msra.mxu0 %v15022_v28  ;;  %13700 = vmatpush3.bf16.msra.mxu1 %v14921_v11 }
0x3889   :  { %13671 = vmatprep.subr.bf16.mxu0 %v15024_v29  ;;  %13701 = vmatprep.subr.bf16.mxu1 %v17312_v41 }
0x388a   :  { %11531 = vmatprep.mubr.msk.f32.mxu1 %vm14800_vm0, %v17311_v2 }
0x388c   :  { %13673 = vmatpush3.bf16.msra.mxu0 %v15028_v37  ;;  %13703 = vmatpush3.bf16.msra.mxu1 %v14930_v20 }
0x388d   :  { %13675 = vmatprep.subr.bf16.mxu0 %v15031_v38  ;;  %13704 = vmatprep.subr.bf16.mxu1 %v17312_v41 }
0x3890   :  { %13677 = vmatpush3.bf16.msra.mxu0 %v15034_v44  ;;  %13706 = vmatpush3.bf16.msra.mxu1 %v14940_v31 }
0x3891   :  { %13679 = vmatprep.subr.bf16.mxu0 %v15047_v62  ;;  %13707 = vmatprep.subr.bf16.mxu1 %v17312_v41 }
0x3894   :  { %13681 = vmatpush3.bf16.msra.mxu0 %v15049_v7  ;;  %13709 = vmatpush3.bf16.msra.mxu1 %v14950_v40 }
0x3895   :  { %13683 = vmatprep.subr.bf16.mxu0 %v15053_v13  ;;  %13710 = vmatprep.subr.bf16.mxu1 %v17312_v41 }
0x3898   :  { %13685 = vmatpush3.bf16.msra.mxu0 %v15055_v21  ;;  %13712 = vmatpush3.bf16.msra.mxu1 %v14960_v49 }
0x3899   :  { %13687 = vmatprep.subr.bf16.mxu0 %v15059_v26  ;;  %13713 = vmatprep.subr.bf16.mxu1 %v17312_v41 }
0x389c   :  { %13689 = vmatpush3.bf16.msra.mxu0 %v15061_v34  ;;  %13715 = vmatpush3.bf16.msra.mxu1 %v14970_v58 }
0x389d   :  { %13691 = vmatprep.subr.bf16.mxu0 %v15064_v43  ;;  %13716 = vmatprep.subr.bf16.mxu1 %v17312_v41 }
0x38a0   :  { %13693 = vmatpush3.bf16.msra.mxu0 %v15067_v53  ;;  %13718 = vmatpush3.bf16.msra.mxu1 %v14980_v5 }
0x38a1   :  { %13695 = vmatprep.subr.bf16.mxu0 %v15070_v54  ;;  %13719 = vmatprep.subr.bf16.mxu1 %v17312_v41 }
0x38a4   :  { %13697 = vmatpush3.bf16.msra.mxu0 %v15075_v61  ;;  %13721 = vmatpush3.bf16.msra.mxu1 %v14990_v16 }
0x38a5   :  { %13723 = vmatprep.subr.bf16.mxu0 %v15020_v23  ;;  %13754 = vmatprep.subr.bf16.mxu1 %v17312_v41 }
0x395a   :  { %v10099_v50 = vpop.f32.mrb[68].mxu0  ;;  %v7067_v8 = vpop.f32.mrb[68].mxu1 }
0x395b   :  { %v7072_v47 = vrot.slane %v7067_v8, 6  ;;  %v10100_v27 = vpop.f32.mrb[69].mxu0  ;;  %v11498_v52 = vpop.f32.mrb[69].mxu1 }
0x395c   :  { %v10101_v36 = vadd.f32 %v10100_v27, %v10099_v50 }
0x395d   :  { %v7074_v14 = vadd.f32 %v7072_v47, %v16794_v55 }
0x395e   :  { %v6980_v18 = vadd.f32 %v16738_v12, %v10101_v36 }
0x395f   :  { %v8389_v25 = vmul.f32 -1.442695, %v7074_v14  ;;  %14563 = vtanh.f32 %v7074_v14 }
0x3960   :  { %v8388_v22 = vmul.f32 -1.442695, %v6980_v18 }
0x3961   :  { %14565 = vpow2.f32 %v8389_v25 }
0x3962   :  { %14567 = vpow2.f32 %v8388_v22 }
0x3963   :  { %14569 = vtanh.f32 %v6980_v18 }
0x3969   :  { %v14564_v0 = vpop.eup %14563 }
0x396a   :  { %v7088_v4 = vrot.slane %v14564_v0, 2 }
0x396b   :  { %v14566_v32 = vpop.eup %14565 }
0x396c   :  { %v14568_v9 = vpop.eup %14567  ;;  %v7078_v3 = vadd.f32 1.0, %v14566_v32  ;;  %7090 = vrot.lane.b32.xlu1 %v7088_v4, %s14803_s19 }
0x396d   :  { %v6986_v46 = vadd.f32 1.0, %v14568_v9  ;;  %v14570_v63 = vpop.eup %14569 }
0x396e   :  { %14571 = vrcp.f32 %v7078_v3 }
0x396f   :  { %14573 = vrcp.f32 %v6986_v46 }
0x3970   :  { %6992 = vrot.lane.b32.xlu1 %v14570_v63, %s14803_s19 }
0x3978   :  { %v14572_v17 = vpop.eup %14571 }
0x3979   :  { %v14574_v45 = vpop.eup %14573  ;;  %v7083_v50 = vrot.slane %v14572_v17, 2 }
0x397a   :  { %6990 = vrot.lane.b32.xlu0 %v14574_v45, %s14802_s17  ;;  %6994 = vrot.lane.b32.xlu1 %v14574_v45, %s14801_s15 }
0x397e   :  { %7085 = vrot.lane.b32.xlu0 %v7083_v50, %s14802_s17 }
0x3982   :  { %7092 = vrot.lane.b32.xlu0 %v7083_v50, %s14801_s15 }
0x39de   :  { %v7091_v8 = vpop.permute.xlu1 %7090 }
0x39df   :  { %v7096_v47 = vrot.slane %v7091_v8, 6 }
0x39e1   :  { %v7098_v36 = vmul.f32 %v14572_v17, %v7096_v47 }
0x39e2   :  { %v6993_v27 = vpop.permute.xlu1 %6992 }
0x39e3   :  { %v6997_v14 = vmul.f32 %v14574_v45, %v6993_v27  ;;  %v7100_v0 = vrot.slane %v7098_v36, 2 }
0x39ec   :  { %v6991_v52 = vpop.permute.xlu0 %6990  ;;  %v6995_v3 = vpop.permute.xlu1 %6994 }
0x39ed   :  { %v6996_v18 = vmul.f32 %v6991_v52, %v16848_v56 }
0x39ef   :  { %v16901_v25 = vadd.f32 %v6997_v14, %v6996_v18 }
0x39f0   :  { %v7086_v22 = vpop.permute.xlu0 %7085 }
0x39f1   :  { %14575 = vtanh.f32 %v16901_v25  ;;  %v7094_v4 = vmul.f32 %v7086_v22, %v16852_v35 }
0x39f3   :  { %v16905_v32 = vadd.f32 %v7100_v0, %v7094_v4 }
0x39f4   :  { %v7093_v56 = vpop.permute.xlu0 %7092 }
0x39f5   :  { %14577 = vtanh.f32 %v16905_v32 }
0x39fb   :  { %v14576_v9 = vpop.eup %14575 }
0x39fc   :  { %v16908_v46 = vmul.f32 %v14576_v9, %v6995_v3 }
0x39fe   :  { %7169 = vmatprep.mubr.f32.mxu0 %v16908_v46 }
0x39ff   :  { %v14578_v63 = vpop.eup %14577 }
0x3a00   :  { %v7104_v17 = vmul.f32 %v14578_v63, %v7093_v56 }
0x3a02   :  { %7170 = vmatmul.mubr.f32.vlgmr.msra.gmra.mrb[70].mxu0 %v7104_v17  ;;  %11532 = vmatmul.mubr.f32.vlgmr.msra.gmra.mrb[70].mxu1 %v7104_v17 }
0x3a03   :  { %13725 = vmatpush3.bf16.msra.mxu0 %v15022_v28  ;;  %13756 = vmatpush3.bf16.msra.mxu1 %v14921_v11 }
0x3a04   :  { %13727 = vmatprep.subr.bf16.mxu0 %v15024_v29  ;;  %13757 = vmatprep.subr.bf16.mxu1 %v17312_v41 }
0x3a05   :  { %11566 = vmatprep.mubr.msk.f32.mxu1 %vm14800_vm0, %v17311_v2 }
0x3a07   :  { %13729 = vmatpush3.bf16.msra.mxu0 %v15028_v37  ;;  %13759 = vmatpush3.bf16.msra.mxu1 %v14930_v20 }
0x3a08   :  { %13731 = vmatprep.subr.bf16.mxu0 %v15031_v38  ;;  %13760 = vmatprep.subr.bf16.mxu1 %v17312_v41 }
0x3a0b   :  { %13733 = vmatpush3.bf16.msra.mxu0 %v15034_v44  ;;  %13762 = vmatpush3.bf16.msra.mxu1 %v14940_v31 }
0x3a0c   :  { %13735 = vmatprep.subr.bf16.mxu0 %v15047_v62  ;;  %13763 = vmatprep.subr.bf16.mxu1 %v17312_v41 }
0x3a0f   :  { %13737 = vmatpush3.bf16.msra.mxu0 %v15049_v7  ;;  %13765 = vmatpush3.bf16.msra.mxu1 %v14950_v40 }
0x3a10   :  { %13739 = vmatprep.subr.bf16.mxu0 %v15053_v13  ;;  %13766 = vmatprep.subr.bf16.mxu1 %v17312_v41 }
0x3a13   :  { %13741 = vmatpush3.bf16.msra.mxu0 %v15055_v21  ;;  %13768 = vmatpush3.bf16.msra.mxu1 %v14960_v49 }
0x3a14   :  { %13743 = vmatprep.subr.bf16.mxu0 %v15059_v26  ;;  %13769 = vmatprep.subr.bf16.mxu1 %v17312_v41 }
0x3a17   :  { %13745 = vmatpush3.bf16.msra.mxu0 %v15061_v34  ;;  %13771 = vmatpush3.bf16.msra.mxu1 %v14970_v58 }
0x3a18   :  { %13747 = vmatprep.subr.bf16.mxu0 %v15064_v43  ;;  %13772 = vmatprep.subr.bf16.mxu1 %v17312_v41 }
0x3a1b   :  { %13749 = vmatpush3.bf16.msra.mxu0 %v15067_v53  ;;  %13774 = vmatpush3.bf16.msra.mxu1 %v14980_v5 }
0x3a1c   :  { %13751 = vmatprep.subr.bf16.mxu0 %v15070_v54  ;;  %13775 = vmatprep.subr.bf16.mxu1 %v17312_v41 }
0x3a1f   :  { %13753 = vmatpush3.bf16.msra.mxu0 %v15075_v61  ;;  %13777 = vmatpush3.bf16.msra.mxu1 %v14990_v16 }
0x3a20   :  { %13779 = vmatprep.subr.bf16.mxu0 %v15020_v23  ;;  %13810 = vmatprep.subr.bf16.mxu1 %v17312_v41 }
0x3ad5   :  { %v10151_v35 = vpop.f32.mrb[70].mxu0  ;;  %v7259_v45 = vpop.f32.mrb[70].mxu1 }
0x3ad6   :  { %v7264_v50 = vrot.slane %v7259_v45, 5  ;;  %v10152_v8 = vpop.f32.mrb[71].mxu0  ;;  %v11533_v47 = vpop.f32.mrb[71].mxu1 }
0x3ad7   :  { %v10153_v27 = vadd.f32 %v10152_v8, %v10151_v35 }
0x3ad8   :  { %v7266_v52 = vadd.f32 %v7264_v50, %v16794_v55 }
0x3ad9   :  { %v7172_v36 = vadd.f32 %v16738_v12, %v10153_v27 }
0x3ada   :  { %v8391_v14 = vmul.f32 -1.442695, %v7266_v52  ;;  %14579 = vtanh.f32 %v7266_v52 }
0x3adb   :  { %v8390_v18 = vmul.f32 -1.442695, %v7172_v36 }
0x3adc   :  { %14581 = vpow2.f32 %v8391_v14 }
0x3add   :  { %14583 = vpow2.f32 %v8390_v18 }
0x3ade   :  { %14585 = vtanh.f32 %v7172_v36 }
0x3ae4   :  { %v14580_v22 = vpop.eup %14579 }
0x3ae5   :  { %v7280_v0 = vrot.slane %v14580_v22, 3 }
0x3ae6   :  { %v14582_v4 = vpop.eup %14581 }
0x3ae7   :  { %v14584_v9 = vpop.eup %14583  ;;  %v7270_v3 = vadd.f32 1.0, %v14582_v4  ;;  %7282 = vrot.lane.b32.xlu1 %v7280_v0, %s14803_s19 }
0x3ae8   :  { %v7178_v63 = vadd.f32 1.0, %v14584_v9  ;;  %v14586_v56 = vpop.eup %14585 }
0x3ae9   :  { %14587 = vrcp.f32 %v7270_v3 }
0x3aea   :  { %14589 = vrcp.f32 %v7178_v63  ;;  %v8154_v63 = vrot.slane %v16908_v46, 7 }
0x3aeb   :  { %7184 = vrot.lane.b32.xlu1 %v14586_v56, %s14803_s19 }
0x3af3   :  { %v14588_v17 = vpop.eup %14587 }
0x3af4   :  { %v14590_v35 = vpop.eup %14589  ;;  %v7275_v45 = vrot.slane %v14588_v17, 3 }
0x3af5   :  { %7182 = vrot.lane.b32.xlu0 %v14590_v35, %s14802_s17  ;;  %7186 = vrot.lane.b32.xlu1 %v14590_v35, %s14801_s15 }
0x3af9   :  { %7277 = vrot.lane.b32.xlu0 %v7275_v45, %s14802_s17 }
0x3afd   :  { %7284 = vrot.lane.b32.xlu0 %v7275_v45, %s14801_s15  ;;  %v8174_v45 = vsel %vm1783_vm1, %v16855_v59, %v8154_v63 }
0x3b59   :  { %v7283_v50 = vpop.permute.xlu1 %7282 }
0x3b5a   :  { %v7288_v8 = vrot.slane %v7283_v50, 5 }
0x3b5c   :  { %v7290_v52 = vmul.f32 %v14588_v17, %v7288_v8 }
0x3b5d   :  { %v7185_v47 = vpop.permute.xlu1 %7184 }
0x3b5e   :  { %v7189_v36 = vmul.f32 %v14590_v35, %v7185_v47  ;;  %v7292_v0 = vrot.slane %v7290_v52, 3 }
0x3b67   :  { %v7183_v27 = vpop.permute.xlu0 %7182  ;;  %v7187_v56 = vpop.permute.xlu1 %7186 }
0x3b68   :  { %v7188_v14 = vmul.f32 %v7183_v27, %v16901_v25 }
0x3b6a   :  { %v16954_v18 = vadd.f32 %v7189_v36, %v7188_v14 }
0x3b6b   :  { %v7278_v22 = vpop.permute.xlu0 %7277 }
0x3b6c   :  { %14591 = vtanh.f32 %v16954_v18  ;;  %v7286_v4 = vmul.f32 %v7278_v22, %v16905_v32 }
0x3b6e   :  { %v16958_v9 = vadd.f32 %v7292_v0, %v7286_v4 }
0x3b6f   :  { %v7285_v50 = vpop.permute.xlu0 %7284 }
0x3b70   :  { %14593 = vtanh.f32 %v16958_v9 }
0x3b76   :  { %v14592_v3 = vpop.eup %14591 }
0x3b77   :  { %v7192_v17 = vmul.f32 %v14592_v3, %v7187_v56 }
0x3b79   :  { %v8157_v35 = vrot.slane %v7192_v17, 6  ;;  %7361 = vmatprep.mubr.f32.mxu0 %v7192_v17 }
0x3b7a   :  { %v14594_v25 = vpop.eup %14593 }
0x3b7b   :  { %v16965_v8 = vsel %vm1785_vm2, %v8174_v45, %v8157_v35  ;;  %v7296_v32 = vmul.f32 %v14594_v25, %v7285_v50 }
0x3b7d   :  { %7362 = vmatmul.mubr.f32.vlgmr.msra.gmra.mrb[72].mxu0 %v7296_v32  ;;  %11567 = vmatmul.mubr.f32.vlgmr.msra.gmra.mrb[72].mxu1 %v7296_v32 }
0x3b7e   :  { %13781 = vmatpush3.bf16.msra.mxu0 %v15022_v28  ;;  %13812 = vmatpush3.bf16.msra.mxu1 %v14921_v11 }
0x3b7f   :  { %13783 = vmatprep.subr.bf16.mxu0 %v15024_v29  ;;  %13813 = vmatprep.subr.bf16.mxu1 %v17312_v41 }
0x3b80   :  { %11601 = vmatprep.mubr.msk.f32.mxu1 %vm14800_vm0, %v17311_v2 }
0x3b82   :  { %13785 = vmatpush3.bf16.msra.mxu0 %v15028_v37  ;;  %13815 = vmatpush3.bf16.msra.mxu1 %v14930_v20 }
0x3b83   :  { %13787 = vmatprep.subr.bf16.mxu0 %v15031_v38  ;;  %13816 = vmatprep.subr.bf16.mxu1 %v17312_v41 }
0x3b86   :  { %13789 = vmatpush3.bf16.msra.mxu0 %v15034_v44  ;;  %13818 = vmatpush3.bf16.msra.mxu1 %v14940_v31 }
0x3b87   :  { %13791 = vmatprep.subr.bf16.mxu0 %v15047_v62  ;;  %13819 = vmatprep.subr.bf16.mxu1 %v17312_v41 }
0x3b8a   :  { %13793 = vmatpush3.bf16.msra.mxu0 %v15049_v7  ;;  %13821 = vmatpush3.bf16.msra.mxu1 %v14950_v40 }
0x3b8b   :  { %13795 = vmatprep.subr.bf16.mxu0 %v15053_v13  ;;  %13822 = vmatprep.subr.bf16.mxu1 %v17312_v41 }
0x3b8e   :  { %13797 = vmatpush3.bf16.msra.mxu0 %v15055_v21  ;;  %13824 = vmatpush3.bf16.msra.mxu1 %v14960_v49 }
0x3b8f   :  { %13799 = vmatprep.subr.bf16.mxu0 %v15059_v26  ;;  %13825 = vmatprep.subr.bf16.mxu1 %v17312_v41 }
0x3b92   :  { %13801 = vmatpush3.bf16.msra.mxu0 %v15061_v34  ;;  %13827 = vmatpush3.bf16.msra.mxu1 %v14970_v58 }
0x3b93   :  { %13803 = vmatprep.subr.bf16.mxu0 %v15064_v43  ;;  %13828 = vmatprep.subr.bf16.mxu1 %v17312_v41 }
0x3b96   :  { %13805 = vmatpush3.bf16.msra.mxu0 %v15067_v53  ;;  %13830 = vmatpush3.bf16.msra.mxu1 %v14980_v5 }
0x3b97   :  { %13807 = vmatprep.subr.bf16.mxu0 %v15070_v54  ;;  %13831 = vmatprep.subr.bf16.mxu1 %v17312_v41 }
0x3b9a   :  { %13809 = vmatpush3.bf16.msra.mxu0 %v15075_v61  ;;  %13833 = vmatpush3.bf16.msra.mxu1 %v14990_v16 }
0x3b9b   :  { %13835 = vmatprep.subr.bf16.mxu0 %v15020_v23  ;;  %13866 = vmatprep.subr.bf16.mxu1 %v17312_v41 }
0x3c50   :  { %v10203_v59 = vpop.f32.mrb[72].mxu0  ;;  %v7451_v46 = vpop.f32.mrb[72].mxu1 }
0x3c51   :  { %v7456_v47 = vrot.slane %v7451_v46, 4  ;;  %v10204_v27 = vpop.f32.mrb[73].mxu0  ;;  %v11568_v52 = vpop.f32.mrb[73].mxu1 }
0x3c52   :  { %v10205_v36 = vadd.f32 %v10204_v27, %v10203_v59 }
0x3c53   :  { %v7458_v14 = vadd.f32 %v7456_v47, %v16794_v55 }
0x3c54   :  { %v7364_v22 = vadd.f32 %v16738_v12, %v10205_v36 }
0x3c55   :  { %v8393_v0 = vmul.f32 -1.442695, %v7458_v14  ;;  %14595 = vtanh.f32 %v7458_v14 }
0x3c56   :  { %v8392_v4 = vmul.f32 -1.442695, %v7364_v22 }
0x3c57   :  { %14597 = vpow2.f32 %v8393_v0 }
0x3c58   :  { %14599 = vpow2.f32 %v8392_v4 }
0x3c59   :  { %14601 = vtanh.f32 %v7364_v22 }
0x3c5f   :  { %v14596_v3 = vpop.eup %14595 }
0x3c60   :  { %v7472_v63 = vrot.slane %v14596_v3, 4 }
0x3c61   :  { %v14598_v56 = vpop.eup %14597 }
0x3c62   :  { %v14600_v17 = vpop.eup %14599  ;;  %v7462_v35 = vadd.f32 1.0, %v14598_v56  ;;  %7474 = vrot.lane.b32.xlu1 %v7472_v63, %s14803_s19 }
0x3c63   :  { %v7370_v25 = vadd.f32 1.0, %v14600_v17  ;;  %v14602_v45 = vpop.eup %14601 }
0x3c64   :  { %14603 = vrcp.f32 %v7462_v35 }
0x3c65   :  { %14605 = vrcp.f32 %v7370_v25 }
0x3c66   :  { %7376 = vrot.lane.b32.xlu1 %v14602_v45, %s14803_s19 }
0x3c6e   :  { %v14604_v12 = vpop.eup %14603 }
0x3c6f   :  { %v14606_v50 = vpop.eup %14605  ;;  %v7467_v32 = vrot.slane %v14604_v12, 4 }
0x3c70   :  { %7374 = vrot.lane.b32.xlu0 %v14606_v50, %s14802_s17  ;;  %7378 = vrot.lane.b32.xlu1 %v14606_v50, %s14801_s15 }
0x3c74   :  { %7469 = vrot.lane.b32.xlu0 %v7467_v32, %s14802_s17 }
0x3c78   :  { %7476 = vrot.lane.b32.xlu0 %v7467_v32, %s14801_s15 }
0x3cd4   :  { %v7475_v59 = vpop.permute.xlu1 %7474 }
0x3cd5   :  { %v7480_v46 = vrot.slane %v7475_v59, 4 }
0x3cd7   :  { %v7482_v52 = vmul.f32 %v14604_v12, %v7480_v46 }
0x3cd8   :  { %v7377_v47 = vpop.permute.xlu1 %7376 }
0x3cd9   :  { %v7381_v36 = vmul.f32 %v14606_v50, %v7377_v47  ;;  %v7484_v4 = vrot.slane %v7482_v52, 4  ;;  %v17059_v52 = vld [vmem:[%s17291_s4] sm:$0x1] }
0x3ce2   :  { %v7375_v27 = vpop.permute.xlu0 %7374  ;;  %v7379_v17 = vpop.permute.xlu1 %7378 }
0x3ce3   :  { %v7380_v14 = vmul.f32 %v7375_v27, %v16954_v18 }
0x3ce5   :  { %v17010_v22 = vadd.f32 %v7381_v36, %v7380_v14 }
0x3ce6   :  { %v7470_v0 = vpop.permute.xlu0 %7469 }
0x3ce7   :  { %14607 = vtanh.f32 %v17010_v22  ;;  %v7478_v3 = vmul.f32 %v7470_v0, %v16958_v9 }
0x3ce9   :  { %v17014_v63 = vadd.f32 %v7484_v4, %v7478_v3 }
0x3cea   :  { %v7477_v12 = vpop.permute.xlu0 %7476 }
0x3ceb   :  { %14609 = vtanh.f32 %v17014_v63 }
0x3cf1   :  { %v14608_v56 = vpop.eup %14607 }
0x3cf2   :  { %v7384_v35 = vmul.f32 %v14608_v56, %v7379_v17 }
0x3cf4   :  { %v8160_v25 = vrot.slane %v7384_v35, 5  ;;  %7553 = vmatprep.mubr.f32.mxu0 %v7384_v35 }
0x3cf5   :  { %v14610_v45 = vpop.eup %14609 }
0x3cf6   :  { %v17019_v18 = vsel %vm1787_vm3, %v16965_v8, %v8160_v25  ;;  %v7488_v50 = vmul.f32 %v14610_v45, %v7477_v12 }
0x3cf8   :  { %7554 = vmatmul.mubr.f32.vlgmr.msra.gmra.mrb[74].mxu0 %v7488_v50  ;;  %11602 = vmatmul.mubr.f32.vlgmr.msra.gmra.mrb[74].mxu1 %v7488_v50 }
0x3cf9   :  { %13837 = vmatpush3.bf16.msra.mxu0 %v15022_v28  ;;  %13868 = vmatpush3.bf16.msra.mxu1 %v14921_v11 }
0x3cfa   :  { %13839 = vmatprep.subr.bf16.mxu0 %v15024_v29  ;;  %13869 = vmatprep.subr.bf16.mxu1 %v17312_v41 }
0x3cfb   :  { %11636 = vmatprep.mubr.msk.f32.mxu1 %vm14800_vm0, %v17311_v2 }
0x3cfd   :  { %13841 = vmatpush3.bf16.msra.mxu0 %v15028_v37  ;;  %13871 = vmatpush3.bf16.msra.mxu1 %v14930_v20 }
0x3cfe   :  { %13843 = vmatprep.subr.bf16.mxu0 %v15031_v38  ;;  %13872 = vmatprep.subr.bf16.mxu1 %v17312_v41 }
0x3d01   :  { %13845 = vmatpush3.bf16.msra.mxu0 %v15034_v44  ;;  %13874 = vmatpush3.bf16.msra.mxu1 %v14940_v31 }
0x3d02   :  { %13847 = vmatprep.subr.bf16.mxu0 %v15047_v62  ;;  %13875 = vmatprep.subr.bf16.mxu1 %v17312_v41 }
0x3d05   :  { %13849 = vmatpush3.bf16.msra.mxu0 %v15049_v7  ;;  %13877 = vmatpush3.bf16.msra.mxu1 %v14950_v40 }
0x3d06   :  { %13851 = vmatprep.subr.bf16.mxu0 %v15053_v13  ;;  %13878 = vmatprep.subr.bf16.mxu1 %v17312_v41 }
0x3d09   :  { %13853 = vmatpush3.bf16.msra.mxu0 %v15055_v21  ;;  %13880 = vmatpush3.bf16.msra.mxu1 %v14960_v49 }
0x3d0a   :  { %13855 = vmatprep.subr.bf16.mxu0 %v15059_v26  ;;  %13881 = vmatprep.subr.bf16.mxu1 %v17312_v41 }
0x3d0d   :  { %13857 = vmatpush3.bf16.msra.mxu0 %v15061_v34  ;;  %13883 = vmatpush3.bf16.msra.mxu1 %v14970_v58 }
0x3d0e   :  { %13859 = vmatprep.subr.bf16.mxu0 %v15064_v43  ;;  %13884 = vmatprep.subr.bf16.mxu1 %v17312_v41 }
0x3d11   :  { %13861 = vmatpush3.bf16.msra.mxu0 %v15067_v53  ;;  %13886 = vmatpush3.bf16.msra.mxu1 %v14980_v5 }
0x3d12   :  { %13863 = vmatprep.subr.bf16.mxu0 %v15070_v54  ;;  %13887 = vmatprep.subr.bf16.mxu1 %v17312_v41 }
0x3d15   :  { %13865 = vmatpush3.bf16.msra.mxu0 %v15075_v61  ;;  %13889 = vmatpush3.bf16.msra.mxu1 %v14990_v16 }
0x3d16   :  { %13891 = vmatprep.subr.bf16.mxu0 %v15020_v23  ;;  %13922 = vmatprep.subr.bf16.mxu1 %v17312_v41 }
0x3dcb   :  { %v10255_v9 = vpop.f32.mrb[74].mxu0  ;;  %v7643_v8 = vpop.f32.mrb[74].mxu1 }
0x3dcc   :  { %v7648_v32 = vrot.slane %v7643_v8, 3  ;;  %v10256_v59 = vpop.f32.mrb[75].mxu0  ;;  %v11603_v46 = vpop.f32.mrb[75].mxu1 }
0x3dcd   :  { %v10257_v47 = vadd.f32 %v10256_v59, %v10255_v9 }
0x3dce   :  { %v7650_v27 = vadd.f32 %v7648_v32, %v16794_v55 }
0x3dcf   :  { %v7556_v36 = vadd.f32 %v17059_v52, %v10257_v47 }
0x3dd0   :  { %v8395_v14 = vmul.f32 -1.442695, %v7650_v27  ;;  %14611 = vtanh.f32 %v7650_v27 }
0x3dd1   :  { %v8394_v0 = vmul.f32 -1.442695, %v7556_v36 }
0x3dd2   :  { %14613 = vpow2.f32 %v8395_v14 }
0x3dd3   :  { %14615 = vpow2.f32 %v8394_v0 }
0x3dd4   :  { %14617 = vtanh.f32 %v7556_v36 }
0x3dda   :  { %v14612_v4 = vpop.eup %14611 }
0x3ddb   :  { %v7664_v3 = vrot.slane %v14612_v4, 5 }
0x3ddc   :  { %v14614_v56 = vpop.eup %14613 }
0x3ddd   :  { %v14616_v17 = vpop.eup %14615  ;;  %v7654_v35 = vadd.f32 1.0, %v14614_v56  ;;  %7666 = vrot.lane.b32.xlu1 %v7664_v3, %s14803_s19 }
0x3dde   :  { %v7562_v25 = vadd.f32 1.0, %v14616_v17  ;;  %v14618_v45 = vpop.eup %14617 }
0x3ddf   :  { %14619 = vrcp.f32 %v7654_v35 }
0x3de0   :  { %14621 = vrcp.f32 %v7562_v25 }
0x3de1   :  { %7568 = vrot.lane.b32.xlu1 %v14618_v45, %s14803_s19 }
0x3de9   :  { %v14620_v12 = vpop.eup %14619 }
0x3dea   :  { %v14622_v50 = vpop.eup %14621  ;;  %v7659_v9 = vrot.slane %v14620_v12, 5 }
0x3deb   :  { %7566 = vrot.lane.b32.xlu0 %v14622_v50, %s14802_s17  ;;  %7570 = vrot.lane.b32.xlu1 %v14622_v50, %s14801_s15 }
0x3def   :  { %7661 = vrot.lane.b32.xlu0 %v7659_v9, %s14802_s17 }
0x3df3   :  { %7668 = vrot.lane.b32.xlu0 %v7659_v9, %s14801_s15 }
0x3e4f   :  { %v7667_v8 = vpop.permute.xlu1 %7666 }
0x3e50   :  { %v7672_v32 = vrot.slane %v7667_v8, 3 }
0x3e52   :  { %v7674_v47 = vmul.f32 %v14620_v12, %v7672_v32 }
0x3e53   :  { %v7569_v59 = vpop.permute.xlu1 %7568 }
0x3e54   :  { %v7573_v27 = vmul.f32 %v14622_v50, %v7569_v59  ;;  %v7676_v4 = vrot.slane %v7674_v47, 5 }
0x3e5d   :  { %v7567_v46 = vpop.permute.xlu0 %7566  ;;  %v7571_v35 = vpop.permute.xlu1 %7570 }
0x3e5e   :  { %v7572_v36 = vmul.f32 %v7567_v46, %v17010_v22 }
0x3e60   :  { %v17069_v14 = vadd.f32 %v7573_v27, %v7572_v36 }
0x3e61   :  { %v7662_v0 = vpop.permute.xlu0 %7661 }
0x3e62   :  { %14623 = vtanh.f32 %v17069_v14  ;;  %v7670_v3 = vmul.f32 %v7662_v0, %v17014_v63 }
0x3e64   :  { %v17073_v56 = vadd.f32 %v7676_v4, %v7670_v3 }
0x3e65   :  { %v7669_v50 = vpop.permute.xlu0 %7668 }
0x3e66   :  { %14625 = vtanh.f32 %v17073_v56 }
0x3e6c   :  { %v14624_v17 = vpop.eup %14623 }
0x3e6d   :  { %v7576_v25 = vmul.f32 %v14624_v17, %v7571_v35 }
0x3e6f   :  { %v8163_v45 = vrot.slane %v7576_v25, 4  ;;  %7745 = vmatprep.mubr.f32.mxu0 %v7576_v25 }
0x3e70   :  { %v14626_v12 = vpop.eup %14625 }
0x3e71   :  { %v17078_v22 = vsel %vm1789_vm4, %v17019_v18, %v8163_v45  ;;  %v7680_v9 = vmul.f32 %v14626_v12, %v7669_v50 }
0x3e73   :  { %7746 = vmatmul.mubr.f32.vlgmr.msra.gmra.mrb[76].mxu0 %v7680_v9  ;;  %11637 = vmatmul.mubr.f32.vlgmr.msra.gmra.mrb[76].mxu1 %v7680_v9 }
0x3e74   :  { %13893 = vmatpush3.bf16.msra.mxu0 %v15022_v28  ;;  %13924 = vmatpush3.bf16.msra.mxu1 %v14921_v11 }
0x3e75   :  { %13895 = vmatprep.subr.bf16.mxu0 %v15024_v29  ;;  %13925 = vmatprep.subr.bf16.mxu1 %v17312_v41 }
0x3e76   :  { %11671 = vmatprep.mubr.msk.f32.mxu1 %vm14800_vm0, %v17311_v2 }
0x3e78   :  { %13897 = vmatpush3.bf16.msra.mxu0 %v15028_v37  ;;  %13927 = vmatpush3.bf16.msra.mxu1 %v14930_v20 }
0x3e79   :  { %13899 = vmatprep.subr.bf16.mxu0 %v15031_v38  ;;  %13928 = vmatprep.subr.bf16.mxu1 %v17312_v41 }
0x3e7c   :  { %13901 = vmatpush3.bf16.msra.mxu0 %v15034_v44  ;;  %13930 = vmatpush3.bf16.msra.mxu1 %v14940_v31 }
0x3e7d   :  { %13903 = vmatprep.subr.bf16.mxu0 %v15047_v62  ;;  %13931 = vmatprep.subr.bf16.mxu1 %v17312_v41 }
0x3e80   :  { %13905 = vmatpush3.bf16.msra.mxu0 %v15049_v7  ;;  %13933 = vmatpush3.bf16.msra.mxu1 %v14950_v40 }
0x3e81   :  { %13907 = vmatprep.subr.bf16.mxu0 %v15053_v13  ;;  %13934 = vmatprep.subr.bf16.mxu1 %v17312_v41 }
0x3e84   :  { %13909 = vmatpush3.bf16.msra.mxu0 %v15055_v21  ;;  %13936 = vmatpush3.bf16.msra.mxu1 %v14960_v49 }
0x3e85   :  { %13911 = vmatprep.subr.bf16.mxu0 %v15059_v26  ;;  %13937 = vmatprep.subr.bf16.mxu1 %v17312_v41 }
0x3e88   :  { %13913 = vmatpush3.bf16.msra.mxu0 %v15061_v34  ;;  %13939 = vmatpush3.bf16.msra.mxu1 %v14970_v58 }
0x3e89   :  { %13915 = vmatprep.subr.bf16.mxu0 %v15064_v43  ;;  %13940 = vmatprep.subr.bf16.mxu1 %v17312_v41 }
0x3e8c   :  { %13917 = vmatpush3.bf16.msra.mxu0 %v15067_v53  ;;  %13942 = vmatpush3.bf16.msra.mxu1 %v14980_v5 }
0x3e8d   :  { %13919 = vmatprep.subr.bf16.mxu0 %v15070_v54  ;;  %13943 = vmatprep.subr.bf16.mxu1 %v17312_v41 }
0x3e90   :  { %13921 = vmatpush3.bf16.msra.mxu0 %v15075_v61  ;;  %13945 = vmatpush3.bf16.msra.mxu1 %v14990_v16 }
0x3e91   :  { %13947 = vmatprep.subr.bf16.mxu0 %v15020_v23  ;;  %13979 = vmatprep.subr.bf16.mxu1 %v14917_v6 }
0x3f46   :  { %v10307_v11 = vpop.f32.mrb[76].mxu0  ;;  %v7835_v20 = vpop.f32.mrb[76].mxu1 }
0x3f47   :  { %v7840_v31 = vrot.slane %v7835_v20, 2  ;;  %v10308_v40 = vpop.f32.mrb[77].mxu0  ;;  %v11638_v49 = vpop.f32.mrb[77].mxu1 }
0x3f48   :  { %v10309_v58 = vadd.f32 %v10308_v40, %v10307_v11 }
0x3f49   :  { %v7842_v5 = vadd.f32 %v7840_v31, %v16794_v55 }
0x3f4a   :  { %v7748_v63 = vadd.f32 %v17059_v52, %v10309_v58 }
0x3f4b   :  { %v8397_v18 = vmul.f32 -1.442695, %v7842_v5  ;;  %14627 = vtanh.f32 %v7842_v5 }
0x3f4c   :  { %v8396_v41 = vmul.f32 -1.442695, %v7748_v63 }
0x3f4d   :  { %14629 = vpow2.f32 %v8397_v18 }
0x3f4e   :  { %14631 = vpow2.f32 %v8396_v41 }
0x3f4f   :  { %14633 = vtanh.f32 %v7748_v63 }
0x3f55   :  { %v14628_v16 = vpop.eup %14627 }
0x3f56   :  { %v7856_v23 = vrot.slane %v14628_v16, 6 }
0x3f57   :  { %v14630_v8 = vpop.eup %14629 }
0x3f58   :  { %v14632_v6 = vpop.eup %14631  ;;  %v7846_v32 = vadd.f32 1.0, %v14630_v8  ;;  %7858 = vrot.lane.b32.xlu1 %v7856_v23, %s14803_s19 }
0x3f59   :  { %v7754_v59 = vadd.f32 1.0, %v14632_v6  ;;  %v14634_v46 = vpop.eup %14633 }
0x3f5a   :  { %14635 = vrcp.f32 %v7846_v32 }
0x3f5b   :  { %14637 = vrcp.f32 %v7754_v59 }
0x3f5c   :  { %7760 = vrot.lane.b32.xlu1 %v14634_v46, %s14803_s19 }
0x3f64   :  { %v14636_v47 = vpop.eup %14635 }
0x3f65   :  { %v14638_v27 = vpop.eup %14637  ;;  %v7851_v36 = vrot.slane %v14636_v47, 6 }
0x3f66   :  { %7758 = vrot.lane.b32.xlu0 %v14638_v27, %s14802_s17  ;;  %7762 = vrot.lane.b32.xlu1 %v14638_v27, %s14801_s15 }
0x3f6a   :  { %7853 = vrot.lane.b32.xlu0 %v7851_v36, %s14802_s17 }
0x3f6e   :  { %7860 = vrot.lane.b32.xlu0 %v7851_v36, %s14801_s15 }
0x3fca   :  { %v7859_v0 = vpop.permute.xlu1 %7858 }
0x3fcb   :  { %v7864_v4 = vrot.slane %v7859_v0, 2 }
0x3fcd   :  { %v7866_v35 = vmul.f32 %v14636_v47, %v7864_v4  ;;  %v17185_v4 = vld [vmem:[%s17293_s6] ss:$0 sm:$0xff] }
0x3fce   :  { %v7761_v3 = vpop.permute.xlu1 %7760 }
0x3fcf   :  { %v7765_v25 = vmul.f32 %v14638_v27, %v7761_v3  ;;  %v7868_v9 = vrot.slane %v7866_v35, 6  ;;  %v17326_v3 = vld [vmem:[#allocation16_spill] sm:$0xff] }
0x3fd8   :  { %v7759_v17 = vpop.permute.xlu0 %7758  ;;  %v7763_v40 = vpop.permute.xlu1 %7762 }
0x3fd9   :  { %v7764_v45 = vmul.f32 %v7759_v17, %v17069_v14  ;;  %v17189_v17 = vadd.f32 %v17185_v4, %v17326_v3 }
0x3fdb   :  { %v17123_v12 = vadd.f32 %v7765_v25, %v7764_v45  ;;  %v17192_v35 = vmul.f32 0.70710677, %v17189_v17  ;;  %v17327_v25 = vld [vmem:[#allocation18_spill] sm:$0xff] }
0x3fdc   :  { %v7854_v50 = vpop.permute.xlu0 %7853  ;;  %v17196_v45 = vadd.f32 %v17185_v4, %v17327_v25 }
0x3fdd   :  { %14639 = vtanh.f32 %v17123_v12  ;;  %v7862_v11 = vmul.f32 %v7854_v50, %v17073_v56  ;;  %vm1899_vm8 = vcmp.ge.f32.partialorder %v17192_v35, 0.0 }
0x3fde   :  { %v17200_v50 = vmul.f32 0.70710677, %v17196_v45 }
0x3fdf   :  { %v17127_v20 = vadd.f32 %v7868_v9, %v7862_v11  ;;  %v17204_v9 = vadd.f32 %v17185_v4, %v16796_v1 }
0x3fe0   :  { %v7861_v63 = vpop.permute.xlu0 %7860  ;;  %vm5094_vm9 = vcmp.ge.f32.partialorder %v17200_v50, 0.0 }
0x3fe1   :  { %14641 = vtanh.f32 %v17127_v20 }
0x3fe7   :  { %v14640_v31 = vpop.eup %14639 }
0x3fe8   :  { %v7768_v49 = vmul.f32 %v14640_v31, %v7763_v40  ;;  %v17208_v31 = vmul.f32 0.70710677, %v17204_v9 }
0x3fea   :  { %v8166_v58 = vrot.slane %v7768_v49, 3  ;;  %7937 = vmatprep.mubr.f32.mxu0 %v7768_v49  ;;  %vm6686_vm10 = vcmp.ge.f32.partialorder %v17208_v31, 0.0 }
0x3feb   :  { %v14642_v5 = vpop.eup %14641 }
0x3fec   :  { %v17132_v14 = vsel %vm1791_vm5, %v17078_v22, %v8166_v58  ;;  %v7872_v18 = vmul.f32 %v14642_v5, %v7861_v63  ;;  %v6666_v58 = vand.u32 2147483647, %v17208_v31 }
0x3fee   :  { %7938 = vmatmul.mubr.f32.vlgmr.msra.gmra.mrb[78].mxu0 %v7872_v18  ;;  %11672 = vmatmul.mubr.f32.vlgmr.msra.gmra.mrb[78].mxu1 %v7872_v18  ;;  %v6667_v63 = vmul.f32 0.3275911, %v6666_v58 }
0x3fef   :  { %13949 = vmatpush3.bf16.msra.mxu0 %v15022_v28  ;;  %13981 = vmatpush1.bf16.msra.mxu1 %v14919_v10  ;;  %v17323_v10 = vld [vmem:[#allocation13_spill] sm:$0xff] }
0x3ff0   :  { %13951 = vmatprep.subr.bf16.mxu0 %v15024_v29  ;;  %13983 = vmatprep.subr.bf16.mxu1 %v14924_v15  ;;  %v17324_v15 = vld [vmem:[#allocation14_spill] sm:$0xff]  ;;  %v6668_v1 = vadd.f32 1.0, %v6667_v63 }
0x3ff1   :  { %8247 = vmatprep.mubr.f32.mxu1 %v17311_v2 }
0x3ff3   :  { %13953 = vmatpush3.bf16.msra.mxu0 %v15028_v37  ;;  %13985 = vmatpush1.bf16.msra.mxu1 %v14928_v19  ;;  %v17325_v19 = vld [vmem:[#allocation15_spill] sm:$0xff] }
0x3ff4   :  { %13955 = vmatprep.subr.bf16.mxu0 %v15031_v38  ;;  %13987 = vmatprep.subr.bf16.mxu1 %v14934_v24 }
0x3ff7   :  { %13957 = vmatpush3.bf16.msra.mxu0 %v15034_v44  ;;  %13989 = vmatpush1.bf16.msra.mxu1 %v14938_v30 }
0x3ff8   :  { %13959 = vmatprep.subr.bf16.mxu0 %v15047_v62  ;;  %13991 = vmatprep.subr.bf16.mxu1 %v14944_v33 }
0x3ffb   :  { %13961 = vmatpush3.bf16.msra.mxu0 %v15049_v7  ;;  %13993 = vmatpush1.bf16.msra.mxu1 %v14948_v39 }
0x3ffc   :  { %13963 = vmatprep.subr.bf16.mxu0 %v15053_v13  ;;  %13995 = vmatprep.subr.bf16.mxu1 %v14954_v42 }
0x3fff   :  { %13965 = vmatpush3.bf16.msra.mxu0 %v15055_v21  ;;  %13997 = vmatpush1.bf16.msra.mxu1 %v14958_v48 }
0x4000   :  { %13967 = vmatprep.subr.bf16.mxu0 %v15059_v26  ;;  %13999 = vmatprep.subr.bf16.mxu1 %v14964_v51 }
0x4003   :  { %13969 = vmatpush3.bf16.msra.mxu0 %v15061_v34  ;;  %14001 = vmatpush1.bf16.msra.mxu1 %v14968_v57 }
0x4004   :  { %13971 = vmatprep.subr.bf16.mxu0 %v15064_v43  ;;  %14003 = vmatprep.subr.bf16.mxu1 %v14974_v60 }
0x4007   :  { %13973 = vmatpush3.bf16.msra.mxu0 %v15067_v53  ;;  %14005 = vmatpush1.bf16.msra.mxu1 %v17323_v10 }
0x4008   :  { %13975 = vmatprep.subr.bf16.mxu0 %v15070_v54  ;;  %14007 = vmatprep.subr.bf16.mxu1 %v17324_v15 }
0x400b   :  { %13977 = vmatpush3.bf16.msra.mxu0 %v15075_v61  ;;  %14009 = vmatpush1.bf16.msra.mxu1 %v17325_v19 }
0x40c1   :  { %v10359_v24 = vpop.f32.mrb[78].mxu0  ;;  %v8027_v30 = vpop.f32.mrb[78].mxu1 }
0x40c2   :  { %v8032_v33 = vrot.slane %v8027_v30, 1  ;;  %v10360_v39 = vpop.f32.mrb[79].mxu0  ;;  %v11673_v42 = vpop.f32.mrb[79].mxu1 }
0x40c3   :  { %v10361_v48 = vadd.f32 %v10360_v39, %v10359_v24 }
0x40c4   :  { %v8034_v51 = vadd.f32 %v8032_v33, %v16794_v55 }
0x40c5   :  { %v7940_v57 = vadd.f32 %v17059_v52, %v10361_v48 }
0x40c6   :  { %v8399_v60 = vmul.f32 -1.442695, %v8034_v51  ;;  %14643 = vtanh.f32 %v8034_v51 }
0x40c7   :  { %v8398_v28 = vmul.f32 -1.442695, %v7940_v57 }
0x40c8   :  { %14645 = vpow2.f32 %v8399_v60 }
0x40c9   :  { %14647 = vpow2.f32 %v8398_v28 }
0x40ca   :  { %14649 = vtanh.f32 %v7940_v57 }
0x40d0   :  { %v14644_v29 = vpop.eup %14643 }
0x40d1   :  { %v8048_v37 = vrot.slane %v14644_v29, 7 }
0x40d2   :  { %v14646_v38 = vpop.eup %14645 }
0x40d3   :  { %v14648_v44 = vpop.eup %14647  ;;  %v8038_v62 = vadd.f32 1.0, %v14646_v38  ;;  %8050 = vrot.lane.b32.xlu1 %v8048_v37, %s14803_s19 }
0x40d4   :  { %v7946_v7 = vadd.f32 1.0, %v14648_v44  ;;  %v14650_v13 = vpop.eup %14649 }
0x40d5   :  { %14651 = vrcp.f32 %v8038_v62 }
0x40d6   :  { %14653 = vrcp.f32 %v7946_v7 }
0x40d7   :  { %7952 = vrot.lane.b32.xlu1 %v14650_v13, %s14803_s19 }
0x40df   :  { %v14652_v21 = vpop.eup %14651 }
0x40e0   :  { %v14654_v26 = vpop.eup %14653  ;;  %v8043_v34 = vrot.slane %v14652_v21, 7 }
0x40e1   :  { %7950 = vrot.lane.b32.xlu0 %v14654_v26, %s14802_s17  ;;  %7954 = vrot.lane.b32.xlu1 %v14654_v26, %s14801_s15 }
0x40e5   :  { %8045 = vrot.lane.b32.xlu0 %v8043_v34, %s14802_s17 }
0x40e9   :  { %8052 = vrot.lane.b32.xlu0 %v8043_v34, %s14801_s15 }
0x4145   :  { %v8051_v43 = vpop.permute.xlu1 %8050 }
0x4146   :  { %v8056_v53 = vrot.slane %v8051_v43, 1 }
0x4148   :  { %v8058_v2 = vmul.f32 %v14652_v21, %v8056_v53 }
0x4149   :  { %v7953_v54 = vpop.permute.xlu1 %7952 }
0x414a   :  { %v7957_v55 = vmul.f32 %v14654_v26, %v7953_v54  ;;  %v8060_v16 = vrot.slane %v8058_v2, 7 }
0x4153   :  { %v7951_v61 = vpop.permute.xlu0 %7950  ;;  %v7955_v32 = vpop.permute.xlu1 %7954 }
0x4154   :  { %v7956_v56 = vmul.f32 %v7951_v61, %v17123_v12  ;;  %v1879_v12 = vand.u32 2147483647, %v17192_v35 }
0x4156   :  { %v17174_v22 = vadd.f32 %v7957_v55, %v7956_v56  ;;  %v1880_v11 = vmul.f32 0.3275911, %v1879_v12  ;;  %v1893_v44 = vsub.f32 0.0, %v1879_v12 }
0x4157   :  { %v8046_v41 = vpop.permute.xlu0 %8045 }
0x4158   :  { %14655 = vtanh.f32 %v17174_v22  ;;  %v8054_v23 = vmul.f32 %v8046_v41, %v17127_v20  ;;  %v5074_v20 = vand.u32 2147483647, %v17200_v50  ;;  %v1881_v40 = vadd.f32 1.0, %v1880_v11 }
0x4159   :  { %v1894_v43 = vmul.f32 %v1893_v44, %v1879_v12 }
0x415a   :  { %v8062_v8 = vadd.f32 %v8060_v16, %v8054_v23  ;;  %v5075_v49 = vmul.f32 0.3275911, %v5074_v20  ;;  %v5088_v53 = vsub.f32 0.0, %v5074_v20 }
0x415b   :  { %v8053_v27 = vpop.permute.xlu0 %8052  ;;  %v1895_v16 = vmul.f32 1.442695, %v1894_v43 }
0x415c   :  { %14657 = vtanh.f32 %v8062_v8  ;;  %v5076_v5 = vadd.f32 1.0, %v5075_v49  ;;  %v5089_v23 = vmul.f32 %v5088_v53, %v5074_v20  ;;  %v6680_v8 = vsub.f32 0.0, %v6666_v58 }
0x415d   :  { %14659 = vrcp.f32 %v1881_v40 }
0x415e   :  { %14661 = vrcp.f32 %v5076_v5 }
0x415f   :  { %14663 = vrcp.f32 %v6668_v1 }
0x4162   :  { %v14656_v6 = vpop.eup %14655 }
0x4163   :  { %v7960_v59 = vmul.f32 %v14656_v6, %v7955_v32 }
0x4165   :  { %v8169_v46 = vrot.slane %v7960_v59, 2  ;;  %8129 = vmatprep.mubr.f32.mxu0 %v7960_v59 }
0x4166   :  { %v14658_v47 = vpop.eup %14657 }
0x4167   :  { %v8064_v36 = vmul.f32 %v14658_v47, %v8053_v27  ;;  %v17180_v0 = vsel %vm1793_vm6, %v17132_v14, %v8169_v46  ;;  %v17328_v14 = vld [vmem:[#allocation17_spill] sm:$0xff]  ;;  %v14660_v15 = vpop.eup %14659  ;;  %v5090_v47 = vmul.f32 1.442695, %v5089_v23  ;;  %v6681_v27 = vmul.f32 %v6680_v8, %v6666_v58 }
0x4168   :  { %v17213_v18 = vadd.f32 %v17185_v4, %v17328_v14  ;;  %v1884_v19 = vmul.f32 1.0614054, %v14660_v15  ;;  %v14662_v30 = vpop.eup %14661  ;;  %v5072_v23 = vmul.f32 0.5, %v17196_v45 }
0x4169   :  { %8130 = vmatmul.mubr.f32.vlgmr.msra.gmra.mrb[80].mxu0 %v8064_v36  ;;  %v5079_v42 = vmul.f32 1.0614054, %v14662_v30  ;;  %v14664_v48 = vpop.eup %14663  ;;  %v6682_v11 = vmul.f32 1.442695, %v6681_v27 }
0x416a   :  { %v17216_v10 = vmul.f32 0.70710677, %v17213_v18  ;;  %v1885_v33 = vadd.f32 -1.4531521, %v1884_v19  ;;  %v6671_v28 = vmul.f32 1.0614054, %v14664_v48 }
0x416b   :  { %v5080_v60 = vadd.f32 -1.4531521, %v5079_v42 }
0x416c   :  { %v17219_v24 = vand.u32 2147483647, %v17216_v10  ;;  %v1886_v51 = vmul.f32 %v14660_v15, %v1885_v33  ;;  %v6672_v38 = vadd.f32 -1.4531521, %v6671_v28  ;;  %vm3502_vm11 = vcmp.ge.f32.partialorder %v17216_v10, 0.0 }
0x416d   :  { %v5081_v37 = vmul.f32 %v14662_v30, %v5080_v60 }
0x416e   :  { %v3483_v39 = vmul.f32 0.3275911, %v17219_v24  ;;  %v1887_v29 = vadd.f32 1.4214138, %v1886_v51  ;;  %v6673_v34 = vmul.f32 %v14664_v48, %v6672_v38  ;;  %v3496_v42 = vsub.f32 0.0, %v17219_v24 }
0x416f   :  { %v5082_v26 = vadd.f32 1.4214138, %v5081_v37 }
0x4170   :  { %v3484_v57 = vadd.f32 1.0, %v3483_v39  ;;  %v1888_v13 = vmul.f32 %v14660_v15, %v1887_v29  ;;  %v6674_v56 = vadd.f32 1.4214138, %v6673_v34  ;;  %v3497_v29 = vmul.f32 %v3496_v42, %v17219_v24 }
0x4171   :  { %v5083_v55 = vmul.f32 %v14662_v30, %v5082_v26 }
0x4172   :  { %14665 = vrcp.f32 %v3484_v57  ;;  %v1889_v61 = vadd.f32 -0.28449672, %v1888_v13  ;;  %v6675_v46 = vmul.f32 %v14664_v48, %v6674_v56 }
0x4173   :  { %v5084_v59 = vadd.f32 -0.28449672, %v5083_v55 }
0x4174   :  { %v1890_v6 = vmul.f32 %v14660_v15, %v1889_v61  ;;  %v6676_v25 = vadd.f32 -0.28449672, %v6675_v46  ;;  %v1877_v61 = vmul.f32 0.5, %v17189_v17 }
0x4175   :  { %v5085_v3 = vmul.f32 %v14662_v30, %v5084_v59  ;;  %v6664_v59 = vmul.f32 0.5, %v17204_v9 }
0x4176   :  { %v6677_v63 = vmul.f32 %v14664_v48, %v6676_v25 }
0x4177   :  { %v5086_v5 = vadd.f32 0.2548296, %v5085_v3  ;;  %v3480_v3 = vmul.f32 0.5, %v17213_v18  ;;  %v8333_v18 = vld [vmem:[#allocation2] ss:$0 sm:$0xff] }
0x4178   :  { %v6678_v39 = vadd.f32 0.2548296, %v6677_v63 }
0x4179   :  { %v5087_v33 = vmul.f32 %v14662_v30, %v5086_v5 }
0x417c   :  { %v17223_v41 = vpop.eup %14665 }
0x417d   :  { %v3487_v32 = vmul.f32 1.0614054, %v17223_v41 }
0x417f   :  { %v3488_v36 = vadd.f32 -1.4531521, %v3487_v32 }
0x4181   :  { %v3489_v49 = vmul.f32 %v17223_v41, %v3488_v36  ;;  %v14804_v36 = vmov 0  }
0x4182   :  { %14025 = vset.pattern.permute.xlu1 %v14804_v36  ;;  %14026 = vset.pattern.permute.xlu0 %v14804_v36 }
0x4183   :  { %v3490_v19 = vadd.f32 1.4214138, %v3489_v49 }
0x4185   :  { %v3491_v60 = vmul.f32 %v17223_v41, %v3490_v19 }
0x423c   :  { %v10411_v62 = vpop.f32.mrb[80].mxu0 }
0x423d   :  { %v10412_v7 = vpop.f32.mrb[81].mxu0 }
0x423e   :  { %v10413_v21 = vadd.f32 %v10412_v7, %v10411_v62  ;;  %v3492_v62 = vadd.f32 -0.28449672, %v3491_v60 }
0x4240   :  { %v8132_v54 = vadd.f32 %v17059_v52, %v10413_v21  ;;  %v1891_v52 = vadd.f32 0.2548296, %v1890_v6  ;;  %v3498_v21 = vmul.f32 1.442695, %v3497_v29  ;;  %v3493_v26 = vmul.f32 %v17223_v41, %v3492_v62 }
0x4242   :  { %v8400_v2 = vmul.f32 -1.442695, %v8132_v54  ;;  %14667 = vtanh.f32 %v8132_v54  ;;  %v1892_v40 = vmul.f32 %v14660_v15, %v1891_v52  ;;  %v6679_v15 = vmul.f32 %v14664_v48, %v6678_v39 }
0x4243   :  { %v3494_v48 = vadd.f32 0.2548296, %v3493_v26 }
0x4244   :  { %14669 = vpow2.f32 %v8400_v2 }
0x4245   :  { %14671 = vpow2.f32 %v1895_v16  ;;  %v3495_v35 = vmul.f32 %v17223_v41, %v3494_v48  ;;  %v17242_v16 = vld [vmem:[%s17294_s7] ss:$0 sm:$0xff] }
0x4246   :  { %14673 = vpow2.f32 %v5090_v47 }
0x4247   :  { %14675 = vpow2.f32 %v6682_v11 }
0x424c   :  { %v14668_v12 = vpop.eup %14667 }
0x424d   :  { %8144 = vrot.lane.b32.xlu0 %v14668_v12, %s14803_s19 }
0x424e   :  { %v14670_v20 = vpop.eup %14669 }
0x424f   :  { %v8138_v14 = vadd.f32 1.0, %v14670_v20  ;;  %v14672_v1 = vpop.eup %14671 }
0x4250   :  { %v1897_v58 = vmul.f32 %v14672_v1, %v1892_v40  ;;  %v14674_v51 = vpop.eup %14673 }
0x4251   :  { %14677 = vrcp.f32 %v8138_v14  ;;  %v5092_v28 = vmul.f32 %v14674_v51, %v5087_v33  ;;  %v14676_v37 = vpop.eup %14675 }
0x4252   :  { %v1898_v57 = vsub.f32 1.0, %v1897_v58  ;;  %v6684_v13 = vmul.f32 %v14676_v37, %v6679_v15  ;;  %14679 = vpow2.f32 %v3498_v21 }
0x4253   :  { %v5093_v7 = vsub.f32 1.0, %v5092_v28 }
0x4254   :  { %v1900_v44 = vsub.f32 0.0, %v1898_v57  ;;  %v6685_v43 = vsub.f32 1.0, %v6684_v13 }
0x4255   :  { %v5095_v34 = vsub.f32 0.0, %v5093_v7 }
0x4256   :  { %v1901_v30 = vsel %vm1899_vm8, %v1898_v57, %v1900_v44  ;;  %v6687_v54 = vsub.f32 0.0, %v6685_v43 }
0x4257   :  { %v1902_v24 = vadd.f32 1.0, %v1901_v30  ;;  %v5096_v53 = vsel %vm5094_vm9, %v5093_v7, %v5095_v34 }
0x4258   :  { %v5097_v55 = vadd.f32 1.0, %v5096_v53  ;;  %v6688_v56 = vsel %vm6686_vm10, %v6685_v43, %v6687_v54 }
0x4259   :  { %v1903_v2 = vmul.f32 %v1902_v24, %v1877_v61  ;;  %v6689_v6 = vadd.f32 1.0, %v6688_v56 }
0x425a   :  { %v5098_v8 = vmul.f32 %v5097_v55, %v5072_v23 }
0x425b   :  { %v14678_v38 = vpop.eup %14677  ;;  %v1910_v32 = vmul.f32 %v17242_v16, %v1903_v2  ;;  %v6690_v31 = vmul.f32 %v6689_v6, %v6664_v59 }
0x425c   :  { %8142 = vrot.lane.b32.xlu1 %v14678_v38, %s14802_s17  ;;  %v14680_v50 = vpop.eup %14679  ;;  %v5099_v41 = vmul.f32 %v17242_v16, %v5098_v8 }
0x425d   :  { %v3500_v17 = vmul.f32 %v14680_v50, %v3495_v35  ;;  %v6691_v47 = vmul.f32 %v17242_v16, %v6690_v31 }
0x425f   :  { %v3501_v46 = vsub.f32 1.0, %v3500_v17 }
0x4260   :  { %8146 = vrot.lane.b32.xlu1 %v14678_v38, %s14801_s15 }
0x4261   :  { %v3503_v27 = vsub.f32 0.0, %v3501_v46 }
0x4263   :  { %v3504_v45 = vsel %vm3502_vm11, %v3501_v46, %v3503_v27 }
0x4264   :  { %v3505_v52 = vadd.f32 1.0, %v3504_v45 }
0x4266   :  { %v3506_v9 = vmul.f32 %v3505_v52, %v3480_v3 }
0x4268   :  { %v3507_v25 = vmul.f32 %v17242_v16, %v3506_v9 }
0x426c   :  { %1911 = vadd.xlane.f32.xlu0 %v1910_v32 }
0x4270   :  { %5100 = vadd.xlane.f32.xlu0 %v5099_v41 }
0x4274   :  { %6692 = vadd.xlane.f32.xlu0 %v6691_v47 }
0x4284   :  { %3508 = vadd.xlane.f32.xlu1 %v3507_v25 }
0x42bf   :  { %v8145_v12 = vpop.permute.xlu0 %8144 }
0x42c0   :  { %v8149_v20 = vmul.f32 %v14678_v38, %v8145_v12 }
0x42ce   :  { %v8143_v11 = vpop.permute.xlu1 %8142 }
0x42cf   :  { %v8148_v40 = vmul.f32 %v8143_v11, %v17174_v22 }
0x42d1   :  { %v8150_v49 = vadd.f32 %v8149_v20, %v8148_v40 }
0x42d2   :  { %v8147_v10 = vpop.permute.xlu1 %8146 }
0x42d3   :  { %14681 = vtanh.f32 %v8150_v49 }
0x42dd   :  { %v14682_v5 = vpop.eup %14681 }
0x42de   :  { %v8152_v63 = vmul.f32 %v14682_v5, %v8147_v10 }
0x42e0   :  { %v8172_v14 = vrot.slane %v8152_v63, 1 }
0x42e2   :  { %v8180_v1 = vsel %vm1795_vm7, %v17180_v0, %v8172_v14 }
0x42e3   :  { %8182 = vst [vmem:[#allocation9 + $0x20] sm:$0xff] %v8180_v1  ;;  %8248 = vmatmul.mubr.f32.vlgmr.msra.gmra.mrb[80].mxu1 %v8180_v1 }
0x42f9   :  { %v1912_v58 = vpop.xlane.xlu0 %1911 }
0x42fa   :  { %v1919_v19 = vadd.f32 %v8333_v18, %v1912_v58 }
0x42fc   :  { %1922 = vperm.xlu1 %14025, %v1919_v19  }
0x42fd   :  { %v5101_v33 = vpop.xlane.xlu0 %5100 }
0x42fe   :  { %v5102_v17 = vadd.f32 %v8333_v18, %v5101_v33 }
0x4301   :  { %v6693_v51 = vpop.xlane.xlu0 %6692 }
0x4302   :  { %v6694_v22 = vadd.f32 %v8333_v18, %v6693_v51 }
0x4311   :  { %v3509_v39 = vpop.xlane.xlu1 %3508 }
0x4312   :  { %v3510_v42 = vadd.f32 %v8333_v18, %v3509_v39 }
0x4314   :  { %3513 = vperm.xlu1 %14025, %v3510_v42  }
0x4318   :  { %6697 = vperm.xlu1 %14025, %v6694_v22  }
0x437b   :  { %v1923_v57 = vpop.permute.xlu1 %1922 }
0x437c   :  { %1925 = vst [vmem:[%s17297_s10] sm:$0xff] %v1923_v57 }
0x4393   :  { %v3514_v60 = vpop.permute.xlu1 %3513 }
0x4394   :  { %8350 = vst [vmem:[%s17297_s10 + $0x8] sm:$0xff] %v3514_v60 }
0x4397   :  { %v6698_v0 = vpop.permute.xlu1 %6697 }
0x4398   :  { %8384 = vst [vmem:[%s17297_s10 + $0x18] sm:$0xff] %v6698_v0 }
0x43b6   :  { %v8249_v28 = vpop.f32.mrb[80].mxu1 }
0x43b7   :  { %v8250_v15 = vpop.f32.mrb[81].mxu1 }
0x43b8   :  { %v8253_v29 = vadd.f32 %v17185_v4, %v8250_v15 }
0x43ba   :  { %v8255_v37 = vmul.f32 0.70710677, %v8253_v29  ;;  %v8254_v50 = vmul.f32 0.5, %v8253_v29 }
0x43bc   :  { %v8256_v38 = vand.u32 2147483647, %v8255_v37  ;;  %vm8276_vm12 = vcmp.ge.f32.partialorder %v8255_v37, 0.0 }
0x43be   :  { %v8257_v44 = vmul.f32 0.3275911, %v8256_v38  ;;  %v8270_v7 = vsub.f32 0.0, %v8256_v38 }
0x43c0   :  { %v8258_v62 = vadd.f32 1.0, %v8257_v44  ;;  %v8271_v21 = vmul.f32 %v8270_v7, %v8256_v38 }
0x43c2   :  { %14683 = vrcp.f32 %v8258_v62  ;;  %v8272_v34 = vmul.f32 1.442695, %v8271_v21 }
0x43c4   :  { %14685 = vpow2.f32 %v8272_v34 }
0x43cc   :  { %v14684_v13 = vpop.eup %14683 }
0x43cd   :  { %v8261_v30 = vmul.f32 1.0614054, %v14684_v13 }
0x43ce   :  { %v14686_v4 = vpop.eup %14685 }
0x43cf   :  { %v8262_v26 = vadd.f32 -1.4531521, %v8261_v30 }
0x43d1   :  { %v8263_v43 = vmul.f32 %v14684_v13, %v8262_v26 }
0x43d3   :  { %v8264_v24 = vadd.f32 1.4214138, %v8263_v43 }
0x43d5   :  { %v8265_v48 = vmul.f32 %v14684_v13, %v8264_v24 }
0x43d7   :  { %v8266_v53 = vadd.f32 -0.28449672, %v8265_v48 }
0x43d9   :  { %v8267_v54 = vmul.f32 %v14684_v13, %v8266_v53 }
0x43db   :  { %v8268_v61 = vadd.f32 0.2548296, %v8267_v54 }
0x43dd   :  { %v8269_v2 = vmul.f32 %v14684_v13, %v8268_v61 }
0x43df   :  { %v8274_v55 = vmul.f32 %v14686_v4, %v8269_v2 }
0x43e1   :  { %v8275_v35 = vsub.f32 1.0, %v8274_v55 }
0x43e3   :  { %v8277_v56 = vsub.f32 0.0, %v8275_v35 }
0x43e5   :  { %v8278_v23 = vsel %vm8276_vm12, %v8275_v35, %v8277_v56 }
0x43e6   :  { %v8279_v8 = vadd.f32 1.0, %v8278_v23 }
0x43e8   :  { %v8280_v6 = vmul.f32 %v8279_v8, %v8254_v50 }
0x43ea   :  { %v8281_v32 = vmul.f32 %v17242_v16, %v8280_v6 }
0x43ec   :  { %8282 = vadd.xlane.f32.xlu0 %v8281_v32 }
0x4402   :  { %5105 = vperm.xlu0 %14026, %v5102_v17  }
0x4479   :  { %v8283_v59 = vpop.xlane.xlu0 %8282 }
0x447a   :  { %v8284_v31 = vadd.f32 %v8333_v18, %v8283_v59 }
0x447c   :  { %8287 = vperm.xlu1 %14025, %v8284_v31  }
0x447d   :  { %14774 = shalt.err (!%p14771_p0)
}
0x447e   :  { %s14775_s29 = scalar_lea.hbm %s17296_s9, 640 }
0x447f   :  { %p14776_p1 = scmp.ne.s32.totalorder %s17296_s9, %s14775_s29  ;;  %p14779_p2 = scmp.lt.u32.totalorder %s14775_s29, %s17296_s9 }
0x4481   :  { %p14781_p3 = pnand %p14779_p2, %p14776_p1 }
0x4483   :  { %14784 = shalt.err (!%p14781_p3)
}
0x4484   :  { %8303 = dma.vmem_to_hbm [thread:$0]  %s8298_s8, 640, %s17296_s9, [#allocation5], %s14793_s26, %s14793_s26, %s14794_s27   ;;  %v5106_v16 = vpop.permute.xlu0 %5105 }
0x4485   :  { %8367 = vst [vmem:[%s17297_s10 + $0x10] sm:$0xff] %v5106_v16 }
0x44fb   :  { %v8288_v41 = vpop.permute.xlu1 %8287 }
0x44fc   :  { %8401 = vst [vmem:[%s17297_s10 + $0x20] sm:$0xff] %v8288_v41 }
0x44fd   :  { %14789 = dma.done.wait [#allocation5], 640  }
0x44fe   :  { %14790 = vsyncadd [#allocation5], 4294966656 }
0x44ff   :  { %8311 = vsyncpa [#allocation4], 1 }
0x4500   :  { %8312 = vsyncpa [#allocation7], 1 }
0x4501   :  { %8313 = vsyncpa [#allocation5], 1 }

</bundles_post_ra>
